<compile_context>
chip_gen: v6e
topology: v6e:2x2x1
jax: 0.10.0
libtpu: 0.0.40
codegen_flags: <defaults>
</compile_context>

<pallas_src>
import functools
import math

import jax
import jax.numpy as jnp
from jax import lax
from jax.experimental import pallas as pl
from jax.experimental.pallas import tpu as pltpu

# -------------------- scaled-down architecture hyper-params -----------------
LAYERS = [1, 1, 1, 1]          # blocks per stage (ResNet "layers" arg)
WIDTHS = [8, 16, 32, 64]       # scaled stand-ins for 64/128/256/512
CTX_LOCAL = 16                 # scaled stand-in for 128 in ContextAware_CVUSA
FEAT = 128                     # scaled stand-in for num_classes=1024
ANGLE_HID = 100                # angle_fc8 hidden size (kept as in reference)
BN_EPS = 1e-5

WGT_DTYPE = jnp.bfloat16       # MXU operand dtype (f32 accumulation)
ACT_DTYPE = jnp.float32        # activations stay f32 (32-bit dynamic slices)
TM_MAX = 256                   # in-kernel M tile (rows per inner step)


def _rup(x, m):
    return (x + m - 1) // m * m


# ----------------------- geometry for the window trick -----------------------
def _geom(H, W, k, p):
    """Stride-1 'same-ish' conv geometry on the padded, row-flattened image."""
    Hp, Wp = H + 2 * p, W + 2 * p
    Ho, Wo = Hp - k + 1, Wp - k + 1
    M = Ho * Wp                                  # rows computed (garbage cols sliced later)
    tm = TM_MAX if _rup(M, 8) >= TM_MAX else _rup(M, 8)
    M_pad = _rup(M, tm)
    L = M_pad + (k - 1) * Wp + (k - 1)           # flat rows needed (no OOB reads)
    offs = tuple(i * Wp + j for i in range(k) for j in range(k))
    return Hp, Wp, Ho, Wo, M, tm, M_pad, L, offs


def _to_flat(x, p, L, pad_value=0.0):
    """NHWC -> spatially padded, row-flattened (N, L, C)."""
    N, H, W, C = x.shape
    Hp, Wp = H + 2 * p, W + 2 * p
    xp = jnp.pad(x, ((0, 0), (p, p), (p, p), (0, 0)), constant_values=pad_value)
    xf = xp.reshape(N, Hp * Wp, C)
    return jnp.pad(xf, ((0, 0), (0, L - Hp * Wp), (0, 0)),
                   constant_values=pad_value)


# ------------------------- direct convolution kernel -------------------------
def _conv_kernel(x_ref, w_ref, b_ref, *rest, offs, tm, num_t, act, has_res):
    """Whole padded image resident in VMEM; sum of kh*kw shifted-window dots.

    Fused epilogue: folded-BN bias + optional residual add + optional ReLU.
    """
    if has_res:
        res_ref, o_ref = rest
    else:
        (o_ref,) = rest
    out_ch = o_ref.shape[-1]

    def body(t, carry):
        base = pl.multiple_of(t * tm, 8)
        acc = jnp.zeros((tm, out_ch), jnp.float32)
        for r, off in enumerate(offs):
            a = x_ref[0, pl.ds(base + off, tm), :].astype(WGT_DTYPE)
            acc = acc + jnp.dot(a, w_ref[r], preferred_element_type=jnp.float32)
        acc = acc + b_ref[...]
        if has_res:
            acc = acc + res_ref[0, pl.ds(base, tm), :]
        if act == "relu":
            acc = jnp.maximum(acc, 0.0)
        o_ref[0, pl.ds(base, tm), :] = acc.astype(o_ref.dtype)
        return carry

    lax.fori_loop(0, num_t, body, 0)


def conv2d_p(x, cp, act="none", res=None):
    """PyTorch-semantics conv (NHWC in/out) with folded BN / fused epilogue.

    cp: dict(w=(k*k, Cin, Cout) bf16, b=(1, Cout) f32, k, p, stride).
    Strided convs run at stride 1 and are subsampled in the wrapper.
    """
    k, p, stride = cp["k"], cp["p"], cp["stride"]
    w_kk, bias = cp["w"], cp["b"]
    N, H, W, C = x.shape
    KK, Cw, O = w_kk.shape
    assert Cw == C and KK == k * k
    Hp, Wp, Ho, Wo, M, tm, M_pad, L, offs = _geom(H, W, k, p)

    xf = _to_flat(x, p, L)

    in_arrays = [xf, w_kk, bias]
    in_specs = [
        pl.BlockSpec((1, L, C), lambda n: (n, 0, 0)),
        pl.BlockSpec((KK, C, O), lambda n: (0, 0, 0)),
        pl.BlockSpec((1, O), lambda n: (0, 0)),
    ]
    has_res = res is not None
    if has_res:
        # residual in the conv-output (width = Wp) row-flattened layout
        rp = jnp.pad(res, ((0, 0), (0, 0), (0, Wp - Wo), (0, 0)))
        rp = rp.reshape(N, Ho * Wp, O)
        rp = jnp.pad(rp, ((0, 0), (0, M_pad - Ho * Wp), (0, 0)))
        in_arrays.append(rp)
        in_specs.append(pl.BlockSpec((1, M_pad, O), lambda n: (n, 0, 0)))

    out = pl.pallas_call(
        functools.partial(_conv_kernel, offs=offs, tm=tm, num_t=M_pad // tm,
                          act=act, has_res=has_res),
        out_shape=jax.ShapeDtypeStruct((N, M_pad, O), ACT_DTYPE),
        grid=(N,),
        in_specs=in_specs,
        out_specs=pl.BlockSpec((1, M_pad, O), lambda n: (n, 0, 0)),
        compiler_params=pltpu.CompilerParams(dimension_semantics=("parallel",)),
    )(*in_arrays)

    y = out[:, :Ho * Wp, :].reshape(N, Ho, Wp, O)[:, :, :Wo, :]
    if stride > 1:
        # TODO(synk): at production widths use space-to-depth instead of
        # stride-1 compute + subsample to avoid the ~s^2 position overcompute.
        y = y[:, ::stride, ::stride, :]
    return y


# --------------------------------- max pool ----------------------------------
def _pool_kernel(x_ref, o_ref, *, offs, tm, num_t):
    def body(t, carry):
        base = pl.multiple_of(t * tm, 8)
        m = x_ref[0, pl.ds(base + offs[0], tm), :]
        for off in offs[1:]:
            m = jnp.maximum(m, x_ref[0, pl.ds(base + off, tm), :])
        o_ref[0, pl.ds(base, tm), :] = m
        return carry

    lax.fori_loop(0, num_t, body, 0)


def maxpool2d_p(x, k, stride, p):
    N, H, W, C = x.shape
    Hp, Wp, Ho, Wo, M, tm, M_pad, L, offs = _geom(H, W, k, p)
    xf = _to_flat(x, p, L, pad_value=-jnp.inf)
    out = pl.pallas_call(
        functools.partial(_pool_kernel, offs=offs, tm=tm, num_t=M_pad // tm),
        out_shape=jax.ShapeDtypeStruct((N, M_pad, C), x.dtype),
        grid=(N,),
        in_specs=[pl.BlockSpec((1, L, C), lambda n: (n, 0, 0))],
        out_specs=pl.BlockSpec((1, M_pad, C), lambda n: (n, 0, 0)),
        compiler_params=pltpu.CompilerParams(dimension_semantics=("parallel",)),
    )(xf)
    y = out[:, :Ho * Wp, :].reshape(N, Ho, Wp, C)[:, :, :Wo, :]
    return y[:, ::stride, ::stride, :]


# --------------------- ContextAware attention (fused) ------------------------
def _attn_kernel(x_ref, f_ref, w_ref, b_ref, o_ref):
    # conv_rw (1x1 -> 1 channel) + sigmoid + channel-broadcast multiply.
    logits = jnp.sum(f_ref[...] * w_ref[...], axis=-1, keepdims=True) + b_ref[...]
    gate = jax.nn.sigmoid(logits)                       # (N, HW, 1)
    o_ref[...] = x_ref[...] * gate                      # broadcast in-vreg


def context_aware_p(x, cp):
    N, H, W, C = x.shape
    # 3x3 / 5x5 / 7x7 branch convs embedded into one 7x7 conv (48 channels).
    feats = conv2d_p(x, cp["conv"], act="relu")         # (N, H, W, 3*CTX_LOCAL)
    out = pl.pallas_call(
        _attn_kernel,
        out_shape=jax.ShapeDtypeStruct((N, H * W, C), x.dtype),
    )(x.reshape(N, H * W, C),
      feats.reshape(N, H * W, 3 * CTX_LOCAL),
      cp["w_rw"], cp["b_rw"])
    return out.reshape(N, H, W, C)


# ------------------------- fused FC / normalisation heads --------------------
def _featvec_kernel(x_ref, w_ref, b_ref, vec_ref, feat_ref):
    v = jnp.dot(x_ref[...], w_ref[...], preferred_element_type=jnp.float32)
    v = v + b_ref[...]
    vec_ref[...] = v
    nrm = jnp.sqrt(jnp.sum(v * v, axis=1, keepdims=True))
    feat_ref[...] = v / jnp.maximum(nrm, 1e-12)          # F.normalize(p=2, dim=1)


def feat_head_p(x_flat, w, b):
    N = x_flat.shape[0]
    vec, feat = pl.pallas_call(
        _featvec_kernel,
        out_shape=(jax.ShapeDtypeStruct((N, FEAT), jnp.float32),
                   jax.ShapeDtypeStruct((N, FEAT), jnp.float32)),
    )(x_flat, w, b)
    return feat, vec


def _angle_kernel(vg_ref, vs_ref, w8_ref, b8_ref, w9_ref, b9_ref, o_ref):
    fc7 = jnp.maximum(jnp.concatenate([vg_ref[...], vs_ref[...]], axis=1), 0.0)
    h = jnp.dot(fc7, w8_ref[...], preferred_element_type=jnp.float32) + b8_ref[...]
    h = jnp.maximum(h, 0.0)
    v = jnp.dot(h, w9_ref[...], preferred_element_type=jnp.float32) + b9_ref[...]
    nrm = jnp.sqrt(jnp.sum(v * v, axis=1, keepdims=True))
    o_ref[...] = v / jnp.maximum(nrm, 1e-12)


# ------------------------------ network blocks -------------------------------
def basic_block(x, bp):
    out = conv2d_p(x, bp["conv1"], act="relu")
    idn = conv2d_p(x, bp["down"], act="none") if "down" in bp else x
    # residual add + ReLU fused into conv2's epilogue
    return conv2d_p(out, bp["conv2"], act="relu", res=idn)


def branch_forward(x_nchw, P, attend_pad):
    x = jnp.transpose(x_nchw, (0, 2, 3, 1)).astype(ACT_DTYPE)   # NCHW -> NHWC once
    x = conv2d_p(x, P["conv1"], act="relu")                     # conv1+bn1+relu
    x = maxpool2d_p(x, 3, 2, 1)                                 # maxpool
    for name in ("layer1", "layer2", "layer3", "layer4"):
        for bp in P[name]:
            x = basic_block(x, bp)
    x = context_aware_p(x, P["ctx"])                            # rw_emb_CVUSA
    x = maxpool2d_p(x, 2, 2, attend_pad)                        # AttendPool
    n = x.shape[0]
    xf = jnp.transpose(x, (0, 3, 1, 2)).reshape(n, -1)          # PyTorch (C,H,W) flatten
    w, b = P["featVec"]
    return feat_head_p(xf, w, b)                                # featVec + F.normalize


def forward(params, x_grd, x_sat):
    g_feat, vg = branch_forward(x_grd, params["sv"], attend_pad=1)   # forward_SV
    s_feat, vs = branch_forward(x_sat, params["oh"], attend_pad=0)   # forward_OH
    angle = pl.pallas_call(                                          # fc8+relu+fc9+norm
        _angle_kernel,
        out_shape=jax.ShapeDtypeStruct((vg.shape[0], 2), jnp.float32),
    )(vg, vs, params["w8"], params["b8"], params["w9"], params["b9"])
    return g_feat, s_feat, angle


# ---------------------------- parameter creation ------------------------------
def conv_weight(key, o, c, kh, kw):
    n = kh * kw * o
    return jax.random.normal(key, (o, c, kh, kw), jnp.float32) * math.sqrt(2.0 / n)


def linear_weight(key, out_f, in_f):
    n = out_f * in_f
    w = jax.random.normal(key, (out_f, in_f), jnp.float32) * math.sqrt(2.0 / n)
    return w.T, jnp.zeros((1, out_f), jnp.float32)      # stored as (in, out)


def prep_conv_bn(key, o, c, k, p, stride):
    # Inference-mode BatchNorm (gamma=1, beta=0, running mean=0, var=1) folded.
    w = conv_weight(key, o, c, k, k)
    gamma = jnp.ones((o,), jnp.float32)
    beta = jnp.zeros((o,), jnp.float32)
    mean = jnp.zeros((o,), jnp.float32)
    var = jnp.ones((o,), jnp.float32)
    scale = gamma / jnp.sqrt(var + BN_EPS)
    w = w * scale[:, None, None, None]
    b = beta - mean * scale
    w_kk = jnp.transpose(w, (2, 3, 1, 0)).reshape(k * k, c, o).astype(WGT_DTYPE)
    return dict(w=w_kk, b=b.reshape(1, o), k=k, p=p, stride=stride)


def prep_ctx(nk, ch):
    w1 = conv_weight(nk(), CTX_LOCAL, ch, 3, 3)
    w2 = conv_weight(nk(), CTX_LOCAL, ch, 5, 5)
    w3 = conv_weight(nk(), CTX_LOCAL, ch, 7, 7)
    wrw = conv_weight(nk(), 1, 3 * CTX_LOCAL, 1, 1)
    # embed the 3x3 / 5x5 / 7x7 kernels into a single 7x7 kernel (48 out-ch)
    comb = jnp.zeros((7, 7, ch, 3 * CTX_LOCAL), jnp.float32)
    comb = comb.at[2:5, 2:5, :, 0:CTX_LOCAL].set(jnp.transpose(w1, (2, 3, 1, 0)))
    comb = comb.at[1:6, 1:6, :, CTX_LOCAL:2 * CTX_LOCAL].set(
        jnp.transpose(w2, (2, 3, 1, 0)))
    comb = comb.at[:, :, :, 2 * CTX_LOCAL:].set(jnp.transpose(w3, (2, 3, 1, 0)))
    return dict(
        conv=dict(w=comb.reshape(49, ch, 3 * CTX_LOCAL).astype(WGT_DTYPE),
                  b=jnp.zeros((1, 3 * CTX_LOCAL), jnp.float32),
                  k=7, p=3, stride=1),
        w_rw=wrw.reshape(1, 1, 3 * CTX_LOCAL).astype(jnp.float32),
        b_rw=jnp.zeros((1, 1, 1), jnp.float32),
    )


def build_params(key):
    keys = iter(jax.random.split(key, 256))

    def nk():
        return next(keys)

    def branch(feat_in):
        P = {"conv1": prep_conv_bn(nk(), WIDTHS[0], 3, 7, 3, 2)}
        inpl = WIDTHS[0]
        for li, (w, nblk, s) in enumerate(zip(WIDTHS, LAYERS, [1, 2, 2, 2]), 1):
            blocks = []
            for bi in range(nblk):
                stride = s if bi == 0 else 1
                bp = {"conv1": prep_conv_bn(nk(), w, inpl, 3, 1, stride),
                      "conv2": prep_conv_bn(nk(), w, w, 3, 1, 1)}
                if stride != 1 or inpl != w:
                    bp["down"] = prep_conv_bn(nk(), w, inpl, 1, 0, stride)
                blocks.append(bp)
                inpl = w
            P[f"layer{li}"] = blocks
        P["ctx"] = prep_ctx(nk, WIDTHS[3])
        P["featVec"] = linear_weight(nk(), FEAT, feat_in)
        return P

    w8, b8 = linear_weight(nk(), ANGLE_HID, 2 * FEAT)
    w9, b9 = linear_weight(nk(), 2, ANGLE_HID)
    return {
        # ground branch: 64x96 input -> layer4 2x3 -> AttendPool(pad=1) 2x2
        "sv": branch(WIDTHS[3] * 2 * 2),
        # satellite branch: 64x64 input -> layer4 2x2 -> AttendPool(pad=0) 1x1
        "oh": branch(WIDTHS[3] * 1 * 1),
        "w8": w8, "b8": b8, "w9": w9, "b9": b9,
    }


# TODO(synk): BatchNorm is implemented in inference mode (folded into convs);
# training-mode batch statistics are not reproduced.

if __name__ == "__main__":
    key = jax.random.PRNGKey(0)
    kg, ks = jax.random.split(key)
    x_grd = jax.random.normal(kg, (2, 3, 64, 96), jnp.float32)   # street-view
    x_sat = jax.random.normal(ks, (2, 3, 64, 64), jnp.float32)   # overhead

    params = build_params(jax.random.PRNGKey(42))
    g, s, angle = forward(params, x_grd, x_sat)
    jax.block_until_ready((g, s, angle))

    assert g.shape == (2, FEAT) and s.shape == (2, FEAT) and angle.shape == (2, 2)
    assert bool(jnp.all(jnp.isfinite(g))) and bool(jnp.all(jnp.isfinite(s)))
    assert bool(jnp.all(jnp.isfinite(angle)))
    print("KERNEL_OK")
</pallas_src>

<mosaic_0001>
module attributes {stable_mosaic.version = 11 : i64} {
  func.func @_conv_kernel(%arg0: i32, %arg1: memref<1x7274x3xf32, #tpu.memory_space<vmem>>, %arg2: memref<49x3x8xbf16, #tpu.memory_space<vmem>>, %arg3: memref<1x8xf32, #tpu.memory_space<vmem>>, %arg4: memref<1x6656x8xf32, #tpu.memory_space<vmem>>) attributes {dimension_semantics = [#tpu.dimension_semantics<parallel>], iteration_bounds = array<i64: 2>, scalar_prefetch = 0 : i64, scratch_operands = 0 : i64, tpu.core_type = #tpu.core_type<tc>, window_params = [{transform_indices = @transform_0, window_bounds = array<i64: 1, 7274, 3>}, {pipeline_mode = #tpu.pipeline_mode<synchronous>, transform_indices = @transform_1, window_bounds = array<i64: 49, 3, 8>}, {pipeline_mode = #tpu.pipeline_mode<synchronous>, transform_indices = @transform_2, window_bounds = array<i64: 1, 8>}, {transform_indices = @transform_3, window_bounds = array<i64: 1, 6656, 8>}]} {
    %c0_i32 = arith.constant 0 : i32
    %c26_i32 = arith.constant 26 : i32
    %0 = arith.addi %c0_i32, %c26_i32 : i32
    %c1_i32 = arith.constant 1 : i32
    scf.for %arg5 = %c0_i32 to %0 step %c1_i32  : i32 {
      %c256_i32 = arith.constant 256 : i32
      %1 = arith.muli %arg5, %c256_i32 : i32
      %2 = tpu.assume_multiple %1, 8 : i32
      %cst = arith.constant 0.000000e+00 : f32
      %3 = vector.broadcast %cst : f32 to vector<256x8xf32>
      %c0_i32_1 = arith.constant 0 : i32
      %4 = arith.addi %2, %c0_i32_1 : i32
      %c0 = arith.constant 0 : index
      %5 = arith.index_cast %4 : i32 to index
      %c0_2 = arith.constant 0 : index
      %6 = vector.load %arg1[%c0, %5, %c0_2] : memref<1x7274x3xf32, #tpu.memory_space<vmem>>, vector<1x256x3xf32>
      %7 = vector.shape_cast %6 : vector<1x256x3xf32> to vector<256x3xf32>
      %8 = arith.truncf %7 : vector<256x3xf32> to vector<256x3xbf16>
      %c0_3 = arith.constant 0 : index
      %c0_4 = arith.constant 0 : index
      %c0_5 = arith.constant 0 : index
      %9 = vector.load %arg2[%c0_3, %c0_4, %c0_5] : memref<49x3x8xbf16, #tpu.memory_space<vmem>>, vector<1x3x8xbf16>
      %10 = vector.shape_cast %9 : vector<1x3x8xbf16> to vector<3x8xbf16>
      %cst_6 = arith.constant dense<0.000000e+00> : vector<256x8xf32>
      %11 = tpu.matmul %8, %10, %cst_6 {dimension_numbers = #tpu.dot_dimension_numbers<[1], [0], [0], [1], [0, 0, 1, 1], [], []>} : vector<256x3xbf16>, vector<3x8xbf16>, vector<256x8xf32> -> vector<256x8xf32>
      %12 = arith.addf %3, %11 : vector<256x8xf32>
      %c1_i32_7 = arith.constant 1 : i32
      %13 = arith.addi %2, %c1_i32_7 : i32
      %c0_8 = arith.constant 0 : index
      %14 = arith.index_cast %13 : i32 to index
      %c0_9 = arith.constant 0 : index
      %15 = vector.load %arg1[%c0_8, %14, %c0_9] : memref<1x7274x3xf32, #tpu.memory_space<vmem>>, vector<1x256x3xf32>
      %16 = vector.shape_cast %15 : vector<1x256x3xf32> to vector<256x3xf32>
      %17 = arith.truncf %16 : vector<256x3xf32> to vector<256x3xbf16>
      %c1 = arith.constant 1 : index
      %c0_10 = arith.constant 0 : index
      %c0_11 = arith.constant 0 : index
      %18 = vector.load %arg2[%c1, %c0_10, %c0_11] : memref<49x3x8xbf16, #tpu.memory_space<vmem>>, vector<1x3x8xbf16>
      %19 = vector.shape_cast %18 : vector<1x3x8xbf16> to vector<3x8xbf16>
      %cst_12 = arith.constant dense<0.000000e+00> : vector<256x8xf32>
      %20 = tpu.matmul %17, %19, %cst_12 {dimension_numbers = #tpu.dot_dimension_numbers<[1], [0], [0], [1], [0, 0, 1, 1], [], []>} : vector<256x3xbf16>, vector<3x8xbf16>, vector<256x8xf32> -> vector<256x8xf32>
      %21 = arith.addf %12, %20 : vector<256x8xf32>
      %c2_i32 = arith.constant 2 : i32
      %22 = arith.addi %2, %c2_i32 : i32
      %c0_13 = arith.constant 0 : index
      %23 = arith.index_cast %22 : i32 to index
      %c0_14 = arith.constant 0 : index
      %24 = vector.load %arg1[%c0_13, %23, %c0_14] : memref<1x7274x3xf32, #tpu.memory_space<vmem>>, vector<1x256x3xf32>
      %25 = vector.shape_cast %24 : vector<1x256x3xf32> to vector<256x3xf32>
      %26 = arith.truncf %25 : vector<256x3xf32> to vector<256x3xbf16>
      %c2 = arith.constant 2 : index
      %c0_15 = arith.constant 0 : index
      %c0_16 = arith.constant 0 : index
      %27 = vector.load %arg2[%c2, %c0_15, %c0_16] : memref<49x3x8xbf16, #tpu.memory_space<vmem>>, vector<1x3x8xbf16>
      %28 = vector.shape_cast %27 : vector<1x3x8xbf16> to vector<3x8xbf16>
      %cst_17 = arith.constant dense<0.000000e+00> : vector<256x8xf32>
      %29 = tpu.matmul %26, %28, %cst_17 {dimension_numbers = #tpu.dot_dimension_numbers<[1], [0], [0], [1], [0, 0, 1, 1], [], []>} : vector<256x3xbf16>, vector<3x8xbf16>, vector<256x8xf32> -> vector<256x8xf32>
      %30 = arith.addf %21, %29 : vector<256x8xf32>
      %c3_i32 = arith.constant 3 : i32
      %31 = arith.addi %2, %c3_i32 : i32
      %c0_18 = arith.constant 0 : index
      %32 = arith.index_cast %31 : i32 to index
      %c0_19 = arith.constant 0 : index
      %33 = vector.load %arg1[%c0_18, %32, %c0_19] : memref<1x7274x3xf32, #tpu.memory_space<vmem>>, vector<1x256x3xf32>
      %34 = vector.shape_cast %33 : vector<1x256x3xf32> to vector<256x3xf32>
      %35 = arith.truncf %34 : vector<256x3xf32> to vector<256x3xbf16>
      %c3 = arith.constant 3 : index
      %c0_20 = arith.constant 0 : index
      %c0_21 = arith.constant 0 : index
      %36 = vector.load %arg2[%c3, %c0_20, %c0_21] : memref<49x3x8xbf16, #tpu.memory_space<vmem>>, vector<1x3x8xbf16>
      %37 = vector.shape_cast %36 : vector<1x3x8xbf16> to vector<3x8xbf16>
      %cst_22 = arith.constant dense<0.000000e+00> : vector<256x8xf32>
      %38 = tpu.matmul %35, %37, %cst_22 {dimension_numbers = #tpu.dot_dimension_numbers<[1], [0], [0], [1], [0, 0, 1, 1], [], []>} : vector<256x3xbf16>, vector<3x8xbf16>, vector<256x8xf32> -> vector<256x8xf32>
      %39 = arith.addf %30, %38 : vector<256x8xf32>
      %c4_i32 = arith.constant 4 : i32
      %40 = arith.addi %2, %c4_i32 : i32
      %c0_23 = arith.constant 0 : index
      %41 = arith.index_cast %40 : i32 to index
      %c0_24 = arith.constant 0 : index
      %42 = vector.load %arg1[%c0_23, %41, %c0_24] : memref<1x7274x3xf32, #tpu.memory_space<vmem>>, vector<1x256x3xf32>
      %43 = vector.shape_cast %42 : vector<1x256x3xf32> to vector<256x3xf32>
      %44 = arith.truncf %43 : vector<256x3xf32> to vector<256x3xbf16>
      %c4 = arith.constant 4 : index
      %c0_25 = arith.constant 0 : index
      %c0_26 = arith.constant 0 : index
      %45 = vector.load %arg2[%c4, %c0_25, %c0_26] : memref<49x3x8xbf16, #tpu.memory_space<vmem>>, vector<1x3x8xbf16>
      %46 = vector.shape_cast %45 : vector<1x3x8xbf16> to vector<3x8xbf16>
      %cst_27 = arith.constant dense<0.000000e+00> : vector<256x8xf32>
      %47 = tpu.matmul %44, %46, %cst_27 {dimension_numbers = #tpu.dot_dimension_numbers<[1], [0], [0], [1], [0, 0, 1, 1], [], []>} : vector<256x3xbf16>, vector<3x8xbf16>, vector<256x8xf32> -> vector<256x8xf32>
      %48 = arith.addf %39, %47 : vector<256x8xf32>
      %c5_i32 = arith.constant 5 : i32
      %49 = arith.addi %2, %c5_i32 : i32
      %c0_28 = arith.constant 0 : index
      %50 = arith.index_cast %49 : i32 to index
      %c0_29 = arith.constant 0 : index
      %51 = vector.load %arg1[%c0_28, %50, %c0_29] : memref<1x7274x3xf32, #tpu.memory_space<vmem>>, vector<1x256x3xf32>
      %52 = vector.shape_cast %51 : vector<1x256x3xf32> to vector<256x3xf32>
      %53 = arith.truncf %52 : vector<256x3xf32> to vector<256x3xbf16>
      %c5 = arith.constant 5 : index
      %c0_30 = arith.constant 0 : index
      %c0_31 = arith.constant 0 : index
      %54 = vector.load %arg2[%c5, %c0_30, %c0_31] : memref<49x3x8xbf16, #tpu.memory_space<vmem>>, vector<1x3x8xbf16>
      %55 = vector.shape_cast %54 : vector<1x3x8xbf16> to vector<3x8xbf16>
      %cst_32 = arith.constant dense<0.000000e+00> : vector<256x8xf32>
      %56 = tpu.matmul %53, %55, %cst_32 {dimension_numbers = #tpu.dot_dimension_numbers<[1], [0], [0], [1], [0, 0, 1, 1], [], []>} : vector<256x3xbf16>, vector<3x8xbf16>, vector<256x8xf32> -> vector<256x8xf32>
      %57 = arith.addf %48, %56 : vector<256x8xf32>
      %c6_i32 = arith.constant 6 : i32
      %58 = arith.addi %2, %c6_i32 : i32
      %c0_33 = arith.constant 0 : index
      %59 = arith.index_cast %58 : i32 to index
      %c0_34 = arith.constant 0 : index
      %60 = vector.load %arg1[%c0_33, %59, %c0_34] : memref<1x7274x3xf32, #tpu.memory_space<vmem>>, vector<1x256x3xf32>
      %61 = vector.shape_cast %60 : vector<1x256x3xf32> to vector<256x3xf32>
      %62 = arith.truncf %61 : vector<256x3xf32> to vector<256x3xbf16>
      %c6 = arith.constant 6 : index
      %c0_35 = arith.constant 0 : index
      %c0_36 = arith.constant 0 : index
      %63 = vector.load %arg2[%c6, %c0_35, %c0_36] : memref<49x3x8xbf16, #tpu.memory_space<vmem>>, vector<1x3x8xbf16>
      %64 = vector.shape_cast %63 : vector<1x3x8xbf16> to vector<3x8xbf16>
      %cst_37 = arith.constant dense<0.000000e+00> : vector<256x8xf32>
      %65 = tpu.matmul %62, %64, %cst_37 {dimension_numbers = #tpu.dot_dimension_numbers<[1], [0], [0], [1], [0, 0, 1, 1], [], []>} : vector<256x3xbf16>, vector<3x8xbf16>, vector<256x8xf32> -> vector<256x8xf32>
      %66 = arith.addf %57, %65 : vector<256x8xf32>
      %c102_i32 = arith.constant 102 : i32
      %67 = arith.addi %2, %c102_i32 : i32
      %c0_38 = arith.constant 0 : index
      %68 = arith.index_cast %67 : i32 to index
      %c0_39 = arith.constant 0 : index
      %69 = vector.load %arg1[%c0_38, %68, %c0_39] : memref<1x7274x3xf32, #tpu.memory_space<vmem>>, vector<1x256x3xf32>
      %70 = vector.shape_cast %69 : vector<1x256x3xf32> to vector<256x3xf32>
      %71 = arith.truncf %70 : vector<256x3xf32> to vector<256x3xbf16>
      %c7 = arith.constant 7 : index
      %c0_40 = arith.constant 0 : index
      %c0_41 = arith.constant 0 : index
      %72 = vector.load %arg2[%c7, %c0_40, %c0_41] : memref<49x3x8xbf16, #tpu.memory_space<vmem>>, vector<1x3x8xbf16>
      %73 = vector.shape_cast %72 : vector<1x3x8xbf16> to vector<3x8xbf16>
      %cst_42 = arith.constant dense<0.000000e+00> : vector<256x8xf32>
      %74 = tpu.matmul %71, %73, %cst_42 {dimension_numbers = #tpu.dot_dimension_numbers<[1], [0], [0], [1], [0, 0, 1, 1], [], []>} : vector<256x3xbf16>, vector<3x8xbf16>, vector<256x8xf32> -> vector<256x8xf32>
      %75 = arith.addf %66, %74 : vector<256x8xf32>
      %c103_i32 = arith.constant 103 : i32
      %76 = arith.addi %2, %c103_i32 : i32
      %c0_43 = arith.constant 0 : index
      %77 = arith.index_cast %76 : i32 to index
      %c0_44 = arith.constant 0 : index
      %78 = vector.load %arg1[%c0_43, %77, %c0_44] : memref<1x7274x3xf32, #tpu.memory_space<vmem>>, vector<1x256x3xf32>
      %79 = vector.shape_cast %78 : vector<1x256x3xf32> to vector<256x3xf32>
      %80 = arith.truncf %79 : vector<256x3xf32> to vector<256x3xbf16>
      %c8 = arith.constant 8 : index
      %c0_45 = arith.constant 0 : index
      %c0_46 = arith.constant 0 : index
      %81 = vector.load %arg2[%c8, %c0_45, %c0_46] : memref<49x3x8xbf16, #tpu.memory_space<vmem>>, vector<1x3x8xbf16>
      %82 = vector.shape_cast %81 : vector<1x3x8xbf16> to vector<3x8xbf16>
      %cst_47 = arith.constant dense<0.000000e+00> : vector<256x8xf32>
      %83 = tpu.matmul %80, %82, %cst_47 {dimension_numbers = #tpu.dot_dimension_numbers<[1], [0], [0], [1], [0, 0, 1, 1], [], []>} : vector<256x3xbf16>, vector<3x8xbf16>, vector<256x8xf32> -> vector<256x8xf32>
      %84 = arith.addf %75, %83 : vector<256x8xf32>
      %c104_i32 = arith.constant 104 : i32
      %85 = arith.addi %2, %c104_i32 : i32
      %c0_48 = arith.constant 0 : index
      %86 = arith.index_cast %85 : i32 to index
      %c0_49 = arith.constant 0 : index
      %87 = vector.load %arg1[%c0_48, %86, %c0_49] : memref<1x7274x3xf32, #tpu.memory_space<vmem>>, vector<1x256x3xf32>
      %88 = vector.shape_cast %87 : vector<1x256x3xf32> to vector<256x3xf32>
      %89 = arith.truncf %88 : vector<256x3xf32> to vector<256x3xbf16>
      %c9 = arith.constant 9 : index
      %c0_50 = arith.constant 0 : index
      %c0_51 = arith.constant 0 : index
      %90 = vector.load %arg2[%c9, %c0_50, %c0_51] : memref<49x3x8xbf16, #tpu.memory_space<vmem>>, vector<1x3x8xbf16>
      %91 = vector.shape_cast %90 : vector<1x3x8xbf16> to vector<3x8xbf16>
      %cst_52 = arith.constant dense<0.000000e+00> : vector<256x8xf32>
      %92 = tpu.matmul %89, %91, %cst_52 {dimension_numbers = #tpu.dot_dimension_numbers<[1], [0], [0], [1], [0, 0, 1, 1], [], []>} : vector<256x3xbf16>, vector<3x8xbf16>, vector<256x8xf32> -> vector<256x8xf32>
      %93 = arith.addf %84, %92 : vector<256x8xf32>
      %c105_i32 = arith.constant 105 : i32
      %94 = arith.addi %2, %c105_i32 : i32
      %c0_53 = arith.constant 0 : index
      %95 = arith.index_cast %94 : i32 to index
      %c0_54 = arith.constant 0 : index
      %96 = vector.load %arg1[%c0_53, %95, %c0_54] : memref<1x7274x3xf32, #tpu.memory_space<vmem>>, vector<1x256x3xf32>
      %97 = vector.shape_cast %96 : vector<1x256x3xf32> to vector<256x3xf32>
      %98 = arith.truncf %97 : vector<256x3xf32> to vector<256x3xbf16>
      %c10 = arith.constant 10 : index
      %c0_55 = arith.constant 0 : index
      %c0_56 = arith.constant 0 : index
      %99 = vector.load %arg2[%c10, %c0_55, %c0_56] : memref<49x3x8xbf16, #tpu.memory_space<vmem>>, vector<1x3x8xbf16>
      %100 = vector.shape_cast %99 : vector<1x3x8xbf16> to vector<3x8xbf16>
      %cst_57 = arith.constant dense<0.000000e+00> : vector<256x8xf32>
      %101 = tpu.matmul %98, %100, %cst_57 {dimension_numbers = #tpu.dot_dimension_numbers<[1], [0], [0], [1], [0, 0, 1, 1], [], []>} : vector<256x3xbf16>, vector<3x8xbf16>, vector<256x8xf32> -> vector<256x8xf32>
      %102 = arith.addf %93, %101 : vector<256x8xf32>
      %c106_i32 = arith.constant 106 : i32
      %103 = arith.addi %2, %c106_i32 : i32
      %c0_58 = arith.constant 0 : index
      %104 = arith.index_cast %103 : i32 to index
      %c0_59 = arith.constant 0 : index
      %105 = vector.load %arg1[%c0_58, %104, %c0_59] : memref<1x7274x3xf32, #tpu.memory_space<vmem>>, vector<1x256x3xf32>
      %106 = vector.shape_cast %105 : vector<1x256x3xf32> to vector<256x3xf32>
      %107 = arith.truncf %106 : vector<256x3xf32> to vector<256x3xbf16>
      %c11 = arith.constant 11 : index
      %c0_60 = arith.constant 0 : index
      %c0_61 = arith.constant 0 : index
      %108 = vector.load %arg2[%c11, %c0_60, %c0_61] : memref<49x3x8xbf16, #tpu.memory_space<vmem>>, vector<1x3x8xbf16>
      %109 = vector.shape_cast %108 : vector<1x3x8xbf16> to vector<3x8xbf16>
      %cst_62 = arith.constant dense<0.000000e+00> : vector<256x8xf32>
      %110 = tpu.matmul %107, %109, %cst_62 {dimension_numbers = #tpu.dot_dimension_numbers<[1], [0], [0], [1], [0, 0, 1, 1], [], []>} : vector<256x3xbf16>, vector<3x8xbf16>, vector<256x8xf32> -> vector<256x8xf32>
      %111 = arith.addf %102, %110 : vector<256x8xf32>
      %c107_i32 = arith.constant 107 : i32
      %112 = arith.addi %2, %c107_i32 : i32
      %c0_63 = arith.constant 0 : index
      %113 = arith.index_cast %112 : i32 to index
      %c0_64 = arith.constant 0 : index
      %114 = vector.load %arg1[%c0_63, %113, %c0_64] : memref<1x7274x3xf32, #tpu.memory_space<vmem>>, vector<1x256x3xf32>
      %115 = vector.shape_cast %114 : vector<1x256x3xf32> to vector<256x3xf32>
      %116 = arith.truncf %115 : vector<256x3xf32> to vector<256x3xbf16>
      %c12 = arith.constant 12 : index
      %c0_65 = arith.constant 0 : index
      %c0_66 = arith.constant 0 : index
      %117 = vector.load %arg2[%c12, %c0_65, %c0_66] : memref<49x3x8xbf16, #tpu.memory_space<vmem>>, vector<1x3x8xbf16>
      %118 = vector.shape_cast %117 : vector<1x3x8xbf16> to vector<3x8xbf16>
      %cst_67 = arith.constant dense<0.000000e+00> : vector<256x8xf32>
      %119 = tpu.matmul %116, %118, %cst_67 {dimension_numbers = #tpu.dot_dimension_numbers<[1], [0], [0], [1], [0, 0, 1, 1], [], []>} : vector<256x3xbf16>, vector<3x8xbf16>, vector<256x8xf32> -> vector<256x8xf32>
      %120 = arith.addf %111, %119 : vector<256x8xf32>
      %c108_i32 = arith.constant 108 : i32
      %121 = arith.addi %2, %c108_i32 : i32
      %c0_68 = arith.constant 0 : index
      %122 = arith.index_cast %121 : i32 to index
      %c0_69 = arith.constant 0 : index
      %123 = vector.load %arg1[%c0_68, %122, %c0_69] : memref<1x7274x3xf32, #tpu.memory_space<vmem>>, vector<1x256x3xf32>
      %124 = vector.shape_cast %123 : vector<1x256x3xf32> to vector<256x3xf32>
      %125 = arith.truncf %124 : vector<256x3xf32> to vector<256x3xbf16>
      %c13 = arith.constant 13 : index
      %c0_70 = arith.constant 0 : index
      %c0_71 = arith.constant 0 : index
      %126 = vector.load %arg2[%c13, %c0_70, %c0_71] : memref<49x3x8xbf16, #tpu.memory_space<vmem>>, vector<1x3x8xbf16>
      %127 = vector.shape_cast %126 : vector<1x3x8xbf16> to vector<3x8xbf16>
      %cst_72 = arith.constant dense<0.000000e+00> : vector<256x8xf32>
      %128 = tpu.matmul %125, %127, %cst_72 {dimension_numbers = #tpu.dot_dimension_numbers<[1], [0], [0], [1], [0, 0, 1, 1], [], []>} : vector<256x3xbf16>, vector<3x8xbf16>, vector<256x8xf32> -> vector<256x8xf32>
      %129 = arith.addf %120, %128 : vector<256x8xf32>
      %c204_i32 = arith.constant 204 : i32
      %130 = arith.addi %2, %c204_i32 : i32
      %c0_73 = arith.constant 0 : index
      %131 = arith.index_cast %130 : i32 to index
      %c0_74 = arith.constant 0 : index
      %132 = vector.load %arg1[%c0_73, %131, %c0_74] : memref<1x7274x3xf32, #tpu.memory_space<vmem>>, vector<1x256x3xf32>
      %133 = vector.shape_cast %132 : vector<1x256x3xf32> to vector<256x3xf32>
      %134 = arith.truncf %133 : vector<256x3xf32> to vector<256x3xbf16>
      %c14 = arith.constant 14 : index
      %c0_75 = arith.constant 0 : index
      %c0_76 = arith.constant 0 : index
      %135 = vector.load %arg2[%c14, %c0_75, %c0_76] : memref<49x3x8xbf16, #tpu.memory_space<vmem>>, vector<1x3x8xbf16>
      %136 = vector.shape_cast %135 : vector<1x3x8xbf16> to vector<3x8xbf16>
      %cst_77 = arith.constant dense<0.000000e+00> : vector<256x8xf32>
      %137 = tpu.matmul %134, %136, %cst_77 {dimension_numbers = #tpu.dot_dimension_numbers<[1], [0], [0], [1], [0, 0, 1, 1], [], []>} : vector<256x3xbf16>, vector<3x8xbf16>, vector<256x8xf32> -> vector<256x8xf32>
      %138 = arith.addf %129, %137 : vector<256x8xf32>
      %c205_i32 = arith.constant 205 : i32
      %139 = arith.addi %2, %c205_i32 : i32
      %c0_78 = arith.constant 0 : index
      %140 = arith.index_cast %139 : i32 to index
      %c0_79 = arith.constant 0 : index
      %141 = vector.load %arg1[%c0_78, %140, %c0_79] : memref<1x7274x3xf32, #tpu.memory_space<vmem>>, vector<1x256x3xf32>
      %142 = vector.shape_cast %141 : vector<1x256x3xf32> to vector<256x3xf32>
      %143 = arith.truncf %142 : vector<256x3xf32> to vector<256x3xbf16>
      %c15 = arith.constant 15 : index
      %c0_80 = arith.constant 0 : index
      %c0_81 = arith.constant 0 : index
      %144 = vector.load %arg2[%c15, %c0_80, %c0_81] : memref<49x3x8xbf16, #tpu.memory_space<vmem>>, vector<1x3x8xbf16>
      %145 = vector.shape_cast %144 : vector<1x3x8xbf16> to vector<3x8xbf16>
      %cst_82 = arith.constant dense<0.000000e+00> : vector<256x8xf32>
      %146 = tpu.matmul %143, %145, %cst_82 {dimension_numbers = #tpu.dot_dimension_numbers<[1], [0], [0], [1], [0, 0, 1, 1], [], []>} : vector<256x3xbf16>, vector<3x8xbf16>, vector<256x8xf32> -> vector<256x8xf32>
      %147 = arith.addf %138, %146 : vector<256x8xf32>
      %c206_i32 = arith.constant 206 : i32
      %148 = arith.addi %2, %c206_i32 : i32
      %c0_83 = arith.constant 0 : index
      %149 = arith.index_cast %148 : i32 to index
      %c0_84 = arith.constant 0 : index
      %150 = vector.load %arg1[%c0_83, %149, %c0_84] : memref<1x7274x3xf32, #tpu.memory_space<vmem>>, vector<1x256x3xf32>
      %151 = vector.shape_cast %150 : vector<1x256x3xf32> to vector<256x3xf32>
      %152 = arith.truncf %151 : vector<256x3xf32> to vector<256x3xbf16>
      %c16 = arith.constant 16 : index
      %c0_85 = arith.constant 0 : index
      %c0_86 = arith.constant 0 : index
      %153 = vector.load %arg2[%c16, %c0_85, %c0_86] : memref<49x3x8xbf16, #tpu.memory_space<vmem>>, vector<1x3x8xbf16>
      %154 = vector.shape_cast %153 : vector<1x3x8xbf16> to vector<3x8xbf16>
      %cst_87 = arith.constant dense<0.000000e+00> : vector<256x8xf32>
      %155 = tpu.matmul %152, %154, %cst_87 {dimension_numbers = #tpu.dot_dimension_numbers<[1], [0], [0], [1], [0, 0, 1, 1], [], []>} : vector<256x3xbf16>, vector<3x8xbf16>, vector<256x8xf32> -> vector<256x8xf32>
      %156 = arith.addf %147, %155 : vector<256x8xf32>
      %c207_i32 = arith.constant 207 : i32
      %157 = arith.addi %2, %c207_i32 : i32
      %c0_88 = arith.constant 0 : index
      %158 = arith.index_cast %157 : i32 to index
      %c0_89 = arith.constant 0 : index
      %159 = vector.load %arg1[%c0_88, %158, %c0_89] : memref<1x7274x3xf32, #tpu.memory_space<vmem>>, vector<1x256x3xf32>
      %160 = vector.shape_cast %159 : vector<1x256x3xf32> to vector<256x3xf32>
      %161 = arith.truncf %160 : vector<256x3xf32> to vector<256x3xbf16>
      %c17 = arith.constant 17 : index
      %c0_90 = arith.constant 0 : index
      %c0_91 = arith.constant 0 : index
      %162 = vector.load %arg2[%c17, %c0_90, %c0_91] : memref<49x3x8xbf16, #tpu.memory_space<vmem>>, vector<1x3x8xbf16>
      %163 = vector.shape_cast %162 : vector<1x3x8xbf16> to vector<3x8xbf16>
      %cst_92 = arith.constant dense<0.000000e+00> : vector<256x8xf32>
      %164 = tpu.matmul %161, %163, %cst_92 {dimension_numbers = #tpu.dot_dimension_numbers<[1], [0], [0], [1], [0, 0, 1, 1], [], []>} : vector<256x3xbf16>, vector<3x8xbf16>, vector<256x8xf32> -> vector<256x8xf32>
      %165 = arith.addf %156, %164 : vector<256x8xf32>
      %c208_i32 = arith.constant 208 : i32
      %166 = arith.addi %2, %c208_i32 : i32
      %c0_93 = arith.constant 0 : index
      %167 = arith.index_cast %166 : i32 to index
      %c0_94 = arith.constant 0 : index
      %168 = vector.load %arg1[%c0_93, %167, %c0_94] : memref<1x7274x3xf32, #tpu.memory_space<vmem>>, vector<1x256x3xf32>
      %169 = vector.shape_cast %168 : vector<1x256x3xf32> to vector<256x3xf32>
      %170 = arith.truncf %169 : vector<256x3xf32> to vector<256x3xbf16>
      %c18 = arith.constant 18 : index
      %c0_95 = arith.constant 0 : index
      %c0_96 = arith.constant 0 : index
      %171 = vector.load %arg2[%c18, %c0_95, %c0_96] : memref<49x3x8xbf16, #tpu.memory_space<vmem>>, vector<1x3x8xbf16>
      %172 = vector.shape_cast %171 : vector<1x3x8xbf16> to vector<3x8xbf16>
      %cst_97 = arith.constant dense<0.000000e+00> : vector<256x8xf32>
      %173 = tpu.matmul %170, %172, %cst_97 {dimension_numbers = #tpu.dot_dimension_numbers<[1], [0], [0], [1], [0, 0, 1, 1], [], []>} : vector<256x3xbf16>, vector<3x8xbf16>, vector<256x8xf32> -> vector<256x8xf32>
      %174 = arith.addf %165, %173 : vector<256x8xf32>
      %c209_i32 = arith.constant 209 : i32
      %175 = arith.addi %2, %c209_i32 : i32
      %c0_98 = arith.constant 0 : index
      %176 = arith.index_cast %175 : i32 to index
      %c0_99 = arith.constant 0 : index
      %177 = vector.load %arg1[%c0_98, %176, %c0_99] : memref<1x7274x3xf32, #tpu.memory_space<vmem>>, vector<1x256x3xf32>
      %178 = vector.shape_cast %177 : vector<1x256x3xf32> to vector<256x3xf32>
      %179 = arith.truncf %178 : vector<256x3xf32> to vector<256x3xbf16>
      %c19 = arith.constant 19 : index
      %c0_100 = arith.constant 0 : index
      %c0_101 = arith.constant 0 : index
      %180 = vector.load %arg2[%c19, %c0_100, %c0_101] : memref<49x3x8xbf16, #tpu.memory_space<vmem>>, vector<1x3x8xbf16>
      %181 = vector.shape_cast %180 : vector<1x3x8xbf16> to vector<3x8xbf16>
      %cst_102 = arith.constant dense<0.000000e+00> : vector<256x8xf32>
      %182 = tpu.matmul %179, %181, %cst_102 {dimension_numbers = #tpu.dot_dimension_numbers<[1], [0], [0], [1], [0, 0, 1, 1], [], []>} : vector<256x3xbf16>, vector<3x8xbf16>, vector<256x8xf32> -> vector<256x8xf32>
      %183 = arith.addf %174, %182 : vector<256x8xf32>
      %c210_i32 = arith.constant 210 : i32
      %184 = arith.addi %2, %c210_i32 : i32
      %c0_103 = arith.constant 0 : index
      %185 = arith.index_cast %184 : i32 to index
      %c0_104 = arith.constant 0 : index
      %186 = vector.load %arg1[%c0_103, %185, %c0_104] : memref<1x7274x3xf32, #tpu.memory_space<vmem>>, vector<1x256x3xf32>
      %187 = vector.shape_cast %186 : vector<1x256x3xf32> to vector<256x3xf32>
      %188 = arith.truncf %187 : vector<256x3xf32> to vector<256x3xbf16>
      %c20 = arith.constant 20 : index
      %c0_105 = arith.constant 0 : index
      %c0_106 = arith.constant 0 : index
      %189 = vector.load %arg2[%c20, %c0_105, %c0_106] : memref<49x3x8xbf16, #tpu.memory_space<vmem>>, vector<1x3x8xbf16>
      %190 = vector.shape_cast %189 : vector<1x3x8xbf16> to vector<3x8xbf16>
      %cst_107 = arith.constant dense<0.000000e+00> : vector<256x8xf32>
      %191 = tpu.matmul %188, %190, %cst_107 {dimension_numbers = #tpu.dot_dimension_numbers<[1], [0], [0], [1], [0, 0, 1, 1], [], []>} : vector<256x3xbf16>, vector<3x8xbf16>, vector<256x8xf32> -> vector<256x8xf32>
      %192 = arith.addf %183, %191 : vector<256x8xf32>
      %c306_i32 = arith.constant 306 : i32
      %193 = arith.addi %2, %c306_i32 : i32
      %c0_108 = arith.constant 0 : index
      %194 = arith.index_cast %193 : i32 to index
      %c0_109 = arith.constant 0 : index
      %195 = vector.load %arg1[%c0_108, %194, %c0_109] : memref<1x7274x3xf32, #tpu.memory_space<vmem>>, vector<1x256x3xf32>
      %196 = vector.shape_cast %195 : vector<1x256x3xf32> to vector<256x3xf32>
      %197 = arith.truncf %196 : vector<256x3xf32> to vector<256x3xbf16>
      %c21 = arith.constant 21 : index
      %c0_110 = arith.constant 0 : index
      %c0_111 = arith.constant 0 : index
      %198 = vector.load %arg2[%c21, %c0_110, %c0_111] : memref<49x3x8xbf16, #tpu.memory_space<vmem>>, vector<1x3x8xbf16>
      %199 = vector.shape_cast %198 : vector<1x3x8xbf16> to vector<3x8xbf16>
      %cst_112 = arith.constant dense<0.000000e+00> : vector<256x8xf32>
      %200 = tpu.matmul %197, %199, %cst_112 {dimension_numbers = #tpu.dot_dimension_numbers<[1], [0], [0], [1], [0, 0, 1, 1], [], []>} : vector<256x3xbf16>, vector<3x8xbf16>, vector<256x8xf32> -> vector<256x8xf32>
      %201 = arith.addf %192, %200 : vector<256x8xf32>
      %c307_i32 = arith.constant 307 : i32
      %202 = arith.addi %2, %c307_i32 : i32
      %c0_113 = arith.constant 0 : index
      %203 = arith.index_cast %202 : i32 to index
      %c0_114 = arith.constant 0 : index
      %204 = vector.load %arg1[%c0_113, %203, %c0_114] : memref<1x7274x3xf32, #tpu.memory_space<vmem>>, vector<1x256x3xf32>
      %205 = vector.shape_cast %204 : vector<1x256x3xf32> to vector<256x3xf32>
      %206 = arith.truncf %205 : vector<256x3xf32> to vector<256x3xbf16>
      %c22 = arith.constant 22 : index
      %c0_115 = arith.constant 0 : index
      %c0_116 = arith.constant 0 : index
      %207 = vector.load %arg2[%c22, %c0_115, %c0_116] : memref<49x3x8xbf16, #tpu.memory_space<vmem>>, vector<1x3x8xbf16>
      %208 = vector.shape_cast %207 : vector<1x3x8xbf16> to vector<3x8xbf16>
      %cst_117 = arith.constant dense<0.000000e+00> : vector<256x8xf32>
      %209 = tpu.matmul %206, %208, %cst_117 {dimension_numbers = #tpu.dot_dimension_numbers<[1], [0], [0], [1], [0, 0, 1, 1], [], []>} : vector<256x3xbf16>, vector<3x8xbf16>, vector<256x8xf32> -> vector<256x8xf32>
      %210 = arith.addf %201, %209 : vector<256x8xf32>
      %c308_i32 = arith.constant 308 : i32
      %211 = arith.addi %2, %c308_i32 : i32
      %c0_118 = arith.constant 0 : index
      %212 = arith.index_cast %211 : i32 to index
      %c0_119 = arith.constant 0 : index
      %213 = vector.load %arg1[%c0_118, %212, %c0_119] : memref<1x7274x3xf32, #tpu.memory_space<vmem>>, vector<1x256x3xf32>
      %214 = vector.shape_cast %213 : vector<1x256x3xf32> to vector<256x3xf32>
      %215 = arith.truncf %214 : vector<256x3xf32> to vector<256x3xbf16>
      %c23 = arith.constant 23 : index
      %c0_120 = arith.constant 0 : index
      %c0_121 = arith.constant 0 : index
      %216 = vector.load %arg2[%c23, %c0_120, %c0_121] : memref<49x3x8xbf16, #tpu.memory_space<vmem>>, vector<1x3x8xbf16>
      %217 = vector.shape_cast %216 : vector<1x3x8xbf16> to vector<3x8xbf16>
      %cst_122 = arith.constant dense<0.000000e+00> : vector<256x8xf32>
      %218 = tpu.matmul %215, %217, %cst_122 {dimension_numbers = #tpu.dot_dimension_numbers<[1], [0], [0], [1], [0, 0, 1, 1], [], []>} : vector<256x3xbf16>, vector<3x8xbf16>, vector<256x8xf32> -> vector<256x8xf32>
      %219 = arith.addf %210, %218 : vector<256x8xf32>
      %c309_i32 = arith.constant 309 : i32
      %220 = arith.addi %2, %c309_i32 : i32
      %c0_123 = arith.constant 0 : index
      %221 = arith.index_cast %220 : i32 to index
      %c0_124 = arith.constant 0 : index
      %222 = vector.load %arg1[%c0_123, %221, %c0_124] : memref<1x7274x3xf32, #tpu.memory_space<vmem>>, vector<1x256x3xf32>
      %223 = vector.shape_cast %222 : vector<1x256x3xf32> to vector<256x3xf32>
      %224 = arith.truncf %223 : vector<256x3xf32> to vector<256x3xbf16>
      %c24 = arith.constant 24 : index
      %c0_125 = arith.constant 0 : index
      %c0_126 = arith.constant 0 : index
      %225 = vector.load %arg2[%c24, %c0_125, %c0_126] : memref<49x3x8xbf16, #tpu.memory_space<vmem>>, vector<1x3x8xbf16>
      %226 = vector.shape_cast %225 : vector<1x3x8xbf16> to vector<3x8xbf16>
      %cst_127 = arith.constant dense<0.000000e+00> : vector<256x8xf32>
      %227 = tpu.matmul %224, %226, %cst_127 {dimension_numbers = #tpu.dot_dimension_numbers<[1], [0], [0], [1], [0, 0, 1, 1], [], []>} : vector<256x3xbf16>, vector<3x8xbf16>, vector<256x8xf32> -> vector<256x8xf32>
      %228 = arith.addf %219, %227 : vector<256x8xf32>
      %c310_i32 = arith.constant 310 : i32
      %229 = arith.addi %2, %c310_i32 : i32
      %c0_128 = arith.constant 0 : index
      %230 = arith.index_cast %229 : i32 to index
      %c0_129 = arith.constant 0 : index
      %231 = vector.load %arg1[%c0_128, %230, %c0_129] : memref<1x7274x3xf32, #tpu.memory_space<vmem>>, vector<1x256x3xf32>
      %232 = vector.shape_cast %231 : vector<1x256x3xf32> to vector<256x3xf32>
      %233 = arith.truncf %232 : vector<256x3xf32> to vector<256x3xbf16>
      %c25 = arith.constant 25 : index
      %c0_130 = arith.constant 0 : index
      %c0_131 = arith.constant 0 : index
      %234 = vector.load %arg2[%c25, %c0_130, %c0_131] : memref<49x3x8xbf16, #tpu.memory_space<vmem>>, vector<1x3x8xbf16>
      %235 = vector.shape_cast %234 : vector<1x3x8xbf16> to vector<3x8xbf16>
      %cst_132 = arith.constant dense<0.000000e+00> : vector<256x8xf32>
      %236 = tpu.matmul %233, %235, %cst_132 {dimension_numbers = #tpu.dot_dimension_numbers<[1], [0], [0], [1], [0, 0, 1, 1], [], []>} : vector<256x3xbf16>, vector<3x8xbf16>, vector<256x8xf32> -> vector<256x8xf32>
      %237 = arith.addf %228, %236 : vector<256x8xf32>
      %c311_i32 = arith.constant 311 : i32
      %238 = arith.addi %2, %c311_i32 : i32
      %c0_133 = arith.constant 0 : index
      %239 = arith.index_cast %238 : i32 to index
      %c0_134 = arith.constant 0 : index
      %240 = vector.load %arg1[%c0_133, %239, %c0_134] : memref<1x7274x3xf32, #tpu.memory_space<vmem>>, vector<1x256x3xf32>
      %241 = vector.shape_cast %240 : vector<1x256x3xf32> to vector<256x3xf32>
      %242 = arith.truncf %241 : vector<256x3xf32> to vector<256x3xbf16>
      %c26 = arith.constant 26 : index
      %c0_135 = arith.constant 0 : index
      %c0_136 = arith.constant 0 : index
      %243 = vector.load %arg2[%c26, %c0_135, %c0_136] : memref<49x3x8xbf16, #tpu.memory_space<vmem>>, vector<1x3x8xbf16>
      %244 = vector.shape_cast %243 : vector<1x3x8xbf16> to vector<3x8xbf16>
      %cst_137 = arith.constant dense<0.000000e+00> : vector<256x8xf32>
      %245 = tpu.matmul %242, %244, %cst_137 {dimension_numbers = #tpu.dot_dimension_numbers<[1], [0], [0], [1], [0, 0, 1, 1], [], []>} : vector<256x3xbf16>, vector<3x8xbf16>, vector<256x8xf32> -> vector<256x8xf32>
      %246 = arith.addf %237, %245 : vector<256x8xf32>
      %c312_i32 = arith.constant 312 : i32
      %247 = arith.addi %2, %c312_i32 : i32
      %c0_138 = arith.constant 0 : index
      %248 = arith.index_cast %247 : i32 to index
      %c0_139 = arith.constant 0 : index
      %249 = vector.load %arg1[%c0_138, %248, %c0_139] : memref<1x7274x3xf32, #tpu.memory_space<vmem>>, vector<1x256x3xf32>
      %250 = vector.shape_cast %249 : vector<1x256x3xf32> to vector<256x3xf32>
      %251 = arith.truncf %250 : vector<256x3xf32> to vector<256x3xbf16>
      %c27 = arith.constant 27 : index
      %c0_140 = arith.constant 0 : index
      %c0_141 = arith.constant 0 : index
      %252 = vector.load %arg2[%c27, %c0_140, %c0_141] : memref<49x3x8xbf16, #tpu.memory_space<vmem>>, vector<1x3x8xbf16>
      %253 = vector.shape_cast %252 : vector<1x3x8xbf16> to vector<3x8xbf16>
      %cst_142 = arith.constant dense<0.000000e+00> : vector<256x8xf32>
      %254 = tpu.matmul %251, %253, %cst_142 {dimension_numbers = #tpu.dot_dimension_numbers<[1], [0], [0], [1], [0, 0, 1, 1], [], []>} : vector<256x3xbf16>, vector<3x8xbf16>, vector<256x8xf32> -> vector<256x8xf32>
      %255 = arith.addf %246, %254 : vector<256x8xf32>
      %c408_i32 = arith.constant 408 : i32
      %256 = arith.addi %2, %c408_i32 : i32
      %c0_143 = arith.constant 0 : index
      %257 = arith.index_cast %256 : i32 to index
      %c0_144 = arith.constant 0 : index
      %258 = vector.load %arg1[%c0_143, %257, %c0_144] : memref<1x7274x3xf32, #tpu.memory_space<vmem>>, vector<1x256x3xf32>
      %259 = vector.shape_cast %258 : vector<1x256x3xf32> to vector<256x3xf32>
      %260 = arith.truncf %259 : vector<256x3xf32> to vector<256x3xbf16>
      %c28 = arith.constant 28 : index
      %c0_145 = arith.constant 0 : index
      %c0_146 = arith.constant 0 : index
      %261 = vector.load %arg2[%c28, %c0_145, %c0_146] : memref<49x3x8xbf16, #tpu.memory_space<vmem>>, vector<1x3x8xbf16>
      %262 = vector.shape_cast %261 : vector<1x3x8xbf16> to vector<3x8xbf16>
      %cst_147 = arith.constant dense<0.000000e+00> : vector<256x8xf32>
      %263 = tpu.matmul %260, %262, %cst_147 {dimension_numbers = #tpu.dot_dimension_numbers<[1], [0], [0], [1], [0, 0, 1, 1], [], []>} : vector<256x3xbf16>, vector<3x8xbf16>, vector<256x8xf32> -> vector<256x8xf32>
      %264 = arith.addf %255, %263 : vector<256x8xf32>
      %c409_i32 = arith.constant 409 : i32
      %265 = arith.addi %2, %c409_i32 : i32
      %c0_148 = arith.constant 0 : index
      %266 = arith.index_cast %265 : i32 to index
      %c0_149 = arith.constant 0 : index
      %267 = vector.load %arg1[%c0_148, %266, %c0_149] : memref<1x7274x3xf32, #tpu.memory_space<vmem>>, vector<1x256x3xf32>
      %268 = vector.shape_cast %267 : vector<1x256x3xf32> to vector<256x3xf32>
      %269 = arith.truncf %268 : vector<256x3xf32> to vector<256x3xbf16>
      %c29 = arith.constant 29 : index
      %c0_150 = arith.constant 0 : index
      %c0_151 = arith.constant 0 : index
      %270 = vector.load %arg2[%c29, %c0_150, %c0_151] : memref<49x3x8xbf16, #tpu.memory_space<vmem>>, vector<1x3x8xbf16>
      %271 = vector.shape_cast %270 : vector<1x3x8xbf16> to vector<3x8xbf16>
      %cst_152 = arith.constant dense<0.000000e+00> : vector<256x8xf32>
      %272 = tpu.matmul %269, %271, %cst_152 {dimension_numbers = #tpu.dot_dimension_numbers<[1], [0], [0], [1], [0, 0, 1, 1], [], []>} : vector<256x3xbf16>, vector<3x8xbf16>, vector<256x8xf32> -> vector<256x8xf32>
      %273 = arith.addf %264, %272 : vector<256x8xf32>
      %c410_i32 = arith.constant 410 : i32
      %274 = arith.addi %2, %c410_i32 : i32
      %c0_153 = arith.constant 0 : index
      %275 = arith.index_cast %274 : i32 to index
      %c0_154 = arith.constant 0 : index
      %276 = vector.load %arg1[%c0_153, %275, %c0_154] : memref<1x7274x3xf32, #tpu.memory_space<vmem>>, vector<1x256x3xf32>
      %277 = vector.shape_cast %276 : vector<1x256x3xf32> to vector<256x3xf32>
      %278 = arith.truncf %277 : vector<256x3xf32> to vector<256x3xbf16>
      %c30 = arith.constant 30 : index
      %c0_155 = arith.constant 0 : index
      %c0_156 = arith.constant 0 : index
      %279 = vector.load %arg2[%c30, %c0_155, %c0_156] : memref<49x3x8xbf16, #tpu.memory_space<vmem>>, vector<1x3x8xbf16>
      %280 = vector.shape_cast %279 : vector<1x3x8xbf16> to vector<3x8xbf16>
      %cst_157 = arith.constant dense<0.000000e+00> : vector<256x8xf32>
      %281 = tpu.matmul %278, %280, %cst_157 {dimension_numbers = #tpu.dot_dimension_numbers<[1], [0], [0], [1], [0, 0, 1, 1], [], []>} : vector<256x3xbf16>, vector<3x8xbf16>, vector<256x8xf32> -> vector<256x8xf32>
      %282 = arith.addf %273, %281 : vector<256x8xf32>
      %c411_i32 = arith.constant 411 : i32
      %283 = arith.addi %2, %c411_i32 : i32
      %c0_158 = arith.constant 0 : index
      %284 = arith.index_cast %283 : i32 to index
      %c0_159 = arith.constant 0 : index
      %285 = vector.load %arg1[%c0_158, %284, %c0_159] : memref<1x7274x3xf32, #tpu.memory_space<vmem>>, vector<1x256x3xf32>
      %286 = vector.shape_cast %285 : vector<1x256x3xf32> to vector<256x3xf32>
      %287 = arith.truncf %286 : vector<256x3xf32> to vector<256x3xbf16>
      %c31 = arith.constant 31 : index
      %c0_160 = arith.constant 0 : index
      %c0_161 = arith.constant 0 : index
      %288 = vector.load %arg2[%c31, %c0_160, %c0_161] : memref<49x3x8xbf16, #tpu.memory_space<vmem>>, vector<1x3x8xbf16>
      %289 = vector.shape_cast %288 : vector<1x3x8xbf16> to vector<3x8xbf16>
      %cst_162 = arith.constant dense<0.000000e+00> : vector<256x8xf32>
      %290 = tpu.matmul %287, %289, %cst_162 {dimension_numbers = #tpu.dot_dimension_numbers<[1], [0], [0], [1], [0, 0, 1, 1], [], []>} : vector<256x3xbf16>, vector<3x8xbf16>, vector<256x8xf32> -> vector<256x8xf32>
      %291 = arith.addf %282, %290 : vector<256x8xf32>
      %c412_i32 = arith.constant 412 : i32
      %292 = arith.addi %2, %c412_i32 : i32
      %c0_163 = arith.constant 0 : index
      %293 = arith.index_cast %292 : i32 to index
      %c0_164 = arith.constant 0 : index
      %294 = vector.load %arg1[%c0_163, %293, %c0_164] : memref<1x7274x3xf32, #tpu.memory_space<vmem>>, vector<1x256x3xf32>
      %295 = vector.shape_cast %294 : vector<1x256x3xf32> to vector<256x3xf32>
      %296 = arith.truncf %295 : vector<256x3xf32> to vector<256x3xbf16>
      %c32 = arith.constant 32 : index
      %c0_165 = arith.constant 0 : index
      %c0_166 = arith.constant 0 : index
      %297 = vector.load %arg2[%c32, %c0_165, %c0_166] : memref<49x3x8xbf16, #tpu.memory_space<vmem>>, vector<1x3x8xbf16>
      %298 = vector.shape_cast %297 : vector<1x3x8xbf16> to vector<3x8xbf16>
      %cst_167 = arith.constant dense<0.000000e+00> : vector<256x8xf32>
      %299 = tpu.matmul %296, %298, %cst_167 {dimension_numbers = #tpu.dot_dimension_numbers<[1], [0], [0], [1], [0, 0, 1, 1], [], []>} : vector<256x3xbf16>, vector<3x8xbf16>, vector<256x8xf32> -> vector<256x8xf32>
      %300 = arith.addf %291, %299 : vector<256x8xf32>
      %c413_i32 = arith.constant 413 : i32
      %301 = arith.addi %2, %c413_i32 : i32
      %c0_168 = arith.constant 0 : index
      %302 = arith.index_cast %301 : i32 to index
      %c0_169 = arith.constant 0 : index
      %303 = vector.load %arg1[%c0_168, %302, %c0_169] : memref<1x7274x3xf32, #tpu.memory_space<vmem>>, vector<1x256x3xf32>
      %304 = vector.shape_cast %303 : vector<1x256x3xf32> to vector<256x3xf32>
      %305 = arith.truncf %304 : vector<256x3xf32> to vector<256x3xbf16>
      %c33 = arith.constant 33 : index
      %c0_170 = arith.constant 0 : index
      %c0_171 = arith.constant 0 : index
      %306 = vector.load %arg2[%c33, %c0_170, %c0_171] : memref<49x3x8xbf16, #tpu.memory_space<vmem>>, vector<1x3x8xbf16>
      %307 = vector.shape_cast %306 : vector<1x3x8xbf16> to vector<3x8xbf16>
      %cst_172 = arith.constant dense<0.000000e+00> : vector<256x8xf32>
      %308 = tpu.matmul %305, %307, %cst_172 {dimension_numbers = #tpu.dot_dimension_numbers<[1], [0], [0], [1], [0, 0, 1, 1], [], []>} : vector<256x3xbf16>, vector<3x8xbf16>, vector<256x8xf32> -> vector<256x8xf32>
      %309 = arith.addf %300, %308 : vector<256x8xf32>
      %c414_i32 = arith.constant 414 : i32
      %310 = arith.addi %2, %c414_i32 : i32
      %c0_173 = arith.constant 0 : index
      %311 = arith.index_cast %310 : i32 to index
      %c0_174 = arith.constant 0 : index
      %312 = vector.load %arg1[%c0_173, %311, %c0_174] : memref<1x7274x3xf32, #tpu.memory_space<vmem>>, vector<1x256x3xf32>
      %313 = vector.shape_cast %312 : vector<1x256x3xf32> to vector<256x3xf32>
      %314 = arith.truncf %313 : vector<256x3xf32> to vector<256x3xbf16>
      %c34 = arith.constant 34 : index
      %c0_175 = arith.constant 0 : index
      %c0_176 = arith.constant 0 : index
      %315 = vector.load %arg2[%c34, %c0_175, %c0_176] : memref<49x3x8xbf16, #tpu.memory_space<vmem>>, vector<1x3x8xbf16>
      %316 = vector.shape_cast %315 : vector<1x3x8xbf16> to vector<3x8xbf16>
      %cst_177 = arith.constant dense<0.000000e+00> : vector<256x8xf32>
      %317 = tpu.matmul %314, %316, %cst_177 {dimension_numbers = #tpu.dot_dimension_numbers<[1], [0], [0], [1], [0, 0, 1, 1], [], []>} : vector<256x3xbf16>, vector<3x8xbf16>, vector<256x8xf32> -> vector<256x8xf32>
      %318 = arith.addf %309, %317 : vector<256x8xf32>
      %c510_i32 = arith.constant 510 : i32
      %319 = arith.addi %2, %c510_i32 : i32
      %c0_178 = arith.constant 0 : index
      %320 = arith.index_cast %319 : i32 to index
      %c0_179 = arith.constant 0 : index
      %321 = vector.load %arg1[%c0_178, %320, %c0_179] : memref<1x7274x3xf32, #tpu.memory_space<vmem>>, vector<1x256x3xf32>
      %322 = vector.shape_cast %321 : vector<1x256x3xf32> to vector<256x3xf32>
      %323 = arith.truncf %322 : vector<256x3xf32> to vector<256x3xbf16>
      %c35 = arith.constant 35 : index
      %c0_180 = arith.constant 0 : index
      %c0_181 = arith.constant 0 : index
      %324 = vector.load %arg2[%c35, %c0_180, %c0_181] : memref<49x3x8xbf16, #tpu.memory_space<vmem>>, vector<1x3x8xbf16>
      %325 = vector.shape_cast %324 : vector<1x3x8xbf16> to vector<3x8xbf16>
      %cst_182 = arith.constant dense<0.000000e+00> : vector<256x8xf32>
      %326 = tpu.matmul %323, %325, %cst_182 {dimension_numbers = #tpu.dot_dimension_numbers<[1], [0], [0], [1], [0, 0, 1, 1], [], []>} : vector<256x3xbf16>, vector<3x8xbf16>, vector<256x8xf32> -> vector<256x8xf32>
      %327 = arith.addf %318, %326 : vector<256x8xf32>
      %c511_i32 = arith.constant 511 : i32
      %328 = arith.addi %2, %c511_i32 : i32
      %c0_183 = arith.constant 0 : index
      %329 = arith.index_cast %328 : i32 to index
      %c0_184 = arith.constant 0 : index
      %330 = vector.load %arg1[%c0_183, %329, %c0_184] : memref<1x7274x3xf32, #tpu.memory_space<vmem>>, vector<1x256x3xf32>
      %331 = vector.shape_cast %330 : vector<1x256x3xf32> to vector<256x3xf32>
      %332 = arith.truncf %331 : vector<256x3xf32> to vector<256x3xbf16>
      %c36 = arith.constant 36 : index
      %c0_185 = arith.constant 0 : index
      %c0_186 = arith.constant 0 : index
      %333 = vector.load %arg2[%c36, %c0_185, %c0_186] : memref<49x3x8xbf16, #tpu.memory_space<vmem>>, vector<1x3x8xbf16>
      %334 = vector.shape_cast %333 : vector<1x3x8xbf16> to vector<3x8xbf16>
      %cst_187 = arith.constant dense<0.000000e+00> : vector<256x8xf32>
      %335 = tpu.matmul %332, %334, %cst_187 {dimension_numbers = #tpu.dot_dimension_numbers<[1], [0], [0], [1], [0, 0, 1, 1], [], []>} : vector<256x3xbf16>, vector<3x8xbf16>, vector<256x8xf32> -> vector<256x8xf32>
      %336 = arith.addf %327, %335 : vector<256x8xf32>
      %c512_i32 = arith.constant 512 : i32
      %337 = arith.addi %2, %c512_i32 : i32
      %c0_188 = arith.constant 0 : index
      %338 = arith.index_cast %337 : i32 to index
      %c0_189 = arith.constant 0 : index
      %339 = vector.load %arg1[%c0_188, %338, %c0_189] : memref<1x7274x3xf32, #tpu.memory_space<vmem>>, vector<1x256x3xf32>
      %340 = vector.shape_cast %339 : vector<1x256x3xf32> to vector<256x3xf32>
      %341 = arith.truncf %340 : vector<256x3xf32> to vector<256x3xbf16>
      %c37 = arith.constant 37 : index
      %c0_190 = arith.constant 0 : index
      %c0_191 = arith.constant 0 : index
      %342 = vector.load %arg2[%c37, %c0_190, %c0_191] : memref<49x3x8xbf16, #tpu.memory_space<vmem>>, vector<1x3x8xbf16>
      %343 = vector.shape_cast %342 : vector<1x3x8xbf16> to vector<3x8xbf16>
      %cst_192 = arith.constant dense<0.000000e+00> : vector<256x8xf32>
      %344 = tpu.matmul %341, %343, %cst_192 {dimension_numbers = #tpu.dot_dimension_numbers<[1], [0], [0], [1], [0, 0, 1, 1], [], []>} : vector<256x3xbf16>, vector<3x8xbf16>, vector<256x8xf32> -> vector<256x8xf32>
      %345 = arith.addf %336, %344 : vector<256x8xf32>
      %c513_i32 = arith.constant 513 : i32
      %346 = arith.addi %2, %c513_i32 : i32
      %c0_193 = arith.constant 0 : index
      %347 = arith.index_cast %346 : i32 to index
      %c0_194 = arith.constant 0 : index
      %348 = vector.load %arg1[%c0_193, %347, %c0_194] : memref<1x7274x3xf32, #tpu.memory_space<vmem>>, vector<1x256x3xf32>
      %349 = vector.shape_cast %348 : vector<1x256x3xf32> to vector<256x3xf32>
      %350 = arith.truncf %349 : vector<256x3xf32> to vector<256x3xbf16>
      %c38 = arith.constant 38 : index
      %c0_195 = arith.constant 0 : index
      %c0_196 = arith.constant 0 : index
      %351 = vector.load %arg2[%c38, %c0_195, %c0_196] : memref<49x3x8xbf16, #tpu.memory_space<vmem>>, vector<1x3x8xbf16>
      %352 = vector.shape_cast %351 : vector<1x3x8xbf16> to vector<3x8xbf16>
      %cst_197 = arith.constant dense<0.000000e+00> : vector<256x8xf32>
      %353 = tpu.matmul %350, %352, %cst_197 {dimension_numbers = #tpu.dot_dimension_numbers<[1], [0], [0], [1], [0, 0, 1, 1], [], []>} : vector<256x3xbf16>, vector<3x8xbf16>, vector<256x8xf32> -> vector<256x8xf32>
      %354 = arith.addf %345, %353 : vector<256x8xf32>
      %c514_i32 = arith.constant 514 : i32
      %355 = arith.addi %2, %c514_i32 : i32
      %c0_198 = arith.constant 0 : index
      %356 = arith.index_cast %355 : i32 to index
      %c0_199 = arith.constant 0 : index
      %357 = vector.load %arg1[%c0_198, %356, %c0_199] : memref<1x7274x3xf32, #tpu.memory_space<vmem>>, vector<1x256x3xf32>
      %358 = vector.shape_cast %357 : vector<1x256x3xf32> to vector<256x3xf32>
      %359 = arith.truncf %358 : vector<256x3xf32> to vector<256x3xbf16>
      %c39 = arith.constant 39 : index
      %c0_200 = arith.constant 0 : index
      %c0_201 = arith.constant 0 : index
      %360 = vector.load %arg2[%c39, %c0_200, %c0_201] : memref<49x3x8xbf16, #tpu.memory_space<vmem>>, vector<1x3x8xbf16>
      %361 = vector.shape_cast %360 : vector<1x3x8xbf16> to vector<3x8xbf16>
      %cst_202 = arith.constant dense<0.000000e+00> : vector<256x8xf32>
      %362 = tpu.matmul %359, %361, %cst_202 {dimension_numbers = #tpu.dot_dimension_numbers<[1], [0], [0], [1], [0, 0, 1, 1], [], []>} : vector<256x3xbf16>, vector<3x8xbf16>, vector<256x8xf32> -> vector<256x8xf32>
      %363 = arith.addf %354, %362 : vector<256x8xf32>
      %c515_i32 = arith.constant 515 : i32
      %364 = arith.addi %2, %c515_i32 : i32
      %c0_203 = arith.constant 0 : index
      %365 = arith.index_cast %364 : i32 to index
      %c0_204 = arith.constant 0 : index
      %366 = vector.load %arg1[%c0_203, %365, %c0_204] : memref<1x7274x3xf32, #tpu.memory_space<vmem>>, vector<1x256x3xf32>
      %367 = vector.shape_cast %366 : vector<1x256x3xf32> to vector<256x3xf32>
      %368 = arith.truncf %367 : vector<256x3xf32> to vector<256x3xbf16>
      %c40 = arith.constant 40 : index
      %c0_205 = arith.constant 0 : index
      %c0_206 = arith.constant 0 : index
      %369 = vector.load %arg2[%c40, %c0_205, %c0_206] : memref<49x3x8xbf16, #tpu.memory_space<vmem>>, vector<1x3x8xbf16>
      %370 = vector.shape_cast %369 : vector<1x3x8xbf16> to vector<3x8xbf16>
      %cst_207 = arith.constant dense<0.000000e+00> : vector<256x8xf32>
      %371 = tpu.matmul %368, %370, %cst_207 {dimension_numbers = #tpu.dot_dimension_numbers<[1], [0], [0], [1], [0, 0, 1, 1], [], []>} : vector<256x3xbf16>, vector<3x8xbf16>, vector<256x8xf32> -> vector<256x8xf32>
      %372 = arith.addf %363, %371 : vector<256x8xf32>
      %c516_i32 = arith.constant 516 : i32
      %373 = arith.addi %2, %c516_i32 : i32
      %c0_208 = arith.constant 0 : index
      %374 = arith.index_cast %373 : i32 to index
      %c0_209 = arith.constant 0 : index
      %375 = vector.load %arg1[%c0_208, %374, %c0_209] : memref<1x7274x3xf32, #tpu.memory_space<vmem>>, vector<1x256x3xf32>
      %376 = vector.shape_cast %375 : vector<1x256x3xf32> to vector<256x3xf32>
      %377 = arith.truncf %376 : vector<256x3xf32> to vector<256x3xbf16>
      %c41 = arith.constant 41 : index
      %c0_210 = arith.constant 0 : index
      %c0_211 = arith.constant 0 : index
      %378 = vector.load %arg2[%c41, %c0_210, %c0_211] : memref<49x3x8xbf16, #tpu.memory_space<vmem>>, vector<1x3x8xbf16>
      %379 = vector.shape_cast %378 : vector<1x3x8xbf16> to vector<3x8xbf16>
      %cst_212 = arith.constant dense<0.000000e+00> : vector<256x8xf32>
      %380 = tpu.matmul %377, %379, %cst_212 {dimension_numbers = #tpu.dot_dimension_numbers<[1], [0], [0], [1], [0, 0, 1, 1], [], []>} : vector<256x3xbf16>, vector<3x8xbf16>, vector<256x8xf32> -> vector<256x8xf32>
      %381 = arith.addf %372, %380 : vector<256x8xf32>
      %c612_i32 = arith.constant 612 : i32
      %382 = arith.addi %2, %c612_i32 : i32
      %c0_213 = arith.constant 0 : index
      %383 = arith.index_cast %382 : i32 to index
      %c0_214 = arith.constant 0 : index
      %384 = vector.load %arg1[%c0_213, %383, %c0_214] : memref<1x7274x3xf32, #tpu.memory_space<vmem>>, vector<1x256x3xf32>
      %385 = vector.shape_cast %384 : vector<1x256x3xf32> to vector<256x3xf32>
      %386 = arith.truncf %385 : vector<256x3xf32> to vector<256x3xbf16>
      %c42 = arith.constant 42 : index
      %c0_215 = arith.constant 0 : index
      %c0_216 = arith.constant 0 : index
      %387 = vector.load %arg2[%c42, %c0_215, %c0_216] : memref<49x3x8xbf16, #tpu.memory_space<vmem>>, vector<1x3x8xbf16>
      %388 = vector.shape_cast %387 : vector<1x3x8xbf16> to vector<3x8xbf16>
      %cst_217 = arith.constant dense<0.000000e+00> : vector<256x8xf32>
      %389 = tpu.matmul %386, %388, %cst_217 {dimension_numbers = #tpu.dot_dimension_numbers<[1], [0], [0], [1], [0, 0, 1, 1], [], []>} : vector<256x3xbf16>, vector<3x8xbf16>, vector<256x8xf32> -> vector<256x8xf32>
      %390 = arith.addf %381, %389 : vector<256x8xf32>
      %c613_i32 = arith.constant 613 : i32
      %391 = arith.addi %2, %c613_i32 : i32
      %c0_218 = arith.constant 0 : index
      %392 = arith.index_cast %391 : i32 to index
      %c0_219 = arith.constant 0 : index
      %393 = vector.load %arg1[%c0_218, %392, %c0_219] : memref<1x7274x3xf32, #tpu.memory_space<vmem>>, vector<1x256x3xf32>
      %394 = vector.shape_cast %393 : vector<1x256x3xf32> to vector<256x3xf32>
      %395 = arith.truncf %394 : vector<256x3xf32> to vector<256x3xbf16>
      %c43 = arith.constant 43 : index
      %c0_220 = arith.constant 0 : index
      %c0_221 = arith.constant 0 : index
      %396 = vector.load %arg2[%c43, %c0_220, %c0_221] : memref<49x3x8xbf16, #tpu.memory_space<vmem>>, vector<1x3x8xbf16>
      %397 = vector.shape_cast %396 : vector<1x3x8xbf16> to vector<3x8xbf16>
      %cst_222 = arith.constant dense<0.000000e+00> : vector<256x8xf32>
      %398 = tpu.matmul %395, %397, %cst_222 {dimension_numbers = #tpu.dot_dimension_numbers<[1], [0], [0], [1], [0, 0, 1, 1], [], []>} : vector<256x3xbf16>, vector<3x8xbf16>, vector<256x8xf32> -> vector<256x8xf32>
      %399 = arith.addf %390, %398 : vector<256x8xf32>
      %c614_i32 = arith.constant 614 : i32
      %400 = arith.addi %2, %c614_i32 : i32
      %c0_223 = arith.constant 0 : index
      %401 = arith.index_cast %400 : i32 to index
      %c0_224 = arith.constant 0 : index
      %402 = vector.load %arg1[%c0_223, %401, %c0_224] : memref<1x7274x3xf32, #tpu.memory_space<vmem>>, vector<1x256x3xf32>
      %403 = vector.shape_cast %402 : vector<1x256x3xf32> to vector<256x3xf32>
      %404 = arith.truncf %403 : vector<256x3xf32> to vector<256x3xbf16>
      %c44 = arith.constant 44 : index
      %c0_225 = arith.constant 0 : index
      %c0_226 = arith.constant 0 : index
      %405 = vector.load %arg2[%c44, %c0_225, %c0_226] : memref<49x3x8xbf16, #tpu.memory_space<vmem>>, vector<1x3x8xbf16>
      %406 = vector.shape_cast %405 : vector<1x3x8xbf16> to vector<3x8xbf16>
      %cst_227 = arith.constant dense<0.000000e+00> : vector<256x8xf32>
      %407 = tpu.matmul %404, %406, %cst_227 {dimension_numbers = #tpu.dot_dimension_numbers<[1], [0], [0], [1], [0, 0, 1, 1], [], []>} : vector<256x3xbf16>, vector<3x8xbf16>, vector<256x8xf32> -> vector<256x8xf32>
      %408 = arith.addf %399, %407 : vector<256x8xf32>
      %c615_i32 = arith.constant 615 : i32
      %409 = arith.addi %2, %c615_i32 : i32
      %c0_228 = arith.constant 0 : index
      %410 = arith.index_cast %409 : i32 to index
      %c0_229 = arith.constant 0 : index
      %411 = vector.load %arg1[%c0_228, %410, %c0_229] : memref<1x7274x3xf32, #tpu.memory_space<vmem>>, vector<1x256x3xf32>
      %412 = vector.shape_cast %411 : vector<1x256x3xf32> to vector<256x3xf32>
      %413 = arith.truncf %412 : vector<256x3xf32> to vector<256x3xbf16>
      %c45 = arith.constant 45 : index
      %c0_230 = arith.constant 0 : index
      %c0_231 = arith.constant 0 : index
      %414 = vector.load %arg2[%c45, %c0_230, %c0_231] : memref<49x3x8xbf16, #tpu.memory_space<vmem>>, vector<1x3x8xbf16>
      %415 = vector.shape_cast %414 : vector<1x3x8xbf16> to vector<3x8xbf16>
      %cst_232 = arith.constant dense<0.000000e+00> : vector<256x8xf32>
      %416 = tpu.matmul %413, %415, %cst_232 {dimension_numbers = #tpu.dot_dimension_numbers<[1], [0], [0], [1], [0, 0, 1, 1], [], []>} : vector<256x3xbf16>, vector<3x8xbf16>, vector<256x8xf32> -> vector<256x8xf32>
      %417 = arith.addf %408, %416 : vector<256x8xf32>
      %c616_i32 = arith.constant 616 : i32
      %418 = arith.addi %2, %c616_i32 : i32
      %c0_233 = arith.constant 0 : index
      %419 = arith.index_cast %418 : i32 to index
      %c0_234 = arith.constant 0 : index
      %420 = vector.load %arg1[%c0_233, %419, %c0_234] : memref<1x7274x3xf32, #tpu.memory_space<vmem>>, vector<1x256x3xf32>
      %421 = vector.shape_cast %420 : vector<1x256x3xf32> to vector<256x3xf32>
      %422 = arith.truncf %421 : vector<256x3xf32> to vector<256x3xbf16>
      %c46 = arith.constant 46 : index
      %c0_235 = arith.constant 0 : index
      %c0_236 = arith.constant 0 : index
      %423 = vector.load %arg2[%c46, %c0_235, %c0_236] : memref<49x3x8xbf16, #tpu.memory_space<vmem>>, vector<1x3x8xbf16>
      %424 = vector.shape_cast %423 : vector<1x3x8xbf16> to vector<3x8xbf16>
      %cst_237 = arith.constant dense<0.000000e+00> : vector<256x8xf32>
      %425 = tpu.matmul %422, %424, %cst_237 {dimension_numbers = #tpu.dot_dimension_numbers<[1], [0], [0], [1], [0, 0, 1, 1], [], []>} : vector<256x3xbf16>, vector<3x8xbf16>, vector<256x8xf32> -> vector<256x8xf32>
      %426 = arith.addf %417, %425 : vector<256x8xf32>
      %c617_i32 = arith.constant 617 : i32
      %427 = arith.addi %2, %c617_i32 : i32
      %c0_238 = arith.constant 0 : index
      %428 = arith.index_cast %427 : i32 to index
      %c0_239 = arith.constant 0 : index
      %429 = vector.load %arg1[%c0_238, %428, %c0_239] : memref<1x7274x3xf32, #tpu.memory_space<vmem>>, vector<1x256x3xf32>
      %430 = vector.shape_cast %429 : vector<1x256x3xf32> to vector<256x3xf32>
      %431 = arith.truncf %430 : vector<256x3xf32> to vector<256x3xbf16>
      %c47 = arith.constant 47 : index
      %c0_240 = arith.constant 0 : index
      %c0_241 = arith.constant 0 : index
      %432 = vector.load %arg2[%c47, %c0_240, %c0_241] : memref<49x3x8xbf16, #tpu.memory_space<vmem>>, vector<1x3x8xbf16>
      %433 = vector.shape_cast %432 : vector<1x3x8xbf16> to vector<3x8xbf16>
      %cst_242 = arith.constant dense<0.000000e+00> : vector<256x8xf32>
      %434 = tpu.matmul %431, %433, %cst_242 {dimension_numbers = #tpu.dot_dimension_numbers<[1], [0], [0], [1], [0, 0, 1, 1], [], []>} : vector<256x3xbf16>, vector<3x8xbf16>, vector<256x8xf32> -> vector<256x8xf32>
      %435 = arith.addf %426, %434 : vector<256x8xf32>
      %c618_i32 = arith.constant 618 : i32
      %436 = arith.addi %2, %c618_i32 : i32
      %c0_243 = arith.constant 0 : index
      %437 = arith.index_cast %436 : i32 to index
      %c0_244 = arith.constant 0 : index
      %438 = vector.load %arg1[%c0_243, %437, %c0_244] : memref<1x7274x3xf32, #tpu.memory_space<vmem>>, vector<1x256x3xf32>
      %439 = vector.shape_cast %438 : vector<1x256x3xf32> to vector<256x3xf32>
      %440 = arith.truncf %439 : vector<256x3xf32> to vector<256x3xbf16>
      %c48 = arith.constant 48 : index
      %c0_245 = arith.constant 0 : index
      %c0_246 = arith.constant 0 : index
      %441 = vector.load %arg2[%c48, %c0_245, %c0_246] : memref<49x3x8xbf16, #tpu.memory_space<vmem>>, vector<1x3x8xbf16>
      %442 = vector.shape_cast %441 : vector<1x3x8xbf16> to vector<3x8xbf16>
      %cst_247 = arith.constant dense<0.000000e+00> : vector<256x8xf32>
      %443 = tpu.matmul %440, %442, %cst_247 {dimension_numbers = #tpu.dot_dimension_numbers<[1], [0], [0], [1], [0, 0, 1, 1], [], []>} : vector<256x3xbf16>, vector<3x8xbf16>, vector<256x8xf32> -> vector<256x8xf32>
      %444 = arith.addf %435, %443 : vector<256x8xf32>
      %c0_248 = arith.constant 0 : index
      %c0_249 = arith.constant 0 : index
      %445 = vector.load %arg3[%c0_248, %c0_249] : memref<1x8xf32, #tpu.memory_space<vmem>>, vector<1x8xf32>
      %446 = vector.broadcast %445 : vector<1x8xf32> to vector<256x8xf32>
      %447 = arith.addf %444, %446 : vector<256x8xf32>
      %cst_250 = arith.constant 0.000000e+00 : f32
      %448 = vector.broadcast %cst_250 : f32 to vector<256x8xf32>
      %449 = arith.maximumf %447, %448 : vector<256x8xf32>
      %c0_251 = arith.constant 0 : index
      %450 = arith.index_cast %2 : i32 to index
      %c0_252 = arith.constant 0 : index
      %451 = vector.load %arg4[%c0_251, %450, %c0_252] : memref<1x6656x8xf32, #tpu.memory_space<vmem>>, vector<1x256x8xf32>
      %452 = vector.shape_cast %451 : vector<1x256x8xf32> to vector<256x8xf32>
      %453 = vector.shape_cast %449 : vector<256x8xf32> to vector<1x256x8xf32>
      tpu.vector_store %arg4[%c0_251, %450, %c0_252], %453 {strides = array<i32>} : memref<1x6656x8xf32, #tpu.memory_space<vmem>>, vector<1x256x8xf32>,
    }
    %c26_i32_0 = arith.constant 26 : i32
    return
  }
  func.func @transform_0(%arg0: i32) -> (i32, i32, i32) {
    %c0_i32 = arith.constant 0 : i32
    %c0_i32_0 = arith.constant 0 : i32
    %c0_i32_1 = arith.constant 0 : i32
    return %arg0, %c0_i32, %c0_i32_0 : i32, i32, i32
  }
  func.func @transform_1(%arg0: i32) -> (i32, i32, i32) {
    %c0_i32 = arith.constant 0 : i32
    %c0_i32_0 = arith.constant 0 : i32
    %c0_i32_1 = arith.constant 0 : i32
    %c0_i32_2 = arith.constant 0 : i32
    return %c0_i32, %c0_i32_0, %c0_i32_1 : i32, i32, i32
  }
  func.func @transform_2(%arg0: i32) -> (i32, i32) {
    %c0_i32 = arith.constant 0 : i32
    %c0_i32_0 = arith.constant 0 : i32
    %c0_i32_1 = arith.constant 0 : i32
    return %c0_i32, %c0_i32_0 : i32, i32
  }
  func.func @transform_3(%arg0: i32) -> (i32, i32, i32) {
    %c0_i32 = arith.constant 0 : i32
    %c0_i32_0 = arith.constant 0 : i32
    %c0_i32_1 = arith.constant 0 : i32
    return %arg0, %c0_i32, %c0_i32_0 : i32, i32, i32
  }
}

</mosaic_0001>

<bundles_post_ra>
// kernel: tpu_custom_call.1
= control target key start
LH: loop header
LB: loop body
LE: loop exit
PB: predicated region body
PF: predicated region fallthrough
CT: control target
= control target key end

     0   :  { %s19919_s12 = smov 0   ;;  %s25308_s0 = inlined_call_operand.vmem [shape: f32[2,7274,3], index: 0, kind: input, shape index: {}]   ;;  %s25309_s1 = inlined_call_operand.vmem [shape: bf16[49,3,8], index: 1, kind: input, shape index: {}]   ;;  %s25310_s2 = inlined_call_operand.vmem [shape: f32[1,8], index: 2, kind: input, shape index: {}]   ;;  %s25311_s3 = inlined_call_operand.vmem [shape: f32[2,6656,8], index: 3, kind: output, shape index: {}]  }
   0x1 LB: > { %s14935_s13 = sadd.s32 4294967295, %s19892_s12   ;;  %p14939_p0 = scmp.ge.s32.totalorder %s19892_s12, 1  ;;  %s19892_s12 = sphi %s19919_s12, %s13_s12  }
   0x2   : > { %p137_p1 = scmp.lt.s32.totalorder %s19892_s12, 3 }
   0x4   : > { %p138_p2 = pnand %p14939_p0, %p137_p1 }
   0x5   : > { %p161_p3 = scmp.lt.s32.totalorder (!%p138_p2), %s14935_s13, 1  ;;  %s19937_s22 = smov (!%p138_p2), 0  }
   0x6   : > { %141 = sbr.rel (%p138_p2) target bundleno = 1793 (0x701), region = 32 }
   0xb   : > { %s25399_s13 = smov (!%p161_p3, %s14935_s13), 1 }
   0xc   : > { %s19863_s14 = smul.u32 7280, %s25399_s13 }
   0xd   : > { %s19864_s15 = smul.u32 6656, %s25399_s13 }
   0xe   : > { %s19930_s18 = scalar_lea.vmem %s25308_s0, %s19863_s14 }
   0xf   : > { %s19935_s21 = scalar_lea.vmem %s25311_s3, %s19864_s15 }
  0x10 LB: >> { %v14976_v0 = vld [vmem:[%s25309_s1 + $0x2] sm:$0x3]  ;;  %vm330_vm0 = vcmask 1040384   ;;  %vm331_vm1 = vcmask 1041408   ;;  %v19898_v1 = vmov 65535   ;;  %s14942_s29 = sshll.u32 %s19896_s22, 8  ;;  %s19896_s22 = sphi %s19937_s22, %s177_s22  }
  0x11   : >> { %v332_v2 = vsel %vm330_vm0, 4294967295, %v19898_v1  ;;  %v228_v3 = vld [vmem:[%s25309_s1] sm:$0x3]  ;;  %v15042_v4 = vld [vmem:[%s25309_s1 + $0x4] sm:$0x3]  ;;  %s19958_s30 = scalar_lea.vmem %s19930_s18, %s14942_s29  ;;  %vm281_vm2 = vcmask 23552   ;;  %s25128_s14 = scalar_lea.vmem %s19935_s21, %s14942_s29 }
  0x12   : >> { %v19951_v5 = vsel %vm331_vm1, %v332_v2, 0  ;;  %v15092_v8 = vld [vmem:[%s25309_s1 + $0x6] sm:$0x3]  ;;  %v15142_v9 = vld [vmem:[%s25309_s1 + $0x8] sm:$0x3]  ;;  %v14946_v16 = vld [vmem:[%s19958_s30 + $0x11] sm:$0xff] }
  0x13   : >> { %v335_v6 = vand.u32 %v14976_v0, %v19951_v5  ;;  %v547_v7 = vand.u32 %v19951_v5, %v228_v3  ;;  %v14944_v10 = vld [vmem:[%s19958_s30 + $0x1] sm:$0xff]  ;;  %v14945_v11 = vld [vmem:[%s19958_s30 + $0x9] sm:$0xff]  ;;  %v811_v13 = vand.u32 %v15042_v4, %v19951_v5  ;;  %v14947_v17 = vld [vmem:[%s19958_s30 + $0x19] sm:$0xff]  ;;  %v19982_v27 = vand.u32 %v15092_v8, %v19951_v5  ;;  %s177_s22 = sadd.s32 1, %s19896_s22  }
  0x14   : >> { %v14960_v12 = vld [vmem:[%s19958_s30 + $0x81] sm:$0xff]  ;;  %v263_v14 = vpack.c.bf16 %v14945_v11, %v14944_v10  ;;  %v14961_v15 = vld [vmem:[%s19958_s30 + $0x89] sm:$0xff]  ;;  %v264_v19 = vpack.c.bf16 %v14947_v17, %v14946_v16  ;;  %v14962_v20 = vld [vmem:[%s19958_s30 + $0x91] sm:$0xff]  ;;  %v19986_v30 = vand.u32 %v15142_v9, %v19951_v5  ;;  %vm14694_vm3 = vcmask 64512   ;;  %p174_p4 = scmp.ge.s32.totalorder %s177_s22, 26  }
  0x15   : >> { %18195 = vmatprep.subr.bf16.mxu0 %v335_v6  ;;  %19861 = vmatprep.subr.bf16.mxu1 %v335_v6  ;;  %v271_v18 = vpack.c.bf16 %v14961_v15, %v14960_v12  ;;  %v14963_v21 = vld [vmem:[%s19958_s30 + $0x99] sm:$0xff]  ;;  %v14948_v22 = vld [vmem:[%s19958_s30 + $0x21] sm:$0xff]  ;;  %v14949_v24 = vld [vmem:[%s19958_s30 + $0x29] sm:$0xff] }
  0x16   : >> { %18196 = vmatpush3.bf16.msra.mxu0 %v335_v6  ;;  %19862 = vmatpush3.bf16.msra.mxu1 %v335_v6  ;;  %v272_v23 = vpack.c.bf16 %v14963_v21, %v14962_v20  ;;  %v14964_v25 = vld [vmem:[%s19958_s30 + $0xa1] sm:$0xff]  ;;  %v14965_v26 = vld [vmem:[%s19958_s30 + $0xa9] sm:$0xff]  ;;  %v265_v28 = vpack.c.bf16 %v14949_v24, %v14948_v22  ;;  %v14950_v31 = vld [vmem:[%s19958_s30 + $0x31] sm:$0xff] }
  0x17   : >> { %18197 = vmatprep.mubr.msk.bf16.mxu0 %vm281_vm2, %v263_v14  ;;  %18229 = vmatprep.subr.bf16.mxu1 %v547_v7  ;;  %v273_v29 = vpack.c.bf16 %v14965_v26, %v14964_v25  ;;  %v14951_v32 = vld [vmem:[%s19958_s30 + $0x39] sm:$0xff]  ;;  %v14966_v33 = vld [vmem:[%s19958_s30 + $0xb1] sm:$0xff]  ;;  %v14952_v35 = vld [vmem:[%s19958_s30 + $0x41] sm:$0xff] }
  0x18   : >> { %18213 = vmatprep.mubr.msk.bf16.mxu1 %vm281_vm2, %v271_v18  ;;  %18263 = vmatprep.subr.bf16.mxu0 %v811_v13  ;;  %v14967_v34 = vld [vmem:[%s19958_s30 + $0xb9] sm:$0xff]  ;;  %v14953_v36 = vld [vmem:[%s19958_s30 + $0x49] sm:$0xff]  ;;  %v14968_v37 = vld [vmem:[%s19958_s30 + $0xc1] sm:$0xff]  ;;  %v266_v39 = vpack.c.bf16 %v14951_v32, %v14950_v31 }
  0x19   : >> { %18198 = vmatmul.mubr.msk.bf16.vlgmr.msra.gmra.mxu0 %vm281_vm2, %v264_v19  ;;  %18214 = vmatmul.mubr.msk.bf16.vlgmr.msra.gmra.mxu1 %vm281_vm2, %v272_v23  ;;  %v14969_v38 = vld [vmem:[%s19958_s30 + $0xc9] sm:$0xff]  ;;  %v274_v40 = vpack.c.bf16 %v14967_v34, %v14966_v33  ;;  %v267_v41 = vpack.c.bf16 %v14953_v36, %v14952_v35  ;;  %v14954_v43 = vld [vmem:[%s19958_s30 + $0x51] sm:$0xff]  ;;  %v14955_v44 = vld [vmem:[%s19958_s30 + $0x59] sm:$0xff] }
  0x1a   : >> { %18230 = vmatpush3.bf16.msra.mxu1 %v547_v7  ;;  %18264 = vmatpush3.bf16.msra.mxu0 %v811_v13  ;;  %v275_v42 = vpack.c.bf16 %v14969_v38, %v14968_v37  ;;  %v14970_v45 = vld [vmem:[%s19958_s30 + $0xd1] sm:$0xff]  ;;  %v14971_v46 = vld [vmem:[%s19958_s30 + $0xd9] sm:$0xff]  ;;  %v14956_v47 = vld [vmem:[%s19958_s30 + $0x61] sm:$0xff]  ;;  %v268_v51 = vpack.c.bf16 %v14955_v44, %v14954_v43 }
  0x1b   : >> { %18201 = vmatprep.mubr.msk.bf16.mxu0 %vm281_vm2, %v265_v28  ;;  %18217 = vmatprep.mubr.msk.bf16.mxu1 %vm281_vm2, %v273_v29  ;;  %v14957_v48 = vld [vmem:[%s19958_s30 + $0x69] sm:$0xff]  ;;  %v14972_v49 = vld [vmem:[%s19958_s30 + $0xe1] sm:$0xff]  ;;  %v276_v52 = vpack.c.bf16 %v14971_v46, %v14970_v45  ;;  %v14958_v55 = vld [vmem:[%s19958_s30 + $0x71] sm:$0xff] }
  0x1c   : >> { %18297 = vmatprep.subr.bf16.mxu1 %v19982_v27  ;;  %18331 = vmatprep.subr.bf16.mxu0 %v19986_v30  ;;  %v14973_v50 = vld [vmem:[%s19958_s30 + $0xe9] sm:$0xff]  ;;  %v269_v53 = vpack.c.bf16 %v14957_v48, %v14956_v47  ;;  %v14959_v56 = vld [vmem:[%s19958_s30 + $0x79] sm:$0xff]  ;;  %v14974_v57 = vld [vmem:[%s19958_s30 + $0xf1] sm:$0xff] }
  0x1d   : >> { %v277_v54 = vpack.c.bf16 %v14973_v50, %v14972_v49  ;;  %v14975_v58 = vld [vmem:[%s19958_s30 + $0xf9] sm:$0xff]  ;;  %v181_v60 = vld [vmem:[%s19958_s30 + $0x8] sm:$0xff]  ;;  %v270_v63 = vpack.c.bf16 %v14959_v56, %v14958_v55  ;;  %v182_v3 = vld [vmem:[%s19958_s30 + $0x10] sm:$0xff] }
  0x1e   : >> { %v180_v59 = vld [vmem:[%s19958_s30] sm:$0xff]  ;;  %v15011_v62 = vld [vmem:[%s19958_s30 + $0xa] sm:$0xff]  ;;  %v278_v0 = vpack.c.bf16 %v14975_v58, %v14974_v57  ;;  %v183_v4 = vld [vmem:[%s19958_s30 + $0x18] sm:$0xff] }
  0x1f   : >> { %v15010_v61 = vld [vmem:[%s19958_s30 + $0x2] sm:$0xff]  ;;  %v212_v1 = vpack.c.bf16 %v181_v60, %v180_v59  ;;  %v15012_v6 = vld [vmem:[%s19958_s30 + $0x12] sm:$0xff]  ;;  %v15013_v7 = vld [vmem:[%s19958_s30 + $0x1a] sm:$0xff]  ;;  %v213_v12 = vpack.c.bf16 %v183_v4, %v182_v3 }
  0x20   : >> { %v744_v2 = vpack.c.bf16 %v15011_v62, %v15010_v61  ;;  %v184_v8 = vld [vmem:[%s19958_s30 + $0x20] sm:$0xff]  ;;  %v185_v9 = vld [vmem:[%s19958_s30 + $0x28] sm:$0xff]  ;;  %v745_v13 = vpack.c.bf16 %v15013_v7, %v15012_v6  ;;  %v186_v20 = vld [vmem:[%s19958_s30 + $0x30] sm:$0xff] }
  0x21   : >> { %18202 = vmatmul.mubr.msk.bf16.gmra.mxu0 %vm281_vm2, %v266_v39  ;;  %18218 = vmatmul.mubr.msk.bf16.gmra.mxu1 %vm281_vm2, %v274_v40  ;;  %v15014_v10 = vld [vmem:[%s19958_s30 + $0x22] sm:$0xff]  ;;  %v15015_v11 = vld [vmem:[%s19958_s30 + $0x2a] sm:$0xff]  ;;  %v214_v16 = vpack.c.bf16 %v185_v9, %v184_v8  ;;  %v187_v21 = vld [vmem:[%s19958_s30 + $0x38] sm:$0xff] }
  0x22   : >> { %18205 = vmatprep.mubr.msk.bf16.mxu0 %vm281_vm2, %v267_v41  ;;  %18221 = vmatprep.mubr.msk.bf16.mxu1 %vm281_vm2, %v275_v42  ;;  %v15192_v14 = vld [vmem:[%s25309_s1 + $0xa] sm:$0x3]  ;;  %v15242_v15 = vld [vmem:[%s25309_s1 + $0xc] sm:$0x3]  ;;  %v746_v17 = vpack.c.bf16 %v15015_v11, %v15014_v10  ;;  %v15016_v22 = vld [vmem:[%s19958_s30 + $0x32] sm:$0xff] }
  0x23   : >> { %v20045_v18 = vand.u32 %v15192_v14, %v19951_v5  ;;  %v20048_v19 = vand.u32 %v15242_v15, %v19951_v5  ;;  %v15017_v23 = vld [vmem:[%s19958_s30 + $0x3a] sm:$0xff]  ;;  %v189_v25 = vld [vmem:[%s19958_s30 + $0x48] sm:$0xff]  ;;  %v190_v32 = vld [vmem:[%s19958_s30 + $0x50] sm:$0xff] }
  0x24   : >> { %v188_v24 = vld [vmem:[%s19958_s30 + $0x40] sm:$0xff]  ;;  %v15019_v28 = vld [vmem:[%s19958_s30 + $0x4a] sm:$0xff]  ;;  %v747_v29 = vpack.c.bf16 %v15017_v23, %v15016_v22  ;;  %v191_v33 = vld [vmem:[%s19958_s30 + $0x58] sm:$0xff] }
  0x25   : >> { %v15018_v26 = vld [vmem:[%s19958_s30 + $0x42] sm:$0xff]  ;;  %v15020_v34 = vld [vmem:[%s19958_s30 + $0x52] sm:$0xff]  ;;  %v15021_v35 = vld [vmem:[%s19958_s30 + $0x5a] sm:$0xff]  ;;  %v217_v40 = vpack.c.bf16 %v191_v33, %v190_v32 }
  0x26   : >> { %v748_v31 = vpack.c.bf16 %v15019_v28, %v15018_v26  ;;  %v192_v36 = vld [vmem:[%s19958_s30 + $0x60] sm:$0xff]  ;;  %v193_v37 = vld [vmem:[%s19958_s30 + $0x68] sm:$0xff]  ;;  %v749_v41 = vpack.c.bf16 %v15021_v35, %v15020_v34  ;;  %v194_v44 = vld [vmem:[%s19958_s30 + $0x70] sm:$0xff] }
  0x27   : >> { %v15022_v38 = vld [vmem:[%s19958_s30 + $0x62] sm:$0xff]  ;;  %v15023_v39 = vld [vmem:[%s19958_s30 + $0x6a] sm:$0xff]  ;;  %v218_v42 = vpack.c.bf16 %v193_v37, %v192_v36  ;;  %v195_v45 = vld [vmem:[%s19958_s30 + $0x78] sm:$0xff] }
  0x28   : >> { %v750_v43 = vpack.c.bf16 %v15023_v39, %v15022_v38  ;;  %v15024_v46 = vld [vmem:[%s19958_s30 + $0x72] sm:$0xff]  ;;  %v15025_v47 = vld [vmem:[%s19958_s30 + $0x7a] sm:$0xff]  ;;  %v197_v49 = vld [vmem:[%s19958_s30 + $0x88] sm:$0xff] }
  0x29   : >> { %18206 = vmatmul.mubr.msk.bf16.gmra.mxu0 %vm281_vm2, %v268_v51  ;;  %18222 = vmatmul.mubr.msk.bf16.gmra.mxu1 %vm281_vm2, %v276_v52  ;;  %v196_v48 = vld [vmem:[%s19958_s30 + $0x80] sm:$0xff]  ;;  %v15027_v51 = vld [vmem:[%s19958_s30 + $0x8a] sm:$0xff]  ;;  %v219_v52 = vpack.c.bf16 %v195_v45, %v194_v44  ;;  %v199_v57 = vld [vmem:[%s19958_s30 + $0x98] sm:$0xff] }
  0x2a   : >> { %18209 = vmatprep.mubr.msk.bf16.mxu0 %vm281_vm2, %v269_v53  ;;  %18225 = vmatprep.mubr.msk.bf16.mxu1 %vm281_vm2, %v277_v54  ;;  %v15026_v50 = vld [vmem:[%s19958_s30 + $0x82] sm:$0xff]  ;;  %v751_v53 = vpack.c.bf16 %v15025_v47, %v15024_v46  ;;  %v220_v54 = vpack.c.bf16 %v197_v49, %v196_v48  ;;  %v198_v56 = vld [vmem:[%s19958_s30 + $0x90] sm:$0xff]  ;;  %v15029_v59 = vld [vmem:[%s19958_s30 + $0x9a] sm:$0xff] }
  0x2b   : >> { %v752_v55 = vpack.c.bf16 %v15027_v51, %v15026_v50  ;;  %v15028_v58 = vld [vmem:[%s19958_s30 + $0x92] sm:$0xff]  ;;  %v200_v60 = vld [vmem:[%s19958_s30 + $0xa0] sm:$0xff]  ;;  %v201_v61 = vld [vmem:[%s19958_s30 + $0xa8] sm:$0xff] }
  0x2c   : >> { %v15030_v62 = vld [vmem:[%s19958_s30 + $0xa2] sm:$0xff]  ;;  %v202_v4 = vld [vmem:[%s19958_s30 + $0xb0] sm:$0xff]  ;;  %v203_v6 = vld [vmem:[%s19958_s30 + $0xb8] sm:$0xff] }
  0x2d   : >> { %v15032_v7 = vld [vmem:[%s19958_s30 + $0xb2] sm:$0xff]  ;;  %v15033_v8 = vld [vmem:[%s19958_s30 + $0xba] sm:$0xff]  ;;  %v205_v10 = vld [vmem:[%s19958_s30 + $0xc8] sm:$0xff] }
  0x2e   : >> { %v204_v9 = vld [vmem:[%s19958_s30 + $0xc0] sm:$0xff]  ;;  %v755_v14 = vpack.c.bf16 %v15033_v8, %v15032_v7  ;;  %v15039_v26 = vld [vmem:[%s19958_s30 + $0xea] sm:$0xff]  ;;  %v211_v32 = vld [vmem:[%s19958_s30 + $0xf8] sm:$0xff] }
  0x2f   : >> { %v15034_v11 = vld [vmem:[%s19958_s30 + $0xc2] sm:$0xff]  ;;  %v224_v15 = vpack.c.bf16 %v205_v10, %v204_v9  ;;  %v15037_v22 = vld [vmem:[%s19958_s30 + $0xda] sm:$0xff]  ;;  %v15040_v33 = vld [vmem:[%s19958_s30 + $0xf2] sm:$0xff] }
  0x30   : >> { %v208_v23 = vld [vmem:[%s19958_s30 + $0xe0] sm:$0xff]  ;;  %v15061_v36 = vld [vmem:[%s19958_s30 + $0xb] sm:$0xff]  ;;  %v15112_v45 = vld [vmem:[%s19958_s30 + $0x14] sm:$0xff] }
  0x31   : >> { %18210 = vmatmul.mubr.msk.bf16.gmra.mxu0 %vm281_vm2, %v270_v63  ;;  %18226 = vmatmul.mubr.msk.bf16.gmra.mxu1 %vm281_vm2, %v278_v0  ;;  %v15031_v63 = vld [vmem:[%s19958_s30 + $0xaa] sm:$0xff]  ;;  %v221_v0 = vpack.c.bf16 %v199_v57, %v198_v56  ;;  %v15041_v34 = vld [vmem:[%s19958_s30 + $0xfa] sm:$0xff] }
  0x32   : >> { %18231 = vmatprep.mubr.msk.bf16.mxu1 %vm281_vm2, %v212_v1  ;;  %18265 = vmatprep.mubr.msk.bf16.mxu0 %vm281_vm2, %v744_v2  ;;  %v753_v1 = vpack.c.bf16 %v15029_v59, %v15028_v58  ;;  %v222_v2 = vpack.c.bf16 %v201_v61, %v200_v60  ;;  %v754_v3 = vpack.c.bf16 %v15031_v63, %v15030_v62  ;;  %v15060_v35 = vld [vmem:[%s19958_s30 + $0x3] sm:$0xff]  ;;  %v15111_v38 = vld [vmem:[%s19958_s30 + $0xc] sm:$0xff]  ;;  %v15063_v44 = vld [vmem:[%s19958_s30 + $0x1b] sm:$0xff] }
  0x33   : >> { %v15110_v37 = vld [vmem:[%s19958_s30 + $0x4] sm:$0xff]  ;;  %v15113_v46 = vld [vmem:[%s19958_s30 + $0x1c] sm:$0xff]  ;;  %v15115_v50 = vld [vmem:[%s19958_s30 + $0x2c] sm:$0xff] }
  0x34   : >> { %v15064_v47 = vld [vmem:[%s19958_s30 + $0x23] sm:$0xff]  ;;  %v15065_v48 = vld [vmem:[%s19958_s30 + $0x2b] sm:$0xff]  ;;  %v15066_v59 = vld [vmem:[%s19958_s30 + $0x33] sm:$0xff] }
  0x35   : >> { %v15114_v49 = vld [vmem:[%s19958_s30 + $0x24] sm:$0xff]  ;;  %v15067_v60 = vld [vmem:[%s19958_s30 + $0x3b] sm:$0xff] }
  0x36   : >> { %v1338_v56 = vpack.c.bf16 %v15115_v50, %v15114_v49  ;;  %v15116_v61 = vld [vmem:[%s19958_s30 + $0x34] sm:$0xff]  ;;  %v15117_v62 = vld [vmem:[%s19958_s30 + $0x3c] sm:$0xff]  ;;  %v15085_v49 = vld [vmem:[%s19958_s30 + $0xcb] sm:$0xff] }
  0x37   : >> { %v15068_v63 = vld [vmem:[%s19958_s30 + $0x43] sm:$0xff]  ;;  %v15071_v7 = vld [vmem:[%s19958_s30 + $0x5b] sm:$0xff] }
  0x38   : >> { %v15120_v8 = vld [vmem:[%s19958_s30 + $0x54] sm:$0xff]  ;;  %v15121_v9 = vld [vmem:[%s19958_s30 + $0x5c] sm:$0xff]  ;;  %v15134_v50 = vld [vmem:[%s19958_s30 + $0xc4] sm:$0xff] }
  0x39   : >> { %18232 = vmatmul.mubr.msk.bf16.vlgmr.msra.gmra.mxu1 %vm281_vm2, %v213_v12  ;;  %18266 = vmatmul.mubr.msk.bf16.vlgmr.msra.gmra.mxu0 %vm281_vm2, %v745_v13  ;;  %v15035_v12 = vld [vmem:[%s19958_s30 + $0xca] sm:$0xff]  ;;  %v223_v13 = vpack.c.bf16 %v203_v6, %v202_v4  ;;  %v15070_v6 = vld [vmem:[%s19958_s30 + $0x53] sm:$0xff] }
  0x3a   : >> { %18298 = vmatpush3.bf16.msra.mxu1 %v19982_v27  ;;  %18332 = vmatpush3.bf16.msra.mxu0 %v19986_v30  ;;  %v215_v27 = vpack.c.bf16 %v187_v21, %v186_v20  ;;  %v216_v30 = vpack.c.bf16 %v189_v25, %v188_v24  ;;  %v207_v20 = vld [vmem:[%s19958_s30 + $0xd8] sm:$0xff]  ;;  %v209_v24 = vld [vmem:[%s19958_s30 + $0xe8] sm:$0xff] }
  0x3b   : >> { %18235 = vmatprep.mubr.msk.bf16.mxu1 %vm281_vm2, %v214_v16  ;;  %18269 = vmatprep.mubr.msk.bf16.mxu0 %vm281_vm2, %v746_v17  ;;  %v756_v16 = vpack.c.bf16 %v15035_v12, %v15034_v11  ;;  %v206_v17 = vld [vmem:[%s19958_s30 + $0xd0] sm:$0xff]  ;;  %v15038_v25 = vld [vmem:[%s19958_s30 + $0xe2] sm:$0xff] }
  0x3c   : >> { %18365 = vmatprep.subr.bf16.mxu1 %v20045_v18  ;;  %18399 = vmatprep.subr.bf16.mxu0 %v20048_v19  ;;  %v15036_v21 = vld [vmem:[%s19958_s30 + $0xd2] sm:$0xff]  ;;  %v225_v28 = vpack.c.bf16 %v207_v20, %v206_v17  ;;  %v15072_v10 = vld [vmem:[%s19958_s30 + $0x63] sm:$0xff] }
  0x3d   : >> { %v15073_v11 = vld [vmem:[%s19958_s30 + $0x6b] sm:$0xff]  ;;  %v15074_v20 = vld [vmem:[%s19958_s30 + $0x73] sm:$0xff] }
  0x3e   : >> { %v15122_v12 = vld [vmem:[%s19958_s30 + $0x64] sm:$0xff] }
  0x41   : >> { %18236 = vmatmul.mubr.msk.bf16.gmra.mxu1 %vm281_vm2, %v215_v27  ;;  %18270 = vmatmul.mubr.msk.bf16.gmra.mxu0 %vm281_vm2, %v747_v29  ;;  %v757_v27 = vpack.c.bf16 %v15037_v22, %v15036_v21  ;;  %v226_v29 = vpack.c.bf16 %v209_v24, %v208_v23  ;;  %v15075_v21 = vld [vmem:[%s19958_s30 + $0x7b] sm:$0xff]  ;;  %v15076_v24 = vld [vmem:[%s19958_s30 + $0x83] sm:$0xff] }
  0x42   : >> { %18239 = vmatprep.mubr.msk.bf16.mxu1 %vm281_vm2, %v216_v30  ;;  %18273 = vmatprep.mubr.msk.bf16.mxu0 %vm281_vm2, %v748_v31  ;;  %v758_v30 = vpack.c.bf16 %v15039_v26, %v15038_v25  ;;  %v210_v31 = vld [vmem:[%s19958_s30 + $0xf0] sm:$0xff]  ;;  %v15125_v23 = vld [vmem:[%s19958_s30 + $0x7c] sm:$0xff]  ;;  %v15126_v26 = vld [vmem:[%s19958_s30 + $0x84] sm:$0xff] }
  0x43   : >> { %v227_v39 = vpack.c.bf16 %v211_v32, %v210_v31  ;;  %v15124_v22 = vld [vmem:[%s19958_s30 + $0x74] sm:$0xff]  ;;  %v15077_v25 = vld [vmem:[%s19958_s30 + $0x8b] sm:$0xff] }
  0x44   : >> { %v15078_v32 = vld [vmem:[%s19958_s30 + $0x93] sm:$0xff] }
  0x49   : >> { %18240 = vmatmul.mubr.msk.bf16.gmra.mxu1 %vm281_vm2, %v217_v40  ;;  %18274 = vmatmul.mubr.msk.bf16.gmra.mxu0 %vm281_vm2, %v749_v41  ;;  %v759_v40 = vpack.c.bf16 %v15041_v34, %v15040_v33  ;;  %v1040_v41 = vpack.c.bf16 %v15061_v36, %v15060_v35  ;;  %v15079_v33 = vld [vmem:[%s19958_s30 + $0x9b] sm:$0xff]  ;;  %v15080_v36 = vld [vmem:[%s19958_s30 + $0xa3] sm:$0xff] }
  0x4a   : >> { %18243 = vmatprep.mubr.msk.bf16.mxu1 %vm281_vm2, %v218_v42  ;;  %18277 = vmatprep.mubr.msk.bf16.mxu0 %vm281_vm2, %v750_v43  ;;  %v1336_v42 = vpack.c.bf16 %v15111_v38, %v15110_v37  ;;  %v15062_v43 = vld [vmem:[%s19958_s30 + $0x13] sm:$0xff]  ;;  %v15129_v35 = vld [vmem:[%s19958_s30 + $0x9c] sm:$0xff]  ;;  %v15081_v37 = vld [vmem:[%s19958_s30 + $0xab] sm:$0xff] }
  0x4b   : >> { %v1041_v51 = vpack.c.bf16 %v15063_v44, %v15062_v43  ;;  %v15128_v34 = vld [vmem:[%s19958_s30 + $0x94] sm:$0xff]  ;;  %v15130_v38 = vld [vmem:[%s19958_s30 + $0xa4] sm:$0xff] }
  0x4c   : >> { %v15082_v44 = vld [vmem:[%s19958_s30 + $0xb3] sm:$0xff] }
  0x51   : >> { %18244 = vmatmul.mubr.msk.bf16.gmra.mxu1 %vm281_vm2, %v219_v52  ;;  %18278 = vmatmul.mubr.msk.bf16.gmra.mxu0 %vm281_vm2, %v751_v53  ;;  %v1337_v52 = vpack.c.bf16 %v15113_v46, %v15112_v45  ;;  %v15292_v53 = vld [vmem:[%s25309_s1 + $0xe] sm:$0x3]  ;;  %v15083_v45 = vld [vmem:[%s19958_s30 + $0xbb] sm:$0xff] }
  0x52   : >> { %18247 = vmatprep.mubr.msk.bf16.mxu1 %vm281_vm2, %v220_v54  ;;  %18281 = vmatprep.mubr.msk.bf16.mxu0 %vm281_vm2, %v752_v55  ;;  %v15342_v54 = vld [vmem:[%s25309_s1 + $0x10] sm:$0x3]  ;;  %v1042_v55 = vpack.c.bf16 %v15065_v48, %v15064_v47  ;;  %v20157_v57 = vand.u32 %v15292_v53, %v19951_v5  ;;  %v15132_v46 = vld [vmem:[%s19958_s30 + $0xb4] sm:$0xff]  ;;  %v15133_v47 = vld [vmem:[%s19958_s30 + $0xbc] sm:$0xff] }
  0x53   : >> { %v20160_v58 = vand.u32 %v15342_v54, %v19951_v5  ;;  %v15084_v48 = vld [vmem:[%s19958_s30 + $0xc3] sm:$0xff]  ;;  %v1347_v53 = vpack.c.bf16 %v15133_v47, %v15132_v46  ;;  %v15220_v47 = vld [vmem:[%s19958_s30 + $0x56] sm:$0xff] }
  0x54   : >> { %v1052_v54 = vpack.c.bf16 %v15085_v49, %v15084_v48  ;;  %v15171_v46 = vld [vmem:[%s19958_s30 + $0x5d] sm:$0xff]  ;;  %v15172_v49 = vld [vmem:[%s19958_s30 + $0x65] sm:$0xff] }
  0x55   : >> { %v15221_v48 = vld [vmem:[%s19958_s30 + $0x5e] sm:$0xff] }
  0x59   : >> { %18248 = vmatmul.mubr.msk.bf16.gmra.mxu1 %vm281_vm2, %v221_v0  ;;  %18282 = vmatmul.mubr.msk.bf16.gmra.mxu0 %vm281_vm2, %v753_v1  ;;  %v15069_v0 = vld [vmem:[%s19958_s30 + $0x4b] sm:$0xff] }
  0x5a   : >> { %18251 = vmatprep.mubr.msk.bf16.mxu1 %vm281_vm2, %v222_v2  ;;  %18285 = vmatprep.mubr.msk.bf16.mxu0 %vm281_vm2, %v754_v3  ;;  %v15118_v1 = vld [vmem:[%s19958_s30 + $0x44] sm:$0xff]  ;;  %v15119_v2 = vld [vmem:[%s19958_s30 + $0x4c] sm:$0xff]  ;;  %v1044_v3 = vpack.c.bf16 %v15069_v0, %v15068_v63 }
  0x5b   : >> { %v1340_v4 = vpack.c.bf16 %v15119_v2, %v15118_v1  ;;  %v15089_v63 = vld [vmem:[%s19958_s30 + $0xeb] sm:$0xff] }
  0x5c   : >> { %v15138_v0 = vld [vmem:[%s19958_s30 + $0xe4] sm:$0xff]  ;;  %v15139_v1 = vld [vmem:[%s19958_s30 + $0xec] sm:$0xff] }
  0x61   : >> { %18252 = vmatmul.mubr.msk.bf16.gmra.mxu1 %vm281_vm2, %v223_v13  ;;  %18286 = vmatmul.mubr.msk.bf16.gmra.mxu0 %vm281_vm2, %v755_v14  ;;  %v15123_v13 = vld [vmem:[%s19958_s30 + $0x6c] sm:$0xff]  ;;  %v1045_v14 = vpack.c.bf16 %v15071_v7, %v15070_v6  ;;  %v15091_v6 = vld [vmem:[%s19958_s30 + $0xfb] sm:$0xff] }
  0x62   : >> { %18255 = vmatprep.mubr.msk.bf16.mxu1 %vm281_vm2, %v224_v15  ;;  %18289 = vmatprep.mubr.msk.bf16.mxu0 %vm281_vm2, %v756_v16  ;;  %v1341_v15 = vpack.c.bf16 %v15121_v9, %v15120_v8  ;;  %v1046_v16 = vpack.c.bf16 %v15073_v11, %v15072_v10  ;;  %v1342_v17 = vpack.c.bf16 %v15123_v13, %v15122_v12  ;;  %v15140_v7 = vld [vmem:[%s19958_s30 + $0xf4] sm:$0xff]  ;;  %v15141_v8 = vld [vmem:[%s19958_s30 + $0xfc] sm:$0xff]  ;;  %v15160_v9 = vld [vmem:[%s19958_s30 + $0x5] sm:$0xff] }
  0x63   : >> { %v15161_v10 = vld [vmem:[%s19958_s30 + $0xd] sm:$0xff] }
  0x64   : >> { %v15210_v11 = vld [vmem:[%s19958_s30 + $0x6] sm:$0xff]  ;;  %v15211_v12 = vld [vmem:[%s19958_s30 + $0xe] sm:$0xff] }
  0x69   : >> { %18256 = vmatmul.mubr.msk.bf16.gmra.mxu1 %vm281_vm2, %v225_v28  ;;  %18290 = vmatmul.mubr.msk.bf16.gmra.mxu0 %vm281_vm2, %v757_v27  ;;  %v15127_v28 = vld [vmem:[%s19958_s30 + $0x8c] sm:$0xff]  ;;  %v1047_v27 = vpack.c.bf16 %v15075_v21, %v15074_v20  ;;  %v15163_v20 = vld [vmem:[%s19958_s30 + $0x1d] sm:$0xff] }
  0x6a   : >> { %18259 = vmatprep.mubr.msk.bf16.mxu1 %vm281_vm2, %v226_v29  ;;  %18293 = vmatprep.mubr.msk.bf16.mxu0 %vm281_vm2, %v758_v30  ;;  %v1343_v29 = vpack.c.bf16 %v15125_v23, %v15124_v22  ;;  %v1048_v30 = vpack.c.bf16 %v15077_v25, %v15076_v24  ;;  %v1344_v31 = vpack.c.bf16 %v15127_v28, %v15126_v26  ;;  %v15212_v21 = vld [vmem:[%s19958_s30 + $0x16] sm:$0xff]  ;;  %v15213_v22 = vld [vmem:[%s19958_s30 + $0x1e] sm:$0xff]  ;;  %v15165_v24 = vld [vmem:[%s19958_s30 + $0x2d] sm:$0xff] }
  0x6b   : >> { %v15164_v23 = vld [vmem:[%s19958_s30 + $0x25] sm:$0xff]  ;;  %v15215_v26 = vld [vmem:[%s19958_s30 + $0x2e] sm:$0xff] }
  0x6c   : >> { %v15214_v25 = vld [vmem:[%s19958_s30 + $0x26] sm:$0xff] }
  0x71   : >> { %18260 = vmatmul.mubr.msk.bf16.gmra.mxu1 %vm281_vm2, %v227_v39  ;;  %18294 = vmatmul.mubr.msk.bf16.gmra.mxu0 %vm281_vm2, %v759_v40  ;;  %v15131_v39 = vld [vmem:[%s19958_s30 + $0xac] sm:$0xff]  ;;  %v1049_v40 = vpack.c.bf16 %v15079_v33, %v15078_v32  ;;  %v1930_v32 = vpack.c.bf16 %v15215_v26, %v15214_v25  ;;  %v15233_v25 = vld [vmem:[%s19958_s30 + $0xbe] sm:$0xff] }
  0x72   : >> { %18299 = vmatprep.mubr.msk.bf16.mxu1 %vm281_vm2, %v1040_v41  ;;  %18333 = vmatprep.mubr.msk.bf16.mxu0 %vm281_vm2, %v1336_v42  ;;  %v1345_v41 = vpack.c.bf16 %v15129_v35, %v15128_v34  ;;  %v1050_v42 = vpack.c.bf16 %v15081_v37, %v15080_v36  ;;  %v1346_v43 = vpack.c.bf16 %v15131_v39, %v15130_v38  ;;  %v15166_v35 = vld [vmem:[%s19958_s30 + $0x35] sm:$0xff]  ;;  %v15167_v36 = vld [vmem:[%s19958_s30 + $0x3d] sm:$0xff]  ;;  %v15168_v39 = vld [vmem:[%s19958_s30 + $0x45] sm:$0xff] }
  0x73   : >> { %v15216_v37 = vld [vmem:[%s19958_s30 + $0x36] sm:$0xff]  ;;  %v15217_v38 = vld [vmem:[%s19958_s30 + $0x3e] sm:$0xff] }
  0x74   : >> { %v15184_v26 = vld [vmem:[%s19958_s30 + $0xc5] sm:$0xff] }
  0x79   : >> { %18300 = vmatmul.mubr.msk.bf16.vlgmr.msra.gmra.mxu1 %vm281_vm2, %v1041_v51  ;;  %18334 = vmatmul.mubr.msk.bf16.vlgmr.msra.gmra.mxu0 %vm281_vm2, %v1337_v52  ;;  %v15135_v51 = vld [vmem:[%s19958_s30 + $0xcc] sm:$0xff]  ;;  %v1051_v52 = vpack.c.bf16 %v15083_v45, %v15082_v44  ;;  %v15170_v45 = vld [vmem:[%s19958_s30 + $0x55] sm:$0xff] }
  0x7a   : >> { %18366 = vmatpush3.bf16.msra.mxu1 %v20045_v18  ;;  %18400 = vmatpush3.bf16.msra.mxu0 %v20048_v19  ;;  %v1043_v18 = vpack.c.bf16 %v15067_v60, %v15066_v59  ;;  %v1339_v19 = vpack.c.bf16 %v15117_v62, %v15116_v61  ;;  %v15087_v59 = vld [vmem:[%s19958_s30 + $0xdb] sm:$0xff]  ;;  %v15088_v62 = vld [vmem:[%s19958_s30 + $0xe3] sm:$0xff] }
  0x7b   : >> { %18303 = vmatprep.mubr.msk.bf16.mxu1 %vm281_vm2, %v1042_v55  ;;  %18337 = vmatprep.mubr.msk.bf16.mxu0 %vm281_vm2, %v1338_v56  ;;  %v1348_v55 = vpack.c.bf16 %v15135_v51, %v15134_v50  ;;  %v15086_v56 = vld [vmem:[%s19958_s30 + $0xd3] sm:$0xff]  ;;  %v15137_v61 = vld [vmem:[%s19958_s30 + $0xdc] sm:$0xff]  ;;  %v15222_v51 = vld [vmem:[%s19958_s30 + $0x66] sm:$0xff] }
  0x7c   : >> { %18433 = vmatprep.subr.bf16.mxu1 %v20157_v57  ;;  %18467 = vmatprep.subr.bf16.mxu0 %v20160_v58  ;;  %v15136_v60 = vld [vmem:[%s19958_s30 + $0xd4] sm:$0xff]  ;;  %v1053_v2 = vpack.c.bf16 %v15087_v59, %v15086_v56 }
  0x7d   : >> { %v15173_v50 = vld [vmem:[%s19958_s30 + $0x6d] sm:$0xff]  ;;  %v15174_v59 = vld [vmem:[%s19958_s30 + $0x75] sm:$0xff] }
  0x81   : >> { %18304 = vmatmul.mubr.msk.bf16.gmra.mxu1 %vm281_vm2, %v1043_v18  ;;  %18338 = vmatmul.mubr.msk.bf16.gmra.mxu0 %vm281_vm2, %v1339_v19  ;;  %v1349_v18 = vpack.c.bf16 %v15137_v61, %v15136_v60  ;;  %v1054_v19 = vpack.c.bf16 %v15089_v63, %v15088_v62  ;;  %v15175_v60 = vld [vmem:[%s19958_s30 + $0x7d] sm:$0xff]  ;;  %v15176_v63 = vld [vmem:[%s19958_s30 + $0x85] sm:$0xff] }
  0x82   : >> { %18307 = vmatprep.mubr.msk.bf16.mxu1 %vm281_vm2, %v1044_v3  ;;  %18341 = vmatprep.mubr.msk.bf16.mxu0 %vm281_vm2, %v1340_v4  ;;  %v1350_v3 = vpack.c.bf16 %v15139_v1, %v15138_v0  ;;  %v15090_v4 = vld [vmem:[%s19958_s30 + $0xf3] sm:$0xff]  ;;  %v15225_v62 = vld [vmem:[%s19958_s30 + $0x7e] sm:$0xff]  ;;  %v15226_v1 = vld [vmem:[%s19958_s30 + $0x86] sm:$0xff] }
  0x83   : >> { %v1055_v13 = vpack.c.bf16 %v15091_v6, %v15090_v4  ;;  %v15224_v61 = vld [vmem:[%s19958_s30 + $0x76] sm:$0xff]  ;;  %v15177_v0 = vld [vmem:[%s19958_s30 + $0x8d] sm:$0xff] }
  0x84   : >> { %v15178_v6 = vld [vmem:[%s19958_s30 + $0x95] sm:$0xff] }
  0x89   : >> { %18308 = vmatmul.mubr.msk.bf16.gmra.mxu1 %vm281_vm2, %v1045_v14  ;;  %18342 = vmatmul.mubr.msk.bf16.gmra.mxu0 %vm281_vm2, %v1341_v15  ;;  %v1351_v14 = vpack.c.bf16 %v15141_v8, %v15140_v7  ;;  %v1632_v15 = vpack.c.bf16 %v15161_v10, %v15160_v9  ;;  %v15179_v7 = vld [vmem:[%s19958_s30 + $0x9d] sm:$0xff]  ;;  %v15180_v10 = vld [vmem:[%s19958_s30 + $0xa5] sm:$0xff] }
  0x8a   : >> { %18311 = vmatprep.mubr.msk.bf16.mxu1 %vm281_vm2, %v1046_v16  ;;  %18345 = vmatprep.mubr.msk.bf16.mxu0 %vm281_vm2, %v1342_v17  ;;  %v1928_v16 = vpack.c.bf16 %v15211_v12, %v15210_v11  ;;  %v15162_v17 = vld [vmem:[%s19958_s30 + $0x15] sm:$0xff]  ;;  %v15229_v9 = vld [vmem:[%s19958_s30 + $0x9e] sm:$0xff]  ;;  %v15181_v11 = vld [vmem:[%s19958_s30 + $0xad] sm:$0xff] }
  0x8b   : >> { %v1633_v28 = vpack.c.bf16 %v15163_v20, %v15162_v17  ;;  %v15228_v8 = vld [vmem:[%s19958_s30 + $0x96] sm:$0xff]  ;;  %v15230_v12 = vld [vmem:[%s19958_s30 + $0xa6] sm:$0xff] }
  0x91   : >> { %18312 = vmatmul.mubr.msk.bf16.gmra.mxu1 %vm281_vm2, %v1047_v27  ;;  %18346 = vmatmul.mubr.msk.bf16.gmra.mxu0 %vm281_vm2, %v1343_v29  ;;  %v1929_v27 = vpack.c.bf16 %v15213_v22, %v15212_v21  ;;  %v15392_v29 = vld [vmem:[%s25309_s1 + $0x12] sm:$0x3]  ;;  %v15182_v22 = vld [vmem:[%s19958_s30 + $0xb5] sm:$0xff] }
  0x92   : >> { %18315 = vmatprep.mubr.msk.bf16.mxu1 %vm281_vm2, %v1048_v30  ;;  %18349 = vmatprep.mubr.msk.bf16.mxu0 %vm281_vm2, %v1344_v31  ;;  %v15442_v30 = vld [vmem:[%s25309_s1 + $0x14] sm:$0x3]  ;;  %v1634_v31 = vpack.c.bf16 %v15165_v24, %v15164_v23  ;;  %v20269_v33 = vand.u32 %v15392_v29, %v19951_v5  ;;  %v15183_v23 = vld [vmem:[%s19958_s30 + $0xbd] sm:$0xff] }
  0x93   : >> { %v20272_v34 = vand.u32 %v15442_v30, %v19951_v5  ;;  %v15232_v24 = vld [vmem:[%s19958_s30 + $0xb6] sm:$0xff]  ;;  %v15185_v29 = vld [vmem:[%s19958_s30 + $0xcd] sm:$0xff] }
  0x94   : >> { %v15234_v30 = vld [vmem:[%s19958_s30 + $0xc6] sm:$0xff] }
  0x99   : >> { %18316 = vmatmul.mubr.msk.bf16.gmra.mxu1 %vm281_vm2, %v1049_v40  ;;  %18350 = vmatmul.mubr.msk.bf16.gmra.mxu0 %vm281_vm2, %v1345_v41  ;;  %v15169_v40 = vld [vmem:[%s19958_s30 + $0x4d] sm:$0xff] }
  0x9a   : >> { %18319 = vmatprep.mubr.msk.bf16.mxu1 %vm281_vm2, %v1050_v42  ;;  %18353 = vmatprep.mubr.msk.bf16.mxu0 %vm281_vm2, %v1346_v43  ;;  %v15218_v41 = vld [vmem:[%s19958_s30 + $0x46] sm:$0xff]  ;;  %v15219_v42 = vld [vmem:[%s19958_s30 + $0x4e] sm:$0xff]  ;;  %v1636_v43 = vpack.c.bf16 %v15169_v40, %v15168_v39 }
  0x9b   : >> { %v1932_v44 = vpack.c.bf16 %v15219_v42, %v15218_v41 }
  0xa1   : >> { %18320 = vmatmul.mubr.msk.bf16.gmra.mxu1 %vm281_vm2, %v1051_v52  ;;  %18354 = vmatmul.mubr.msk.bf16.gmra.mxu0 %vm281_vm2, %v1347_v53  ;;  %v15223_v52 = vld [vmem:[%s19958_s30 + $0x6e] sm:$0xff]  ;;  %v1637_v53 = vpack.c.bf16 %v15171_v46, %v15170_v45  ;;  %v15237_v45 = vld [vmem:[%s19958_s30 + $0xde] sm:$0xff] }
  0xa2   : >> { %18323 = vmatprep.mubr.msk.bf16.mxu1 %vm281_vm2, %v1052_v54  ;;  %18357 = vmatprep.mubr.msk.bf16.mxu0 %vm281_vm2, %v1348_v55  ;;  %v1933_v54 = vpack.c.bf16 %v15221_v48, %v15220_v47  ;;  %v1638_v55 = vpack.c.bf16 %v15173_v50, %v15172_v49  ;;  %v20302_v56 = vpack.c.bf16 %v15223_v52, %v15222_v51  ;;  %v15188_v46 = vld [vmem:[%s19958_s30 + $0xe5] sm:$0xff]  ;;  %v15189_v49 = vld [vmem:[%s19958_s30 + $0xed] sm:$0xff] }
  0xa3   : >> { %v15238_v50 = vld [vmem:[%s19958_s30 + $0xe6] sm:$0xff]  ;;  %v15239_v51 = vld [vmem:[%s19958_s30 + $0xee] sm:$0xff] }
  0xa9   : >> { %18324 = vmatmul.mubr.msk.bf16.gmra.mxu1 %vm281_vm2, %v1053_v2  ;;  %18358 = vmatmul.mubr.msk.bf16.gmra.mxu0 %vm281_vm2, %v1349_v18  ;;  %v15227_v2 = vld [vmem:[%s19958_s30 + $0x8e] sm:$0xff]  ;;  %v1639_v18 = vpack.c.bf16 %v15175_v60, %v15174_v59  ;;  %v1646_v59 = vpack.c.bf16 %v15189_v49, %v15188_v46  ;;  %v20401_v60 = vpack.c.bf16 %v15239_v51, %v15238_v50 }
  0xaa   : >> { %18327 = vmatprep.mubr.msk.bf16.mxu1 %vm281_vm2, %v1054_v19  ;;  %18361 = vmatprep.mubr.msk.bf16.mxu0 %vm281_vm2, %v1350_v3  ;;  %v20317_v19 = vpack.c.bf16 %v15225_v62, %v15224_v61  ;;  %v1640_v3 = vpack.c.bf16 %v15177_v0, %v15176_v63  ;;  %v20319_v4 = vpack.c.bf16 %v15227_v2, %v15226_v1  ;;  %v15190_v1 = vld [vmem:[%s19958_s30 + $0xf5] sm:$0xff]  ;;  %v15191_v2 = vld [vmem:[%s19958_s30 + $0xfd] sm:$0xff] }
  0xb1   : >> { %18328 = vmatmul.mubr.msk.bf16.gmra.mxu1 %vm281_vm2, %v1055_v13  ;;  %18362 = vmatmul.mubr.msk.bf16.gmra.mxu0 %vm281_vm2, %v1351_v14  ;;  %v15231_v13 = vld [vmem:[%s19958_s30 + $0xae] sm:$0xff]  ;;  %v1641_v14 = vpack.c.bf16 %v15179_v7, %v15178_v6 }
  0xb2   : >> { %18367 = vmatprep.mubr.msk.bf16.mxu1 %vm281_vm2, %v1632_v15  ;;  %18401 = vmatprep.mubr.msk.bf16.mxu0 %vm281_vm2, %v1928_v16  ;;  %v20335_v15 = vpack.c.bf16 %v15229_v9, %v15228_v8  ;;  %v1642_v16 = vpack.c.bf16 %v15181_v11, %v15180_v10  ;;  %v20337_v17 = vpack.c.bf16 %v15231_v13, %v15230_v12  ;;  %v15310_v8 = vld [vmem:[%s19958_s30 + $0x67] sm:$0xff]  ;;  %v15311_v9 = vld [vmem:[%s19958_s30 + $0x6f] sm:$0xff] }
  0xb3   : >> { %v1647_v12 = vpack.c.bf16 %v15191_v2, %v15190_v1  ;;  %v15316_v2 = vld [vmem:[%s19958_s30 + $0x97] sm:$0xff] }
  0xb9   : >> { %18368 = vmatmul.mubr.msk.bf16.vlgmr.msra.gmra.mxu1 %vm281_vm2, %v1633_v28  ;;  %18402 = vmatmul.mubr.msk.bf16.vlgmr.msra.gmra.mxu0 %vm281_vm2, %v1929_v27 }
  0xba   : >> { %18434 = vmatpush3.bf16.msra.mxu1 %v20157_v57  ;;  %18468 = vmatpush3.bf16.msra.mxu0 %v20160_v58  ;;  %v1635_v57 = vpack.c.bf16 %v15167_v36, %v15166_v35  ;;  %v1931_v58 = vpack.c.bf16 %v15217_v38, %v15216_v37  ;;  %v1643_v36 = vpack.c.bf16 %v15183_v23, %v15182_v22 }
  0xbb   : >> { %18371 = vmatprep.mubr.msk.bf16.mxu1 %vm281_vm2, %v1634_v31  ;;  %18405 = vmatprep.mubr.msk.bf16.mxu0 %vm281_vm2, %v1930_v32  ;;  %v15235_v31 = vld [vmem:[%s19958_s30 + $0xce] sm:$0xff]  ;;  %v20365_v37 = vpack.c.bf16 %v15233_v25, %v15232_v24  ;;  %v1644_v38 = vpack.c.bf16 %v15185_v29, %v15184_v26  ;;  %v15312_v25 = vld [vmem:[%s19958_s30 + $0x77] sm:$0xff]  ;;  %v15313_v26 = vld [vmem:[%s19958_s30 + $0x7f] sm:$0xff] }
  0xbc   : >> { %18501 = vmatprep.subr.bf16.mxu1 %v20269_v33  ;;  %18535 = vmatprep.subr.bf16.mxu0 %v20272_v34  ;;  %v20367_v39 = vpack.c.bf16 %v15235_v31, %v15234_v30  ;;  %v15314_v31 = vld [vmem:[%s19958_s30 + $0x87] sm:$0xff] }
  0xc1   : >> { %18372 = vmatmul.mubr.msk.bf16.gmra.mxu1 %vm281_vm2, %v1635_v57  ;;  %18406 = vmatmul.mubr.msk.bf16.gmra.mxu0 %vm281_vm2, %v1931_v58  ;;  %v15186_v58 = vld [vmem:[%s19958_s30 + $0xd5] sm:$0xff] }
  0xc2   : >> { %18375 = vmatprep.mubr.msk.bf16.mxu1 %vm281_vm2, %v1636_v43  ;;  %18409 = vmatprep.mubr.msk.bf16.mxu0 %vm281_vm2, %v1932_v44  ;;  %v15187_v43 = vld [vmem:[%s19958_s30 + $0xdd] sm:$0xff] }
  0xc3   : >> { %v15236_v44 = vld [vmem:[%s19958_s30 + $0xd6] sm:$0xff] }
  0xc9   : >> { %18376 = vmatmul.mubr.msk.bf16.gmra.mxu1 %vm281_vm2, %v1637_v53  ;;  %18410 = vmatmul.mubr.msk.bf16.gmra.mxu0 %vm281_vm2, %v1933_v54  ;;  %v1645_v54 = vpack.c.bf16 %v15187_v43, %v15186_v58  ;;  %v2521_v43 = vpack.c.bf16 %v15313_v26, %v15312_v25 }
  0xca   : >> { %18379 = vmatprep.mubr.msk.bf16.mxu1 %vm281_vm2, %v1638_v55  ;;  %18413 = vmatprep.mubr.msk.bf16.mxu0 %vm281_vm2, %v20302_v56  ;;  %v20399_v55 = vpack.c.bf16 %v15237_v45, %v15236_v44  ;;  %v15542_v44 = vld [vmem:[%s25309_s1 + $0x18] sm:$0x3] }
  0xcb   : >> { %v20473_v51 = vand.u32 %v15542_v44, %v19951_v5 }
  0xd1   : >> { %18380 = vmatmul.mubr.msk.bf16.gmra.mxu1 %vm281_vm2, %v1639_v18  ;;  %18414 = vmatmul.mubr.msk.bf16.gmra.mxu0 %vm281_vm2, %v20317_v19  ;;  %v15240_v18 = vld [vmem:[%s19958_s30 + $0xf6] sm:$0xff] }
  0xd2   : >> { %18383 = vmatprep.mubr.msk.bf16.mxu1 %vm281_vm2, %v1640_v3  ;;  %18417 = vmatprep.mubr.msk.bf16.mxu0 %vm281_vm2, %v20319_v4  ;;  %v15241_v3 = vld [vmem:[%s19958_s30 + $0xfe] sm:$0xff] }
  0xd3   : >> { %v20431_v13 = vpack.c.bf16 %v15241_v3, %v15240_v18  ;;  %v15317_v18 = vld [vmem:[%s19958_s30 + $0x9f] sm:$0xff] }
  0xd9   : >> { %v20339_v20 = vpop.f32.mrf.mxu0  ;;  %v20341_v21 = vpop.f32.mrf.mxu1  ;;  %18384 = vmatmul.mubr.msk.bf16.gmra.mxu1 %vm281_vm2, %v1641_v14  ;;  %18418 = vmatmul.mubr.msk.bf16.gmra.mxu0 %vm281_vm2, %v20335_v15  ;;  %v2520_v14 = vpack.c.bf16 %v15311_v9, %v15310_v8  ;;  %v15318_v9 = vld [vmem:[%s19958_s30 + $0xa7] sm:$0xff] }
  0xda   : >> { %18387 = vmatprep.mubr.msk.bf16.mxu1 %vm281_vm2, %v1642_v16  ;;  %18421 = vmatprep.mubr.msk.bf16.mxu0 %vm281_vm2, %v20337_v17 }
  0xdb   : >> { %v20354_v28 = vpop.f32.mrf.mxu0  ;;  %v20356_v27 = vpop.f32.mrf.mxu1 }
  0xdd   : >> { %v20361_v32 = vpop.f32.mrf.mxu0  ;;  %v20363_v35 = vpop.f32.mrf.mxu1 }
  0xdf   : >> { %v20369_v40 = vpop.f32.mrf.mxu0  ;;  %v20371_v41 = vpop.f32.mrf.mxu1 }
  0xe1   : >> { %v20373_v42 = vpop.f32.mrf.mxu0  ;;  %v20375_v57 = vpop.f32.mrf.mxu1  ;;  %18388 = vmatmul.mubr.msk.bf16.gmra.mxu1 %vm281_vm2, %v1643_v36  ;;  %18422 = vmatmul.mubr.msk.bf16.gmra.mxu0 %vm281_vm2, %v20365_v37  ;;  %v15315_v36 = vld [vmem:[%s19958_s30 + $0x8f] sm:$0xff] }
  0xe2   : >> { %18391 = vmatprep.mubr.msk.bf16.mxu1 %vm281_vm2, %v1644_v38  ;;  %18425 = vmatprep.mubr.msk.bf16.mxu0 %vm281_vm2, %v20367_v39  ;;  %v2522_v49 = vpack.c.bf16 %v15315_v36, %v15314_v31 }
  0xe3   : >> { %v20388_v47 = vpop.f32.mrf.mxu0  ;;  %v20390_v48 = vpop.f32.mrf.mxu1 }
  0xe5   : >> { %v20395_v52 = vpop.f32.mrf.mxu0  ;;  %v20397_v53 = vpop.f32.mrf.mxu1 }
  0xe7   : >> { %v20403_v61 = vpop.f32.mrf.mxu0  ;;  %v20405_v62 = vpop.f32.mrf.mxu1 }
  0xe9   : >> { %v20407_v63 = vpop.f32.mrf.mxu0  ;;  %v20409_v0 = vpop.f32.mrf.mxu1  ;;  %18392 = vmatmul.mubr.msk.bf16.gmra.mxu1 %vm281_vm2, %v1645_v54  ;;  %18426 = vmatmul.mubr.msk.bf16.gmra.mxu0 %vm281_vm2, %v20399_v55 }
  0xea   : >> { %18395 = vmatprep.mubr.msk.bf16.mxu1 %vm281_vm2, %v1646_v59  ;;  %18429 = vmatprep.mubr.msk.bf16.mxu0 %vm281_vm2, %v20401_v60 }
  0xeb   : >> { %v20421_v6 = vpop.f32.mrf.mxu0  ;;  %v20423_v7 = vpop.f32.mrf.mxu1 }
  0xed   : >> { %v20427_v10 = vpop.f32.mrf.mxu0  ;;  %v20429_v11 = vpop.f32.mrf.mxu1 }
  0xef   : >> { %v20433_v16 = vpop.f32.mrf.mxu0  ;;  %v20435_v22 = vpop.f32.mrf.mxu1 }
  0xf1   : >> { %v20437_v23 = vpop.f32.mrf.mxu0  ;;  %v20439_v24 = vpop.f32.mrf.mxu1  ;;  %18396 = vmatmul.mubr.msk.bf16.gmra.mxu1 %vm281_vm2, %v1647_v12  ;;  %18430 = vmatmul.mubr.msk.bf16.gmra.mxu0 %vm281_vm2, %v20431_v13  ;;  %v15319_v12 = vld [vmem:[%s19958_s30 + $0xaf] sm:$0xff] }
  0xf2   : >> { %18435 = vmatprep.mubr.msk.bf16.mxu1 %vm281_vm2, %v20302_v56  ;;  %18469 = vmatprep.mubr.msk.bf16.mxu0 %vm281_vm2, %v2520_v14  ;;  %v15492_v56 = vld [vmem:[%s25309_s1 + $0x16] sm:$0x3]  ;;  %v2524_v26 = vpack.c.bf16 %v15319_v12, %v15318_v9 }
  0xf3   : >> { %v20449_v29 = vpop.f32.mrf.mxu0  ;;  %v20451_v30 = vpop.f32.mrf.mxu1  ;;  %v20470_v50 = vand.u32 %v15492_v56, %v19951_v5 }
  0xf5   : >> { %v20455_v38 = vpop.f32.mrf.mxu0  ;;  %v20457_v58 = vpop.f32.mrf.mxu1 }
  0xf7   : >> { %v20465_v45 = vpop.f32.mrf.mxu0  ;;  %v20467_v46 = vpop.f32.mrf.mxu1 }
  0xf9   : >> { %v18233_v54 = vpop.f32.mrf.mxu1  ;;  %v18267_v59 = vpop.f32.mrf.mxu0  ;;  %18436 = vmatmul.mubr.msk.bf16.vlgmr.msra.gmra.mxu1 %vm281_vm2, %v20317_v19  ;;  %18470 = vmatmul.mubr.msk.bf16.vlgmr.msra.gmra.mxu0 %vm281_vm2, %v2521_v43 }
  0xfa   : >> { %v592_v1 = vadd.f32 %v18233_v54, %v20339_v20  ;;  %18502 = vmatpush3.bf16.msra.mxu1 %v20269_v33  ;;  %18536 = vmatpush3.bf16.msra.mxu0 %v20272_v34  ;;  %v2523_v20 = vpack.c.bf16 %v15317_v18, %v15316_v2  ;;  %v15320_v54 = vld [vmem:[%s19958_s30 + $0xb7] sm:$0xff]  ;;  %v15322_v2 = vld [vmem:[%s19958_s30 + $0xc7] sm:$0xff]  ;;  %v15323_v18 = vld [vmem:[%s19958_s30 + $0xcf] sm:$0xff] }
  0xfb   : >> { %v583_v3 = vpop.f32.mrf.mxu1  ;;  %v847_v8 = vpop.f32.mrf.mxu0  ;;  %18439 = vmatprep.mubr.msk.bf16.mxu1 %vm281_vm2, %v20319_v4  ;;  %18473 = vmatprep.mubr.msk.bf16.mxu0 %vm281_vm2, %v2522_v49 }
  0xfc   : >> { %v20488_v19 = vadd.f32 %v18267_v59, %v592_v1  ;;  %v584_v14 = vadd.f32 %v583_v3, %v20354_v28  ;;  %18569 = vmatprep.subr.bf16.mxu1 %v20470_v50  ;;  %18603 = vmatprep.subr.bf16.mxu0 %v20473_v51  ;;  %v15321_v59 = vld [vmem:[%s19958_s30 + $0xbf] sm:$0xff] }
  0xfd   : >> { %v18234_v33 = vpop.f32.mrf.mxu1  ;;  %v18268_v34 = vpop.f32.mrf.mxu0  ;;  %v2525_v12 = vpack.c.bf16 %v15321_v59, %v15320_v54 }
  0xfe   : >> { %v20493_v25 = vadd.f32 %v847_v8, %v584_v14  ;;  %v595_v4 = vadd.f32 %v18234_v33, %v20361_v32  ;;  %v2526_v14 = vpack.c.bf16 %v15323_v18, %v15322_v2 }
  0xff   : >> { %v586_v31 = vpop.f32.mrf.mxu1  ;;  %v850_v36 = vpop.f32.mrf.mxu0 }
 0x100   : >> { %v20496_v43 = vadd.f32 %v18268_v34, %v595_v4  ;;  %v587_v28 = vadd.f32 %v586_v31, %v20369_v40 }
 0x101   : >> { %v18237_v56 = vpop.f32.mrf.mxu1  ;;  %v18271_v44 = vpop.f32.mrf.mxu0  ;;  %18440 = vmatmul.mubr.msk.bf16.gmra.mxu1 %vm281_vm2, %v20335_v15  ;;  %18474 = vmatmul.mubr.msk.bf16.gmra.mxu0 %vm281_vm2, %v2523_v20 }
 0x102   : >> { %v20502_v49 = vadd.f32 %v850_v36, %v587_v28  ;;  %v608_v32 = vadd.f32 %v18237_v56, %v20373_v42  ;;  %18443 = vmatprep.mubr.msk.bf16.mxu1 %vm281_vm2, %v20337_v17  ;;  %18477 = vmatprep.mubr.msk.bf16.mxu0 %vm281_vm2, %v2524_v26  ;;  %v15324_v36 = vld [vmem:[%s19958_s30 + $0xd7] sm:$0xff]  ;;  %v15325_v28 = vld [vmem:[%s19958_s30 + $0xdf] sm:$0xff] }
 0x103   : >> { %v599_v1 = vpop.f32.mrf.mxu1  ;;  %v863_v40 = vpop.f32.mrf.mxu0 }
 0x104   : >> { %v20512_v3 = vadd.f32 %v18271_v44, %v608_v32  ;;  %v600_v15 = vadd.f32 %v599_v1, %v20388_v47  ;;  %v15326_v44 = vld [vmem:[%s19958_s30 + $0xe7] sm:$0xff]  ;;  %v15327_v32 = vld [vmem:[%s19958_s30 + $0xef] sm:$0xff] }
 0x105   : >> { %v18238_v8 = vpop.f32.mrf.mxu1  ;;  %v18272_v9 = vpop.f32.mrf.mxu0  ;;  %v2528_v2 = vpack.c.bf16 %v15327_v32, %v15326_v44 }
 0x106   : >> { %v20515_v42 = vadd.f32 %v863_v40, %v600_v15  ;;  %v611_v17 = vadd.f32 %v18238_v8, %v20395_v52  ;;  %v2527_v40 = vpack.c.bf16 %v15325_v28, %v15324_v36 }
 0x107   : >> { %v602_v33 = vpop.f32.mrf.mxu1  ;;  %v866_v34 = vpop.f32.mrf.mxu0 }
 0x108   : >> { %v20518_v20 = vadd.f32 %v18272_v9, %v611_v17  ;;  %v603_v4 = vadd.f32 %v602_v33, %v20403_v61  ;;  %v15329_v33 = vld [vmem:[%s19958_s30 + $0xff] sm:$0xff] }
 0x109   : >> { %v18241_v26 = vpop.f32.mrf.mxu1  ;;  %v18275_v47 = vpop.f32.mrf.mxu0  ;;  %18444 = vmatmul.mubr.msk.bf16.gmra.mxu1 %vm281_vm2, %v20365_v37  ;;  %18478 = vmatmul.mubr.msk.bf16.gmra.mxu0 %vm281_vm2, %v2525_v12 }
 0x10a   : >> { %v20524_v31 = vadd.f32 %v866_v34, %v603_v4  ;;  %v624_v52 = vadd.f32 %v18241_v26, %v20407_v63  ;;  %18447 = vmatprep.mubr.msk.bf16.mxu1 %vm281_vm2, %v20367_v39  ;;  %18481 = vmatprep.mubr.msk.bf16.mxu0 %vm281_vm2, %v2526_v14  ;;  %v15328_v14 = vld [vmem:[%s19958_s30 + $0xf7] sm:$0xff]  ;;  %v15281_v26 = vld [vmem:[%s19958_s30 + $0x10e] sm:$0xff] }
 0x10b   : >> { %v615_v56 = vpop.f32.mrf.mxu1  ;;  %v879_v61 = vpop.f32.mrf.mxu0 }
 0x10c   : >> { %v20534_v54 = vadd.f32 %v18275_v47, %v624_v52  ;;  %v616_v37 = vadd.f32 %v615_v56, %v20421_v6  ;;  %v15330_v47 = vld [vmem:[%s19958_s30 + $0x107] sm:$0xff]  ;;  %v15331_v52 = vld [vmem:[%s19958_s30 + $0x10f] sm:$0xff]  ;;  %v2529_v56 = vpack.c.bf16 %v15329_v33, %v15328_v14 }
 0x10d   : >> { %v18242_v59 = vpop.f32.mrf.mxu1  ;;  %v18276_v1 = vpop.f32.mrf.mxu0  ;;  %v2530_v32 = vpack.c.bf16 %v15331_v52, %v15330_v47  ;;  %v15285_v14 = vld [vmem:[%s19958_s30 + $0x12e] sm:$0xff] }
 0x10e   : >> { %v20537_v63 = vadd.f32 %v879_v61, %v616_v37  ;;  %v627_v39 = vadd.f32 %v18242_v59, %v20427_v10  ;;  %v15334_v33 = vld [vmem:[%s19958_s30 + $0x127] sm:$0xff] }
 0x10f   : >> { %v618_v18 = vpop.f32.mrf.mxu1  ;;  %v882_v15 = vpop.f32.mrf.mxu0 }
 0x110   : >> { %v20540_v8 = vadd.f32 %v18276_v1, %v627_v39  ;;  %v619_v9 = vadd.f32 %v618_v18, %v20433_v16  ;;  %v15280_v16 = vld [vmem:[%s19958_s30 + $0x106] sm:$0xff] }
 0x111   : >> { %v18245_v6 = vpop.f32.mrf.mxu1  ;;  %v18279_v12 = vpop.f32.mrf.mxu0  ;;  %18448 = vmatmul.mubr.msk.bf16.gmra.mxu1 %vm281_vm2, %v20399_v55  ;;  %18482 = vmatmul.mubr.msk.bf16.gmra.mxu0 %vm281_vm2, %v2527_v40  ;;  %v2234_v44 = vpack.c.bf16 %v15281_v26, %v15280_v16 }
 0x112   : >> { %v20546_v17 = vadd.f32 %v882_v15, %v619_v9  ;;  %v640_v10 = vadd.f32 %v18245_v6, %v20437_v23  ;;  %18451 = vmatprep.mubr.msk.bf16.mxu1 %vm281_vm2, %v20401_v60  ;;  %18485 = vmatprep.mubr.msk.bf16.mxu0 %vm281_vm2, %v2528_v2  ;;  %v15283_v2 = vld [vmem:[%s19958_s30 + $0x11e] sm:$0xff]  ;;  %v15284_v6 = vld [vmem:[%s19958_s30 + $0x126] sm:$0xff] }
 0x113   : >> { %v631_v34 = vpop.f32.mrf.mxu1  ;;  %v895_v4 = vpop.f32.mrf.mxu0  ;;  %v15333_v9 = vld [vmem:[%s19958_s30 + $0x11f] sm:$0xff] }
 0x114   : >> { %v20558_v55 = vadd.f32 %v18279_v12, %v640_v10  ;;  %v632_v36 = vadd.f32 %v631_v34, %v20449_v29 }
 0x115   : >> { %v18246_v28 = vpop.f32.mrf.mxu1  ;;  %v18280_v23 = vpop.f32.mrf.mxu0 }
 0x116   : >> { %v20561_v60 = vadd.f32 %v895_v4, %v632_v36  ;;  %v643_v61 = vadd.f32 %v18246_v28, %v20455_v38  ;;  %v15282_v38 = vld [vmem:[%s19958_s30 + $0x116] sm:$0xff]  ;;  %v2236_v28 = vpack.c.bf16 %v15285_v14, %v15284_v6 }
 0x117   : >> { %v634_v37 = vpop.f32.mrf.mxu1  ;;  %v898_v59 = vpop.f32.mrf.mxu0  ;;  %v15339_v6 = vld [vmem:[%s19958_s30 + $0x14f] sm:$0xff] }
 0x118   : >> { %v20564_v1 = vadd.f32 %v18280_v23, %v643_v61  ;;  %v635_v29 = vadd.f32 %v634_v37, %v20465_v45  ;;  %v15332_v45 = vld [vmem:[%s19958_s30 + $0x117] sm:$0xff] }
 0x119   : >> { %v18249_v40 = vpop.f32.mrf.mxu1  ;;  %v18283_v39 = vpop.f32.mrf.mxu0  ;;  %18452 = vmatmul.mubr.msk.bf16.gmra.mxu1 %vm281_vm2, %v20431_v13  ;;  %18486 = vmatmul.mubr.msk.bf16.gmra.mxu0 %vm281_vm2, %v2529_v56  ;;  %v15335_v13 = vld [vmem:[%s19958_s30 + $0x12f] sm:$0xff]  ;;  %v2531_v47 = vpack.c.bf16 %v15333_v9, %v15332_v45  ;;  %v15338_v9 = vld [vmem:[%s19958_s30 + $0x147] sm:$0xff] }
 0x11a   : >> { %v20572_v18 = vadd.f32 %v898_v59, %v635_v29  ;;  %v656_v15 = vadd.f32 %v18249_v40, %v20341_v21  ;;  %18455 = vmatprep.mubr.msk.bf16.mxu1 %vm281_vm2, %v2234_v44  ;;  %18489 = vmatprep.mubr.msk.bf16.mxu0 %vm281_vm2, %v2530_v32  ;;  %v2235_v21 = vpack.c.bf16 %v15283_v2, %v15282_v38  ;;  %v15287_v59 = vld [vmem:[%s19958_s30 + $0x13e] sm:$0xff]  ;;  %v15288_v38 = vld [vmem:[%s19958_s30 + $0x146] sm:$0xff]  ;;  %v15289_v45 = vld [vmem:[%s19958_s30 + $0x14e] sm:$0xff] }
 0x11b   : >> { %v647_v12 = vpop.f32.mrf.mxu1  ;;  %v911_v10 = vpop.f32.mrf.mxu0  ;;  %v2532_v23 = vpack.c.bf16 %v15335_v13, %v15334_v33 }
 0x11c   : >> { %v20583_v16 = vadd.f32 %v18283_v39, %v656_v15  ;;  %v648_v34 = vadd.f32 %v647_v12, %v20356_v27  ;;  %v15337_v39 = vld [vmem:[%s19958_s30 + $0x13f] sm:$0xff] }
 0x11d   : >> { %v18250_v4 = vpop.f32.mrf.mxu1  ;;  %v18284_v26 = vpop.f32.mrf.mxu0 }
 0x11e   : >> { %v20586_v52 = vadd.f32 %v911_v10, %v648_v34  ;;  %v659_v36 = vadd.f32 %v18250_v4, %v20363_v35  ;;  %v15286_v35 = vld [vmem:[%s19958_s30 + $0x136] sm:$0xff] }
 0x11f   : >> { %v650_v56 = vpop.f32.mrf.mxu1  ;;  %v914_v61 = vpop.f32.mrf.mxu0 }
 0x120   : >> { %v20589_v44 = vadd.f32 %v18284_v26, %v659_v36  ;;  %v651_v27 = vadd.f32 %v650_v56, %v20371_v41  ;;  %v15336_v41 = vld [vmem:[%s19958_s30 + $0x137] sm:$0xff]  ;;  %v2238_v26 = vpack.c.bf16 %v15289_v45, %v15288_v38 }
 0x121   : >> { %v18253_v32 = vpop.f32.mrf.mxu1  ;;  %v18287_v37 = vpop.f32.mrf.mxu0  ;;  %18456 = vmatmul.mubr.msk.bf16.gmra.mxu1 %vm281_vm2, %v2235_v21  ;;  %18490 = vmatmul.mubr.msk.bf16.gmra.mxu0 %vm281_vm2, %v2531_v47  ;;  %v2533_v13 = vpack.c.bf16 %v15337_v39, %v15336_v41  ;;  %v2534_v21 = vpack.c.bf16 %v15339_v6, %v15338_v9  ;;  %v15361_v41 = vld [vmem:[%s19958_s30 + $0x70] sm:$0xff] }
 0x122   : >> { %v20596_v29 = vadd.f32 %v914_v61, %v651_v27  ;;  %v672_v40 = vadd.f32 %v18253_v32, %v20375_v57  ;;  %18459 = vmatprep.mubr.msk.bf16.mxu1 %vm281_vm2, %v2236_v28  ;;  %18493 = vmatprep.mubr.msk.bf16.mxu0 %vm281_vm2, %v2532_v23  ;;  %v2237_v57 = vpack.c.bf16 %v15287_v59, %v15286_v35  ;;  %v15291_v61 = vld [vmem:[%s19958_s30 + $0x15e] sm:$0xff]  ;;  %v15360_v35 = vld [vmem:[%s19958_s30 + $0x68] sm:$0xff]  ;;  %v15411_v38 = vld [vmem:[%s19958_s30 + $0x71] sm:$0xff] }
 0x123   : >> { %v663_v2 = vpop.f32.mrf.mxu1  ;;  %v927_v15 = vpop.f32.mrf.mxu0  ;;  %v15410_v39 = vld [vmem:[%s19958_s30 + $0x69] sm:$0xff] }
 0x124   : >> { %v20607_v12 = vadd.f32 %v18287_v37, %v672_v40  ;;  %v664_v10 = vadd.f32 %v663_v2, %v20390_v48  ;;  %v15341_v37 = vld [vmem:[%s19958_s30 + $0x15f] sm:$0xff] }
 0x125   : >> { %v18254_v14 = vpop.f32.mrf.mxu1  ;;  %v18288_v33 = vpop.f32.mrf.mxu0 }
 0x126   : >> { %v20610_v34 = vadd.f32 %v927_v15, %v664_v10  ;;  %v675_v4 = vadd.f32 %v18254_v14, %v20397_v53  ;;  %v15290_v53 = vld [vmem:[%s19958_s30 + $0x156] sm:$0xff] }
 0x127   : >> { %v666_v47 = vpop.f32.mrf.mxu1  ;;  %v930_v36 = vpop.f32.mrf.mxu0 }
 0x128   : >> { %v20613_v28 = vadd.f32 %v18288_v33, %v675_v4  ;;  %v667_v48 = vadd.f32 %v666_v47, %v20405_v62  ;;  %v15340_v62 = vld [vmem:[%s19958_s30 + $0x157] sm:$0xff]  ;;  %v2816_v33 = vpack.c.bf16 %v15361_v41, %v15360_v35 }
 0x129   : >> { %v18257_v23 = vpop.f32.mrf.mxu1  ;;  %v18291_v56 = vpop.f32.mrf.mxu0  ;;  %18460 = vmatmul.mubr.msk.bf16.gmra.mxu1 %vm281_vm2, %v2237_v57  ;;  %18494 = vmatmul.mubr.msk.bf16.gmra.mxu0 %vm281_vm2, %v2533_v13  ;;  %v2535_v6 = vpack.c.bf16 %v15341_v37, %v15340_v62  ;;  %v3112_v57 = vpack.c.bf16 %v15411_v38, %v15410_v39  ;;  %v15365_v35 = vld [vmem:[%s19958_s30 + $0x90] sm:$0xff] }
 0x12a   : >> { %v20620_v27 = vadd.f32 %v930_v36, %v667_v48  ;;  %v688_v32 = vadd.f32 %v18257_v23, %v20409_v0  ;;  %18463 = vmatprep.mubr.msk.bf16.mxu1 %vm281_vm2, %v2238_v26  ;;  %18497 = vmatprep.mubr.msk.bf16.mxu0 %vm281_vm2, %v2534_v21  ;;  %v2239_v0 = vpack.c.bf16 %v15291_v61, %v15290_v53  ;;  %v15363_v23 = vld [vmem:[%s19958_s30 + $0x80] sm:$0xff] }
 0x12b   : >> { %v679_v59 = vpop.f32.mrf.mxu1  ;;  %v943_v40 = vpop.f32.mrf.mxu0 }
 0x12c   : >> { %v20631_v2 = vadd.f32 %v18291_v56, %v688_v32  ;;  %v680_v15 = vadd.f32 %v679_v59, %v20423_v7  ;;  %v15413_v56 = vld [vmem:[%s19958_s30 + $0x81] sm:$0xff]  ;;  %v15414_v59 = vld [vmem:[%s19958_s30 + $0x89] sm:$0xff] }
 0x12d   : >> { %v18258_v45 = vpop.f32.mrf.mxu1  ;;  %v18292_v9 = vpop.f32.mrf.mxu0  ;;  %v15364_v32 = vld [vmem:[%s19958_s30 + $0x88] sm:$0xff] }
 0x12e   : >> { %v20634_v10 = vadd.f32 %v943_v40, %v680_v15  ;;  %v691_v14 = vadd.f32 %v18258_v45, %v20429_v11  ;;  %v15362_v11 = vld [vmem:[%s19958_s30 + $0x78] sm:$0xff] }
 0x12f   : >> { %v682_v13 = vpop.f32.mrf.mxu1  ;;  %v946_v4 = vpop.f32.mrf.mxu0  ;;  %v15415_v40 = vld [vmem:[%s19958_s30 + $0x91] sm:$0xff]  ;;  %v15592_v15 = vld [vmem:[%s25309_s1 + $0x1a] sm:$0x3]  ;;  %v15642_v45 = vld [vmem:[%s25309_s1 + $0x1c] sm:$0x3] }
 0x130   : >> { %v20637_v26 = vadd.f32 %v18292_v9, %v691_v14  ;;  %v683_v7 = vadd.f32 %v682_v13, %v20435_v22  ;;  %v15412_v22 = vld [vmem:[%s19958_s30 + $0x79] sm:$0xff]  ;;  %v2818_v14 = vpack.c.bf16 %v15365_v35, %v15364_v32  ;;  %v15369_v32 = vld [vmem:[%s19958_s30 + $0xb0] sm:$0xff] }
 0x131   : >> { %v18261_v21 = vpop.f32.mrf.mxu1  ;;  %v18295_v47 = vpop.f32.mrf.mxu0  ;;  %18464 = vmatmul.mubr.msk.bf16.gmra.mxu1 %vm281_vm2, %v2239_v0  ;;  %18498 = vmatmul.mubr.msk.bf16.gmra.mxu0 %vm281_vm2, %v2535_v6  ;;  %v3113_v38 = vpack.c.bf16 %v15413_v56, %v15412_v22  ;;  %v15417_v22 = vld [vmem:[%s19958_s30 + $0xa1] sm:$0xff]  ;;  %v15419_v35 = vld [vmem:[%s19958_s30 + $0xb1] sm:$0xff] }
 0x132   : >> { %v20643_v36 = vadd.f32 %v946_v4, %v683_v7  ;;  %v704_v48 = vadd.f32 %v18261_v21, %v20439_v24  ;;  %18503 = vmatprep.mubr.msk.bf16.mxu1 %vm281_vm2, %v2816_v33  ;;  %18537 = vmatprep.mubr.msk.bf16.mxu0 %vm281_vm2, %v3112_v57  ;;  %v2817_v24 = vpack.c.bf16 %v15363_v23, %v15362_v11  ;;  %v15367_v11 = vld [vmem:[%s19958_s30 + $0xa0] sm:$0xff]  ;;  %v15368_v56 = vld [vmem:[%s19958_s30 + $0xa8] sm:$0xff] }
 0x133   : >> { %v695_v53 = vpop.f32.mrf.mxu1  ;;  %v959_v61 = vpop.f32.mrf.mxu0  ;;  %v3114_v33 = vpack.c.bf16 %v15415_v40, %v15414_v59  ;;  %v20671_v4 = vand.u32 %v15592_v15, %v19951_v5  ;;  %v20674_v7 = vand.u32 %v15642_v45, %v19951_v5  ;;  %v15416_v23 = vld [vmem:[%s19958_s30 + $0x99] sm:$0xff] }
 0x134   : >> { %v20652_v62 = vadd.f32 %v18295_v47, %v704_v48  ;;  %v696_v37 = vadd.f32 %v695_v53, %v20451_v30 }
 0x135   : >> { %v18262_v41 = vpop.f32.mrf.mxu1  ;;  %v18296_v39 = vpop.f32.mrf.mxu0 }
 0x136   : >> { %v20664_v9 = vadd.f32 %v959_v61, %v696_v37  ;;  %v707_v30 = vadd.f32 %v18262_v41, %v20457_v58  ;;  %v15366_v58 = vld [vmem:[%s19958_s30 + $0x98] sm:$0xff]  ;;  %v15418_v37 = vld [vmem:[%s19958_s30 + $0xa9] sm:$0xff]  ;;  %v3115_v41 = vpack.c.bf16 %v15417_v22, %v15416_v23 }
 0x137   : >> { %v698_v0 = vpop.f32.mrf.mxu1  ;;  %v962_v6 = vpop.f32.mrf.mxu0  ;;  %v2819_v40 = vpack.c.bf16 %v15367_v11, %v15366_v58  ;;  %v3116_v15 = vpack.c.bf16 %v15419_v35, %v15418_v37  ;;  %v15372_v58 = vld [vmem:[%s19958_s30 + $0xc8] sm:$0xff]  ;;  %v15373_v23 = vld [vmem:[%s19958_s30 + $0xd0] sm:$0xff] }
 0x138   : >> { %v20667_v57 = vadd.f32 %v18296_v39, %v707_v30  ;;  %v699_v13 = vadd.f32 %v698_v0, %v20467_v46  ;;  %v15422_v22 = vld [vmem:[%s19958_s30 + $0xc9] sm:$0xff] }
 0x139   : >> { %v18301_v21 = vpop.f32.mrf.mxu1  ;;  %v18335_v47 = vpop.f32.mrf.mxu0  ;;  %18504 = vmatmul.mubr.msk.bf16.vlgmr.msra.gmra.mxu1 %vm281_vm2, %v2817_v24  ;;  %18538 = vmatmul.mubr.msk.bf16.vlgmr.msra.gmra.mxu0 %vm281_vm2, %v3113_v38  ;;  %v2820_v38 = vpack.c.bf16 %v15369_v32, %v15368_v56  ;;  %v15423_v56 = vld [vmem:[%s19958_s30 + $0xd1] sm:$0xff] }
 0x13a   : >> { %v20680_v48 = vadd.f32 %v962_v6, %v699_v13  ;;  %v1272_v46 = vadd.f32 %v18301_v21, %v20488_v19  ;;  %18570 = vmatpush3.bf16.msra.mxu1 %v20470_v50  ;;  %18604 = vmatpush3.bf16.msra.mxu0 %v20473_v51 }
 0x13b   : >> { %v1143_v53 = vpop.f32.mrf.mxu1  ;;  %v1439_v61 = vpop.f32.mrf.mxu0  ;;  %18507 = vmatprep.mubr.msk.bf16.mxu1 %vm281_vm2, %v2818_v14  ;;  %18541 = vmatprep.mubr.msk.bf16.mxu0 %vm281_vm2, %v3114_v33  ;;  %v15371_v33 = vld [vmem:[%s19958_s30 + $0xc0] sm:$0xff] }
 0x13c   : >> { %v20693_v59 = vadd.f32 %v18335_v47, %v1272_v46  ;;  %v1270_v19 = vadd.f32 %v1143_v53, %v20493_v25  ;;  %18637 = vmatprep.subr.bf16.mxu1 %v20671_v4  ;;  %18671 = vmatprep.subr.bf16.mxu0 %v20674_v7  ;;  %v15421_v47 = vld [vmem:[%s19958_s30 + $0xc1] sm:$0xff] }
 0x13d   : >> { %v18302_v50 = vpop.f32.mrf.mxu1  ;;  %v18336_v51 = vpop.f32.mrf.mxu0 }
 0x13e   : >> { %v20698_v39 = vadd.f32 %v1439_v61, %v1270_v19  ;;  %v1273_v24 = vadd.f32 %v18302_v50, %v20496_v43  ;;  %v15370_v43 = vld [vmem:[%s19958_s30 + $0xb8] sm:$0xff] }
 0x13f   : >> { %v1146_v45 = vpop.f32.mrf.mxu1  ;;  %v1442_v25 = vpop.f32.mrf.mxu0 }
 0x140   : >> { %v20701_v30 = vadd.f32 %v18336_v51, %v1273_v24  ;;  %v1271_v0 = vadd.f32 %v1146_v45, %v20502_v49  ;;  %v15420_v49 = vld [vmem:[%s19958_s30 + $0xb9] sm:$0xff]  ;;  %v2822_v51 = vpack.c.bf16 %v15373_v23, %v15372_v58  ;;  %v15427_v58 = vld [vmem:[%s19958_s30 + $0xf1] sm:$0xff] }
 0x141   : >> { %v18305_v6 = vpop.f32.mrf.mxu1  ;;  %v18339_v14 = vpop.f32.mrf.mxu0  ;;  %18508 = vmatmul.mubr.msk.bf16.gmra.mxu1 %vm281_vm2, %v2819_v40  ;;  %18542 = vmatmul.mubr.msk.bf16.gmra.mxu0 %vm281_vm2, %v3115_v41  ;;  %v3117_v35 = vpack.c.bf16 %v15421_v47, %v15420_v49  ;;  %v3118_v40 = vpack.c.bf16 %v15423_v56, %v15422_v22  ;;  %v15377_v49 = vld [vmem:[%s19958_s30 + $0xf0] sm:$0xff] }
 0x142   : >> { %v20708_v13 = vadd.f32 %v1442_v25, %v1271_v0  ;;  %v1276_v21 = vadd.f32 %v18305_v6, %v20512_v3  ;;  %18511 = vmatprep.mubr.msk.bf16.mxu1 %vm281_vm2, %v2820_v38  ;;  %18545 = vmatprep.mubr.msk.bf16.mxu0 %vm281_vm2, %v3116_v15  ;;  %v2821_v3 = vpack.c.bf16 %v15371_v33, %v15370_v43  ;;  %v15375_v25 = vld [vmem:[%s19958_s30 + $0xe0] sm:$0xff]  ;;  %v15376_v43 = vld [vmem:[%s19958_s30 + $0xe8] sm:$0xff] }
 0x143   : >> { %v1159_v11 = vpop.f32.mrf.mxu1  ;;  %v1455_v46 = vpop.f32.mrf.mxu0  ;;  %v15426_v47 = vld [vmem:[%s19958_s30 + $0xe9] sm:$0xff] }
 0x144   : >> { %v20719_v53 = vadd.f32 %v18339_v14, %v1276_v21  ;;  %v1274_v61 = vadd.f32 %v1159_v11, %v20515_v42  ;;  %v15425_v14 = vld [vmem:[%s19958_s30 + $0xe1] sm:$0xff] }
 0x145   : >> { %v18306_v32 = vpop.f32.mrf.mxu1  ;;  %v18340_v37 = vpop.f32.mrf.mxu0 }
 0x146   : >> { %v20722_v19 = vadd.f32 %v1455_v46, %v1274_v61  ;;  %v1277_v50 = vadd.f32 %v18306_v32, %v20518_v20  ;;  %v15374_v20 = vld [vmem:[%s19958_s30 + $0xd8] sm:$0xff] }
 0x147   : >> { %v1162_v41 = vpop.f32.mrf.mxu1  ;;  %v1458_v24 = vpop.f32.mrf.mxu0 }
 0x148   : >> { %v20725_v38 = vadd.f32 %v18340_v37, %v1277_v50  ;;  %v1275_v42 = vadd.f32 %v1162_v41, %v20524_v31  ;;  %v15424_v31 = vld [vmem:[%s19958_s30 + $0xd9] sm:$0xff]  ;;  %v2824_v37 = vpack.c.bf16 %v15377_v49, %v15376_v43  ;;  %v15431_v43 = vld [vmem:[%s19958_s30 + $0x111] sm:$0xff] }
 0x149   : >> { %v18309_v15 = vpop.f32.mrf.mxu1  ;;  %v18343_v45 = vpop.f32.mrf.mxu0  ;;  %18512 = vmatmul.mubr.msk.bf16.gmra.mxu1 %vm281_vm2, %v2821_v3  ;;  %18546 = vmatmul.mubr.msk.bf16.gmra.mxu0 %vm281_vm2, %v3117_v35  ;;  %v3119_v56 = vpack.c.bf16 %v15425_v14, %v15424_v31  ;;  %v3120_v3 = vpack.c.bf16 %v15427_v58, %v15426_v47  ;;  %v15381_v31 = vld [vmem:[%s19958_s30 + $0x110] sm:$0xff] }
 0x14a   : >> { %v20732_v0 = vadd.f32 %v1458_v24, %v1275_v42  ;;  %v1280_v6 = vadd.f32 %v18309_v15, %v20534_v54  ;;  %18515 = vmatprep.mubr.msk.bf16.mxu1 %vm281_vm2, %v2822_v51  ;;  %18549 = vmatprep.mubr.msk.bf16.mxu0 %vm281_vm2, %v3118_v40  ;;  %v2823_v54 = vpack.c.bf16 %v15375_v25, %v15374_v20  ;;  %v15379_v24 = vld [vmem:[%s19958_s30 + $0x100] sm:$0xff]  ;;  %v15380_v20 = vld [vmem:[%s19958_s30 + $0x108] sm:$0xff] }
 0x14b   : >> { %v1175_v33 = vpop.f32.mrf.mxu1  ;;  %v1471_v21 = vpop.f32.mrf.mxu0  ;;  %v15430_v14 = vld [vmem:[%s19958_s30 + $0x109] sm:$0xff] }
 0x14c   : >> { %v20743_v11 = vadd.f32 %v18343_v45, %v1280_v6  ;;  %v1278_v46 = vadd.f32 %v1175_v33, %v20537_v63  ;;  %v15429_v45 = vld [vmem:[%s19958_s30 + $0x101] sm:$0xff] }
 0x14d   : >> { %v18310_v23 = vpop.f32.mrf.mxu1  ;;  %v18344_v22 = vpop.f32.mrf.mxu0 }
 0x14e   : >> { %v20746_v61 = vadd.f32 %v1471_v21, %v1278_v46  ;;  %v1281_v32 = vadd.f32 %v18310_v23, %v20540_v8  ;;  %v15378_v8 = vld [vmem:[%s19958_s30 + $0xf8] sm:$0xff] }
 0x14f   : >> { %v1178_v35 = vpop.f32.mrf.mxu1  ;;  %v1474_v50 = vpop.f32.mrf.mxu0 }
 0x150   : >> { %v20749_v51 = vadd.f32 %v18344_v22, %v1281_v32  ;;  %v1279_v63 = vadd.f32 %v1178_v35, %v20546_v17  ;;  %v15428_v17 = vld [vmem:[%s19958_s30 + $0xf9] sm:$0xff]  ;;  %v2826_v22 = vpack.c.bf16 %v15381_v31, %v15380_v20  ;;  %v15435_v20 = vld [vmem:[%s19958_s30 + $0x131] sm:$0xff] }
 0x151   : >> { %v18313_v40 = vpop.f32.mrf.mxu1  ;;  %v18347_v41 = vpop.f32.mrf.mxu0  ;;  %18516 = vmatmul.mubr.msk.bf16.gmra.mxu1 %vm281_vm2, %v2823_v54  ;;  %18550 = vmatmul.mubr.msk.bf16.gmra.mxu0 %vm281_vm2, %v3119_v56  ;;  %v3121_v58 = vpack.c.bf16 %v15429_v45, %v15428_v17  ;;  %v3122_v54 = vpack.c.bf16 %v15431_v43, %v15430_v14  ;;  %v15385_v17 = vld [vmem:[%s19958_s30 + $0x130] sm:$0xff] }
 0x152   : >> { %v20756_v42 = vadd.f32 %v1474_v50, %v1279_v63  ;;  %v1284_v15 = vadd.f32 %v18313_v40, %v20558_v55  ;;  %18519 = vmatprep.mubr.msk.bf16.mxu1 %vm281_vm2, %v2824_v37  ;;  %18553 = vmatprep.mubr.msk.bf16.mxu0 %vm281_vm2, %v3120_v3  ;;  %v2825_v55 = vpack.c.bf16 %v15379_v24, %v15378_v8  ;;  %v15383_v50 = vld [vmem:[%s19958_s30 + $0x120] sm:$0xff]  ;;  %v15384_v8 = vld [vmem:[%s19958_s30 + $0x128] sm:$0xff] }
 0x153   : >> { %v1191_v25 = vpop.f32.mrf.mxu1  ;;  %v1487_v6 = vpop.f32.mrf.mxu0  ;;  %v15434_v45 = vld [vmem:[%s19958_s30 + $0x129] sm:$0xff] }
 0x154   : >> { %v20767_v33 = vadd.f32 %v18347_v41, %v1284_v15  ;;  %v1282_v21 = vadd.f32 %v1191_v25, %v20561_v60  ;;  %v15433_v41 = vld [vmem:[%s19958_s30 + $0x121] sm:$0xff] }
 0x155   : >> { %v18314_v49 = vpop.f32.mrf.mxu1  ;;  %v18348_v47 = vpop.f32.mrf.mxu0 }
 0x156   : >> { %v20770_v46 = vadd.f32 %v1487_v6, %v1282_v21  ;;  %v1285_v23 = vadd.f32 %v18314_v49, %v20564_v1  ;;  %v15382_v1 = vld [vmem:[%s19958_s30 + $0x118] sm:$0xff] }
 0x157   : >> { %v1194_v56 = vpop.f32.mrf.mxu1  ;;  %v1490_v32 = vpop.f32.mrf.mxu0 }
 0x158   : >> { %v20773_v37 = vadd.f32 %v18348_v47, %v1285_v23  ;;  %v1283_v60 = vadd.f32 %v1194_v56, %v20572_v18  ;;  %v15432_v18 = vld [vmem:[%s19958_s30 + $0x119] sm:$0xff]  ;;  %v2828_v47 = vpack.c.bf16 %v15385_v17, %v15384_v8  ;;  %v15439_v8 = vld [vmem:[%s19958_s30 + $0x151] sm:$0xff] }
 0x159   : >> { %v18317_v3 = vpop.f32.mrf.mxu1  ;;  %v18351_v35 = vpop.f32.mrf.mxu0  ;;  %18520 = vmatmul.mubr.msk.bf16.gmra.mxu1 %vm281_vm2, %v2825_v55  ;;  %18554 = vmatmul.mubr.msk.bf16.gmra.mxu0 %vm281_vm2, %v3121_v58  ;;  %v3123_v43 = vpack.c.bf16 %v15433_v41, %v15432_v18  ;;  %v3124_v55 = vpack.c.bf16 %v15435_v20, %v15434_v45  ;;  %v15389_v18 = vld [vmem:[%s19958_s30 + $0x150] sm:$0xff] }
 0x15a   : >> { %v20780_v63 = vadd.f32 %v1490_v32, %v1283_v60  ;;  %v1288_v40 = vadd.f32 %v18317_v3, %v20583_v16  ;;  %18523 = vmatprep.mubr.msk.bf16.mxu1 %vm281_vm2, %v2826_v22  ;;  %18557 = vmatprep.mubr.msk.bf16.mxu0 %vm281_vm2, %v3122_v54  ;;  %v2827_v16 = vpack.c.bf16 %v15383_v50, %v15382_v1  ;;  %v15387_v32 = vld [vmem:[%s19958_s30 + $0x140] sm:$0xff]  ;;  %v15388_v1 = vld [vmem:[%s19958_s30 + $0x148] sm:$0xff] }
 0x15b   : >> { %v1207_v24 = vpop.f32.mrf.mxu1  ;;  %v1503_v15 = vpop.f32.mrf.mxu0  ;;  %v15438_v41 = vld [vmem:[%s19958_s30 + $0x149] sm:$0xff] }
 0x15c   : >> { %v20791_v25 = vadd.f32 %v18351_v35, %v1288_v40  ;;  %v1286_v6 = vadd.f32 %v1207_v24, %v20586_v52  ;;  %v15437_v35 = vld [vmem:[%s19958_s30 + $0x141] sm:$0xff] }
 0x15d   : >> { %v18318_v31 = vpop.f32.mrf.mxu1  ;;  %v18352_v14 = vpop.f32.mrf.mxu0 }
 0x15e   : >> { %v20794_v21 = vadd.f32 %v1503_v15, %v1286_v6  ;;  %v1289_v49 = vadd.f32 %v18318_v31, %v20589_v44  ;;  %v15386_v44 = vld [vmem:[%s19958_s30 + $0x138] sm:$0xff] }
 0x15f   : >> { %v1210_v58 = vpop.f32.mrf.mxu1  ;;  %v1506_v23 = vpop.f32.mrf.mxu0 }
 0x160   : >> { %v20797_v22 = vadd.f32 %v18352_v14, %v1289_v49  ;;  %v1287_v52 = vadd.f32 %v1210_v58, %v20596_v29  ;;  %v15436_v29 = vld [vmem:[%s19958_s30 + $0x139] sm:$0xff]  ;;  %v2830_v14 = vpack.c.bf16 %v15389_v18, %v15388_v1 }
 0x161   : >> { %v18321_v54 = vpop.f32.mrf.mxu1  ;;  %v18355_v56 = vpop.f32.mrf.mxu0  ;;  %18524 = vmatmul.mubr.msk.bf16.gmra.mxu1 %vm281_vm2, %v2827_v16  ;;  %18558 = vmatmul.mubr.msk.bf16.gmra.mxu0 %vm281_vm2, %v3123_v43  ;;  %v3125_v20 = vpack.c.bf16 %v15437_v35, %v15436_v29  ;;  %v3126_v16 = vpack.c.bf16 %v15439_v8, %v15438_v41  ;;  %v15461_v29 = vld [vmem:[%s19958_s30 + $0x72] sm:$0xff] }
 0x162   : >> { %v20804_v60 = vadd.f32 %v1506_v23, %v1287_v52  ;;  %v1292_v3 = vadd.f32 %v18321_v54, %v20607_v12  ;;  %18527 = vmatprep.mubr.msk.bf16.mxu1 %vm281_vm2, %v2828_v47  ;;  %18561 = vmatprep.mubr.msk.bf16.mxu0 %vm281_vm2, %v3124_v55  ;;  %v2829_v12 = vpack.c.bf16 %v15387_v32, %v15386_v44  ;;  %v15391_v23 = vld [vmem:[%s19958_s30 + $0x160] sm:$0xff]  ;;  %v15460_v44 = vld [vmem:[%s19958_s30 + $0x6a] sm:$0xff]  ;;  %v15511_v1 = vld [vmem:[%s19958_s30 + $0x73] sm:$0xff] }
 0x163   : >> { %v1223_v50 = vpop.f32.mrf.mxu1  ;;  %v1519_v40 = vpop.f32.mrf.mxu0  ;;  %v15510_v35 = vld [vmem:[%s19958_s30 + $0x6b] sm:$0xff] }
 0x164   : >> { %v20815_v24 = vadd.f32 %v18355_v56, %v1292_v3  ;;  %v1290_v15 = vadd.f32 %v1223_v50, %v20610_v34  ;;  %v15441_v56 = vld [vmem:[%s19958_s30 + $0x161] sm:$0xff] }
 0x165   : >> { %v18322_v17 = vpop.f32.mrf.mxu1  ;;  %v18356_v45 = vpop.f32.mrf.mxu0 }
 0x166   : >> { %v20818_v6 = vadd.f32 %v1519_v40, %v1290_v15  ;;  %v1293_v31 = vadd.f32 %v18322_v17, %v20613_v28  ;;  %v15390_v28 = vld [vmem:[%s19958_s30 + $0x158] sm:$0xff] }
 0x167   : >> { %v1226_v43 = vpop.f32.mrf.mxu1  ;;  %v1522_v49 = vpop.f32.mrf.mxu0 }
 0x168   : >> { %v20821_v47 = vadd.f32 %v18356_v45, %v1293_v31  ;;  %v1291_v34 = vadd.f32 %v1226_v43, %v20620_v27  ;;  %v15440_v27 = vld [vmem:[%s19958_s30 + $0x159] sm:$0xff]  ;;  %v3408_v45 = vpack.c.bf16 %v15461_v29, %v15460_v44 }
 0x169   : >> { %v18325_v55 = vpop.f32.mrf.mxu1  ;;  %v18359_v58 = vpop.f32.mrf.mxu0  ;;  %18528 = vmatmul.mubr.msk.bf16.gmra.mxu1 %vm281_vm2, %v2829_v12  ;;  %18562 = vmatmul.mubr.msk.bf16.gmra.mxu0 %vm281_vm2, %v3125_v20  ;;  %v3127_v8 = vpack.c.bf16 %v15441_v56, %v15440_v27  ;;  %v3704_v12 = vpack.c.bf16 %v15511_v1, %v15510_v35  ;;  %v15465_v44 = vld [vmem:[%s19958_s30 + $0x92] sm:$0xff] }
 0x16a   : >> { %v20828_v52 = vadd.f32 %v1522_v49, %v1291_v34  ;;  %v1296_v54 = vadd.f32 %v18325_v55, %v20631_v2  ;;  %18531 = vmatprep.mubr.msk.bf16.mxu1 %vm281_vm2, %v2830_v14  ;;  %18565 = vmatprep.mubr.msk.bf16.mxu0 %vm281_vm2, %v3126_v16  ;;  %v2831_v2 = vpack.c.bf16 %v15391_v23, %v15390_v28  ;;  %v15463_v55 = vld [vmem:[%s19958_s30 + $0x82] sm:$0xff] }
 0x16b   : >> { %v1239_v32 = vpop.f32.mrf.mxu1  ;;  %v1535_v3 = vpop.f32.mrf.mxu0 }
 0x16c   : >> { %v20839_v50 = vadd.f32 %v18359_v58, %v1296_v54  ;;  %v1294_v40 = vadd.f32 %v1239_v32, %v20634_v10  ;;  %v15513_v58 = vld [vmem:[%s19958_s30 + $0x83] sm:$0xff]  ;;  %v15514_v32 = vld [vmem:[%s19958_s30 + $0x8b] sm:$0xff] }
 0x16d   : >> { %v18326_v18 = vpop.f32.mrf.mxu1  ;;  %v18360_v41 = vpop.f32.mrf.mxu0  ;;  %v15464_v54 = vld [vmem:[%s19958_s30 + $0x8a] sm:$0xff] }
 0x16e   : >> { %v20842_v15 = vadd.f32 %v1535_v3, %v1294_v40  ;;  %v1297_v17 = vadd.f32 %v18326_v18, %v20637_v26  ;;  %v15462_v26 = vld [vmem:[%s19958_s30 + $0x7a] sm:$0xff] }
 0x16f   : >> { %v1242_v20 = vpop.f32.mrf.mxu1  ;;  %v1538_v31 = vpop.f32.mrf.mxu0  ;;  %v15515_v3 = vld [vmem:[%s19958_s30 + $0x93] sm:$0xff]  ;;  %v15692_v40 = vld [vmem:[%s25309_s1 + $0x1e] sm:$0x3]  ;;  %v15742_v18 = vld [vmem:[%s25309_s1 + $0x20] sm:$0x3] }
 0x170   : >> { %v20845_v14 = vadd.f32 %v18360_v41, %v1297_v17  ;;  %v1295_v10 = vadd.f32 %v1242_v20, %v20643_v36  ;;  %v15512_v36 = vld [vmem:[%s19958_s30 + $0x7b] sm:$0xff]  ;;  %v3410_v17 = vpack.c.bf16 %v15465_v44, %v15464_v54  ;;  %v15469_v54 = vld [vmem:[%s19958_s30 + $0xb2] sm:$0xff] }
 0x171   : >> { %v18329_v16 = vpop.f32.mrf.mxu1  ;;  %v18363_v43 = vpop.f32.mrf.mxu0  ;;  %18532 = vmatmul.mubr.msk.bf16.gmra.mxu1 %vm281_vm2, %v2831_v2  ;;  %18566 = vmatmul.mubr.msk.bf16.gmra.mxu0 %vm281_vm2, %v3127_v8  ;;  %v3705_v1 = vpack.c.bf16 %v15513_v58, %v15512_v36  ;;  %v15517_v36 = vld [vmem:[%s19958_s30 + $0xa3] sm:$0xff]  ;;  %v15519_v44 = vld [vmem:[%s19958_s30 + $0xb3] sm:$0xff] }
 0x172   : >> { %v20851_v49 = vadd.f32 %v1538_v31, %v1295_v10  ;;  %v1300_v34 = vadd.f32 %v18329_v16, %v20652_v62  ;;  %18571 = vmatprep.mubr.msk.bf16.mxu1 %vm281_vm2, %v3408_v45  ;;  %18605 = vmatprep.mubr.msk.bf16.mxu0 %vm281_vm2, %v3704_v12  ;;  %v3409_v62 = vpack.c.bf16 %v15463_v55, %v15462_v26  ;;  %v15467_v26 = vld [vmem:[%s19958_s30 + $0xa2] sm:$0xff]  ;;  %v15468_v58 = vld [vmem:[%s19958_s30 + $0xaa] sm:$0xff] }
 0x173   : >> { %v1255_v28 = vpop.f32.mrf.mxu1  ;;  %v1551_v23 = vpop.f32.mrf.mxu0  ;;  %v3706_v45 = vpack.c.bf16 %v15515_v3, %v15514_v32  ;;  %v20879_v31 = vand.u32 %v15692_v40, %v19951_v5  ;;  %v20882_v10 = vand.u32 %v15742_v18, %v19951_v5  ;;  %v15516_v55 = vld [vmem:[%s19958_s30 + $0x9b] sm:$0xff] }
 0x174   : >> { %v20860_v27 = vadd.f32 %v18363_v43, %v1300_v34  ;;  %v1298_v56 = vadd.f32 %v1255_v28, %v20664_v9 }
 0x175   : >> { %v18330_v29 = vpop.f32.mrf.mxu1  ;;  %v18364_v35 = vpop.f32.mrf.mxu0 }
 0x176   : >> { %v20872_v41 = vadd.f32 %v1551_v23, %v1298_v56  ;;  %v1301_v9 = vadd.f32 %v18330_v29, %v20667_v57  ;;  %v15466_v57 = vld [vmem:[%s19958_s30 + $0x9a] sm:$0xff]  ;;  %v15518_v56 = vld [vmem:[%s19958_s30 + $0xab] sm:$0xff]  ;;  %v3707_v29 = vpack.c.bf16 %v15517_v36, %v15516_v55 }
 0x177   : >> { %v1258_v2 = vpop.f32.mrf.mxu1  ;;  %v1554_v8 = vpop.f32.mrf.mxu0  ;;  %v3411_v3 = vpack.c.bf16 %v15467_v26, %v15466_v57  ;;  %v3708_v40 = vpack.c.bf16 %v15519_v44, %v15518_v56  ;;  %v15472_v57 = vld [vmem:[%s19958_s30 + $0xca] sm:$0xff]  ;;  %v15473_v55 = vld [vmem:[%s19958_s30 + $0xd2] sm:$0xff] }
 0x178   : >> { %v20875_v12 = vadd.f32 %v18364_v35, %v1301_v9  ;;  %v1299_v20 = vadd.f32 %v1258_v2, %v20680_v48  ;;  %v15522_v36 = vld [vmem:[%s19958_s30 + $0xcb] sm:$0xff] }
 0x179   : >> { %v18369_v16 = vpop.f32.mrf.mxu1  ;;  %v18403_v43 = vpop.f32.mrf.mxu0  ;;  %18572 = vmatmul.mubr.msk.bf16.vlgmr.msra.gmra.mxu1 %vm281_vm2, %v3409_v62  ;;  %18606 = vmatmul.mubr.msk.bf16.vlgmr.msra.gmra.mxu0 %vm281_vm2, %v3705_v1  ;;  %v3412_v1 = vpack.c.bf16 %v15469_v54, %v15468_v58  ;;  %v15523_v58 = vld [vmem:[%s19958_s30 + $0xd3] sm:$0xff] }
 0x17a   : >> { %v20888_v34 = vadd.f32 %v1554_v8, %v1299_v20  ;;  %v1864_v48 = vadd.f32 %v18369_v16, %v20693_v59  ;;  %18638 = vmatpush3.bf16.msra.mxu1 %v20671_v4  ;;  %18672 = vmatpush3.bf16.msra.mxu0 %v20674_v7 }
 0x17b   : >> { %v1735_v28 = vpop.f32.mrf.mxu1  ;;  %v2031_v23 = vpop.f32.mrf.mxu0  ;;  %18575 = vmatprep.mubr.msk.bf16.mxu1 %vm281_vm2, %v3410_v17  ;;  %18609 = vmatprep.mubr.msk.bf16.mxu0 %vm281_vm2, %v3706_v45  ;;  %v15471_v45 = vld [vmem:[%s19958_s30 + $0xc2] sm:$0xff] }
 0x17c   : >> { %v20901_v32 = vadd.f32 %v18403_v43, %v1864_v48  ;;  %v1862_v59 = vadd.f32 %v1735_v28, %v20698_v39  ;;  %18705 = vmatprep.subr.bf16.mxu1 %v20879_v31  ;;  %18739 = vmatprep.subr.bf16.mxu0 %v20882_v10  ;;  %v15521_v43 = vld [vmem:[%s19958_s30 + $0xc3] sm:$0xff] }
 0x17d   : >> { %v18370_v4 = vpop.f32.mrf.mxu1  ;;  %v18404_v7 = vpop.f32.mrf.mxu0 }
 0x17e   : >> { %v20906_v35 = vadd.f32 %v2031_v23, %v1862_v59  ;;  %v1865_v62 = vadd.f32 %v18370_v4, %v20701_v30  ;;  %v15470_v30 = vld [vmem:[%s19958_s30 + $0xba] sm:$0xff] }
 0x17f   : >> { %v1738_v18 = vpop.f32.mrf.mxu1  ;;  %v2034_v39 = vpop.f32.mrf.mxu0 }
 0x180   : >> { %v20909_v9 = vadd.f32 %v18404_v7, %v1865_v62  ;;  %v1863_v2 = vadd.f32 %v1738_v18, %v20708_v13  ;;  %v15520_v13 = vld [vmem:[%s19958_s30 + $0xbb] sm:$0xff]  ;;  %v3414_v7 = vpack.c.bf16 %v15473_v55, %v15472_v57  ;;  %v15527_v57 = vld [vmem:[%s19958_s30 + $0xf3] sm:$0xff] }
 0x181   : >> { %v18373_v8 = vpop.f32.mrf.mxu1  ;;  %v18407_v17 = vpop.f32.mrf.mxu0  ;;  %18576 = vmatmul.mubr.msk.bf16.gmra.mxu1 %vm281_vm2, %v3411_v3  ;;  %18610 = vmatmul.mubr.msk.bf16.gmra.mxu0 %vm281_vm2, %v3707_v29  ;;  %v3709_v44 = vpack.c.bf16 %v15521_v43, %v15520_v13  ;;  %v3710_v3 = vpack.c.bf16 %v15523_v58, %v15522_v36  ;;  %v15477_v13 = vld [vmem:[%s19958_s30 + $0xf2] sm:$0xff] }
 0x182   : >> { %v20916_v20 = vadd.f32 %v2034_v39, %v1863_v2  ;;  %v1868_v16 = vadd.f32 %v18373_v8, %v20719_v53  ;;  %18579 = vmatprep.mubr.msk.bf16.mxu1 %vm281_vm2, %v3412_v1  ;;  %18613 = vmatprep.mubr.msk.bf16.mxu0 %vm281_vm2, %v3708_v40  ;;  %v3413_v53 = vpack.c.bf16 %v15471_v45, %v15470_v30  ;;  %v15475_v39 = vld [vmem:[%s19958_s30 + $0xe2] sm:$0xff]  ;;  %v15476_v30 = vld [vmem:[%s19958_s30 + $0xea] sm:$0xff] }
 0x183   : >> { %v1751_v26 = vpop.f32.mrf.mxu1  ;;  %v2047_v48 = vpop.f32.mrf.mxu0  ;;  %v15526_v43 = vld [vmem:[%s19958_s30 + $0xeb] sm:$0xff] }
 0x184   : >> { %v20927_v28 = vadd.f32 %v18407_v17, %v1868_v16  ;;  %v1866_v23 = vadd.f32 %v1751_v26, %v20722_v19  ;;  %v15525_v17 = vld [vmem:[%s19958_s30 + $0xe3] sm:$0xff] }
 0x185   : >> { %v18374_v54 = vpop.f32.mrf.mxu1  ;;  %v18408_v56 = vpop.f32.mrf.mxu0 }
 0x186   : >> { %v20930_v59 = vadd.f32 %v2047_v48, %v1866_v23  ;;  %v1869_v4 = vadd.f32 %v18374_v54, %v20725_v38  ;;  %v15474_v38 = vld [vmem:[%s19958_s30 + $0xda] sm:$0xff] }
 0x187   : >> { %v1754_v29 = vpop.f32.mrf.mxu1  ;;  %v2050_v62 = vpop.f32.mrf.mxu0 }
 0x188   : >> { %v20933_v1 = vadd.f32 %v18408_v56, %v1869_v4  ;;  %v1867_v19 = vadd.f32 %v1754_v29, %v20732_v0  ;;  %v15524_v0 = vld [vmem:[%s19958_s30 + $0xdb] sm:$0xff]  ;;  %v3416_v56 = vpack.c.bf16 %v15477_v13, %v15476_v30  ;;  %v15531_v30 = vld [vmem:[%s19958_s30 + $0x113] sm:$0xff] }
 0x189   : >> { %v18377_v40 = vpop.f32.mrf.mxu1  ;;  %v18411_v18 = vpop.f32.mrf.mxu0  ;;  %18580 = vmatmul.mubr.msk.bf16.gmra.mxu1 %vm281_vm2, %v3413_v53  ;;  %18614 = vmatmul.mubr.msk.bf16.gmra.mxu0 %vm281_vm2, %v3709_v44  ;;  %v3711_v58 = vpack.c.bf16 %v15525_v17, %v15524_v0  ;;  %v3712_v53 = vpack.c.bf16 %v15527_v57, %v15526_v43  ;;  %v15481_v0 = vld [vmem:[%s19958_s30 + $0x112] sm:$0xff] }
 0x18a   : >> { %v20940_v2 = vadd.f32 %v2050_v62, %v1867_v19  ;;  %v1872_v8 = vadd.f32 %v18377_v40, %v20743_v11  ;;  %18583 = vmatprep.mubr.msk.bf16.mxu1 %vm281_vm2, %v3414_v7  ;;  %18617 = vmatprep.mubr.msk.bf16.mxu0 %vm281_vm2, %v3710_v3  ;;  %v3415_v11 = vpack.c.bf16 %v15475_v39, %v15474_v38  ;;  %v15479_v62 = vld [vmem:[%s19958_s30 + $0x102] sm:$0xff]  ;;  %v15480_v38 = vld [vmem:[%s19958_s30 + $0x10a] sm:$0xff] }
 0x18b   : >> { %v1767_v45 = vpop.f32.mrf.mxu1  ;;  %v2063_v16 = vpop.f32.mrf.mxu0  ;;  %v15530_v17 = vld [vmem:[%s19958_s30 + $0x10b] sm:$0xff] }
 0x18c   : >> { %v20951_v26 = vadd.f32 %v18411_v18, %v1872_v8  ;;  %v1870_v48 = vadd.f32 %v1767_v45, %v20746_v61  ;;  %v15529_v18 = vld [vmem:[%s19958_s30 + $0x103] sm:$0xff] }
 0x18d   : >> { %v18378_v55 = vpop.f32.mrf.mxu1  ;;  %v18412_v36 = vpop.f32.mrf.mxu0 }
 0x18e   : >> { %v20954_v23 = vadd.f32 %v2063_v16, %v1870_v48  ;;  %v1873_v54 = vadd.f32 %v18378_v55, %v20749_v51  ;;  %v15478_v51 = vld [vmem:[%s19958_s30 + $0xfa] sm:$0xff] }
 0x18f   : >> { %v1770_v44 = vpop.f32.mrf.mxu1  ;;  %v2066_v4 = vpop.f32.mrf.mxu0 }
 0x190   : >> { %v20957_v7 = vadd.f32 %v18412_v36, %v1873_v54  ;;  %v1871_v61 = vadd.f32 %v1770_v44, %v20756_v42  ;;  %v15528_v42 = vld [vmem:[%s19958_s30 + $0xfb] sm:$0xff]  ;;  %v3418_v36 = vpack.c.bf16 %v15481_v0, %v15480_v38  ;;  %v15535_v38 = vld [vmem:[%s19958_s30 + $0x133] sm:$0xff] }
 0x191   : >> { %v18381_v3 = vpop.f32.mrf.mxu1  ;;  %v18415_v29 = vpop.f32.mrf.mxu0  ;;  %18584 = vmatmul.mubr.msk.bf16.gmra.mxu1 %vm281_vm2, %v3415_v11  ;;  %18618 = vmatmul.mubr.msk.bf16.gmra.mxu0 %vm281_vm2, %v3711_v58  ;;  %v3713_v57 = vpack.c.bf16 %v15529_v18, %v15528_v42  ;;  %v3714_v11 = vpack.c.bf16 %v15531_v30, %v15530_v17  ;;  %v15485_v42 = vld [vmem:[%s19958_s30 + $0x132] sm:$0xff] }
 0x192   : >> { %v20964_v19 = vadd.f32 %v2066_v4, %v1871_v61  ;;  %v1876_v40 = vadd.f32 %v18381_v3, %v20767_v33  ;;  %18587 = vmatprep.mubr.msk.bf16.mxu1 %vm281_vm2, %v3416_v56  ;;  %18621 = vmatprep.mubr.msk.bf16.mxu0 %vm281_vm2, %v3712_v53  ;;  %v3417_v33 = vpack.c.bf16 %v15479_v62, %v15478_v51  ;;  %v15483_v4 = vld [vmem:[%s19958_s30 + $0x122] sm:$0xff]  ;;  %v15484_v51 = vld [vmem:[%s19958_s30 + $0x12a] sm:$0xff] }
 0x193   : >> { %v1783_v39 = vpop.f32.mrf.mxu1  ;;  %v2079_v8 = vpop.f32.mrf.mxu0  ;;  %v15534_v18 = vld [vmem:[%s19958_s30 + $0x12b] sm:$0xff] }
 0x194   : >> { %v20975_v45 = vadd.f32 %v18415_v29, %v1876_v40  ;;  %v1874_v16 = vadd.f32 %v1783_v39, %v20770_v46  ;;  %v15533_v29 = vld [vmem:[%s19958_s30 + $0x123] sm:$0xff] }
 0x195   : >> { %v18382_v13 = vpop.f32.mrf.mxu1  ;;  %v18416_v43 = vpop.f32.mrf.mxu0 }
 0x196   : >> { %v20978_v48 = vadd.f32 %v2079_v8, %v1874_v16  ;;  %v1877_v55 = vadd.f32 %v18382_v13, %v20773_v37  ;;  %v15482_v37 = vld [vmem:[%s19958_s30 + $0x11a] sm:$0xff] }
 0x197   : >> { %v1786_v58 = vpop.f32.mrf.mxu1  ;;  %v2082_v54 = vpop.f32.mrf.mxu0 }
 0x198   : >> { %v20981_v56 = vadd.f32 %v18416_v43, %v1877_v55  ;;  %v1875_v46 = vadd.f32 %v1786_v58, %v20780_v63  ;;  %v15532_v63 = vld [vmem:[%s19958_s30 + $0x11b] sm:$0xff]  ;;  %v3420_v43 = vpack.c.bf16 %v15485_v42, %v15484_v51  ;;  %v15539_v51 = vld [vmem:[%s19958_s30 + $0x153] sm:$0xff] }
 0x199   : >> { %v18385_v53 = vpop.f32.mrf.mxu1  ;;  %v18419_v44 = vpop.f32.mrf.mxu0  ;;  %18588 = vmatmul.mubr.msk.bf16.gmra.mxu1 %vm281_vm2, %v3417_v33  ;;  %18622 = vmatmul.mubr.msk.bf16.gmra.mxu0 %vm281_vm2, %v3713_v57  ;;  %v3715_v30 = vpack.c.bf16 %v15533_v29, %v15532_v63  ;;  %v3716_v33 = vpack.c.bf16 %v15535_v38, %v15534_v18  ;;  %v15489_v63 = vld [vmem:[%s19958_s30 + $0x152] sm:$0xff] }
 0x19a   : >> { %v20988_v61 = vadd.f32 %v2082_v54, %v1875_v46  ;;  %v1880_v3 = vadd.f32 %v18385_v53, %v20791_v25  ;;  %18591 = vmatprep.mubr.msk.bf16.mxu1 %vm281_vm2, %v3418_v36  ;;  %18625 = vmatprep.mubr.msk.bf16.mxu0 %vm281_vm2, %v3714_v11  ;;  %v3419_v25 = vpack.c.bf16 %v15483_v4, %v15482_v37  ;;  %v15487_v54 = vld [vmem:[%s19958_s30 + $0x142] sm:$0xff]  ;;  %v15488_v37 = vld [vmem:[%s19958_s30 + $0x14a] sm:$0xff] }
 0x19b   : >> { %v1799_v62 = vpop.f32.mrf.mxu1  ;;  %v2095_v40 = vpop.f32.mrf.mxu0  ;;  %v15538_v29 = vld [vmem:[%s19958_s30 + $0x14b] sm:$0xff] }
 0x19c   : >> { %v20999_v39 = vadd.f32 %v18419_v44, %v1880_v3  ;;  %v1878_v8 = vadd.f32 %v1799_v62, %v20794_v21  ;;  %v15537_v44 = vld [vmem:[%s19958_s30 + $0x143] sm:$0xff] }
 0x19d   : >> { %v18386_v0 = vpop.f32.mrf.mxu1  ;;  %v18420_v17 = vpop.f32.mrf.mxu0 }
 0x19e   : >> { %v21002_v16 = vadd.f32 %v2095_v40, %v1878_v8  ;;  %v1881_v13 = vadd.f32 %v18386_v0, %v20797_v22  ;;  %v15486_v22 = vld [vmem:[%s19958_s30 + $0x13a] sm:$0xff] }
 0x19f   : >> { %v1802_v57 = vpop.f32.mrf.mxu1  ;;  %v2098_v55 = vpop.f32.mrf.mxu0 }
 0x1a0   : >> { %v21005_v36 = vadd.f32 %v18420_v17, %v1881_v13  ;;  %v1879_v21 = vadd.f32 %v1802_v57, %v20804_v60  ;;  %v15536_v60 = vld [vmem:[%s19958_s30 + $0x13b] sm:$0xff]  ;;  %v3422_v17 = vpack.c.bf16 %v15489_v63, %v15488_v37 }
 0x1a1   : >> { %v18389_v11 = vpop.f32.mrf.mxu1  ;;  %v18423_v58 = vpop.f32.mrf.mxu0  ;;  %18592 = vmatmul.mubr.msk.bf16.gmra.mxu1 %vm281_vm2, %v3419_v25  ;;  %18626 = vmatmul.mubr.msk.bf16.gmra.mxu0 %vm281_vm2, %v3715_v30  ;;  %v3717_v38 = vpack.c.bf16 %v15537_v44, %v15536_v60  ;;  %v3718_v25 = vpack.c.bf16 %v15539_v51, %v15538_v29  ;;  %v15561_v60 = vld [vmem:[%s19958_s30 + $0x74] sm:$0xff]  ;;  %v15610_v44 = vld [vmem:[%s19958_s30 + $0xcc] sm:$0xff] }
 0x1a2   : >> { %v21012_v46 = vadd.f32 %v2098_v55, %v1879_v21  ;;  %v1884_v53 = vadd.f32 %v18389_v11, %v20815_v24  ;;  %18595 = vmatprep.mubr.msk.bf16.mxu1 %vm281_vm2, %v3420_v43  ;;  %18629 = vmatprep.mubr.msk.bf16.mxu0 %vm281_vm2, %v3716_v33  ;;  %v3421_v24 = vpack.c.bf16 %v15487_v54, %v15486_v22  ;;  %v15491_v55 = vld [vmem:[%s19958_s30 + $0x162] sm:$0xff]  ;;  %v15560_v22 = vld [vmem:[%s19958_s30 + $0x6c] sm:$0xff]  ;;  %v15611_v37 = vld [vmem:[%s19958_s30 + $0xd4] sm:$0xff] }
 0x1a3   : >> { %v1815_v4 = vpop.f32.mrf.mxu1  ;;  %v2111_v3 = vpop.f32.mrf.mxu0 }
 0x1a4   : >> { %v21023_v62 = vadd.f32 %v18423_v58, %v1884_v53  ;;  %v1882_v40 = vadd.f32 %v1815_v4, %v20818_v6  ;;  %v15541_v58 = vld [vmem:[%s19958_s30 + $0x163] sm:$0xff] }
 0x1a5   : >> { %v18390_v42 = vpop.f32.mrf.mxu1  ;;  %v18424_v18 = vpop.f32.mrf.mxu0 }
 0x1a6   : >> { %v21026_v8 = vadd.f32 %v2111_v3, %v1882_v40  ;;  %v1885_v0 = vadd.f32 %v18390_v42, %v20821_v47  ;;  %v15490_v47 = vld [vmem:[%s19958_s30 + $0x15a] sm:$0xff] }
 0x1a7   : >> { %v1818_v30 = vpop.f32.mrf.mxu1  ;;  %v2114_v13 = vpop.f32.mrf.mxu0 }
 0x1a8   : >> { %v21029_v43 = vadd.f32 %v18424_v18, %v1885_v0  ;;  %v1883_v6 = vadd.f32 %v1818_v30, %v20828_v52  ;;  %v15540_v52 = vld [vmem:[%s19958_s30 + $0x15b] sm:$0xff]  ;;  %v4000_v18 = vpack.c.bf16 %v15561_v60, %v15560_v22 }
 0x1a9   : >> { %v18393_v33 = vpop.f32.mrf.mxu1  ;;  %v18427_v57 = vpop.f32.mrf.mxu0  ;;  %18596 = vmatmul.mubr.msk.bf16.gmra.mxu1 %vm281_vm2, %v3421_v24  ;;  %18630 = vmatmul.mubr.msk.bf16.gmra.mxu0 %vm281_vm2, %v3717_v38  ;;  %v3719_v51 = vpack.c.bf16 %v15541_v58, %v15540_v52  ;;  %v21053_v24 = vpack.c.bf16 %v15611_v37, %v15610_v44  ;;  %v15565_v22 = vld [vmem:[%s19958_s30 + $0x94] sm:$0xff] }
 0x1aa   : >> { %v21036_v21 = vadd.f32 %v2114_v13, %v1883_v6  ;;  %v1888_v11 = vadd.f32 %v18393_v33, %v20839_v50  ;;  %18599 = vmatprep.mubr.msk.bf16.mxu1 %vm281_vm2, %v3422_v17  ;;  %18633 = vmatprep.mubr.msk.bf16.mxu0 %vm281_vm2, %v3718_v25  ;;  %v3423_v50 = vpack.c.bf16 %v15491_v55, %v15490_v47  ;;  %v15612_v33 = vld [vmem:[%s19958_s30 + $0xdc] sm:$0xff] }
 0x1ab   : >> { %v1831_v54 = vpop.f32.mrf.mxu1  ;;  %v2127_v53 = vpop.f32.mrf.mxu0 }
 0x1ac   : >> { %v21047_v4 = vadd.f32 %v18427_v57, %v1888_v11  ;;  %v1886_v3 = vadd.f32 %v1831_v54, %v20842_v15  ;;  %v15613_v57 = vld [vmem:[%s19958_s30 + $0xe4] sm:$0xff]  ;;  %v15564_v11 = vld [vmem:[%s19958_s30 + $0x8c] sm:$0xff] }
 0x1ad   : >> { %v18394_v63 = vpop.f32.mrf.mxu1  ;;  %v18428_v29 = vpop.f32.mrf.mxu0  ;;  %v15614_v54 = vld [vmem:[%s19958_s30 + $0xec] sm:$0xff]  ;;  %v21077_v37 = vpack.c.bf16 %v15613_v57, %v15612_v33  ;;  %v15616_v33 = vld [vmem:[%s19958_s30 + $0xfc] sm:$0xff]  ;;  %v15617_v57 = vld [vmem:[%s19958_s30 + $0x104] sm:$0xff] }
 0x1ae   : >> { %v21050_v40 = vadd.f32 %v2127_v53, %v1886_v3  ;;  %v1889_v42 = vadd.f32 %v18394_v63, %v20845_v14  ;;  %v15562_v14 = vld [vmem:[%s19958_s30 + $0x7c] sm:$0xff]  ;;  %v15615_v53 = vld [vmem:[%s19958_s30 + $0xf4] sm:$0xff]  ;;  %v15842_v63 = vld [vmem:[%s25309_s1 + $0x24] sm:$0x3] }
 0x1af   : >> { %v1834_v38 = vpop.f32.mrf.mxu1  ;;  %v2130_v0 = vpop.f32.mrf.mxu0  ;;  %v15792_v3 = vld [vmem:[%s25309_s1 + $0x22] sm:$0x3] }
 0x1b0   : >> { %v21055_v17 = vadd.f32 %v18428_v29, %v1889_v42  ;;  %v1887_v15 = vadd.f32 %v1834_v38, %v20851_v49  ;;  %v15563_v49 = vld [vmem:[%s19958_s30 + $0x84] sm:$0xff]  ;;  %v4002_v42 = vpack.c.bf16 %v15565_v22, %v15564_v11  ;;  %v15618_v22 = vld [vmem:[%s19958_s30 + $0x10c] sm:$0xff] }
 0x1b1   : >> { %v18397_v25 = vpop.f32.mrf.mxu1  ;;  %v18431_v30 = vpop.f32.mrf.mxu0  ;;  %18600 = vmatmul.mubr.msk.bf16.gmra.mxu1 %vm281_vm2, %v3423_v50  ;;  %18634 = vmatmul.mubr.msk.bf16.gmra.mxu0 %vm281_vm2, %v3719_v51  ;;  %v4001_v44 = vpack.c.bf16 %v15563_v49, %v15562_v14  ;;  %v15566_v14 = vld [vmem:[%s19958_s30 + $0x9c] sm:$0xff] }
 0x1b2   : >> { %v21061_v13 = vadd.f32 %v2130_v0, %v1887_v15  ;;  %v1892_v6 = vadd.f32 %v18397_v25, %v20860_v27  ;;  %18639 = vmatprep.mubr.msk.bf16.mxu1 %vm281_vm2, %v4000_v18  ;;  %18673 = vmatprep.mubr.msk.bf16.mxu0 %vm281_vm2, %v21053_v24  ;;  %v21088_v18 = vpack.c.bf16 %v15615_v53, %v15614_v54  ;;  %v15619_v54 = vld [vmem:[%s19958_s30 + $0x114] sm:$0xff] }
 0x1b3   : >> { %v1847_v47 = vpop.f32.mrf.mxu1  ;;  %v2143_v55 = vpop.f32.mrf.mxu0  ;;  %v21094_v15 = vand.u32 %v15792_v3, %v19951_v5  ;;  %v21097_v25 = vand.u32 %v15842_v63, %v19951_v5 }
 0x1b4   : >> { %v21071_v52 = vadd.f32 %v18431_v30, %v1892_v6  ;;  %v1890_v58 = vadd.f32 %v1847_v47, %v20872_v41  ;;  %v15567_v6 = vld [vmem:[%s19958_s30 + $0xa4] sm:$0xff]  ;;  %v15568_v47 = vld [vmem:[%s19958_s30 + $0xac] sm:$0xff] }
 0x1b5   : >> { %v18398_v60 = vpop.f32.mrf.mxu1  ;;  %v18432_v27 = vpop.f32.mrf.mxu0 }
 0x1b6   : >> { %v21085_v29 = vadd.f32 %v2143_v55, %v1890_v58  ;;  %v1893_v41 = vadd.f32 %v18398_v60, %v20875_v12  ;;  %v15569_v58 = vld [vmem:[%s19958_s30 + $0xb4] sm:$0xff]  ;;  %v4003_v60 = vpack.c.bf16 %v15567_v6, %v15566_v14  ;;  %v15571_v6 = vld [vmem:[%s19958_s30 + $0xc4] sm:$0xff] }
 0x1b7   : >> { %v1850_v50 = vpop.f32.mrf.mxu1  ;;  %v2146_v51 = vpop.f32.mrf.mxu0  ;;  %v4004_v63 = vpack.c.bf16 %v15569_v58, %v15568_v47  ;;  %v15622_v47 = vld [vmem:[%s19958_s30 + $0x12c] sm:$0xff] }
 0x1b8   : >> { %v21090_v38 = vadd.f32 %v18432_v27, %v1893_v41  ;;  %v1891_v0 = vadd.f32 %v1850_v50, %v20888_v34  ;;  %v21123_v27 = vpack.c.bf16 %v15617_v57, %v15616_v33  ;;  %v21128_v41 = vpack.c.bf16 %v15619_v54, %v15618_v22 }
 0x1b9   : >> { %v18437_v30 = vpop.f32.mrf.mxu1  ;;  %v18471_v12 = vpop.f32.mrf.mxu0  ;;  %18640 = vmatmul.mubr.msk.bf16.vlgmr.msra.gmra.mxu1 %vm281_vm2, %v4001_v44  ;;  %18674 = vmatmul.mubr.msk.bf16.vlgmr.msra.gmra.mxu0 %vm281_vm2, %v21077_v37 }
 0x1ba   : >> { %v21104_v49 = vadd.f32 %v2146_v51, %v1891_v0  ;;  %v2456_v34 = vadd.f32 %v18437_v30, %v20901_v32  ;;  %18706 = vmatpush3.bf16.msra.mxu1 %v20879_v31  ;;  %18740 = vmatpush3.bf16.msra.mxu0 %v20882_v10 }
 0x1bb   : >> { %v2327_v55 = vpop.f32.mrf.mxu1  ;;  %v2623_v11 = vpop.f32.mrf.mxu0  ;;  %18643 = vmatprep.mubr.msk.bf16.mxu1 %vm281_vm2, %v4002_v42  ;;  %18677 = vmatprep.mubr.msk.bf16.mxu0 %vm281_vm2, %v21088_v18 }
 0x1bc   : >> { %v21118_v53 = vadd.f32 %v18471_v12, %v2456_v34  ;;  %v2454_v32 = vadd.f32 %v2327_v55, %v20906_v35  ;;  %18773 = vmatprep.subr.bf16.mxu1 %v21094_v15  ;;  %18807 = vmatprep.subr.bf16.mxu0 %v21097_v25  ;;  %v15621_v34 = vld [vmem:[%s19958_s30 + $0x124] sm:$0xff]  ;;  %v15623_v55 = vld [vmem:[%s19958_s30 + $0x134] sm:$0xff] }
 0x1bd   : >> { %v18438_v31 = vpop.f32.mrf.mxu1  ;;  %v18472_v10 = vpop.f32.mrf.mxu0 }
 0x1be   : >> { %v21125_v44 = vadd.f32 %v2623_v11, %v2454_v32  ;;  %v2457_v3 = vadd.f32 %v18438_v31, %v20909_v9  ;;  %v15570_v9 = vld [vmem:[%s19958_s30 + $0xbc] sm:$0xff] }
 0x1bf   : >> { %v2330_v35 = vpop.f32.mrf.mxu1  ;;  %v2626_v50 = vpop.f32.mrf.mxu0  ;;  %v4005_v32 = vpack.c.bf16 %v15571_v6, %v15570_v9  ;;  %v15625_v9 = vld [vmem:[%s19958_s30 + $0x144] sm:$0xff]  ;;  %v15626_v6 = vld [vmem:[%s19958_s30 + $0x14c] sm:$0xff] }
 0x1c0   : >> { %v21130_v51 = vadd.f32 %v18472_v10, %v2457_v3  ;;  %v2455_v42 = vadd.f32 %v2330_v35, %v20916_v20  ;;  %v15620_v20 = vld [vmem:[%s19958_s30 + $0x11c] sm:$0xff] }
 0x1c1   : >> { %v18441_v0 = vpop.f32.mrf.mxu1  ;;  %v18475_v30 = vpop.f32.mrf.mxu0  ;;  %18644 = vmatmul.mubr.msk.bf16.gmra.mxu1 %vm281_vm2, %v4003_v60  ;;  %18678 = vmatmul.mubr.msk.bf16.gmra.mxu0 %vm281_vm2, %v21123_v27  ;;  %v21156_v60 = vpack.c.bf16 %v15623_v55, %v15622_v47 }
 0x1c2   : >> { %v21137_v12 = vadd.f32 %v2626_v50, %v2455_v42  ;;  %v2460_v14 = vadd.f32 %v18441_v0, %v20927_v28  ;;  %18647 = vmatprep.mubr.msk.bf16.mxu1 %vm281_vm2, %v4004_v63  ;;  %18681 = vmatprep.mubr.msk.bf16.mxu0 %vm281_vm2, %v21128_v41  ;;  %v21151_v28 = vpack.c.bf16 %v15621_v34, %v15620_v20  ;;  %v15627_v20 = vld [vmem:[%s19958_s30 + $0x154] sm:$0xff] }
 0x1c3   : >> { %v2343_v33 = vpop.f32.mrf.mxu1  ;;  %v2639_v57 = vpop.f32.mrf.mxu0 }
 0x1c4   : >> { %v21148_v11 = vadd.f32 %v18475_v30, %v2460_v14  ;;  %v2458_v58 = vadd.f32 %v2343_v33, %v20930_v59  ;;  %v15624_v30 = vld [vmem:[%s19958_s30 + $0x13c] sm:$0xff] }
 0x1c5   : >> { %v18442_v22 = vpop.f32.mrf.mxu1  ;;  %v18476_v54 = vpop.f32.mrf.mxu0  ;;  %v21178_v55 = vpack.c.bf16 %v15625_v9, %v15624_v30  ;;  %v15631_v30 = vld [vmem:[%s19958_s30 + $0x174] sm:$0xff] }
 0x1c6   : >> { %v21153_v31 = vadd.f32 %v2639_v57, %v2458_v58  ;;  %v2461_v10 = vadd.f32 %v18442_v22, %v20933_v1  ;;  %v21183_v58 = vpack.c.bf16 %v15627_v20, %v15626_v6 }
 0x1c7   : >> { %v2346_v3 = vpop.f32.mrf.mxu1  ;;  %v2642_v63 = vpop.f32.mrf.mxu0 }
 0x1c8   : >> { %v21158_v35 = vadd.f32 %v18476_v54, %v2461_v10  ;;  %v2459_v59 = vadd.f32 %v2346_v3, %v20940_v2 }
 0x1c9   : >> { %v18445_v50 = vpop.f32.mrf.mxu1  ;;  %v18479_v42 = vpop.f32.mrf.mxu0  ;;  %18648 = vmatmul.mubr.msk.bf16.gmra.mxu1 %vm281_vm2, %v4005_v32  ;;  %18682 = vmatmul.mubr.msk.bf16.gmra.mxu0 %vm281_vm2, %v21151_v28 }
 0x1ca   : >> { %v21164_v0 = vadd.f32 %v2642_v63, %v2459_v59  ;;  %v2464_v1 = vadd.f32 %v18445_v50, %v20951_v26  ;;  %18651 = vmatprep.mubr.msk.bf16.mxu1 %vm281_vm2, %v21053_v24  ;;  %18685 = vmatprep.mubr.msk.bf16.mxu0 %vm281_vm2, %v21156_v60  ;;  %v15628_v59 = vld [vmem:[%s19958_s30 + $0x15c] sm:$0xff] }
 0x1cb   : >> { %v2359_v2 = vpop.f32.mrf.mxu1  ;;  %v2655_v14 = vpop.f32.mrf.mxu0 }
 0x1cc   : >> { %v21175_v34 = vadd.f32 %v18479_v42, %v2464_v1  ;;  %v2462_v33 = vadd.f32 %v2359_v2, %v20954_v23  ;;  %v15630_v1 = vld [vmem:[%s19958_s30 + $0x16c] sm:$0xff] }
 0x1cd   : >> { %v18446_v57 = vpop.f32.mrf.mxu1  ;;  %v18480_v47 = vpop.f32.mrf.mxu0  ;;  %v4306_v20 = vpack.c.bf16 %v15631_v30, %v15630_v1 }
 0x1ce   : >> { %v21180_v26 = vadd.f32 %v2655_v14, %v2462_v33  ;;  %v2465_v24 = vadd.f32 %v18446_v57, %v20957_v7 }
 0x1cf   : >> { %v2362_v22 = vpop.f32.mrf.mxu1  ;;  %v2658_v54 = vpop.f32.mrf.mxu0 }
 0x1d0   : >> { %v21185_v32 = vadd.f32 %v18480_v47, %v2465_v24  ;;  %v2463_v23 = vadd.f32 %v2362_v22, %v20964_v19  ;;  %v15629_v19 = vld [vmem:[%s19958_s30 + $0x164] sm:$0xff] }
 0x1d1   : >> { %v18449_v10 = vpop.f32.mrf.mxu1  ;;  %v18483_v3 = vpop.f32.mrf.mxu0  ;;  %18652 = vmatmul.mubr.msk.bf16.gmra.mxu1 %vm281_vm2, %v21077_v37  ;;  %18686 = vmatmul.mubr.msk.bf16.gmra.mxu0 %vm281_vm2, %v21178_v55  ;;  %v21206_v6 = vpack.c.bf16 %v15629_v19, %v15628_v59  ;;  %v15635_v59 = vld [vmem:[%s19958_s30 + $0x194] sm:$0xff] }
 0x1d2   : >> { %v21192_v63 = vadd.f32 %v2658_v54, %v2463_v23  ;;  %v2468_v7 = vadd.f32 %v18449_v10, %v20975_v45  ;;  %18655 = vmatprep.mubr.msk.bf16.mxu1 %vm281_vm2, %v21088_v18  ;;  %18689 = vmatprep.mubr.msk.bf16.mxu0 %vm281_vm2, %v21183_v58  ;;  %v15632_v23 = vld [vmem:[%s19958_s30 + $0x17c] sm:$0xff]  ;;  %v15633_v10 = vld [vmem:[%s19958_s30 + $0x184] sm:$0xff] }
 0x1d3   : >> { %v2375_v50 = vpop.f32.mrf.mxu1  ;;  %v2671_v42 = vpop.f32.mrf.mxu0  ;;  %v4307_v1 = vpack.c.bf16 %v15633_v10, %v15632_v23 }
 0x1d4   : >> { %v21203_v37 = vadd.f32 %v18483_v3, %v2468_v7  ;;  %v2466_v9 = vadd.f32 %v2375_v50, %v20978_v48  ;;  %v15634_v7 = vld [vmem:[%s19958_s30 + $0x18c] sm:$0xff] }
 0x1d5   : >> { %v18450_v2 = vpop.f32.mrf.mxu1  ;;  %v18484_v14 = vpop.f32.mrf.mxu0  ;;  %v4308_v30 = vpack.c.bf16 %v15635_v59, %v15634_v7 }
 0x1d6   : >> { %v21208_v45 = vadd.f32 %v2671_v42, %v2466_v9  ;;  %v2469_v18 = vadd.f32 %v18450_v2, %v20981_v56 }
 0x1d7   : >> { %v2378_v33 = vpop.f32.mrf.mxu1  ;;  %v2674_v57 = vpop.f32.mrf.mxu0 }
 0x1d8   : >> { %v21211_v47 = vadd.f32 %v18484_v14, %v2469_v18  ;;  %v2467_v24 = vadd.f32 %v2378_v33, %v20988_v61 }
 0x1d9   : >> { %v18453_v48 = vpop.f32.mrf.mxu1  ;;  %v18487_v22 = vpop.f32.mrf.mxu0  ;;  %18656 = vmatmul.mubr.msk.bf16.gmra.mxu1 %vm281_vm2, %v21123_v27  ;;  %18690 = vmatmul.mubr.msk.bf16.gmra.mxu0 %vm281_vm2, %v21206_v6 }
 0x1da   : >> { %v21218_v54 = vadd.f32 %v2674_v57, %v2467_v24  ;;  %v2472_v56 = vadd.f32 %v18453_v48, %v20999_v39  ;;  %18659 = vmatprep.mubr.msk.bf16.mxu1 %vm281_vm2, %v21128_v41  ;;  %18693 = vmatprep.mubr.msk.bf16.mxu0 %vm281_vm2, %v4306_v20  ;;  %v15636_v57 = vld [vmem:[%s19958_s30 + $0x19c] sm:$0xff]  ;;  %v15637_v24 = vld [vmem:[%s19958_s30 + $0x1a4] sm:$0xff] }
 0x1db   : >> { %v2391_v61 = vpop.f32.mrf.mxu1  ;;  %v2687_v3 = vpop.f32.mrf.mxu0 }
 0x1dc   : >> { %v21228_v19 = vadd.f32 %v18487_v22, %v2472_v56  ;;  %v2470_v27 = vadd.f32 %v2391_v61, %v21002_v16  ;;  %v15638_v22 = vld [vmem:[%s19958_s30 + $0x1ac] sm:$0xff]  ;;  %v15639_v56 = vld [vmem:[%s19958_s30 + $0x1b4] sm:$0xff] }
 0x1dd   : >> { %v18454_v50 = vpop.f32.mrf.mxu1  ;;  %v18488_v42 = vpop.f32.mrf.mxu0  ;;  %v4310_v7 = vpack.c.bf16 %v15639_v56, %v15638_v22 }
 0x1de   : >> { %v21231_v39 = vadd.f32 %v2687_v3, %v2470_v27  ;;  %v2473_v41 = vadd.f32 %v18454_v50, %v21005_v36  ;;  %v4309_v3 = vpack.c.bf16 %v15637_v24, %v15636_v57 }
 0x1df   : >> { %v2394_v9 = vpop.f32.mrf.mxu1  ;;  %v2690_v2 = vpop.f32.mrf.mxu0 }
 0x1e0   : >> { %v21234_v14 = vadd.f32 %v18488_v42, %v2473_v41  ;;  %v2471_v18 = vadd.f32 %v2394_v9, %v21012_v46  ;;  %v15641_v9 = vld [vmem:[%s19958_s30 + $0x1c4] sm:$0xff] }
 0x1e1   : >> { %v18457_v20 = vpop.f32.mrf.mxu1  ;;  %v18491_v16 = vpop.f32.mrf.mxu0  ;;  %18660 = vmatmul.mubr.msk.bf16.gmra.mxu1 %vm281_vm2, %v21151_v28  ;;  %18694 = vmatmul.mubr.msk.bf16.gmra.mxu0 %vm281_vm2, %v4307_v1 }
 0x1e2   : >> { %v21240_v33 = vadd.f32 %v2690_v2, %v2471_v18  ;;  %v2476_v36 = vadd.f32 %v18457_v20, %v21023_v62  ;;  %18663 = vmatprep.mubr.msk.bf16.mxu1 %vm281_vm2, %v21156_v60  ;;  %18697 = vmatprep.mubr.msk.bf16.mxu0 %vm281_vm2, %v4308_v30  ;;  %v15640_v30 = vld [vmem:[%s19958_s30 + $0x1bc] sm:$0xff] }
 0x1e3   : >> { %v2407_v48 = vpop.f32.mrf.mxu1  ;;  %v2703_v46 = vpop.f32.mrf.mxu0  ;;  %v15661_v20 = vld [vmem:[%s19958_s30 + $0xd5] sm:$0xff] }
 0x1e4   : >> { %v21250_v23 = vadd.f32 %v18491_v16, %v2476_v36  ;;  %v2474_v28 = vadd.f32 %v2407_v48, %v21026_v8  ;;  %v15710_v16 = vld [vmem:[%s19958_s30 + $0xce] sm:$0xff]  ;;  %v15711_v36 = vld [vmem:[%s19958_s30 + $0xd6] sm:$0xff]  ;;  %v4311_v48 = vpack.c.bf16 %v15641_v9, %v15640_v30 }
 0x1e5   : >> { %v18458_v10 = vpop.f32.mrf.mxu1  ;;  %v18492_v61 = vpop.f32.mrf.mxu0  ;;  %v4888_v56 = vpack.c.bf16 %v15711_v36, %v15710_v16  ;;  %v15665_v9 = vld [vmem:[%s19958_s30 + $0xf5] sm:$0xff]  ;;  %v15892_v36 = vld [vmem:[%s25309_s1 + $0x26] sm:$0x3] }
 0x1e6   : >> { %v21253_v62 = vadd.f32 %v2703_v46, %v2474_v28  ;;  %v2477_v60 = vadd.f32 %v18458_v10, %v21029_v43 }
 0x1e7   : >> { %v2410_v59 = vpop.f32.mrf.mxu1  ;;  %v2706_v27 = vpop.f32.mrf.mxu0 }
 0x1e8   : >> { %v21256_v50 = vadd.f32 %v18492_v61, %v2477_v60  ;;  %v2475_v42 = vadd.f32 %v2410_v59, %v21036_v21  ;;  %v15660_v21 = vld [vmem:[%s19958_s30 + $0xcd] sm:$0xff] }
 0x1e9   : >> { %v18461_v8 = vpop.f32.mrf.mxu1  ;;  %v18495_v1 = vpop.f32.mrf.mxu0  ;;  %18664 = vmatmul.mubr.msk.bf16.gmra.mxu1 %vm281_vm2, %v21178_v55  ;;  %18698 = vmatmul.mubr.msk.bf16.gmra.mxu0 %vm281_vm2, %v4309_v3  ;;  %v4592_v22 = vpack.c.bf16 %v15661_v20, %v15660_v21  ;;  %v15714_v21 = vld [vmem:[%s19958_s30 + $0xee] sm:$0xff] }
 0x1ea   : >> { %v21262_v41 = vadd.f32 %v2706_v27, %v2475_v42  ;;  %v2480_v43 = vadd.f32 %v18461_v8, %v21047_v4  ;;  %18667 = vmatprep.mubr.msk.bf16.mxu1 %vm281_vm2, %v21183_v58  ;;  %18701 = vmatprep.mubr.msk.bf16.mxu0 %vm281_vm2, %v4310_v7  ;;  %v15712_v27 = vld [vmem:[%s19958_s30 + $0xde] sm:$0xff]  ;;  %v15713_v42 = vld [vmem:[%s19958_s30 + $0xe6] sm:$0xff] }
 0x1eb   : >> { %v2423_v2 = vpop.f32.mrf.mxu1  ;;  %v2719_v18 = vpop.f32.mrf.mxu0  ;;  %v4889_v16 = vpack.c.bf16 %v15713_v42, %v15712_v27  ;;  %v15717_v27 = vld [vmem:[%s19958_s30 + $0x106] sm:$0xff] }
 0x1ec   : >> { %v21274_v55 = vadd.f32 %v18495_v1, %v2480_v43  ;;  %v2478_v57 = vadd.f32 %v2423_v2, %v21050_v40  ;;  %v15664_v43 = vld [vmem:[%s19958_s30 + $0xed] sm:$0xff]  ;;  %v15715_v2 = vld [vmem:[%s19958_s30 + $0xf6] sm:$0xff] }
 0x1ed   : >> { %v18462_v24 = vpop.f32.mrf.mxu1  ;;  %v18496_v4 = vpop.f32.mrf.mxu0  ;;  %v15668_v42 = vld [vmem:[%s19958_s30 + $0x10d] sm:$0xff] }
 0x1ee   : >> { %v21277_v46 = vadd.f32 %v2719_v18, %v2478_v57  ;;  %v2481_v58 = vadd.f32 %v18462_v24, %v21055_v17  ;;  %v15662_v17 = vld [vmem:[%s19958_s30 + $0xdd] sm:$0xff]  ;;  %v15942_v57 = vld [vmem:[%s25309_s1 + $0x28] sm:$0x3] }
 0x1ef   : >> { %v2426_v28 = vpop.f32.mrf.mxu1  ;;  %v2722_v10 = vpop.f32.mrf.mxu0 }
 0x1f0   : >> { %v21280_v61 = vadd.f32 %v18496_v4, %v2481_v58  ;;  %v2479_v40 = vadd.f32 %v2426_v28, %v21061_v13  ;;  %v15663_v13 = vld [vmem:[%s19958_s30 + $0xe5] sm:$0xff]  ;;  %v4594_v58 = vpack.c.bf16 %v15665_v9, %v15664_v43  ;;  %v15669_v43 = vld [vmem:[%s19958_s30 + $0x115] sm:$0xff] }
 0x1f1   : >> { %v18465_v3 = vpop.f32.mrf.mxu1  ;;  %v18499_v60 = vpop.f32.mrf.mxu0  ;;  %18668 = vmatmul.mubr.msk.bf16.gmra.mxu1 %vm281_vm2, %v21206_v6  ;;  %18702 = vmatmul.mubr.msk.bf16.gmra.mxu0 %vm281_vm2, %v4311_v48  ;;  %v15719_v9 = vld [vmem:[%s19958_s30 + $0x116] sm:$0xff] }
 0x1f2   : >> { %v21287_v7 = vadd.f32 %v2722_v10, %v2479_v40  ;;  %v2484_v59 = vadd.f32 %v18465_v3, %v21071_v52  ;;  %18707 = vmatprep.mubr.msk.bf16.mxu1 %vm281_vm2, %v4592_v22  ;;  %18741 = vmatprep.mubr.msk.bf16.mxu0 %vm281_vm2, %v4888_v56  ;;  %v4593_v52 = vpack.c.bf16 %v15663_v13, %v15662_v17  ;;  %v15667_v17 = vld [vmem:[%s19958_s30 + $0x105] sm:$0xff] }
 0x1f3   : >> { %v2439_v8 = vpop.f32.mrf.mxu1  ;;  %v2735_v1 = vpop.f32.mrf.mxu0  ;;  %v4890_v22 = vpack.c.bf16 %v15715_v2, %v15714_v21  ;;  %v21315_v10 = vand.u32 %v15892_v36, %v19951_v5  ;;  %v21318_v40 = vand.u32 %v15942_v57, %v19951_v5  ;;  %v15716_v13 = vld [vmem:[%s19958_s30 + $0xfe] sm:$0xff] }
 0x1f4   : >> { %v21296_v6 = vadd.f32 %v18499_v60, %v2484_v59  ;;  %v2482_v30 = vadd.f32 %v2439_v8, %v21085_v29 }
 0x1f5   : >> { %v18466_v18 = vpop.f32.mrf.mxu1  ;;  %v18500_v20 = vpop.f32.mrf.mxu0 }
 0x1f6   : >> { %v21308_v24 = vadd.f32 %v2735_v1, %v2482_v30  ;;  %v2485_v29 = vadd.f32 %v18466_v18, %v21090_v38  ;;  %v15666_v38 = vld [vmem:[%s19958_s30 + $0xfd] sm:$0xff]  ;;  %v15718_v30 = vld [vmem:[%s19958_s30 + $0x10e] sm:$0xff]  ;;  %v4891_v18 = vpack.c.bf16 %v15717_v27, %v15716_v13 }
 0x1f7   : >> { %v2442_v4 = vpop.f32.mrf.mxu1  ;;  %v2738_v48 = vpop.f32.mrf.mxu0  ;;  %v4595_v2 = vpack.c.bf16 %v15667_v17, %v15666_v38  ;;  %v4892_v36 = vpack.c.bf16 %v15719_v9, %v15718_v30  ;;  %v15672_v38 = vld [vmem:[%s19958_s30 + $0x12d] sm:$0xff]  ;;  %v15673_v13 = vld [vmem:[%s19958_s30 + $0x135] sm:$0xff] }
 0x1f8   : >> { %v21311_v56 = vadd.f32 %v18500_v20, %v2485_v29  ;;  %v2483_v28 = vadd.f32 %v2442_v4, %v21104_v49  ;;  %v15722_v27 = vld [vmem:[%s19958_s30 + $0x12e] sm:$0xff] }
 0x1f9   : >> { %v18505_v3 = vpop.f32.mrf.mxu1  ;;  %v18539_v60 = vpop.f32.mrf.mxu0  ;;  %18708 = vmatmul.mubr.msk.bf16.vlgmr.msra.gmra.mxu1 %vm281_vm2, %v4593_v52  ;;  %18742 = vmatmul.mubr.msk.bf16.vlgmr.msra.gmra.mxu0 %vm281_vm2, %v4889_v16  ;;  %v4596_v16 = vpack.c.bf16 %v15669_v43, %v15668_v42  ;;  %v15723_v42 = vld [vmem:[%s19958_s30 + $0x136] sm:$0xff] }
 0x1fa   : >> { %v21324_v59 = vadd.f32 %v2738_v48, %v2483_v28  ;;  %v3048_v49 = vadd.f32 %v18505_v3, %v21118_v53  ;;  %18774 = vmatpush3.bf16.msra.mxu1 %v21094_v15  ;;  %18808 = vmatpush3.bf16.msra.mxu0 %v21097_v25 }
 0x1fb   : >> { %v2919_v8 = vpop.f32.mrf.mxu1  ;;  %v3215_v1 = vpop.f32.mrf.mxu0  ;;  %18711 = vmatprep.mubr.msk.bf16.mxu1 %vm281_vm2, %v4594_v58  ;;  %18745 = vmatprep.mubr.msk.bf16.mxu0 %vm281_vm2, %v4890_v22  ;;  %v15671_v22 = vld [vmem:[%s19958_s30 + $0x125] sm:$0xff] }
 0x1fc   : >> { %v21337_v21 = vadd.f32 %v18539_v60, %v3048_v49  ;;  %v3046_v53 = vadd.f32 %v2919_v8, %v21125_v44  ;;  %18841 = vmatprep.subr.bf16.mxu1 %v21315_v10  ;;  %18875 = vmatprep.subr.bf16.mxu0 %v21318_v40  ;;  %v15721_v60 = vld [vmem:[%s19958_s30 + $0x126] sm:$0xff] }
 0x1fd   : >> { %v18506_v15 = vpop.f32.mrf.mxu1  ;;  %v18540_v25 = vpop.f32.mrf.mxu0 }
 0x1fe   : >> { %v21342_v20 = vadd.f32 %v3215_v1, %v3046_v53  ;;  %v3049_v52 = vadd.f32 %v18506_v15, %v21130_v51  ;;  %v15670_v51 = vld [vmem:[%s19958_s30 + $0x11d] sm:$0xff] }
 0x1ff   : >> { %v2922_v57 = vpop.f32.mrf.mxu1  ;;  %v3218_v44 = vpop.f32.mrf.mxu0 }
 0x200   : >> { %v21345_v29 = vadd.f32 %v18540_v25, %v3049_v52  ;;  %v3047_v4 = vadd.f32 %v2922_v57, %v21137_v12  ;;  %v15720_v12 = vld [vmem:[%s19958_s30 + $0x11e] sm:$0xff]  ;;  %v4598_v25 = vpack.c.bf16 %v15673_v13, %v15672_v38  ;;  %v15727_v38 = vld [vmem:[%s19958_s30 + $0x156] sm:$0xff] }
 0x201   : >> { %v18509_v48 = vpop.f32.mrf.mxu1  ;;  %v18543_v58 = vpop.f32.mrf.mxu0  ;;  %18712 = vmatmul.mubr.msk.bf16.gmra.mxu1 %vm281_vm2, %v4595_v2  ;;  %18746 = vmatmul.mubr.msk.bf16.gmra.mxu0 %vm281_vm2, %v4891_v18  ;;  %v4893_v9 = vpack.c.bf16 %v15721_v60, %v15720_v12  ;;  %v4894_v2 = vpack.c.bf16 %v15723_v42, %v15722_v27  ;;  %v15677_v12 = vld [vmem:[%s19958_s30 + $0x155] sm:$0xff] }
 0x202   : >> { %v21352_v28 = vadd.f32 %v3218_v44, %v3047_v4  ;;  %v3052_v3 = vadd.f32 %v18509_v48, %v21148_v11  ;;  %18715 = vmatprep.mubr.msk.bf16.mxu1 %vm281_vm2, %v4596_v16  ;;  %18749 = vmatprep.mubr.msk.bf16.mxu0 %vm281_vm2, %v4892_v36  ;;  %v4597_v11 = vpack.c.bf16 %v15671_v22, %v15670_v51  ;;  %v15675_v44 = vld [vmem:[%s19958_s30 + $0x145] sm:$0xff]  ;;  %v15676_v51 = vld [vmem:[%s19958_s30 + $0x14d] sm:$0xff] }
 0x203   : >> { %v2935_v17 = vpop.f32.mrf.mxu1  ;;  %v3231_v49 = vpop.f32.mrf.mxu0  ;;  %v15726_v60 = vld [vmem:[%s19958_s30 + $0x14e] sm:$0xff] }
 0x204   : >> { %v21363_v8 = vadd.f32 %v18543_v58, %v3052_v3  ;;  %v3050_v1 = vadd.f32 %v2935_v17, %v21153_v31  ;;  %v15725_v58 = vld [vmem:[%s19958_s30 + $0x146] sm:$0xff] }
 0x205   : >> { %v18510_v43 = vpop.f32.mrf.mxu1  ;;  %v18544_v30 = vpop.f32.mrf.mxu0 }
 0x206   : >> { %v21366_v53 = vadd.f32 %v3231_v49, %v3050_v1  ;;  %v3053_v15 = vadd.f32 %v18510_v43, %v21158_v35  ;;  %v15674_v35 = vld [vmem:[%s19958_s30 + $0x13d] sm:$0xff] }
 0x207   : >> { %v2938_v18 = vpop.f32.mrf.mxu1  ;;  %v3234_v52 = vpop.f32.mrf.mxu0 }
 0x208   : >> { %v21369_v16 = vadd.f32 %v18544_v30, %v3053_v15  ;;  %v3051_v31 = vadd.f32 %v2938_v18, %v21164_v0  ;;  %v15724_v0 = vld [vmem:[%s19958_s30 + $0x13e] sm:$0xff]  ;;  %v4600_v30 = vpack.c.bf16 %v15677_v12, %v15676_v51  ;;  %v15731_v51 = vld [vmem:[%s19958_s30 + $0x176] sm:$0xff] }
 0x209   : >> { %v18513_v36 = vpop.f32.mrf.mxu1  ;;  %v18547_v57 = vpop.f32.mrf.mxu0  ;;  %18716 = vmatmul.mubr.msk.bf16.gmra.mxu1 %vm281_vm2, %v4597_v11  ;;  %18750 = vmatmul.mubr.msk.bf16.gmra.mxu0 %vm281_vm2, %v4893_v9  ;;  %v4895_v42 = vpack.c.bf16 %v15725_v58, %v15724_v0  ;;  %v4896_v11 = vpack.c.bf16 %v15727_v38, %v15726_v60  ;;  %v15681_v0 = vld [vmem:[%s19958_s30 + $0x175] sm:$0xff] }
 0x20a   : >> { %v21376_v4 = vadd.f32 %v3234_v52, %v3051_v31  ;;  %v3056_v48 = vadd.f32 %v18513_v36, %v21175_v34  ;;  %18719 = vmatprep.mubr.msk.bf16.mxu1 %vm281_vm2, %v4598_v25  ;;  %18753 = vmatprep.mubr.msk.bf16.mxu0 %vm281_vm2, %v4894_v2  ;;  %v4599_v34 = vpack.c.bf16 %v15675_v44, %v15674_v35  ;;  %v15679_v52 = vld [vmem:[%s19958_s30 + $0x165] sm:$0xff]  ;;  %v15680_v35 = vld [vmem:[%s19958_s30 + $0x16d] sm:$0xff] }
 0x20b   : >> { %v2951_v22 = vpop.f32.mrf.mxu1  ;;  %v3247_v3 = vpop.f32.mrf.mxu0  ;;  %v15730_v58 = vld [vmem:[%s19958_s30 + $0x16e] sm:$0xff] }
 0x20c   : >> { %v21387_v17 = vadd.f32 %v18547_v57, %v3056_v48  ;;  %v3054_v49 = vadd.f32 %v2951_v22, %v21180_v26  ;;  %v15729_v57 = vld [vmem:[%s19958_s30 + $0x166] sm:$0xff] }
 0x20d   : >> { %v18514_v13 = vpop.f32.mrf.mxu1  ;;  %v18548_v27 = vpop.f32.mrf.mxu0 }
 0x20e   : >> { %v21390_v1 = vadd.f32 %v3247_v3, %v3054_v49  ;;  %v3057_v43 = vadd.f32 %v18514_v13, %v21185_v32  ;;  %v15678_v32 = vld [vmem:[%s19958_s30 + $0x15d] sm:$0xff] }
 0x20f   : >> { %v2954_v9 = vpop.f32.mrf.mxu1  ;;  %v3250_v15 = vpop.f32.mrf.mxu0 }
 0x210   : >> { %v21393_v25 = vadd.f32 %v18548_v27, %v3057_v43  ;;  %v3055_v26 = vadd.f32 %v2954_v9, %v21192_v63  ;;  %v15728_v63 = vld [vmem:[%s19958_s30 + $0x15e] sm:$0xff]  ;;  %v4602_v27 = vpack.c.bf16 %v15681_v0, %v15680_v35  ;;  %v15735_v35 = vld [vmem:[%s19958_s30 + $0x196] sm:$0xff] }
 0x211   : >> { %v18517_v2 = vpop.f32.mrf.mxu1  ;;  %v18551_v18 = vpop.f32.mrf.mxu0  ;;  %18720 = vmatmul.mubr.msk.bf16.gmra.mxu1 %vm281_vm2, %v4599_v34  ;;  %18754 = vmatmul.mubr.msk.bf16.gmra.mxu0 %vm281_vm2, %v4895_v42  ;;  %v4897_v38 = vpack.c.bf16 %v15729_v57, %v15728_v63  ;;  %v4898_v34 = vpack.c.bf16 %v15731_v51, %v15730_v58  ;;  %v15685_v63 = vld [vmem:[%s19958_s30 + $0x195] sm:$0xff] }
 0x212   : >> { %v21400_v31 = vadd.f32 %v3250_v15, %v3055_v26  ;;  %v3060_v36 = vadd.f32 %v18517_v2, %v21203_v37  ;;  %18723 = vmatprep.mubr.msk.bf16.mxu1 %vm281_vm2, %v4600_v30  ;;  %18757 = vmatprep.mubr.msk.bf16.mxu0 %vm281_vm2, %v4896_v11  ;;  %v4601_v37 = vpack.c.bf16 %v15679_v52, %v15678_v32  ;;  %v15683_v15 = vld [vmem:[%s19958_s30 + $0x185] sm:$0xff]  ;;  %v15684_v32 = vld [vmem:[%s19958_s30 + $0x18d] sm:$0xff] }
 0x213   : >> { %v2967_v44 = vpop.f32.mrf.mxu1  ;;  %v3263_v48 = vpop.f32.mrf.mxu0  ;;  %v15734_v57 = vld [vmem:[%s19958_s30 + $0x18e] sm:$0xff] }
 0x214   : >> { %v21411_v22 = vadd.f32 %v18551_v18, %v3060_v36  ;;  %v3058_v3 = vadd.f32 %v2967_v44, %v21208_v45  ;;  %v15733_v18 = vld [vmem:[%s19958_s30 + $0x186] sm:$0xff] }
 0x215   : >> { %v18518_v12 = vpop.f32.mrf.mxu1  ;;  %v18552_v60 = vpop.f32.mrf.mxu0 }
 0x216   : >> { %v21414_v49 = vadd.f32 %v3263_v48, %v3058_v3  ;;  %v3061_v13 = vadd.f32 %v18518_v12, %v21211_v47  ;;  %v15682_v47 = vld [vmem:[%s19958_s30 + $0x17d] sm:$0xff] }
 0x217   : >> { %v2970_v42 = vpop.f32.mrf.mxu1  ;;  %v3266_v43 = vpop.f32.mrf.mxu0 }
 0x218   : >> { %v21417_v30 = vadd.f32 %v18552_v60, %v3061_v13  ;;  %v3059_v45 = vadd.f32 %v2970_v42, %v21218_v54  ;;  %v15732_v54 = vld [vmem:[%s19958_s30 + $0x17e] sm:$0xff]  ;;  %v4604_v60 = vpack.c.bf16 %v15685_v63, %v15684_v32  ;;  %v15739_v32 = vld [vmem:[%s19958_s30 + $0x1b6] sm:$0xff] }
 0x219   : >> { %v18521_v11 = vpop.f32.mrf.mxu1  ;;  %v18555_v9 = vpop.f32.mrf.mxu0  ;;  %18724 = vmatmul.mubr.msk.bf16.gmra.mxu1 %vm281_vm2, %v4601_v37  ;;  %18758 = vmatmul.mubr.msk.bf16.gmra.mxu0 %vm281_vm2, %v4897_v38  ;;  %v4899_v51 = vpack.c.bf16 %v15733_v18, %v15732_v54  ;;  %v4900_v37 = vpack.c.bf16 %v15735_v35, %v15734_v57  ;;  %v15689_v54 = vld [vmem:[%s19958_s30 + $0x1b5] sm:$0xff] }
 0x21a   : >> { %v21424_v26 = vadd.f32 %v3266_v43, %v3059_v45  ;;  %v3064_v2 = vadd.f32 %v18521_v11, %v21228_v19  ;;  %18727 = vmatprep.mubr.msk.bf16.mxu1 %vm281_vm2, %v4602_v27  ;;  %18761 = vmatprep.mubr.msk.bf16.mxu0 %vm281_vm2, %v4898_v34  ;;  %v4603_v19 = vpack.c.bf16 %v15683_v15, %v15682_v47  ;;  %v15687_v43 = vld [vmem:[%s19958_s30 + $0x1a5] sm:$0xff]  ;;  %v15688_v47 = vld [vmem:[%s19958_s30 + $0x1ad] sm:$0xff] }
 0x21b   : >> { %v2983_v52 = vpop.f32.mrf.mxu1  ;;  %v3279_v36 = vpop.f32.mrf.mxu0  ;;  %v15738_v18 = vld [vmem:[%s19958_s30 + $0x1ae] sm:$0xff] }
 0x21c   : >> { %v21435_v44 = vadd.f32 %v18555_v9, %v3064_v2  ;;  %v3062_v48 = vadd.f32 %v2983_v52, %v21231_v39  ;;  %v15737_v9 = vld [vmem:[%s19958_s30 + $0x1a6] sm:$0xff] }
 0x21d   : >> { %v18522_v0 = vpop.f32.mrf.mxu1  ;;  %v18556_v58 = vpop.f32.mrf.mxu0 }
 0x21e   : >> { %v21438_v3 = vadd.f32 %v3279_v36, %v3062_v48  ;;  %v3065_v12 = vadd.f32 %v18522_v0, %v21234_v14  ;;  %v15686_v14 = vld [vmem:[%s19958_s30 + $0x19d] sm:$0xff] }
 0x21f   : >> { %v2986_v38 = vpop.f32.mrf.mxu1  ;;  %v3282_v13 = vpop.f32.mrf.mxu0 }
 0x220   : >> { %v21441_v27 = vadd.f32 %v18556_v58, %v3065_v12  ;;  %v3063_v39 = vadd.f32 %v2986_v38, %v21240_v33  ;;  %v15736_v33 = vld [vmem:[%s19958_s30 + $0x19e] sm:$0xff]  ;;  %v4606_v58 = vpack.c.bf16 %v15689_v54, %v15688_v47 }
 0x221   : >> { %v18525_v34 = vpop.f32.mrf.mxu1  ;;  %v18559_v42 = vpop.f32.mrf.mxu0  ;;  %18728 = vmatmul.mubr.msk.bf16.gmra.mxu1 %vm281_vm2, %v4603_v19  ;;  %18762 = vmatmul.mubr.msk.bf16.gmra.mxu0 %vm281_vm2, %v4899_v51  ;;  %v4901_v35 = vpack.c.bf16 %v15737_v9, %v15736_v33  ;;  %v4902_v19 = vpack.c.bf16 %v15739_v32, %v15738_v18  ;;  %v15761_v33 = vld [vmem:[%s19958_s30 + $0xd7] sm:$0xff] }
 0x222   : >> { %v21448_v45 = vadd.f32 %v3282_v13, %v3063_v39  ;;  %v3068_v11 = vadd.f32 %v18525_v34, %v21250_v23  ;;  %18731 = vmatprep.mubr.msk.bf16.mxu1 %vm281_vm2, %v4604_v60  ;;  %18765 = vmatprep.mubr.msk.bf16.mxu0 %vm281_vm2, %v4900_v37  ;;  %v4605_v23 = vpack.c.bf16 %v15687_v43, %v15686_v14  ;;  %v15691_v13 = vld [vmem:[%s19958_s30 + $0x1c5] sm:$0xff]  ;;  %v15760_v14 = vld [vmem:[%s19958_s30 + $0xcf] sm:$0xff]  ;;  %v15811_v47 = vld [vmem:[%s19958_s30 + $0xd8] sm:$0xff] }
 0x223   : >> { %v2999_v15 = vpop.f32.mrf.mxu1  ;;  %v3295_v2 = vpop.f32.mrf.mxu0  ;;  %v15810_v9 = vld [vmem:[%s19958_s30 + $0xd0] sm:$0xff] }
 0x224   : >> { %v21459_v52 = vadd.f32 %v18559_v42, %v3068_v11  ;;  %v3066_v36 = vadd.f32 %v2999_v15, %v21253_v62  ;;  %v15741_v42 = vld [vmem:[%s19958_s30 + $0x1c6] sm:$0xff] }
 0x225   : >> { %v18526_v63 = vpop.f32.mrf.mxu1  ;;  %v18560_v57 = vpop.f32.mrf.mxu0 }
 0x226   : >> { %v21462_v48 = vadd.f32 %v3295_v2, %v3066_v36  ;;  %v3069_v0 = vadd.f32 %v18526_v63, %v21256_v50  ;;  %v15690_v50 = vld [vmem:[%s19958_s30 + $0x1bd] sm:$0xff] }
 0x227   : >> { %v3002_v51 = vpop.f32.mrf.mxu1  ;;  %v3298_v12 = vpop.f32.mrf.mxu0 }
 0x228   : >> { %v21465_v60 = vadd.f32 %v18560_v57, %v3069_v0  ;;  %v3067_v62 = vadd.f32 %v3002_v51, %v21262_v41  ;;  %v15740_v41 = vld [vmem:[%s19958_s30 + $0x1be] sm:$0xff]  ;;  %v5184_v57 = vpack.c.bf16 %v15761_v33, %v15760_v14 }
 0x229   : >> { %v18529_v37 = vpop.f32.mrf.mxu1  ;;  %v18563_v38 = vpop.f32.mrf.mxu0  ;;  %18732 = vmatmul.mubr.msk.bf16.gmra.mxu1 %vm281_vm2, %v4605_v23  ;;  %18766 = vmatmul.mubr.msk.bf16.gmra.mxu0 %vm281_vm2, %v4901_v35  ;;  %v4903_v32 = vpack.c.bf16 %v15741_v42, %v15740_v41  ;;  %v5480_v23 = vpack.c.bf16 %v15811_v47, %v15810_v9  ;;  %v15765_v14 = vld [vmem:[%s19958_s30 + $0xf7] sm:$0xff] }
 0x22a   : >> { %v21472_v39 = vadd.f32 %v3298_v12, %v3067_v62  ;;  %v3072_v34 = vadd.f32 %v18529_v37, %v21274_v55  ;;  %18735 = vmatprep.mubr.msk.bf16.mxu1 %vm281_vm2, %v4606_v58  ;;  %18769 = vmatprep.mubr.msk.bf16.mxu0 %vm281_vm2, %v4902_v19  ;;  %v4607_v55 = vpack.c.bf16 %v15691_v13, %v15690_v50  ;;  %v15763_v37 = vld [vmem:[%s19958_s30 + $0xe7] sm:$0xff] }
 0x22b   : >> { %v3015_v43 = vpop.f32.mrf.mxu1  ;;  %v3311_v11 = vpop.f32.mrf.mxu0 }
 0x22c   : >> { %v21483_v15 = vadd.f32 %v18563_v38, %v3072_v34  ;;  %v3070_v2 = vadd.f32 %v3015_v43, %v21277_v46  ;;  %v15813_v38 = vld [vmem:[%s19958_s30 + $0xe8] sm:$0xff]  ;;  %v15814_v43 = vld [vmem:[%s19958_s30 + $0xf0] sm:$0xff] }
 0x22d   : >> { %v18530_v54 = vpop.f32.mrf.mxu1  ;;  %v18564_v18 = vpop.f32.mrf.mxu0  ;;  %v15764_v34 = vld [vmem:[%s19958_s30 + $0xef] sm:$0xff] }
 0x22e   : >> { %v21486_v36 = vadd.f32 %v3311_v11, %v3070_v2  ;;  %v3073_v63 = vadd.f32 %v18530_v54, %v21280_v61  ;;  %v15762_v61 = vld [vmem:[%s19958_s30 + $0xdf] sm:$0xff]  ;;  %v15992_v2 = vld [vmem:[%s25309_s1 + $0x2a] sm:$0x3]  ;;  %v16042_v54 = vld [vmem:[%s25309_s1 + $0x2c] sm:$0x3] }
 0x22f   : >> { %v3018_v35 = vpop.f32.mrf.mxu1  ;;  %v3314_v0 = vpop.f32.mrf.mxu0  ;;  %v15815_v11 = vld [vmem:[%s19958_s30 + $0xf8] sm:$0xff] }
 0x230   : >> { %v21489_v58 = vadd.f32 %v18564_v18, %v3073_v63  ;;  %v3071_v46 = vadd.f32 %v3018_v35, %v21287_v7  ;;  %v15812_v7 = vld [vmem:[%s19958_s30 + $0xe0] sm:$0xff]  ;;  %v5186_v63 = vpack.c.bf16 %v15765_v14, %v15764_v34  ;;  %v15769_v34 = vld [vmem:[%s19958_s30 + $0x117] sm:$0xff] }
 0x231   : >> { %v18533_v19 = vpop.f32.mrf.mxu1  ;;  %v18567_v51 = vpop.f32.mrf.mxu0  ;;  %18736 = vmatmul.mubr.msk.bf16.gmra.mxu1 %vm281_vm2, %v4607_v55  ;;  %18770 = vmatmul.mubr.msk.bf16.gmra.mxu0 %vm281_vm2, %v4903_v32  ;;  %v5481_v47 = vpack.c.bf16 %v15813_v38, %v15812_v7  ;;  %v15817_v7 = vld [vmem:[%s19958_s30 + $0x108] sm:$0xff]  ;;  %v15819_v14 = vld [vmem:[%s19958_s30 + $0x118] sm:$0xff] }
 0x232   : >> { %v21495_v12 = vadd.f32 %v3314_v0, %v3071_v46  ;;  %v3076_v62 = vadd.f32 %v18533_v19, %v21296_v6  ;;  %18775 = vmatprep.mubr.msk.bf16.mxu1 %vm281_vm2, %v5184_v57  ;;  %18809 = vmatprep.mubr.msk.bf16.mxu0 %vm281_vm2, %v5480_v23  ;;  %v5185_v6 = vpack.c.bf16 %v15763_v37, %v15762_v61  ;;  %v15767_v61 = vld [vmem:[%s19958_s30 + $0x107] sm:$0xff]  ;;  %v15768_v38 = vld [vmem:[%s19958_s30 + $0x10f] sm:$0xff] }
 0x233   : >> { %v3031_v50 = vpop.f32.mrf.mxu1  ;;  %v3327_v13 = vpop.f32.mrf.mxu0  ;;  %v5482_v57 = vpack.c.bf16 %v15815_v11, %v15814_v43  ;;  %v21523_v0 = vand.u32 %v15992_v2, %v19951_v5  ;;  %v21526_v46 = vand.u32 %v16042_v54, %v19951_v5  ;;  %v15816_v37 = vld [vmem:[%s19958_s30 + $0x100] sm:$0xff] }
 0x234   : >> { %v21504_v41 = vadd.f32 %v18567_v51, %v3076_v62  ;;  %v3074_v42 = vadd.f32 %v3031_v50, %v21308_v24 }
 0x235   : >> { %v18534_v33 = vpop.f32.mrf.mxu1  ;;  %v18568_v9 = vpop.f32.mrf.mxu0 }
 0x236   : >> { %v21516_v18 = vadd.f32 %v3327_v13, %v3074_v42  ;;  %v3077_v24 = vadd.f32 %v18534_v33, %v21311_v56  ;;  %v15766_v56 = vld [vmem:[%s19958_s30 + $0xff] sm:$0xff]  ;;  %v15818_v42 = vld [vmem:[%s19958_s30 + $0x110] sm:$0xff]  ;;  %v5483_v33 = vpack.c.bf16 %v15817_v7, %v15816_v37 }
 0x237   : >> { %v3034_v55 = vpop.f32.mrf.mxu1  ;;  %v3330_v32 = vpop.f32.mrf.mxu0  ;;  %v5187_v11 = vpack.c.bf16 %v15767_v61, %v15766_v56  ;;  %v5484_v2 = vpack.c.bf16 %v15819_v14, %v15818_v42  ;;  %v15772_v56 = vld [vmem:[%s19958_s30 + $0x12f] sm:$0xff]  ;;  %v15773_v37 = vld [vmem:[%s19958_s30 + $0x137] sm:$0xff] }
 0x238   : >> { %v21519_v23 = vadd.f32 %v18568_v9, %v3077_v24  ;;  %v3075_v35 = vadd.f32 %v3034_v55, %v21324_v59  ;;  %v15822_v7 = vld [vmem:[%s19958_s30 + $0x130] sm:$0xff] }
 0x239   : >> { %v18573_v19 = vpop.f32.mrf.mxu1  ;;  %v18607_v51 = vpop.f32.mrf.mxu0  ;;  %18776 = vmatmul.mubr.msk.bf16.vlgmr.msra.gmra.mxu1 %vm281_vm2, %v5185_v6  ;;  %18810 = vmatmul.mubr.msk.bf16.vlgmr.msra.gmra.mxu0 %vm281_vm2, %v5481_v47  ;;  %v5188_v47 = vpack.c.bf16 %v15769_v34, %v15768_v38  ;;  %v15823_v38 = vld [vmem:[%s19958_s30 + $0x138] sm:$0xff] }
 0x23a   : >> { %v21532_v62 = vadd.f32 %v3330_v32, %v3075_v35  ;;  %v3640_v59 = vadd.f32 %v18573_v19, %v21337_v21  ;;  %18842 = vmatpush3.bf16.msra.mxu1 %v21315_v10  ;;  %18876 = vmatpush3.bf16.msra.mxu0 %v21318_v40 }
 0x23b   : >> { %v3511_v50 = vpop.f32.mrf.mxu1  ;;  %v3807_v13 = vpop.f32.mrf.mxu0  ;;  %18779 = vmatprep.mubr.msk.bf16.mxu1 %vm281_vm2, %v5186_v63  ;;  %18813 = vmatprep.mubr.msk.bf16.mxu0 %vm281_vm2, %v5482_v57  ;;  %v15771_v57 = vld [vmem:[%s19958_s30 + $0x127] sm:$0xff] }
 0x23c   : >> { %v21545_v43 = vadd.f32 %v18607_v51, %v3640_v59  ;;  %v3638_v21 = vadd.f32 %v3511_v50, %v21342_v20  ;;  %18909 = vmatprep.subr.bf16.mxu1 %v21523_v0  ;;  %18943 = vmatprep.subr.bf16.mxu0 %v21526_v46  ;;  %v15821_v51 = vld [vmem:[%s19958_s30 + $0x128] sm:$0xff] }
 0x23d   : >> { %v18574_v10 = vpop.f32.mrf.mxu1  ;;  %v18608_v40 = vpop.f32.mrf.mxu0 }
 0x23e   : >> { %v21550_v9 = vadd.f32 %v3807_v13, %v3638_v21  ;;  %v3641_v6 = vadd.f32 %v18574_v10, %v21345_v29  ;;  %v15770_v29 = vld [vmem:[%s19958_s30 + $0x11f] sm:$0xff] }
 0x23f   : >> { %v3514_v54 = vpop.f32.mrf.mxu1  ;;  %v3810_v20 = vpop.f32.mrf.mxu0 }
 0x240   : >> { %v21553_v24 = vadd.f32 %v18608_v40, %v3641_v6  ;;  %v3639_v55 = vadd.f32 %v3514_v54, %v21352_v28  ;;  %v15820_v28 = vld [vmem:[%s19958_s30 + $0x120] sm:$0xff]  ;;  %v5190_v40 = vpack.c.bf16 %v15773_v37, %v15772_v56  ;;  %v15827_v56 = vld [vmem:[%s19958_s30 + $0x158] sm:$0xff] }
 0x241   : >> { %v18577_v32 = vpop.f32.mrf.mxu1  ;;  %v18611_v63 = vpop.f32.mrf.mxu0  ;;  %18780 = vmatmul.mubr.msk.bf16.gmra.mxu1 %vm281_vm2, %v5187_v11  ;;  %18814 = vmatmul.mubr.msk.bf16.gmra.mxu0 %vm281_vm2, %v5483_v33  ;;  %v5485_v14 = vpack.c.bf16 %v15821_v51, %v15820_v28  ;;  %v5486_v11 = vpack.c.bf16 %v15823_v38, %v15822_v7  ;;  %v15777_v28 = vld [vmem:[%s19958_s30 + $0x157] sm:$0xff] }
 0x242   : >> { %v21560_v35 = vadd.f32 %v3810_v20, %v3639_v55  ;;  %v3644_v19 = vadd.f32 %v18577_v32, %v21363_v8  ;;  %18783 = vmatprep.mubr.msk.bf16.mxu1 %vm281_vm2, %v5188_v47  ;;  %18817 = vmatprep.mubr.msk.bf16.mxu0 %vm281_vm2, %v5484_v2  ;;  %v5189_v8 = vpack.c.bf16 %v15771_v57, %v15770_v29  ;;  %v15775_v20 = vld [vmem:[%s19958_s30 + $0x147] sm:$0xff]  ;;  %v15776_v29 = vld [vmem:[%s19958_s30 + $0x14f] sm:$0xff] }
 0x243   : >> { %v3527_v61 = vpop.f32.mrf.mxu1  ;;  %v3823_v59 = vpop.f32.mrf.mxu0  ;;  %v15826_v51 = vld [vmem:[%s19958_s30 + $0x150] sm:$0xff] }
 0x244   : >> { %v21571_v50 = vadd.f32 %v18611_v63, %v3644_v19  ;;  %v3642_v13 = vadd.f32 %v3527_v61, %v21366_v53  ;;  %v15825_v63 = vld [vmem:[%s19958_s30 + $0x148] sm:$0xff] }
 0x245   : >> { %v18578_v34 = vpop.f32.mrf.mxu1  ;;  %v18612_v42 = vpop.f32.mrf.mxu0 }
 0x246   : >> { %v21574_v21 = vadd.f32 %v3823_v59, %v3642_v13  ;;  %v3645_v10 = vadd.f32 %v18578_v34, %v21369_v16  ;;  %v15774_v16 = vld [vmem:[%s19958_s30 + $0x13f] sm:$0xff] }
 0x247   : >> { %v3530_v33 = vpop.f32.mrf.mxu1  ;;  %v3826_v6 = vpop.f32.mrf.mxu0 }
 0x248   : >> { %v21577_v47 = vadd.f32 %v18612_v42, %v3645_v10  ;;  %v3643_v53 = vadd.f32 %v3530_v33, %v21376_v4  ;;  %v15824_v4 = vld [vmem:[%s19958_s30 + $0x140] sm:$0xff]  ;;  %v5192_v42 = vpack.c.bf16 %v15777_v28, %v15776_v29  ;;  %v15831_v29 = vld [vmem:[%s19958_s30 + $0x178] sm:$0xff] }
 0x249   : >> { %v18581_v2 = vpop.f32.mrf.mxu1  ;;  %v18615_v54 = vpop.f32.mrf.mxu0  ;;  %18784 = vmatmul.mubr.msk.bf16.gmra.mxu1 %vm281_vm2, %v5189_v8  ;;  %18818 = vmatmul.mubr.msk.bf16.gmra.mxu0 %vm281_vm2, %v5485_v14  ;;  %v5487_v38 = vpack.c.bf16 %v15825_v63, %v15824_v4  ;;  %v5488_v8 = vpack.c.bf16 %v15827_v56, %v15826_v51  ;;  %v15781_v4 = vld [vmem:[%s19958_s30 + $0x177] sm:$0xff] }
 0x24a   : >> { %v21584_v55 = vadd.f32 %v3826_v6, %v3643_v53  ;;  %v3648_v32 = vadd.f32 %v18581_v2, %v21387_v17  ;;  %18787 = vmatprep.mubr.msk.bf16.mxu1 %vm281_vm2, %v5190_v40  ;;  %18821 = vmatprep.mubr.msk.bf16.mxu0 %vm281_vm2, %v5486_v11  ;;  %v5191_v17 = vpack.c.bf16 %v15775_v20, %v15774_v16  ;;  %v15779_v6 = vld [vmem:[%s19958_s30 + $0x167] sm:$0xff]  ;;  %v15780_v16 = vld [vmem:[%s19958_s30 + $0x16f] sm:$0xff] }
 0x24b   : >> { %v3543_v57 = vpop.f32.mrf.mxu1  ;;  %v3839_v19 = vpop.f32.mrf.mxu0  ;;  %v15830_v63 = vld [vmem:[%s19958_s30 + $0x170] sm:$0xff] }
 0x24c   : >> { %v21595_v61 = vadd.f32 %v18615_v54, %v3648_v32  ;;  %v3646_v59 = vadd.f32 %v3543_v57, %v21390_v1  ;;  %v15829_v54 = vld [vmem:[%s19958_s30 + $0x168] sm:$0xff] }
 0x24d   : >> { %v18582_v37 = vpop.f32.mrf.mxu1  ;;  %v18616_v7 = vpop.f32.mrf.mxu0 }
 0x24e   : >> { %v21598_v13 = vadd.f32 %v3839_v19, %v3646_v59  ;;  %v3649_v34 = vadd.f32 %v18582_v37, %v21393_v25  ;;  %v15778_v25 = vld [vmem:[%s19958_s30 + $0x15f] sm:$0xff] }
 0x24f   : >> { %v3546_v14 = vpop.f32.mrf.mxu1  ;;  %v3842_v10 = vpop.f32.mrf.mxu0 }
 0x250   : >> { %v21601_v40 = vadd.f32 %v18616_v7, %v3649_v34  ;;  %v3647_v1 = vadd.f32 %v3546_v14, %v21400_v31  ;;  %v15828_v31 = vld [vmem:[%s19958_s30 + $0x160] sm:$0xff]  ;;  %v5194_v7 = vpack.c.bf16 %v15781_v4, %v15780_v16  ;;  %v15835_v16 = vld [vmem:[%s19958_s30 + $0x198] sm:$0xff] }
 0x251   : >> { %v18585_v11 = vpop.f32.mrf.mxu1  ;;  %v18619_v33 = vpop.f32.mrf.mxu0  ;;  %18788 = vmatmul.mubr.msk.bf16.gmra.mxu1 %vm281_vm2, %v5191_v17  ;;  %18822 = vmatmul.mubr.msk.bf16.gmra.mxu0 %vm281_vm2, %v5487_v38  ;;  %v5489_v56 = vpack.c.bf16 %v15829_v54, %v15828_v31  ;;  %v5490_v17 = vpack.c.bf16 %v15831_v29, %v15830_v63  ;;  %v15785_v31 = vld [vmem:[%s19958_s30 + $0x197] sm:$0xff] }
 0x252   : >> { %v21608_v53 = vadd.f32 %v3842_v10, %v3647_v1  ;;  %v3652_v2 = vadd.f32 %v18585_v11, %v21411_v22  ;;  %18791 = vmatprep.mubr.msk.bf16.mxu1 %vm281_vm2, %v5192_v42  ;;  %18825 = vmatprep.mubr.msk.bf16.mxu0 %vm281_vm2, %v5488_v8  ;;  %v5193_v22 = vpack.c.bf16 %v15779_v6, %v15778_v25  ;;  %v15783_v10 = vld [vmem:[%s19958_s30 + $0x187] sm:$0xff]  ;;  %v15784_v25 = vld [vmem:[%s19958_s30 + $0x18f] sm:$0xff] }
 0x253   : >> { %v3559_v20 = vpop.f32.mrf.mxu1  ;;  %v3855_v32 = vpop.f32.mrf.mxu0  ;;  %v15834_v54 = vld [vmem:[%s19958_s30 + $0x190] sm:$0xff] }
 0x254   : >> { %v21619_v57 = vadd.f32 %v18619_v33, %v3652_v2  ;;  %v3650_v19 = vadd.f32 %v3559_v20, %v21414_v49  ;;  %v15833_v33 = vld [vmem:[%s19958_s30 + $0x188] sm:$0xff] }
 0x255   : >> { %v18586_v28 = vpop.f32.mrf.mxu1  ;;  %v18620_v51 = vpop.f32.mrf.mxu0 }
 0x256   : >> { %v21622_v59 = vadd.f32 %v3855_v32, %v3650_v19  ;;  %v3653_v37 = vadd.f32 %v18586_v28, %v21417_v30  ;;  %v15782_v30 = vld [vmem:[%s19958_s30 + $0x17f] sm:$0xff] }
 0x257   : >> { %v3562_v38 = vpop.f32.mrf.mxu1  ;;  %v3858_v34 = vpop.f32.mrf.mxu0 }
 0x258   : >> { %v21625_v42 = vadd.f32 %v18620_v51, %v3653_v37  ;;  %v3651_v49 = vadd.f32 %v3562_v38, %v21424_v26  ;;  %v15832_v26 = vld [vmem:[%s19958_s30 + $0x180] sm:$0xff]  ;;  %v5196_v51 = vpack.c.bf16 %v15785_v31, %v15784_v25  ;;  %v15839_v25 = vld [vmem:[%s19958_s30 + $0x1b8] sm:$0xff] }
 0x259   : >> { %v18589_v8 = vpop.f32.mrf.mxu1  ;;  %v18623_v14 = vpop.f32.mrf.mxu0  ;;  %18792 = vmatmul.mubr.msk.bf16.gmra.mxu1 %vm281_vm2, %v5193_v22  ;;  %18826 = vmatmul.mubr.msk.bf16.gmra.mxu0 %vm281_vm2, %v5489_v56  ;;  %v5491_v29 = vpack.c.bf16 %v15833_v33, %v15832_v26  ;;  %v5492_v22 = vpack.c.bf16 %v15835_v16, %v15834_v54  ;;  %v15789_v26 = vld [vmem:[%s19958_s30 + $0x1b7] sm:$0xff] }
 0x25a   : >> { %v21632_v1 = vadd.f32 %v3858_v34, %v3651_v49  ;;  %v3656_v11 = vadd.f32 %v18589_v8, %v21435_v44  ;;  %18795 = vmatprep.mubr.msk.bf16.mxu1 %vm281_vm2, %v5194_v7  ;;  %18829 = vmatprep.mubr.msk.bf16.mxu0 %vm281_vm2, %v5490_v17  ;;  %v5195_v44 = vpack.c.bf16 %v15783_v10, %v15782_v30  ;;  %v15787_v34 = vld [vmem:[%s19958_s30 + $0x1a7] sm:$0xff]  ;;  %v15788_v30 = vld [vmem:[%s19958_s30 + $0x1af] sm:$0xff] }
 0x25b   : >> { %v3575_v6 = vpop.f32.mrf.mxu1  ;;  %v3871_v2 = vpop.f32.mrf.mxu0  ;;  %v15838_v33 = vld [vmem:[%s19958_s30 + $0x1b0] sm:$0xff] }
 0x25c   : >> { %v21643_v20 = vadd.f32 %v18623_v14, %v3656_v11  ;;  %v3654_v32 = vadd.f32 %v3575_v6, %v21438_v3  ;;  %v15837_v14 = vld [vmem:[%s19958_s30 + $0x1a8] sm:$0xff] }
 0x25d   : >> { %v18590_v4 = vpop.f32.mrf.mxu1  ;;  %v18624_v63 = vpop.f32.mrf.mxu0 }
 0x25e   : >> { %v21646_v19 = vadd.f32 %v3871_v2, %v3654_v32  ;;  %v3657_v28 = vadd.f32 %v18590_v4, %v21441_v27  ;;  %v15786_v27 = vld [vmem:[%s19958_s30 + $0x19f] sm:$0xff] }
 0x25f   : >> { %v3578_v56 = vpop.f32.mrf.mxu1  ;;  %v3874_v37 = vpop.f32.mrf.mxu0 }
 0x260   : >> { %v21649_v7 = vadd.f32 %v18624_v63, %v3657_v28  ;;  %v3655_v3 = vadd.f32 %v3578_v56, %v21448_v45  ;;  %v15836_v45 = vld [vmem:[%s19958_s30 + $0x1a0] sm:$0xff]  ;;  %v5198_v63 = vpack.c.bf16 %v15789_v26, %v15788_v30 }
 0x261   : >> { %v18593_v17 = vpop.f32.mrf.mxu1  ;;  %v18627_v38 = vpop.f32.mrf.mxu0  ;;  %18796 = vmatmul.mubr.msk.bf16.gmra.mxu1 %vm281_vm2, %v5195_v44  ;;  %18830 = vmatmul.mubr.msk.bf16.gmra.mxu0 %vm281_vm2, %v5491_v29  ;;  %v5493_v16 = vpack.c.bf16 %v15837_v14, %v15836_v45  ;;  %v5494_v44 = vpack.c.bf16 %v15839_v25, %v15838_v33  ;;  %v15861_v45 = vld [vmem:[%s19958_s30 + $0xd9] sm:$0xff] }
 0x262   : >> { %v21656_v49 = vadd.f32 %v3874_v37, %v3655_v3  ;;  %v3660_v8 = vadd.f32 %v18593_v17, %v21459_v52  ;;  %18799 = vmatprep.mubr.msk.bf16.mxu1 %vm281_vm2, %v5196_v51  ;;  %18833 = vmatprep.mubr.msk.bf16.mxu0 %vm281_vm2, %v5492_v22  ;;  %v5197_v52 = vpack.c.bf16 %v15787_v34, %v15786_v27  ;;  %v15791_v37 = vld [vmem:[%s19958_s30 + $0x1c7] sm:$0xff]  ;;  %v15860_v27 = vld [vmem:[%s19958_s30 + $0xd1] sm:$0xff]  ;;  %v15911_v30 = vld [vmem:[%s19958_s30 + $0xda] sm:$0xff] }
 0x263   : >> { %v3591_v10 = vpop.f32.mrf.mxu1  ;;  %v3887_v11 = vpop.f32.mrf.mxu0  ;;  %v15910_v14 = vld [vmem:[%s19958_s30 + $0xd2] sm:$0xff] }
 0x264   : >> { %v21667_v6 = vadd.f32 %v18627_v38, %v3660_v8  ;;  %v3658_v2 = vadd.f32 %v3591_v10, %v21462_v48  ;;  %v15841_v38 = vld [vmem:[%s19958_s30 + $0x1c8] sm:$0xff] }
 0x265   : >> { %v18594_v31 = vpop.f32.mrf.mxu1  ;;  %v18628_v54 = vpop.f32.mrf.mxu0 }
 0x266   : >> { %v21670_v32 = vadd.f32 %v3887_v11, %v3658_v2  ;;  %v3661_v4 = vadd.f32 %v18594_v31, %v21465_v60  ;;  %v15790_v60 = vld [vmem:[%s19958_s30 + $0x1bf] sm:$0xff] }
 0x267   : >> { %v3594_v29 = vpop.f32.mrf.mxu1  ;;  %v3890_v28 = vpop.f32.mrf.mxu0 }
 0x268   : >> { %v21673_v51 = vadd.f32 %v18628_v54, %v3661_v4  ;;  %v3659_v48 = vadd.f32 %v3594_v29, %v21472_v39  ;;  %v15840_v39 = vld [vmem:[%s19958_s30 + $0x1c0] sm:$0xff]  ;;  %v5776_v54 = vpack.c.bf16 %v15861_v45, %v15860_v27 }
 0x269   : >> { %v18597_v22 = vpop.f32.mrf.mxu1  ;;  %v18631_v56 = vpop.f32.mrf.mxu0  ;;  %18800 = vmatmul.mubr.msk.bf16.gmra.mxu1 %vm281_vm2, %v5197_v52  ;;  %18834 = vmatmul.mubr.msk.bf16.gmra.mxu0 %vm281_vm2, %v5493_v16  ;;  %v5495_v25 = vpack.c.bf16 %v15841_v38, %v15840_v39  ;;  %v6072_v52 = vpack.c.bf16 %v15911_v30, %v15910_v14  ;;  %v15865_v27 = vld [vmem:[%s19958_s30 + $0xf9] sm:$0xff] }
 0x26a   : >> { %v21680_v3 = vadd.f32 %v3890_v28, %v3659_v48  ;;  %v3664_v17 = vadd.f32 %v18597_v22, %v21483_v15  ;;  %18803 = vmatprep.mubr.msk.bf16.mxu1 %vm281_vm2, %v5198_v63  ;;  %18837 = vmatprep.mubr.msk.bf16.mxu0 %vm281_vm2, %v5494_v44  ;;  %v5199_v15 = vpack.c.bf16 %v15791_v37, %v15790_v60  ;;  %v15863_v22 = vld [vmem:[%s19958_s30 + $0xe9] sm:$0xff] }
 0x26b   : >> { %v3607_v34 = vpop.f32.mrf.mxu1  ;;  %v3903_v8 = vpop.f32.mrf.mxu0 }
 0x26c   : >> { %v21691_v10 = vadd.f32 %v18631_v56, %v3664_v17  ;;  %v3662_v11 = vadd.f32 %v3607_v34, %v21486_v36  ;;  %v15913_v56 = vld [vmem:[%s19958_s30 + $0xea] sm:$0xff]  ;;  %v15914_v34 = vld [vmem:[%s19958_s30 + $0xf2] sm:$0xff] }
 0x26d   : >> { %v18598_v26 = vpop.f32.mrf.mxu1  ;;  %v18632_v33 = vpop.f32.mrf.mxu0  ;;  %v15864_v17 = vld [vmem:[%s19958_s30 + $0xf1] sm:$0xff] }
 0x26e   : >> { %v21694_v2 = vadd.f32 %v3903_v8, %v3662_v11  ;;  %v3665_v31 = vadd.f32 %v18598_v26, %v21489_v58  ;;  %v15862_v58 = vld [vmem:[%s19958_s30 + $0xe1] sm:$0xff]  ;;  %v16092_v11 = vld [vmem:[%s25309_s1 + $0x2e] sm:$0x3]  ;;  %v16142_v26 = vld [vmem:[%s25309_s1 + $0x30] sm:$0x3] }
 0x26f   : >> { %v3610_v16 = vpop.f32.mrf.mxu1  ;;  %v3906_v4 = vpop.f32.mrf.mxu0  ;;  %v15915_v8 = vld [vmem:[%s19958_s30 + $0xfa] sm:$0xff] }
 0x270   : >> { %v21697_v63 = vadd.f32 %v18632_v33, %v3665_v31  ;;  %v3663_v36 = vadd.f32 %v3610_v16, %v21495_v12  ;;  %v15912_v12 = vld [vmem:[%s19958_s30 + $0xe2] sm:$0xff]  ;;  %v5778_v31 = vpack.c.bf16 %v15865_v27, %v15864_v17  ;;  %v15869_v17 = vld [vmem:[%s19958_s30 + $0x119] sm:$0xff] }
 0x271   : >> { %v18601_v44 = vpop.f32.mrf.mxu1  ;;  %v18635_v29 = vpop.f32.mrf.mxu0  ;;  %18804 = vmatmul.mubr.msk.bf16.gmra.mxu1 %vm281_vm2, %v5199_v15  ;;  %18838 = vmatmul.mubr.msk.bf16.gmra.mxu0 %vm281_vm2, %v5495_v25  ;;  %v6073_v30 = vpack.c.bf16 %v15913_v56, %v15912_v12  ;;  %v15917_v12 = vld [vmem:[%s19958_s30 + $0x10a] sm:$0xff]  ;;  %v15919_v27 = vld [vmem:[%s19958_s30 + $0x11a] sm:$0xff] }
 0x272   : >> { %v21703_v28 = vadd.f32 %v3906_v4, %v3663_v36  ;;  %v3668_v48 = vadd.f32 %v18601_v44, %v21504_v41  ;;  %18843 = vmatprep.mubr.msk.bf16.mxu1 %vm281_vm2, %v5776_v54  ;;  %18877 = vmatprep.mubr.msk.bf16.mxu0 %vm281_vm2, %v6072_v52  ;;  %v5777_v41 = vpack.c.bf16 %v15863_v22, %v15862_v58  ;;  %v15867_v58 = vld [vmem:[%s19958_s30 + $0x109] sm:$0xff]  ;;  %v15868_v56 = vld [vmem:[%s19958_s30 + $0x111] sm:$0xff] }
 0x273   : >> { %v3623_v60 = vpop.f32.mrf.mxu1  ;;  %v3919_v37 = vpop.f32.mrf.mxu0  ;;  %v6074_v54 = vpack.c.bf16 %v15915_v8, %v15914_v34  ;;  %v21731_v4 = vand.u32 %v16092_v11, %v19951_v5  ;;  %v21734_v36 = vand.u32 %v16142_v26, %v19951_v5  ;;  %v15916_v22 = vld [vmem:[%s19958_s30 + $0x102] sm:$0xff] }
 0x274   : >> { %v21712_v39 = vadd.f32 %v18635_v29, %v3668_v48  ;;  %v3666_v38 = vadd.f32 %v3623_v60, %v21516_v18 }
 0x275   : >> { %v18602_v45 = vpop.f32.mrf.mxu1  ;;  %v18636_v14 = vpop.f32.mrf.mxu0 }
 0x276   : >> { %v21724_v33 = vadd.f32 %v3919_v37, %v3666_v38  ;;  %v3669_v18 = vadd.f32 %v18602_v45, %v21519_v23  ;;  %v15866_v23 = vld [vmem:[%s19958_s30 + $0x101] sm:$0xff]  ;;  %v15918_v38 = vld [vmem:[%s19958_s30 + $0x112] sm:$0xff]  ;;  %v6075_v45 = vpack.c.bf16 %v15917_v12, %v15916_v22 }
 0x277   : >> { %v3626_v15 = vpop.f32.mrf.mxu1  ;;  %v3922_v25 = vpop.f32.mrf.mxu0  ;;  %v5779_v8 = vpack.c.bf16 %v15867_v58, %v15866_v23  ;;  %v6076_v11 = vpack.c.bf16 %v15919_v27, %v15918_v38  ;;  %v15872_v23 = vld [vmem:[%s19958_s30 + $0x131] sm:$0xff]  ;;  %v15873_v22 = vld [vmem:[%s19958_s30 + $0x139] sm:$0xff] }
 0x278   : >> { %v21727_v52 = vadd.f32 %v18636_v14, %v3669_v18  ;;  %v3667_v16 = vadd.f32 %v3626_v15, %v21532_v62  ;;  %v15922_v12 = vld [vmem:[%s19958_s30 + $0x132] sm:$0xff] }
 0x279   : >> { %v18641_v44 = vpop.f32.mrf.mxu1  ;;  %v18675_v29 = vpop.f32.mrf.mxu0  ;;  %18844 = vmatmul.mubr.msk.bf16.vlgmr.msra.gmra.mxu1 %vm281_vm2, %v5777_v41  ;;  %18878 = vmatmul.mubr.msk.bf16.vlgmr.msra.gmra.mxu0 %vm281_vm2, %v6073_v30  ;;  %v5780_v30 = vpack.c.bf16 %v15869_v17, %v15868_v56  ;;  %v15923_v56 = vld [vmem:[%s19958_s30 + $0x13a] sm:$0xff] }
 0x27a   : >> { %v21740_v48 = vadd.f32 %v3922_v25, %v3667_v16  ;;  %v4232_v62 = vadd.f32 %v18641_v44, %v21545_v43  ;;  %18910 = vmatpush3.bf16.msra.mxu1 %v21523_v0  ;;  %18944 = vmatpush3.bf16.msra.mxu0 %v21526_v46 }
 0x27b   : >> { %v4103_v60 = vpop.f32.mrf.mxu1  ;;  %v4399_v37 = vpop.f32.mrf.mxu0  ;;  %18847 = vmatprep.mubr.msk.bf16.mxu1 %vm281_vm2, %v5778_v31  ;;  %18881 = vmatprep.mubr.msk.bf16.mxu0 %vm281_vm2, %v6074_v54  ;;  %v15871_v54 = vld [vmem:[%s19958_s30 + $0x129] sm:$0xff] }
 0x27c   : >> { %v21753_v34 = vadd.f32 %v18675_v29, %v4232_v62  ;;  %v4230_v43 = vadd.f32 %v4103_v60, %v21550_v9  ;;  %18977 = vmatprep.subr.bf16.mxu1 %v21731_v4  ;;  %19011 = vmatprep.subr.bf16.mxu0 %v21734_v36  ;;  %v15921_v29 = vld [vmem:[%s19958_s30 + $0x12a] sm:$0xff] }
 0x27d   : >> { %v18642_v0 = vpop.f32.mrf.mxu1  ;;  %v18676_v46 = vpop.f32.mrf.mxu0 }
 0x27e   : >> { %v21758_v14 = vadd.f32 %v4399_v37, %v4230_v43  ;;  %v4233_v41 = vadd.f32 %v18642_v0, %v21553_v24  ;;  %v15870_v24 = vld [vmem:[%s19958_s30 + $0x121] sm:$0xff] }
 0x27f   : >> { %v4106_v26 = vpop.f32.mrf.mxu1  ;;  %v4402_v9 = vpop.f32.mrf.mxu0 }
 0x280   : >> { %v21761_v18 = vadd.f32 %v18676_v46, %v4233_v41  ;;  %v4231_v15 = vadd.f32 %v4106_v26, %v21560_v35  ;;  %v15920_v35 = vld [vmem:[%s19958_s30 + $0x122] sm:$0xff]  ;;  %v5782_v46 = vpack.c.bf16 %v15873_v22, %v15872_v23  ;;  %v15927_v23 = vld [vmem:[%s19958_s30 + $0x15a] sm:$0xff] }
 0x281   : >> { %v18645_v25 = vpop.f32.mrf.mxu1  ;;  %v18679_v31 = vpop.f32.mrf.mxu0  ;;  %18848 = vmatmul.mubr.msk.bf16.gmra.mxu1 %vm281_vm2, %v5779_v8  ;;  %18882 = vmatmul.mubr.msk.bf16.gmra.mxu0 %vm281_vm2, %v6075_v45  ;;  %v6077_v27 = vpack.c.bf16 %v15921_v29, %v15920_v35  ;;  %v21785_v8 = vpack.c.bf16 %v15923_v56, %v15922_v12  ;;  %v15877_v35 = vld [vmem:[%s19958_s30 + $0x159] sm:$0xff] }
 0x282   : >> { %v21768_v16 = vadd.f32 %v4402_v9, %v4231_v15  ;;  %v4236_v44 = vadd.f32 %v18645_v25, %v21571_v50  ;;  %18851 = vmatprep.mubr.msk.bf16.mxu1 %vm281_vm2, %v5780_v30  ;;  %18885 = vmatprep.mubr.msk.bf16.mxu0 %vm281_vm2, %v6076_v11  ;;  %v5781_v50 = vpack.c.bf16 %v15871_v54, %v15870_v24  ;;  %v15875_v9 = vld [vmem:[%s19958_s30 + $0x149] sm:$0xff]  ;;  %v15876_v24 = vld [vmem:[%s19958_s30 + $0x151] sm:$0xff] }
 0x283   : >> { %v4119_v58 = vpop.f32.mrf.mxu1  ;;  %v4415_v62 = vpop.f32.mrf.mxu0  ;;  %v15926_v29 = vld [vmem:[%s19958_s30 + $0x152] sm:$0xff] }
 0x284   : >> { %v21779_v60 = vadd.f32 %v18679_v31, %v4236_v44  ;;  %v4234_v37 = vadd.f32 %v4119_v58, %v21574_v21  ;;  %v15925_v31 = vld [vmem:[%s19958_s30 + $0x14a] sm:$0xff] }
 0x285   : >> { %v18646_v17 = vpop.f32.mrf.mxu1  ;;  %v18680_v38 = vpop.f32.mrf.mxu0 }
 0x286   : >> { %v21782_v43 = vadd.f32 %v4415_v62, %v4234_v37  ;;  %v4237_v0 = vadd.f32 %v18646_v17, %v21577_v47  ;;  %v15874_v47 = vld [vmem:[%s19958_s30 + $0x141] sm:$0xff] }
 0x287   : >> { %v4122_v45 = vpop.f32.mrf.mxu1  ;;  %v4418_v41 = vpop.f32.mrf.mxu0  ;;  %v5783_v12 = vpack.c.bf16 %v15875_v9, %v15874_v47  ;;  %v15929_v47 = vld [vmem:[%s19958_s30 + $0x16a] sm:$0xff] }
 0x288   : >> { %v21787_v30 = vadd.f32 %v18680_v38, %v4237_v0  ;;  %v4235_v21 = vadd.f32 %v4122_v45, %v21584_v55  ;;  %v15924_v55 = vld [vmem:[%s19958_s30 + $0x142] sm:$0xff]  ;;  %v5784_v38 = vpack.c.bf16 %v15877_v35, %v15876_v24  ;;  %v15880_v9 = vld [vmem:[%s19958_s30 + $0x171] sm:$0xff] }
 0x289   : >> { %v18649_v11 = vpop.f32.mrf.mxu1  ;;  %v18683_v26 = vpop.f32.mrf.mxu0  ;;  %18852 = vmatmul.mubr.msk.bf16.gmra.mxu1 %vm281_vm2, %v5781_v50  ;;  %18886 = vmatmul.mubr.msk.bf16.gmra.mxu0 %vm281_vm2, %v6077_v27  ;;  %v21809_v56 = vpack.c.bf16 %v15925_v31, %v15924_v55  ;;  %v21814_v50 = vpack.c.bf16 %v15927_v23, %v15926_v29  ;;  %v15881_v31 = vld [vmem:[%s19958_s30 + $0x179] sm:$0xff] }
 0x28a   : >> { %v21794_v15 = vadd.f32 %v4418_v41, %v4235_v21  ;;  %v4240_v25 = vadd.f32 %v18649_v11, %v21595_v61  ;;  %18855 = vmatprep.mubr.msk.bf16.mxu1 %vm281_vm2, %v5782_v46  ;;  %18889 = vmatprep.mubr.msk.bf16.mxu0 %vm281_vm2, %v21785_v8  ;;  %v15879_v21 = vld [vmem:[%s19958_s30 + $0x169] sm:$0xff]  ;;  %v15930_v24 = vld [vmem:[%s19958_s30 + $0x172] sm:$0xff] }
 0x28b   : >> { %v4135_v54 = vpop.f32.mrf.mxu1  ;;  %v4431_v44 = vpop.f32.mrf.mxu0 }
 0x28c   : >> { %v21806_v58 = vadd.f32 %v18683_v26, %v4240_v25  ;;  %v4238_v62 = vadd.f32 %v4135_v54, %v21598_v13  ;;  %v15931_v54 = vld [vmem:[%s19958_s30 + $0x17a] sm:$0xff] }
 0x28d   : >> { %v18650_v22 = vpop.f32.mrf.mxu1  ;;  %v18684_v61 = vpop.f32.mrf.mxu0 }
 0x28e   : >> { %v21811_v37 = vadd.f32 %v4431_v44, %v4238_v62  ;;  %v4241_v17 = vadd.f32 %v18650_v22, %v21601_v40  ;;  %v15878_v40 = vld [vmem:[%s19958_s30 + $0x161] sm:$0xff] }
 0x28f   : >> { %v4138_v27 = vpop.f32.mrf.mxu1  ;;  %v4434_v0 = vpop.f32.mrf.mxu0  ;;  %v5785_v23 = vpack.c.bf16 %v15879_v21, %v15878_v40 }
 0x290   : >> { %v21816_v13 = vadd.f32 %v18684_v61, %v4241_v17  ;;  %v4239_v46 = vadd.f32 %v4138_v27, %v21608_v53  ;;  %v15928_v53 = vld [vmem:[%s19958_s30 + $0x162] sm:$0xff]  ;;  %v21844_v17 = vpack.c.bf16 %v15931_v54, %v15930_v24 }
 0x291   : >> { %v18653_v45 = vpop.f32.mrf.mxu1  ;;  %v18687_v41 = vpop.f32.mrf.mxu0  ;;  %18856 = vmatmul.mubr.msk.bf16.gmra.mxu1 %vm281_vm2, %v5783_v12  ;;  %18890 = vmatmul.mubr.msk.bf16.gmra.mxu0 %vm281_vm2, %v21809_v56  ;;  %v21839_v62 = vpack.c.bf16 %v15929_v47, %v15928_v53  ;;  %v5786_v12 = vpack.c.bf16 %v15881_v31, %v15880_v9  ;;  %v15884_v53 = vld [vmem:[%s19958_s30 + $0x191] sm:$0xff]  ;;  %v15935_v31 = vld [vmem:[%s19958_s30 + $0x19a] sm:$0xff] }
 0x292   : >> { %v21824_v11 = vadd.f32 %v4434_v0, %v4239_v46  ;;  %v4244_v26 = vadd.f32 %v18653_v45, %v21619_v57  ;;  %18859 = vmatprep.mubr.msk.bf16.mxu1 %vm281_vm2, %v5784_v38  ;;  %18893 = vmatprep.mubr.msk.bf16.mxu0 %vm281_vm2, %v21814_v50 }
 0x293   : >> { %v4151_v25 = vpop.f32.mrf.mxu1  ;;  %v4447_v55 = vpop.f32.mrf.mxu0 }
 0x294   : >> { %v21836_v44 = vadd.f32 %v18687_v41, %v4244_v26  ;;  %v4242_v35 = vadd.f32 %v4151_v25, %v21622_v59  ;;  %v15883_v41 = vld [vmem:[%s19958_s30 + $0x189] sm:$0xff]  ;;  %v15885_v25 = vld [vmem:[%s19958_s30 + $0x199] sm:$0xff] }
 0x295   : >> { %v18654_v29 = vpop.f32.mrf.mxu1  ;;  %v18688_v57 = vpop.f32.mrf.mxu0  ;;  %v15933_v26 = vld [vmem:[%s19958_s30 + $0x18a] sm:$0xff] }
 0x296   : >> { %v21841_v22 = vadd.f32 %v4447_v55, %v4242_v35  ;;  %v4245_v61 = vadd.f32 %v18654_v29, %v21625_v42  ;;  %v15882_v42 = vld [vmem:[%s19958_s30 + $0x181] sm:$0xff]  ;;  %v15934_v55 = vld [vmem:[%s19958_s30 + $0x192] sm:$0xff] }
 0x297   : >> { %v4154_v38 = vpop.f32.mrf.mxu1  ;;  %v4450_v27 = vpop.f32.mrf.mxu0  ;;  %v5787_v29 = vpack.c.bf16 %v15883_v41, %v15882_v42  ;;  %v15887_v41 = vld [vmem:[%s19958_s30 + $0x1a9] sm:$0xff] }
 0x298   : >> { %v21846_v59 = vadd.f32 %v18688_v57, %v4245_v61  ;;  %v4243_v0 = vadd.f32 %v4154_v38, %v21632_v1  ;;  %v15932_v1 = vld [vmem:[%s19958_s30 + $0x182] sm:$0xff]  ;;  %v21874_v38 = vpack.c.bf16 %v15935_v31, %v15934_v55  ;;  %v15938_v55 = vld [vmem:[%s19958_s30 + $0x1b2] sm:$0xff]  ;;  %v15939_v31 = vld [vmem:[%s19958_s30 + $0x1ba] sm:$0xff] }
 0x299   : >> { %v18657_v46 = vpop.f32.mrf.mxu1  ;;  %v18691_v45 = vpop.f32.mrf.mxu0  ;;  %18860 = vmatmul.mubr.msk.bf16.gmra.mxu1 %vm281_vm2, %v5785_v23  ;;  %18894 = vmatmul.mubr.msk.bf16.gmra.mxu0 %vm281_vm2, %v21839_v62  ;;  %v21869_v57 = vpack.c.bf16 %v15933_v26, %v15932_v1  ;;  %v15937_v26 = vld [vmem:[%s19958_s30 + $0x1aa] sm:$0xff] }
 0x29a   : >> { %v21854_v40 = vadd.f32 %v4450_v27, %v4243_v0  ;;  %v4248_v21 = vadd.f32 %v18657_v46, %v21643_v20  ;;  %18863 = vmatprep.mubr.msk.bf16.mxu1 %vm281_vm2, %v5786_v12  ;;  %18897 = vmatprep.mubr.msk.bf16.mxu0 %vm281_vm2, %v21844_v17  ;;  %v5788_v12 = vpack.c.bf16 %v15885_v25, %v15884_v53  ;;  %v15888_v53 = vld [vmem:[%s19958_s30 + $0x1b1] sm:$0xff]  ;;  %v15889_v25 = vld [vmem:[%s19958_s30 + $0x1b9] sm:$0xff] }
 0x29b   : >> { %v4167_v47 = vpop.f32.mrf.mxu1  ;;  %v4463_v9 = vpop.f32.mrf.mxu0 }
 0x29c   : >> { %v21866_v24 = vadd.f32 %v18691_v45, %v4248_v21  ;;  %v4246_v54 = vadd.f32 %v4167_v47, %v21646_v19 }
 0x29d   : >> { %v18658_v35 = vpop.f32.mrf.mxu1  ;;  %v18692_v20 = vpop.f32.mrf.mxu0 }
 0x29e   : >> { %v21871_v23 = vadd.f32 %v4463_v9, %v4246_v54  ;;  %v4249_v61 = vadd.f32 %v18658_v35, %v21649_v7  ;;  %v15886_v7 = vld [vmem:[%s19958_s30 + $0x1a1] sm:$0xff] }
 0x29f   : >> { %v4170_v27 = vpop.f32.mrf.mxu1  ;;  %v4466_v0 = vpop.f32.mrf.mxu0 }
 0x2a0   : >> { %v21876_v19 = vadd.f32 %v18692_v20, %v4249_v61  ;;  %v4247_v46 = vadd.f32 %v4170_v27, %v21656_v49  ;;  %v15936_v49 = vld [vmem:[%s19958_s30 + $0x1a2] sm:$0xff] }
 0x2a1   : >> { %v18661_v45 = vpop.f32.mrf.mxu1  ;;  %v18695_v42 = vpop.f32.mrf.mxu0  ;;  %18864 = vmatmul.mubr.msk.bf16.gmra.mxu1 %vm281_vm2, %v5787_v29  ;;  %18898 = vmatmul.mubr.msk.bf16.gmra.mxu0 %vm281_vm2, %v21869_v57  ;;  %v5789_v29 = vpack.c.bf16 %v15887_v41, %v15886_v7  ;;  %v21899_v61 = vpack.c.bf16 %v15937_v26, %v15936_v49 }
 0x2a2   : >> { %v21884_v21 = vadd.f32 %v4466_v0, %v4247_v46  ;;  %v4252_v1 = vadd.f32 %v18661_v45, %v21667_v6  ;;  %18867 = vmatprep.mubr.msk.bf16.mxu1 %vm281_vm2, %v5788_v12  ;;  %18901 = vmatprep.mubr.msk.bf16.mxu0 %vm281_vm2, %v21874_v38  ;;  %v5790_v0 = vpack.c.bf16 %v15889_v25, %v15888_v53  ;;  %v15891_v53 = vld [vmem:[%s19958_s30 + $0x1c9] sm:$0xff] }
 0x2a3   : >> { %v4183_v47 = vpop.f32.mrf.mxu1  ;;  %v4479_v9 = vpop.f32.mrf.mxu0  ;;  %v21904_v46 = vpack.c.bf16 %v15939_v31, %v15938_v55  ;;  %v16010_v55 = vld [vmem:[%s19958_s30 + $0x133] sm:$0xff]  ;;  %v16011_v31 = vld [vmem:[%s19958_s30 + $0x13b] sm:$0xff] }
 0x2a4   : >> { %v21896_v54 = vadd.f32 %v18695_v42, %v4252_v1  ;;  %v4250_v35 = vadd.f32 %v4183_v47, %v21670_v32  ;;  %v15941_v47 = vld [vmem:[%s19958_s30 + $0x1ca] sm:$0xff] }
 0x2a5   : >> { %v18662_v20 = vpop.f32.mrf.mxu1  ;;  %v18696_v6 = vpop.f32.mrf.mxu0 }
 0x2a6   : >> { %v21901_v12 = vadd.f32 %v4479_v9, %v4250_v35  ;;  %v4253_v27 = vadd.f32 %v18662_v20, %v21673_v51  ;;  %v15890_v51 = vld [vmem:[%s19958_s30 + $0x1c1] sm:$0xff] }
 0x2a7   : >> { %v4186_v45 = vpop.f32.mrf.mxu1  ;;  %v4482_v42 = vpop.f32.mrf.mxu0 }
 0x2a8   : >> { %v21906_v1 = vadd.f32 %v18696_v6, %v4253_v27  ;;  %v4251_v32 = vadd.f32 %v4186_v45, %v21680_v3  ;;  %v15940_v3 = vld [vmem:[%s19958_s30 + $0x1c2] sm:$0xff]  ;;  %v5791_v27 = vpack.c.bf16 %v15891_v53, %v15890_v51 }
 0x2a9   : >> { %v18665_v7 = vpop.f32.mrf.mxu1  ;;  %v18699_v41 = vpop.f32.mrf.mxu0  ;;  %18868 = vmatmul.mubr.msk.bf16.gmra.mxu1 %vm281_vm2, %v5789_v29  ;;  %18902 = vmatmul.mubr.msk.bf16.gmra.mxu0 %vm281_vm2, %v21899_v61  ;;  %v16012_v53 = vld [vmem:[%s19958_s30 + $0x143] sm:$0xff] }
 0x2aa   : >> { %v21913_v49 = vadd.f32 %v4482_v42, %v4251_v32  ;;  %v4256_v26 = vadd.f32 %v18665_v7, %v21691_v10  ;;  %18871 = vmatprep.mubr.msk.bf16.mxu1 %vm281_vm2, %v5790_v0  ;;  %18905 = vmatprep.mubr.msk.bf16.mxu0 %vm281_vm2, %v21904_v46  ;;  %v21927_v10 = vpack.c.bf16 %v15941_v47, %v15940_v3  ;;  %v16013_v3 = vld [vmem:[%s19958_s30 + $0x14b] sm:$0xff] }
 0x2ab   : >> { %v4199_v9 = vpop.f32.mrf.mxu1  ;;  %v4495_v25 = vpop.f32.mrf.mxu0  ;;  %v6664_v42 = vpack.c.bf16 %v16011_v31, %v16010_v55  ;;  %v16014_v55 = vld [vmem:[%s19958_s30 + $0x153] sm:$0xff]  ;;  %v16015_v31 = vld [vmem:[%s19958_s30 + $0x15b] sm:$0xff] }
 0x2ac   : >> { %25312 = vst [vmem:[#allocation2_spill] sm:$0xff] %v21913_v49  ;;  %v21924_v35 = vadd.f32 %v18699_v41, %v4256_v26  ;;  %v4254_v20 = vadd.f32 %v4199_v9, %v21694_v2 }
 0x2ad   : >> { %v18666_v6 = vpop.f32.mrf.mxu1  ;;  %v18700_v29 = vpop.f32.mrf.mxu0 }
 0x2ae   : >> { %v21929_v0 = vadd.f32 %v4495_v25, %v4254_v20  ;;  %v4257_v45 = vadd.f32 %v18666_v6, %v21697_v63 }
 0x2af   : >> { %v4202_v32 = vpop.f32.mrf.mxu1  ;;  %v4498_v7 = vpop.f32.mrf.mxu0 }
 0x2b0   : >> { %v21932_v49 = vadd.f32 %v18700_v29, %v4257_v45  ;;  %v4255_v41 = vadd.f32 %v4202_v32, %v21703_v28  ;;  %v6665_v29 = vpack.c.bf16 %v16013_v3, %v16012_v53  ;;  %v6666_v32 = vpack.c.bf16 %v16015_v31, %v16014_v55  ;;  %v16019_v55 = vld [vmem:[%s19958_s30 + $0x17b] sm:$0xff] }
 0x2b1   : >> { %v18669_v2 = vpop.f32.mrf.mxu1  ;;  %v18703_v26 = vpop.f32.mrf.mxu0  ;;  %18872 = vmatmul.mubr.msk.bf16.gmra.mxu1 %vm281_vm2, %v5791_v27  ;;  %18906 = vmatmul.mubr.msk.bf16.gmra.mxu0 %vm281_vm2, %v21927_v10 }
 0x2b2   : >> { %v21938_v51 = vadd.f32 %v4498_v7, %v4255_v41  ;;  %v4260_v63 = vadd.f32 %v18669_v2, %v21712_v39  ;;  %18911 = vmatprep.mubr.msk.bf16.mxu1 %vm281_vm2, %v21785_v8  ;;  %18945 = vmatprep.mubr.msk.bf16.mxu0 %vm281_vm2, %v6664_v42  ;;  %v16192_v39 = vld [vmem:[%s25309_s1 + $0x32] sm:$0x3]  ;;  %v16242_v8 = vld [vmem:[%s25309_s1 + $0x34] sm:$0x3] }
 0x2b3   : >> { %v4215_v28 = vpop.f32.mrf.mxu1  ;;  %v4511_v47 = vpop.f32.mrf.mxu0  ;;  %v21964_v2 = vand.u32 %v16192_v39, %v19951_v5 }
 0x2b4   : >> { %v21946_v9 = vadd.f32 %v18703_v26, %v4260_v63  ;;  %v4258_v25 = vadd.f32 %v4215_v28, %v21724_v33  ;;  %v21967_v26 = vand.u32 %v16242_v8, %v19951_v5  ;;  %v16017_v28 = vld [vmem:[%s19958_s30 + $0x16b] sm:$0xff] }
 0x2b5   : >> { %v18670_v20 = vpop.f32.mrf.mxu1  ;;  %v18704_v6 = vpop.f32.mrf.mxu0 }
 0x2b6   : >> { %v21957_v27 = vadd.f32 %v4511_v47, %v4258_v25  ;;  %v4261_v45 = vadd.f32 %v18670_v20, %v21727_v52 }
 0x2b7   : >> { %v4218_v42 = vpop.f32.mrf.mxu1  ;;  %v4514_v33 = vpop.f32.mrf.mxu0 }
 0x2b8   : >> { %v21960_v7 = vadd.f32 %v18704_v6, %v4261_v45  ;;  %v4259_v41 = vadd.f32 %v4218_v42, %v21740_v48  ;;  %v16016_v48 = vld [vmem:[%s19958_s30 + $0x163] sm:$0xff] }
 0x2b9   : >> { %v18709_v63 = vpop.f32.mrf.mxu1  ;;  %v18743_v53 = vpop.f32.mrf.mxu0  ;;  %18912 = vmatmul.mubr.msk.bf16.vlgmr.msra.gmra.mxu1 %vm281_vm2, %v21809_v56  ;;  %18946 = vmatmul.mubr.msk.bf16.vlgmr.msra.gmra.mxu0 %vm281_vm2, %v6665_v29  ;;  %v16018_v56 = vld [vmem:[%s19958_s30 + $0x173] sm:$0xff] }
 0x2ba   : >> { %v21972_v52 = vadd.f32 %v4514_v33, %v4259_v41  ;;  %v4824_v3 = vadd.f32 %v18709_v63, %v21753_v34  ;;  %18978 = vmatpush3.bf16.msra.mxu1 %v21731_v4  ;;  %19012 = vmatpush3.bf16.msra.mxu0 %v21734_v36  ;;  %v6667_v34 = vpack.c.bf16 %v16017_v28, %v16016_v48  ;;  %v16020_v41 = vld [vmem:[%s19958_s30 + $0x183] sm:$0xff]  ;;  %v16021_v63 = vld [vmem:[%s19958_s30 + $0x18b] sm:$0xff]  ;;  %v16023_v48 = vld [vmem:[%s19958_s30 + $0x19b] sm:$0xff] }
 0x2bb   : >> { %v4695_v47 = vpop.f32.mrf.mxu1  ;;  %v4991_v25 = vpop.f32.mrf.mxu0  ;;  %18915 = vmatprep.mubr.msk.bf16.mxu1 %vm281_vm2, %v21814_v50  ;;  %18949 = vmatprep.mubr.msk.bf16.mxu0 %vm281_vm2, %v6666_v32  ;;  %v6668_v29 = vpack.c.bf16 %v16019_v55, %v16018_v56  ;;  %v6669_v56 = vpack.c.bf16 %v16021_v63, %v16020_v41 }
 0x2bc   : >> { %v21984_v31 = vadd.f32 %v18743_v53, %v4824_v3  ;;  %v4822_v20 = vadd.f32 %v4695_v47, %v21758_v14  ;;  %19045 = vmatprep.subr.bf16.mxu1 %v21964_v2  ;;  %19079 = vmatprep.subr.bf16.mxu0 %v21967_v26  ;;  %v16022_v3 = vld [vmem:[%s19958_s30 + $0x193] sm:$0xff] }
 0x2bd   : >> { %v18710_v4 = vpop.f32.mrf.mxu1  ;;  %v18744_v36 = vpop.f32.mrf.mxu0  ;;  %v6670_v55 = vpack.c.bf16 %v16023_v48, %v16022_v3 }
 0x2be   : >> { %v21989_v6 = vadd.f32 %v4991_v25, %v4822_v20  ;;  %v4825_v50 = vadd.f32 %v18710_v4, %v21761_v18 }
 0x2bf   : >> { %v4698_v39 = vpop.f32.mrf.mxu1  ;;  %v4994_v8 = vpop.f32.mrf.mxu0 }
 0x2c0   : >> { %v21992_v45 = vadd.f32 %v18744_v36, %v4825_v50  ;;  %v4823_v14 = vadd.f32 %v4698_v39, %v21768_v16  ;;  %v16024_v39 = vld [vmem:[%s19958_s30 + $0x1a3] sm:$0xff] }
 0x2c1   : >> { %v18713_v42 = vpop.f32.mrf.mxu1  ;;  %v18747_v33 = vpop.f32.mrf.mxu0  ;;  %18916 = vmatmul.mubr.msk.bf16.gmra.mxu1 %vm281_vm2, %v21839_v62  ;;  %18950 = vmatmul.mubr.msk.bf16.gmra.mxu0 %vm281_vm2, %v6667_v34 }
 0x2c2   : >> { %v21998_v32 = vadd.f32 %v4994_v8, %v4823_v14  ;;  %v4828_v18 = vadd.f32 %v18713_v42, %v21779_v60  ;;  %18919 = vmatprep.mubr.msk.bf16.mxu1 %vm281_vm2, %v21844_v17  ;;  %18953 = vmatprep.mubr.msk.bf16.mxu0 %vm281_vm2, %v6668_v29  ;;  %v16025_v8 = vld [vmem:[%s19958_s30 + $0x1ab] sm:$0xff]  ;;  %v16026_v42 = vld [vmem:[%s19958_s30 + $0x1b3] sm:$0xff] }
 0x2c3   : >> { %v4711_v53 = vpop.f32.mrf.mxu1  ;;  %v5007_v16 = vpop.f32.mrf.mxu0 }
 0x2c4   : >> { %v22008_v28 = vadd.f32 %v18747_v33, %v4828_v18  ;;  %v4826_v62 = vadd.f32 %v4711_v53, %v21782_v43  ;;  %v16027_v33 = vld [vmem:[%s19958_s30 + $0x1bb] sm:$0xff]  ;;  %v6671_v53 = vpack.c.bf16 %v16025_v8, %v16024_v39 }
 0x2c5   : >> { %v18714_v47 = vpop.f32.mrf.mxu1  ;;  %v18748_v25 = vpop.f32.mrf.mxu0 }
 0x2c6   : >> { %v22011_v60 = vadd.f32 %v5007_v16, %v4826_v62  ;;  %v4829_v17 = vadd.f32 %v18714_v47, %v21787_v30  ;;  %v6672_v16 = vpack.c.bf16 %v16027_v33, %v16026_v42 }
 0x2c7   : >> { %v4714_v20 = vpop.f32.mrf.mxu1  ;;  %v5010_v4 = vpop.f32.mrf.mxu0 }
 0x2c8   : >> { %v22014_v36 = vadd.f32 %v18748_v25, %v4829_v17  ;;  %v4827_v34 = vadd.f32 %v4714_v20, %v21794_v15  ;;  %v16028_v17 = vld [vmem:[%s19958_s30 + $0x1c3] sm:$0xff] }
 0x2c9   : >> { %v18717_v50 = vpop.f32.mrf.mxu1  ;;  %v18751_v43 = vpop.f32.mrf.mxu0  ;;  %18920 = vmatmul.mubr.msk.bf16.gmra.mxu1 %vm281_vm2, %v21869_v57  ;;  %18954 = vmatmul.mubr.msk.bf16.gmra.mxu0 %vm281_vm2, %v6669_v56 }
 0x2ca   : >> { %v22020_v29 = vadd.f32 %v5010_v4, %v4827_v34  ;;  %v4832_v30 = vadd.f32 %v18717_v50, %v21806_v58  ;;  %18923 = vmatprep.mubr.msk.bf16.mxu1 %vm281_vm2, %v21874_v38  ;;  %18957 = vmatprep.mubr.msk.bf16.mxu0 %vm281_vm2, %v6670_v55  ;;  %v16029_v55 = vld [vmem:[%s19958_s30 + $0x1cb] sm:$0xff]  ;;  %v15981_v34 = vld [vmem:[%s19958_s30 + $0x1da] sm:$0xff] }
 0x2cb   : >> { %v4727_v14 = vpop.f32.mrf.mxu1  ;;  %v5023_v15 = vpop.f32.mrf.mxu0  ;;  %v16030_v50 = vld [vmem:[%s19958_s30 + $0x1d3] sm:$0xff]  ;;  %v6673_v8 = vpack.c.bf16 %v16029_v55, %v16028_v17 }
 0x2cc   : >> { %v22030_v18 = vadd.f32 %v18751_v43, %v4832_v30  ;;  %v4830_v57 = vadd.f32 %v4727_v14, %v21811_v37  ;;  %v16031_v43 = vld [vmem:[%s19958_s30 + $0x1db] sm:$0xff]  ;;  %v16034_v17 = vld [vmem:[%s19958_s30 + $0x1f3] sm:$0xff] }
 0x2cd   : >> { %v18718_v41 = vpop.f32.mrf.mxu1  ;;  %v18752_v63 = vpop.f32.mrf.mxu0  ;;  %v6674_v42 = vpack.c.bf16 %v16031_v43, %v16030_v50 }
 0x2ce   : >> { %v22033_v58 = vadd.f32 %v5023_v15, %v4830_v57  ;;  %v4833_v38 = vadd.f32 %v18718_v41, %v21816_v13 }
 0x2cf   : >> { %v4730_v3 = vpop.f32.mrf.mxu1  ;;  %v5026_v48 = vpop.f32.mrf.mxu0 }
 0x2d0   : >> { %v22036_v62 = vadd.f32 %v18752_v63, %v4833_v38  ;;  %v4831_v47 = vadd.f32 %v4730_v3, %v21824_v11  ;;  %v15980_v11 = vld [vmem:[%s19958_s30 + $0x1d2] sm:$0xff]  ;;  %v15983_v38 = vld [vmem:[%s19958_s30 + $0x1ea] sm:$0xff] }
 0x2d1   : >> { %v18721_v37 = vpop.f32.mrf.mxu1  ;;  %v18755_v25 = vpop.f32.mrf.mxu0  ;;  %18924 = vmatmul.mubr.msk.bf16.gmra.mxu1 %vm281_vm2, %v21899_v61  ;;  %18958 = vmatmul.mubr.msk.bf16.gmra.mxu0 %vm281_vm2, %v6671_v53  ;;  %v6378_v15 = vpack.c.bf16 %v15981_v34, %v15980_v11 }
 0x2d2   : >> { %v22042_v56 = vadd.f32 %v5026_v48, %v4831_v47  ;;  %v4836_v13 = vadd.f32 %v18721_v37, %v21836_v44  ;;  %18927 = vmatprep.mubr.msk.bf16.mxu1 %vm281_vm2, %v21904_v46  ;;  %18961 = vmatprep.mubr.msk.bf16.mxu0 %vm281_vm2, %v6672_v16  ;;  %v16033_v48 = vld [vmem:[%s19958_s30 + $0x1eb] sm:$0xff] }
 0x2d3   : >> { %v4743_v20 = vpop.f32.mrf.mxu1  ;;  %v5039_v4 = vpop.f32.mrf.mxu0  ;;  %v15984_v47 = vld [vmem:[%s19958_s30 + $0x1f2] sm:$0xff] }
 0x2d4   : >> { %v22054_v61 = vadd.f32 %v18755_v25, %v4836_v13  ;;  %v4834_v30 = vadd.f32 %v4743_v20, %v21841_v22  ;;  %v15985_v13 = vld [vmem:[%s19958_s30 + $0x1fa] sm:$0xff] }
 0x2d5   : >> { %v18722_v39 = vpop.f32.mrf.mxu1  ;;  %v18756_v44 = vpop.f32.mrf.mxu0 }
 0x2d6   : >> { %v22057_v46 = vadd.f32 %v5039_v4, %v4834_v30  ;;  %v4837_v14 = vadd.f32 %v18722_v39, %v21846_v59  ;;  %v15982_v59 = vld [vmem:[%s19958_s30 + $0x1e2] sm:$0xff]  ;;  %v6380_v30 = vpack.c.bf16 %v15985_v13, %v15984_v47 }
 0x2d7   : >> { %v4746_v33 = vpop.f32.mrf.mxu1  ;;  %v5042_v57 = vpop.f32.mrf.mxu0 }
 0x2d8   : >> { %v22060_v41 = vadd.f32 %v18756_v44, %v4837_v14  ;;  %v4835_v22 = vadd.f32 %v4746_v33, %v21854_v40  ;;  %v16032_v40 = vld [vmem:[%s19958_s30 + $0x1e3] sm:$0xff] }
 0x2d9   : >> { %v18725_v63 = vpop.f32.mrf.mxu1  ;;  %v18759_v53 = vpop.f32.mrf.mxu0  ;;  %18928 = vmatmul.mubr.msk.bf16.gmra.mxu1 %vm281_vm2, %v21927_v10  ;;  %18962 = vmatmul.mubr.msk.bf16.gmra.mxu0 %vm281_vm2, %v6673_v8  ;;  %v16035_v10 = vld [vmem:[%s19958_s30 + $0x1fb] sm:$0xff]  ;;  %v6675_v34 = vpack.c.bf16 %v16033_v48, %v16032_v40  ;;  %v15987_v33 = vld [vmem:[%s19958_s30 + $0x20a] sm:$0xff]  ;;  %v16038_v40 = vld [vmem:[%s19958_s30 + $0x213] sm:$0xff] }
 0x2da   : >> { %v22068_v16 = vadd.f32 %v5042_v57, %v4835_v22  ;;  %v4840_v3 = vadd.f32 %v18725_v63, %v21866_v24  ;;  %18931 = vmatprep.mubr.msk.bf16.mxu1 %vm281_vm2, %v6378_v15  ;;  %18965 = vmatprep.mubr.msk.bf16.mxu0 %vm281_vm2, %v6674_v42  ;;  %v6379_v24 = vpack.c.bf16 %v15983_v38, %v15982_v59  ;;  %v16037_v63 = vld [vmem:[%s19958_s30 + $0x20b] sm:$0xff]  ;;  %v16039_v48 = vld [vmem:[%s19958_s30 + $0x21b] sm:$0xff] }
 0x2db   : >> { %v4759_v37 = vpop.f32.mrf.mxu1  ;;  %v5055_v25 = vpop.f32.mrf.mxu0  ;;  %v6676_v39 = vpack.c.bf16 %v16035_v10, %v16034_v17 }
 0x2dc   : >> { %v22079_v55 = vadd.f32 %v18759_v53, %v4840_v3  ;;  %v4838_v11 = vadd.f32 %v4759_v37, %v21871_v23  ;;  %v15988_v53 = vld [vmem:[%s19958_s30 + $0x212] sm:$0xff]  ;;  %v15989_v3 = vld [vmem:[%s19958_s30 + $0x21a] sm:$0xff] }
 0x2dd   : >> { %v18726_v20 = vpop.f32.mrf.mxu1  ;;  %v18760_v4 = vpop.f32.mrf.mxu0 }
 0x2de   : >> { %v22082_v50 = vadd.f32 %v5055_v25, %v4838_v11  ;;  %v4841_v43 = vadd.f32 %v18726_v20, %v21876_v19  ;;  %v15986_v19 = vld [vmem:[%s19958_s30 + $0x202] sm:$0xff]  ;;  %v6382_v20 = vpack.c.bf16 %v15989_v3, %v15988_v53  ;;  %v16110_v53 = vld [vmem:[%s19958_s30 + $0x135] sm:$0xff] }
 0x2df   : >> { %v4762_v44 = vpop.f32.mrf.mxu1  ;;  %v5058_v8 = vpop.f32.mrf.mxu0 }
 0x2e0   : >> { %v22085_v14 = vadd.f32 %v18760_v4, %v4841_v43  ;;  %v4839_v23 = vadd.f32 %v4762_v44, %v21884_v21  ;;  %v16036_v21 = vld [vmem:[%s19958_s30 + $0x203] sm:$0xff]  ;;  %v6678_v4 = vpack.c.bf16 %v16039_v48, %v16038_v40 }
 0x2e1   : >> { %v18729_v15 = vpop.f32.mrf.mxu1  ;;  %v18763_v42 = vpop.f32.mrf.mxu0  ;;  %18932 = vmatmul.mubr.msk.bf16.gmra.mxu1 %vm281_vm2, %v6379_v24  ;;  %18966 = vmatmul.mubr.msk.bf16.gmra.mxu0 %vm281_vm2, %v6675_v34  ;;  %v6677_v17 = vpack.c.bf16 %v16037_v63, %v16036_v21  ;;  %v16061_v63 = vld [vmem:[%s19958_s30 + $0x13c] sm:$0xff] }
 0x2e2   : >> { %v22092_v57 = vadd.f32 %v5058_v8, %v4839_v23  ;;  %v4844_v22 = vadd.f32 %v18729_v15, %v21896_v54  ;;  %18935 = vmatprep.mubr.msk.bf16.mxu1 %vm281_vm2, %v6380_v30  ;;  %18969 = vmatprep.mubr.msk.bf16.mxu0 %vm281_vm2, %v6676_v39  ;;  %v6381_v54 = vpack.c.bf16 %v15987_v33, %v15986_v19  ;;  %v15991_v8 = vld [vmem:[%s19958_s30 + $0x22a] sm:$0xff]  ;;  %v16060_v33 = vld [vmem:[%s19958_s30 + $0x134] sm:$0xff] }
 0x2e3   : >> { %v4775_v59 = vpop.f32.mrf.mxu1  ;;  %v5071_v38 = vpop.f32.mrf.mxu0  ;;  %v16041_v19 = vld [vmem:[%s19958_s30 + $0x22b] sm:$0xff] }
 0x2e4   : >> { %v22103_v47 = vadd.f32 %v18763_v42, %v4844_v22  ;;  %v4842_v37 = vadd.f32 %v4775_v59, %v21901_v12  ;;  %v25313_v12 = vld [vmem:[#allocation2_spill] sm:$0xff] }
 0x2e5   : >> { %v18730_v25 = vpop.f32.mrf.mxu1  ;;  %v18764_v13 = vpop.f32.mrf.mxu0  ;;  %v16040_v42 = vld [vmem:[%s19958_s30 + $0x223] sm:$0xff] }
 0x2e6   : >> { %v22106_v10 = vadd.f32 %v5071_v38, %v4842_v37  ;;  %v4845_v11 = vadd.f32 %v18730_v25, %v21906_v1  ;;  %v15990_v1 = vld [vmem:[%s19958_s30 + $0x222] sm:$0xff]  ;;  %v6679_v37 = vpack.c.bf16 %v16041_v19, %v16040_v42 }
 0x2e7   : >> { %v4778_v24 = vpop.f32.mrf.mxu1  ;;  %v5074_v34 = vpop.f32.mrf.mxu0  ;;  %v16111_v59 = vld [vmem:[%s19958_s30 + $0x13d] sm:$0xff] }
 0x2e8   : >> { %v22109_v43 = vadd.f32 %v18764_v13, %v4845_v11  ;;  %v4843_v30 = vadd.f32 %v4778_v24, %v25313_v12 }
 0x2e9   : >> { %v18733_v39 = vpop.f32.mrf.mxu1  ;;  %v18767_v44 = vpop.f32.mrf.mxu0  ;;  %18936 = vmatmul.mubr.msk.bf16.gmra.mxu1 %vm281_vm2, %v6381_v54  ;;  %18970 = vmatmul.mubr.msk.bf16.gmra.mxu0 %vm281_vm2, %v6677_v17  ;;  %v6960_v54 = vpack.c.bf16 %v16061_v63, %v16060_v33  ;;  %v7256_v17 = vpack.c.bf16 %v16111_v59, %v16110_v53  ;;  %v16065_v33 = vld [vmem:[%s19958_s30 + $0x15c] sm:$0xff] }
 0x2ea   : >> { %v22116_v23 = vadd.f32 %v5074_v34, %v4843_v30  ;;  %v4848_v15 = vadd.f32 %v18733_v39, %v21924_v35  ;;  %18939 = vmatprep.mubr.msk.bf16.mxu1 %vm281_vm2, %v6382_v20  ;;  %18973 = vmatprep.mubr.msk.bf16.mxu0 %vm281_vm2, %v6678_v4  ;;  %v6383_v35 = vpack.c.bf16 %v15991_v8, %v15990_v1  ;;  %v16063_v39 = vld [vmem:[%s19958_s30 + $0x14c] sm:$0xff] }
 0x2eb   : >> { %v4791_v22 = vpop.f32.mrf.mxu1  ;;  %v5087_v21 = vpop.f32.mrf.mxu0 }
 0x2ec   : >> { %v22127_v38 = vadd.f32 %v18767_v44, %v4848_v15  ;;  %v4846_v3 = vadd.f32 %v4791_v22, %v21929_v0  ;;  %v16113_v44 = vld [vmem:[%s19958_s30 + $0x14d] sm:$0xff]  ;;  %v16114_v22 = vld [vmem:[%s19958_s30 + $0x155] sm:$0xff] }
 0x2ed   : >> { %v18734_v40 = vpop.f32.mrf.mxu1  ;;  %v18768_v48 = vpop.f32.mrf.mxu0  ;;  %v16064_v15 = vld [vmem:[%s19958_s30 + $0x154] sm:$0xff] }
 0x2ee   : >> { %v22130_v25 = vadd.f32 %v5087_v21, %v4846_v3  ;;  %v4849_v13 = vadd.f32 %v18734_v40, %v21932_v49  ;;  %v16062_v49 = vld [vmem:[%s19958_s30 + $0x144] sm:$0xff]  ;;  %v16292_v3 = vld [vmem:[%s25309_s1 + $0x36] sm:$0x3]  ;;  %v16342_v40 = vld [vmem:[%s25309_s1 + $0x38] sm:$0x3] }
 0x2ef   : >> { %v4794_v11 = vpop.f32.mrf.mxu1  ;;  %v5090_v20 = vpop.f32.mrf.mxu0  ;;  %v16115_v21 = vld [vmem:[%s19958_s30 + $0x15d] sm:$0xff] }
 0x2f0   : >> { %v22133_v4 = vadd.f32 %v18768_v48, %v4849_v13  ;;  %v4847_v0 = vadd.f32 %v4794_v11, %v21938_v51  ;;  %v16112_v51 = vld [vmem:[%s19958_s30 + $0x145] sm:$0xff]  ;;  %v6962_v13 = vpack.c.bf16 %v16065_v33, %v16064_v15  ;;  %v16069_v15 = vld [vmem:[%s19958_s30 + $0x17c] sm:$0xff] }
 0x2f1   : >> { %v18737_v24 = vpop.f32.mrf.mxu1  ;;  %v18771_v34 = vpop.f32.mrf.mxu0  ;;  %18940 = vmatmul.mubr.msk.bf16.gmra.mxu1 %vm281_vm2, %v6383_v35  ;;  %18974 = vmatmul.mubr.msk.bf16.gmra.mxu0 %vm281_vm2, %v6679_v37  ;;  %v7257_v59 = vpack.c.bf16 %v16113_v44, %v16112_v51  ;;  %v16117_v51 = vld [vmem:[%s19958_s30 + $0x16d] sm:$0xff]  ;;  %v16119_v33 = vld [vmem:[%s19958_s30 + $0x17d] sm:$0xff] }
 0x2f2   : >> { %v22139_v12 = vadd.f32 %v5090_v20, %v4847_v0  ;;  %v4852_v30 = vadd.f32 %v18737_v24, %v21946_v9  ;;  %18979 = vmatprep.mubr.msk.bf16.mxu1 %vm281_vm2, %v6960_v54  ;;  %19013 = vmatprep.mubr.msk.bf16.mxu0 %vm281_vm2, %v7256_v17  ;;  %v6961_v9 = vpack.c.bf16 %v16063_v39, %v16062_v49  ;;  %v16067_v49 = vld [vmem:[%s19958_s30 + $0x16c] sm:$0xff]  ;;  %v16068_v44 = vld [vmem:[%s19958_s30 + $0x174] sm:$0xff] }
 0x2f3   : >> { %v4807_v1 = vpop.f32.mrf.mxu1  ;;  %v5103_v8 = vpop.f32.mrf.mxu0  ;;  %v7258_v54 = vpack.c.bf16 %v16115_v21, %v16114_v22  ;;  %v22167_v20 = vand.u32 %v16292_v3, %v19951_v5  ;;  %v22170_v0 = vand.u32 %v16342_v40, %v19951_v5  ;;  %v16116_v39 = vld [vmem:[%s19958_s30 + $0x165] sm:$0xff] }
 0x2f4   : >> { %v22148_v42 = vadd.f32 %v18771_v34, %v4852_v30  ;;  %v4850_v19 = vadd.f32 %v4807_v1, %v21957_v27 }
 0x2f5   : >> { %v18738_v63 = vpop.f32.mrf.mxu1  ;;  %v18772_v53 = vpop.f32.mrf.mxu0 }
 0x2f6   : >> { %v22160_v48 = vadd.f32 %v5103_v8, %v4850_v19  ;;  %v4853_v27 = vadd.f32 %v18738_v63, %v21960_v7  ;;  %v16066_v7 = vld [vmem:[%s19958_s30 + $0x164] sm:$0xff]  ;;  %v16118_v19 = vld [vmem:[%s19958_s30 + $0x175] sm:$0xff]  ;;  %v7259_v63 = vpack.c.bf16 %v16117_v51, %v16116_v39 }
 0x2f7   : >> { %v4810_v35 = vpop.f32.mrf.mxu1  ;;  %v5106_v37 = vpop.f32.mrf.mxu0  ;;  %v6963_v21 = vpack.c.bf16 %v16067_v49, %v16066_v7  ;;  %v7260_v3 = vpack.c.bf16 %v16119_v33, %v16118_v19  ;;  %v16072_v7 = vld [vmem:[%s19958_s30 + $0x194] sm:$0xff]  ;;  %v16073_v39 = vld [vmem:[%s19958_s30 + $0x19c] sm:$0xff] }
 0x2f8   : >> { %v22163_v17 = vadd.f32 %v18772_v53, %v4853_v27  ;;  %v4851_v11 = vadd.f32 %v4810_v35, %v21972_v52  ;;  %v16122_v51 = vld [vmem:[%s19958_s30 + $0x195] sm:$0xff] }
 0x2f9   : >> { %v18777_v24 = vpop.f32.mrf.mxu1  ;;  %v18811_v34 = vpop.f32.mrf.mxu0  ;;  %18980 = vmatmul.mubr.msk.bf16.vlgmr.msra.gmra.mxu1 %vm281_vm2, %v6961_v9  ;;  %19014 = vmatmul.mubr.msk.bf16.vlgmr.msra.gmra.mxu0 %vm281_vm2, %v7257_v59  ;;  %v6964_v59 = vpack.c.bf16 %v16069_v15, %v16068_v44  ;;  %v16123_v44 = vld [vmem:[%s19958_s30 + $0x19d] sm:$0xff] }
 0x2fa   : >> { %v22176_v30 = vadd.f32 %v5106_v37, %v4851_v11  ;;  %v5416_v52 = vadd.f32 %v18777_v24, %v21984_v31  ;;  %19046 = vmatpush3.bf16.msra.mxu1 %v21964_v2  ;;  %19080 = vmatpush3.bf16.msra.mxu0 %v21967_v26 }
 0x2fb   : >> { %v5287_v1 = vpop.f32.mrf.mxu1  ;;  %v5583_v8 = vpop.f32.mrf.mxu0  ;;  %18983 = vmatprep.mubr.msk.bf16.mxu1 %vm281_vm2, %v6962_v13  ;;  %19017 = vmatprep.mubr.msk.bf16.mxu0 %vm281_vm2, %v7258_v54  ;;  %v16071_v54 = vld [vmem:[%s19958_s30 + $0x18c] sm:$0xff] }
 0x2fc   : >> { %v22189_v22 = vadd.f32 %v18811_v34, %v5416_v52  ;;  %v5414_v31 = vadd.f32 %v5287_v1, %v21989_v6  ;;  %19113 = vmatprep.subr.bf16.mxu1 %v22167_v20  ;;  %19147 = vmatprep.subr.bf16.mxu0 %v22170_v0  ;;  %v16121_v34 = vld [vmem:[%s19958_s30 + $0x18d] sm:$0xff] }
 0x2fd   : >> { %v18778_v2 = vpop.f32.mrf.mxu1  ;;  %v18812_v26 = vpop.f32.mrf.mxu0 }
 0x2fe   : >> { %v22194_v53 = vadd.f32 %v5583_v8, %v5414_v31  ;;  %v5417_v9 = vadd.f32 %v18778_v2, %v21992_v45  ;;  %v16070_v45 = vld [vmem:[%s19958_s30 + $0x184] sm:$0xff] }
 0x2ff   : >> { %v5290_v40 = vpop.f32.mrf.mxu1  ;;  %v5586_v6 = vpop.f32.mrf.mxu0 }
 0x300   : >> { %v22197_v27 = vadd.f32 %v18812_v26, %v5417_v9  ;;  %v5415_v35 = vadd.f32 %v5290_v40, %v21998_v32  ;;  %v16120_v32 = vld [vmem:[%s19958_s30 + $0x185] sm:$0xff]  ;;  %v6966_v26 = vpack.c.bf16 %v16073_v39, %v16072_v7  ;;  %v16127_v7 = vld [vmem:[%s19958_s30 + $0x1bd] sm:$0xff] }
 0x301   : >> { %v18781_v37 = vpop.f32.mrf.mxu1  ;;  %v18815_v13 = vpop.f32.mrf.mxu0  ;;  %18984 = vmatmul.mubr.msk.bf16.gmra.mxu1 %vm281_vm2, %v6963_v21  ;;  %19018 = vmatmul.mubr.msk.bf16.gmra.mxu0 %vm281_vm2, %v7259_v63  ;;  %v7261_v33 = vpack.c.bf16 %v16121_v34, %v16120_v32  ;;  %v7262_v21 = vpack.c.bf16 %v16123_v44, %v16122_v51  ;;  %v16077_v32 = vld [vmem:[%s19958_s30 + $0x1bc] sm:$0xff] }
 0x302   : >> { %v22204_v11 = vadd.f32 %v5586_v6, %v5415_v35  ;;  %v5420_v24 = vadd.f32 %v18781_v37, %v22008_v28  ;;  %18987 = vmatprep.mubr.msk.bf16.mxu1 %vm281_vm2, %v6964_v59  ;;  %19021 = vmatprep.mubr.msk.bf16.mxu0 %vm281_vm2, %v7260_v3  ;;  %v6965_v28 = vpack.c.bf16 %v16071_v54, %v16070_v45  ;;  %v16075_v6 = vld [vmem:[%s19958_s30 + $0x1ac] sm:$0xff]  ;;  %v16076_v45 = vld [vmem:[%s19958_s30 + $0x1b4] sm:$0xff] }
 0x303   : >> { %v5303_v49 = vpop.f32.mrf.mxu1  ;;  %v5599_v52 = vpop.f32.mrf.mxu0  ;;  %v16126_v34 = vld [vmem:[%s19958_s30 + $0x1b5] sm:$0xff] }
 0x304   : >> { %v22215_v1 = vadd.f32 %v18815_v13, %v5420_v24  ;;  %v5418_v8 = vadd.f32 %v5303_v49, %v22011_v60  ;;  %v16125_v13 = vld [vmem:[%s19958_s30 + $0x1ad] sm:$0xff] }
 0x305   : >> { %v18782_v15 = vpop.f32.mrf.mxu1  ;;  %v18816_v19 = vpop.f32.mrf.mxu0 }
 0x306   : >> { %v22218_v31 = vadd.f32 %v5599_v52, %v5418_v8  ;;  %v5421_v2 = vadd.f32 %v18782_v15, %v22014_v36  ;;  %v16074_v36 = vld [vmem:[%s19958_s30 + $0x1a4] sm:$0xff] }
 0x307   : >> { %v5306_v63 = vpop.f32.mrf.mxu1  ;;  %v5602_v9 = vpop.f32.mrf.mxu0 }
 0x308   : >> { %v22221_v59 = vadd.f32 %v18816_v19, %v5421_v2  ;;  %v5419_v60 = vadd.f32 %v5306_v63, %v22020_v29  ;;  %v16124_v29 = vld [vmem:[%s19958_s30 + $0x1a5] sm:$0xff]  ;;  %v6968_v19 = vpack.c.bf16 %v16077_v32, %v16076_v45  ;;  %v16131_v45 = vld [vmem:[%s19958_s30 + $0x1dd] sm:$0xff] }
 0x309   : >> { %v18785_v3 = vpop.f32.mrf.mxu1  ;;  %v18819_v40 = vpop.f32.mrf.mxu0  ;;  %18988 = vmatmul.mubr.msk.bf16.gmra.mxu1 %vm281_vm2, %v6965_v28  ;;  %19022 = vmatmul.mubr.msk.bf16.gmra.mxu0 %vm281_vm2, %v7261_v33  ;;  %v7263_v44 = vpack.c.bf16 %v16125_v13, %v16124_v29  ;;  %v7264_v28 = vpack.c.bf16 %v16127_v7, %v16126_v34  ;;  %v16081_v29 = vld [vmem:[%s19958_s30 + $0x1dc] sm:$0xff] }
 0x30a   : >> { %v22228_v35 = vadd.f32 %v5602_v9, %v5419_v60  ;;  %v5424_v37 = vadd.f32 %v18785_v3, %v22030_v18  ;;  %18991 = vmatprep.mubr.msk.bf16.mxu1 %vm281_vm2, %v6966_v26  ;;  %19025 = vmatprep.mubr.msk.bf16.mxu0 %vm281_vm2, %v7262_v21  ;;  %v6967_v18 = vpack.c.bf16 %v16075_v6, %v16074_v36  ;;  %v16079_v9 = vld [vmem:[%s19958_s30 + $0x1cc] sm:$0xff]  ;;  %v16080_v36 = vld [vmem:[%s19958_s30 + $0x1d4] sm:$0xff] }
 0x30b   : >> { %v5319_v54 = vpop.f32.mrf.mxu1  ;;  %v5615_v24 = vpop.f32.mrf.mxu0  ;;  %v16130_v13 = vld [vmem:[%s19958_s30 + $0x1d5] sm:$0xff] }
 0x30c   : >> { %v22239_v49 = vadd.f32 %v18819_v40, %v5424_v37  ;;  %v5422_v52 = vadd.f32 %v5319_v54, %v22033_v58  ;;  %v16129_v40 = vld [vmem:[%s19958_s30 + $0x1cd] sm:$0xff] }
 0x30d   : >> { %v18786_v39 = vpop.f32.mrf.mxu1  ;;  %v18820_v51 = vpop.f32.mrf.mxu0 }
 0x30e   : >> { %v22242_v8 = vadd.f32 %v5615_v24, %v5422_v52  ;;  %v5425_v15 = vadd.f32 %v18786_v39, %v22036_v62  ;;  %v16078_v62 = vld [vmem:[%s19958_s30 + $0x1c4] sm:$0xff] }
 0x30f   : >> { %v5322_v33 = vpop.f32.mrf.mxu1  ;;  %v5618_v2 = vpop.f32.mrf.mxu0 }
 0x310   : >> { %v22245_v26 = vadd.f32 %v18820_v51, %v5425_v15  ;;  %v5423_v58 = vadd.f32 %v5322_v33, %v22042_v56  ;;  %v16128_v56 = vld [vmem:[%s19958_s30 + $0x1c5] sm:$0xff]  ;;  %v6970_v51 = vpack.c.bf16 %v16081_v29, %v16080_v36  ;;  %v16135_v36 = vld [vmem:[%s19958_s30 + $0x1fd] sm:$0xff] }
 0x311   : >> { %v18789_v21 = vpop.f32.mrf.mxu1  ;;  %v18823_v63 = vpop.f32.mrf.mxu0  ;;  %18992 = vmatmul.mubr.msk.bf16.gmra.mxu1 %vm281_vm2, %v6967_v18  ;;  %19026 = vmatmul.mubr.msk.bf16.gmra.mxu0 %vm281_vm2, %v7263_v44  ;;  %v7265_v7 = vpack.c.bf16 %v16129_v40, %v16128_v56  ;;  %v7266_v18 = vpack.c.bf16 %v16131_v45, %v16130_v13  ;;  %v16085_v56 = vld [vmem:[%s19958_s30 + $0x1fc] sm:$0xff] }
 0x312   : >> { %v22252_v60 = vadd.f32 %v5618_v2, %v5423_v58  ;;  %v5428_v3 = vadd.f32 %v18789_v21, %v22054_v61  ;;  %18995 = vmatprep.mubr.msk.bf16.mxu1 %vm281_vm2, %v6968_v19  ;;  %19029 = vmatprep.mubr.msk.bf16.mxu0 %vm281_vm2, %v7264_v28  ;;  %v6969_v61 = vpack.c.bf16 %v16079_v9, %v16078_v62  ;;  %v16083_v2 = vld [vmem:[%s19958_s30 + $0x1ec] sm:$0xff]  ;;  %v16084_v62 = vld [vmem:[%s19958_s30 + $0x1f4] sm:$0xff] }
 0x313   : >> { %v5335_v6 = vpop.f32.mrf.mxu1  ;;  %v5631_v37 = vpop.f32.mrf.mxu0  ;;  %v16134_v40 = vld [vmem:[%s19958_s30 + $0x1f5] sm:$0xff] }
 0x314   : >> { %v22263_v54 = vadd.f32 %v18823_v63, %v5428_v3  ;;  %v5426_v24 = vadd.f32 %v5335_v6, %v22057_v46  ;;  %v16133_v63 = vld [vmem:[%s19958_s30 + $0x1ed] sm:$0xff] }
 0x315   : >> { %v18790_v32 = vpop.f32.mrf.mxu1  ;;  %v18824_v34 = vpop.f32.mrf.mxu0 }
 0x316   : >> { %v22266_v52 = vadd.f32 %v5631_v37, %v5426_v24  ;;  %v5429_v39 = vadd.f32 %v18790_v32, %v22060_v41  ;;  %v16082_v41 = vld [vmem:[%s19958_s30 + $0x1e4] sm:$0xff] }
 0x317   : >> { %v5338_v44 = vpop.f32.mrf.mxu1  ;;  %v5634_v15 = vpop.f32.mrf.mxu0 }
 0x318   : >> { %v22269_v19 = vadd.f32 %v18824_v34, %v5429_v39  ;;  %v5427_v46 = vadd.f32 %v5338_v44, %v22068_v16  ;;  %v16132_v16 = vld [vmem:[%s19958_s30 + $0x1e5] sm:$0xff]  ;;  %v6972_v34 = vpack.c.bf16 %v16085_v56, %v16084_v62  ;;  %v16139_v62 = vld [vmem:[%s19958_s30 + $0x21d] sm:$0xff] }
 0x319   : >> { %v18793_v28 = vpop.f32.mrf.mxu1  ;;  %v18827_v33 = vpop.f32.mrf.mxu0  ;;  %18996 = vmatmul.mubr.msk.bf16.gmra.mxu1 %vm281_vm2, %v6969_v61  ;;  %19030 = vmatmul.mubr.msk.bf16.gmra.mxu0 %vm281_vm2, %v7265_v7  ;;  %v7267_v45 = vpack.c.bf16 %v16133_v63, %v16132_v16  ;;  %v7268_v61 = vpack.c.bf16 %v16135_v36, %v16134_v40  ;;  %v16089_v16 = vld [vmem:[%s19958_s30 + $0x21c] sm:$0xff] }
 0x31a   : >> { %v22276_v58 = vadd.f32 %v5634_v15, %v5427_v46  ;;  %v5432_v21 = vadd.f32 %v18793_v28, %v22079_v55  ;;  %18999 = vmatprep.mubr.msk.bf16.mxu1 %vm281_vm2, %v6970_v51  ;;  %19033 = vmatprep.mubr.msk.bf16.mxu0 %vm281_vm2, %v7266_v18  ;;  %v6971_v55 = vpack.c.bf16 %v16083_v2, %v16082_v41  ;;  %v16087_v15 = vld [vmem:[%s19958_s30 + $0x20c] sm:$0xff]  ;;  %v16088_v41 = vld [vmem:[%s19958_s30 + $0x214] sm:$0xff] }
 0x31b   : >> { %v5351_v9 = vpop.f32.mrf.mxu1  ;;  %v5647_v3 = vpop.f32.mrf.mxu0  ;;  %v16138_v63 = vld [vmem:[%s19958_s30 + $0x215] sm:$0xff] }
 0x31c   : >> { %v22287_v6 = vadd.f32 %v18827_v33, %v5432_v21  ;;  %v5430_v37 = vadd.f32 %v5351_v9, %v22082_v50  ;;  %v16137_v33 = vld [vmem:[%s19958_s30 + $0x20d] sm:$0xff] }
 0x31d   : >> { %v18794_v29 = vpop.f32.mrf.mxu1  ;;  %v18828_v13 = vpop.f32.mrf.mxu0 }
 0x31e   : >> { %v22290_v24 = vadd.f32 %v5647_v3, %v5430_v37  ;;  %v5433_v32 = vadd.f32 %v18794_v29, %v22085_v14  ;;  %v16086_v14 = vld [vmem:[%s19958_s30 + $0x204] sm:$0xff] }
 0x31f   : >> { %v5354_v7 = vpop.f32.mrf.mxu1  ;;  %v5650_v39 = vpop.f32.mrf.mxu0 }
 0x320   : >> { %v22293_v51 = vadd.f32 %v18828_v13, %v5433_v32  ;;  %v5431_v50 = vadd.f32 %v5354_v7, %v22092_v57  ;;  %v16136_v57 = vld [vmem:[%s19958_s30 + $0x205] sm:$0xff]  ;;  %v6974_v13 = vpack.c.bf16 %v16089_v16, %v16088_v41 }
 0x321   : >> { %v18797_v18 = vpop.f32.mrf.mxu1  ;;  %v18831_v44 = vpop.f32.mrf.mxu0  ;;  %19000 = vmatmul.mubr.msk.bf16.gmra.mxu1 %vm281_vm2, %v6971_v55  ;;  %19034 = vmatmul.mubr.msk.bf16.gmra.mxu0 %vm281_vm2, %v7267_v45  ;;  %v7269_v36 = vpack.c.bf16 %v16137_v33, %v16136_v57  ;;  %v7270_v55 = vpack.c.bf16 %v16139_v62, %v16138_v63  ;;  %v16161_v57 = vld [vmem:[%s19958_s30 + $0x13e] sm:$0xff] }
 0x322   : >> { %v22300_v46 = vadd.f32 %v5650_v39, %v5431_v50  ;;  %v5436_v28 = vadd.f32 %v18797_v18, %v22103_v47  ;;  %19003 = vmatprep.mubr.msk.bf16.mxu1 %vm281_vm2, %v6972_v34  ;;  %19037 = vmatprep.mubr.msk.bf16.mxu0 %vm281_vm2, %v7268_v61  ;;  %v6973_v47 = vpack.c.bf16 %v16087_v15, %v16086_v14  ;;  %v16091_v39 = vld [vmem:[%s19958_s30 + $0x22c] sm:$0xff]  ;;  %v16160_v14 = vld [vmem:[%s19958_s30 + $0x136] sm:$0xff]  ;;  %v16211_v41 = vld [vmem:[%s19958_s30 + $0x13f] sm:$0xff] }
 0x323   : >> { %v5367_v2 = vpop.f32.mrf.mxu1  ;;  %v5663_v21 = vpop.f32.mrf.mxu0  ;;  %v16210_v33 = vld [vmem:[%s19958_s30 + $0x137] sm:$0xff] }
 0x324   : >> { %v22311_v9 = vadd.f32 %v18831_v44, %v5436_v28  ;;  %v5434_v3 = vadd.f32 %v5367_v2, %v22106_v10  ;;  %v16141_v44 = vld [vmem:[%s19958_s30 + $0x22d] sm:$0xff] }
 0x325   : >> { %v18798_v56 = vpop.f32.mrf.mxu1  ;;  %v18832_v40 = vpop.f32.mrf.mxu0 }
 0x326   : >> { %v22314_v37 = vadd.f32 %v5663_v21, %v5434_v3  ;;  %v5437_v29 = vadd.f32 %v18798_v56, %v22109_v43  ;;  %v16090_v43 = vld [vmem:[%s19958_s30 + $0x224] sm:$0xff] }
 0x327   : >> { %v5370_v45 = vpop.f32.mrf.mxu1  ;;  %v5666_v32 = vpop.f32.mrf.mxu0 }
 0x328   : >> { %v22317_v34 = vadd.f32 %v18832_v40, %v5437_v29  ;;  %v5435_v10 = vadd.f32 %v5370_v45, %v22116_v23  ;;  %v16140_v23 = vld [vmem:[%s19958_s30 + $0x225] sm:$0xff]  ;;  %v7552_v40 = vpack.c.bf16 %v16161_v57, %v16160_v14 }
 0x329   : >> { %v18801_v61 = vpop.f32.mrf.mxu1  ;;  %v18835_v7 = vpop.f32.mrf.mxu0  ;;  %19004 = vmatmul.mubr.msk.bf16.gmra.mxu1 %vm281_vm2, %v6973_v47  ;;  %19038 = vmatmul.mubr.msk.bf16.gmra.mxu0 %vm281_vm2, %v7269_v36  ;;  %v7271_v62 = vpack.c.bf16 %v16141_v44, %v16140_v23  ;;  %v7848_v47 = vpack.c.bf16 %v16211_v41, %v16210_v33  ;;  %v16165_v14 = vld [vmem:[%s19958_s30 + $0x15e] sm:$0xff] }
 0x32a   : >> { %v22324_v50 = vadd.f32 %v5666_v32, %v5435_v10  ;;  %v5440_v18 = vadd.f32 %v18801_v61, %v22127_v38  ;;  %19007 = vmatprep.mubr.msk.bf16.mxu1 %vm281_vm2, %v6974_v13  ;;  %19041 = vmatprep.mubr.msk.bf16.mxu0 %vm281_vm2, %v7270_v55  ;;  %v6975_v38 = vpack.c.bf16 %v16091_v39, %v16090_v43  ;;  %v16163_v61 = vld [vmem:[%s19958_s30 + $0x14e] sm:$0xff] }
 0x32b   : >> { %v5383_v15 = vpop.f32.mrf.mxu1  ;;  %v5679_v28 = vpop.f32.mrf.mxu0 }
 0x32c   : >> { %v22335_v2 = vadd.f32 %v18835_v7, %v5440_v18  ;;  %v5438_v21 = vadd.f32 %v5383_v15, %v22130_v25  ;;  %v16213_v7 = vld [vmem:[%s19958_s30 + $0x14f] sm:$0xff]  ;;  %v16214_v15 = vld [vmem:[%s19958_s30 + $0x157] sm:$0xff] }
 0x32d   : >> { %v18802_v16 = vpop.f32.mrf.mxu1  ;;  %v18836_v63 = vpop.f32.mrf.mxu0  ;;  %v16164_v18 = vld [vmem:[%s19958_s30 + $0x156] sm:$0xff] }
 0x32e   : >> { %v22338_v3 = vadd.f32 %v5679_v28, %v5438_v21  ;;  %v5441_v56 = vadd.f32 %v18802_v16, %v22133_v4  ;;  %v16162_v4 = vld [vmem:[%s19958_s30 + $0x146] sm:$0xff]  ;;  %v16392_v21 = vld [vmem:[%s25309_s1 + $0x3a] sm:$0x3]  ;;  %v16442_v16 = vld [vmem:[%s25309_s1 + $0x3c] sm:$0x3] }
 0x32f   : >> { %v5386_v36 = vpop.f32.mrf.mxu1  ;;  %v5682_v29 = vpop.f32.mrf.mxu0  ;;  %v16215_v28 = vld [vmem:[%s19958_s30 + $0x15f] sm:$0xff] }
 0x330   : >> { %v22341_v13 = vadd.f32 %v18836_v63, %v5441_v56  ;;  %v5439_v25 = vadd.f32 %v5386_v36, %v22139_v12  ;;  %v16212_v12 = vld [vmem:[%s19958_s30 + $0x147] sm:$0xff]  ;;  %v7554_v56 = vpack.c.bf16 %v16165_v14, %v16164_v18  ;;  %v16169_v18 = vld [vmem:[%s19958_s30 + $0x17e] sm:$0xff] }
 0x331   : >> { %v18805_v55 = vpop.f32.mrf.mxu1  ;;  %v18839_v45 = vpop.f32.mrf.mxu0  ;;  %19008 = vmatmul.mubr.msk.bf16.gmra.mxu1 %vm281_vm2, %v6975_v38  ;;  %19042 = vmatmul.mubr.msk.bf16.gmra.mxu0 %vm281_vm2, %v7271_v62  ;;  %v7849_v41 = vpack.c.bf16 %v16213_v7, %v16212_v12  ;;  %v16217_v12 = vld [vmem:[%s19958_s30 + $0x16f] sm:$0xff]  ;;  %v16219_v14 = vld [vmem:[%s19958_s30 + $0x17f] sm:$0xff] }
 0x332   : >> { %v22347_v32 = vadd.f32 %v5682_v29, %v5439_v25  ;;  %v5444_v10 = vadd.f32 %v18805_v55, %v22148_v42  ;;  %19047 = vmatprep.mubr.msk.bf16.mxu1 %vm281_vm2, %v7552_v40  ;;  %19081 = vmatprep.mubr.msk.bf16.mxu0 %vm281_vm2, %v7848_v47  ;;  %v7553_v42 = vpack.c.bf16 %v16163_v61, %v16162_v4  ;;  %v16167_v4 = vld [vmem:[%s19958_s30 + $0x16e] sm:$0xff]  ;;  %v16168_v7 = vld [vmem:[%s19958_s30 + $0x176] sm:$0xff] }
 0x333   : >> { %v5399_v43 = vpop.f32.mrf.mxu1  ;;  %v5695_v39 = vpop.f32.mrf.mxu0  ;;  %v7850_v40 = vpack.c.bf16 %v16215_v28, %v16214_v15  ;;  %v22375_v29 = vand.u32 %v16392_v21, %v19951_v5  ;;  %v22378_v25 = vand.u32 %v16442_v16, %v19951_v5  ;;  %v16216_v61 = vld [vmem:[%s19958_s30 + $0x167] sm:$0xff] }
 0x334   : >> { %v22356_v23 = vadd.f32 %v18839_v45, %v5444_v10  ;;  %v5442_v44 = vadd.f32 %v5399_v43, %v22160_v48 }
 0x335   : >> { %v18806_v57 = vpop.f32.mrf.mxu1  ;;  %v18840_v33 = vpop.f32.mrf.mxu0 }
 0x336   : >> { %v22368_v63 = vadd.f32 %v5695_v39, %v5442_v44  ;;  %v5445_v48 = vadd.f32 %v18806_v57, %v22163_v17  ;;  %v16166_v17 = vld [vmem:[%s19958_s30 + $0x166] sm:$0xff]  ;;  %v16218_v44 = vld [vmem:[%s19958_s30 + $0x177] sm:$0xff]  ;;  %v7851_v57 = vpack.c.bf16 %v16217_v12, %v16216_v61 }
 0x337   : >> { %v5402_v38 = vpop.f32.mrf.mxu1  ;;  %v5698_v62 = vpop.f32.mrf.mxu0  ;;  %v7555_v28 = vpack.c.bf16 %v16167_v4, %v16166_v17  ;;  %v7852_v21 = vpack.c.bf16 %v16219_v14, %v16218_v44  ;;  %v16172_v17 = vld [vmem:[%s19958_s30 + $0x196] sm:$0xff]  ;;  %v16173_v61 = vld [vmem:[%s19958_s30 + $0x19e] sm:$0xff] }
 0x338   : >> { %v22371_v47 = vadd.f32 %v18840_v33, %v5445_v48  ;;  %v5443_v36 = vadd.f32 %v5402_v38, %v22176_v30  ;;  %v16222_v12 = vld [vmem:[%s19958_s30 + $0x197] sm:$0xff] }
 0x339   : >> { %v18845_v55 = vpop.f32.mrf.mxu1  ;;  %v18879_v45 = vpop.f32.mrf.mxu0  ;;  %19048 = vmatmul.mubr.msk.bf16.vlgmr.msra.gmra.mxu1 %vm281_vm2, %v7553_v42  ;;  %19082 = vmatmul.mubr.msk.bf16.vlgmr.msra.gmra.mxu0 %vm281_vm2, %v7849_v41  ;;  %v7556_v41 = vpack.c.bf16 %v16169_v18, %v16168_v7  ;;  %v16223_v7 = vld [vmem:[%s19958_s30 + $0x19f] sm:$0xff] }
 0x33a   : >> { %v22384_v10 = vadd.f32 %v5698_v62, %v5443_v36  ;;  %v6008_v30 = vadd.f32 %v18845_v55, %v22189_v22  ;;  %19114 = vmatpush3.bf16.msra.mxu1 %v22167_v20  ;;  %19148 = vmatpush3.bf16.msra.mxu0 %v22170_v0 }
 0x33b   : >> { %v5879_v43 = vpop.f32.mrf.mxu1  ;;  %v6175_v39 = vpop.f32.mrf.mxu0  ;;  %19051 = vmatprep.mubr.msk.bf16.mxu1 %vm281_vm2, %v7554_v56  ;;  %19085 = vmatprep.mubr.msk.bf16.mxu0 %vm281_vm2, %v7850_v40  ;;  %v16171_v40 = vld [vmem:[%s19958_s30 + $0x18e] sm:$0xff] }
 0x33c   : >> { %v22397_v15 = vadd.f32 %v18879_v45, %v6008_v30  ;;  %v6006_v22 = vadd.f32 %v5879_v43, %v22194_v53  ;;  %19181 = vmatprep.subr.bf16.mxu1 %v22375_v29  ;;  %19215 = vmatprep.subr.bf16.mxu0 %v22378_v25  ;;  %v16221_v45 = vld [vmem:[%s19958_s30 + $0x18f] sm:$0xff] }
 0x33d   : >> { %v18846_v20 = vpop.f32.mrf.mxu1  ;;  %v18880_v0 = vpop.f32.mrf.mxu0 }
 0x33e   : >> { %v22402_v33 = vadd.f32 %v6175_v39, %v6006_v22  ;;  %v6009_v42 = vadd.f32 %v18846_v20, %v22197_v27  ;;  %v16170_v27 = vld [vmem:[%s19958_s30 + $0x186] sm:$0xff] }
 0x33f   : >> { %v5882_v16 = vpop.f32.mrf.mxu1  ;;  %v6178_v53 = vpop.f32.mrf.mxu0 }
 0x340   : >> { %v22405_v48 = vadd.f32 %v18880_v0, %v6009_v42  ;;  %v6007_v38 = vadd.f32 %v5882_v16, %v22204_v11  ;;  %v16220_v11 = vld [vmem:[%s19958_s30 + $0x187] sm:$0xff]  ;;  %v7558_v0 = vpack.c.bf16 %v16173_v61, %v16172_v17  ;;  %v16227_v17 = vld [vmem:[%s19958_s30 + $0x1bf] sm:$0xff] }
 0x341   : >> { %v18849_v62 = vpop.f32.mrf.mxu1  ;;  %v18883_v56 = vpop.f32.mrf.mxu0  ;;  %19052 = vmatmul.mubr.msk.bf16.gmra.mxu1 %vm281_vm2, %v7555_v28  ;;  %19086 = vmatmul.mubr.msk.bf16.gmra.mxu0 %vm281_vm2, %v7851_v57  ;;  %v7853_v14 = vpack.c.bf16 %v16221_v45, %v16220_v11  ;;  %v7854_v28 = vpack.c.bf16 %v16223_v7, %v16222_v12  ;;  %v16177_v11 = vld [vmem:[%s19958_s30 + $0x1be] sm:$0xff] }
 0x342   : >> { %v22412_v36 = vadd.f32 %v6178_v53, %v6007_v38  ;;  %v6012_v55 = vadd.f32 %v18849_v62, %v22215_v1  ;;  %19055 = vmatprep.mubr.msk.bf16.mxu1 %vm281_vm2, %v7556_v41  ;;  %19089 = vmatprep.mubr.msk.bf16.mxu0 %vm281_vm2, %v7852_v21  ;;  %v7557_v1 = vpack.c.bf16 %v16171_v40, %v16170_v27  ;;  %v16175_v53 = vld [vmem:[%s19958_s30 + $0x1ae] sm:$0xff]  ;;  %v16176_v27 = vld [vmem:[%s19958_s30 + $0x1b6] sm:$0xff] }
 0x343   : >> { %v5895_v4 = vpop.f32.mrf.mxu1  ;;  %v6191_v30 = vpop.f32.mrf.mxu0  ;;  %v16226_v45 = vld [vmem:[%s19958_s30 + $0x1b7] sm:$0xff] }
 0x344   : >> { %v22423_v43 = vadd.f32 %v18883_v56, %v6012_v55  ;;  %v6010_v39 = vadd.f32 %v5895_v4, %v22218_v31  ;;  %v16225_v56 = vld [vmem:[%s19958_s30 + $0x1af] sm:$0xff] }
 0x345   : >> { %v18850_v18 = vpop.f32.mrf.mxu1  ;;  %v18884_v44 = vpop.f32.mrf.mxu0 }
 0x346   : >> { %v22426_v22 = vadd.f32 %v6191_v30, %v6010_v39  ;;  %v6013_v20 = vadd.f32 %v18850_v18, %v22221_v59  ;;  %v16174_v59 = vld [vmem:[%s19958_s30 + $0x1a6] sm:$0xff] }
 0x347   : >> { %v5898_v57 = vpop.f32.mrf.mxu1  ;;  %v6194_v42 = vpop.f32.mrf.mxu0 }
 0x348   : >> { %v22429_v41 = vadd.f32 %v18884_v44, %v6013_v20  ;;  %v6011_v31 = vadd.f32 %v5898_v57, %v22228_v35  ;;  %v16224_v35 = vld [vmem:[%s19958_s30 + $0x1a7] sm:$0xff]  ;;  %v7560_v44 = vpack.c.bf16 %v16177_v11, %v16176_v27  ;;  %v16231_v27 = vld [vmem:[%s19958_s30 + $0x1df] sm:$0xff] }
 0x349   : >> { %v18853_v21 = vpop.f32.mrf.mxu1  ;;  %v18887_v16 = vpop.f32.mrf.mxu0  ;;  %19056 = vmatmul.mubr.msk.bf16.gmra.mxu1 %vm281_vm2, %v7557_v1  ;;  %19090 = vmatmul.mubr.msk.bf16.gmra.mxu0 %vm281_vm2, %v7853_v14  ;;  %v7855_v7 = vpack.c.bf16 %v16225_v56, %v16224_v35  ;;  %v7856_v1 = vpack.c.bf16 %v16227_v17, %v16226_v45  ;;  %v16181_v35 = vld [vmem:[%s19958_s30 + $0x1de] sm:$0xff] }
 0x34a   : >> { %v22436_v38 = vadd.f32 %v6194_v42, %v6011_v31  ;;  %v6016_v62 = vadd.f32 %v18853_v21, %v22239_v49  ;;  %19059 = vmatprep.mubr.msk.bf16.mxu1 %vm281_vm2, %v7558_v0  ;;  %19093 = vmatprep.mubr.msk.bf16.mxu0 %vm281_vm2, %v7854_v28  ;;  %v7559_v49 = vpack.c.bf16 %v16175_v53, %v16174_v59  ;;  %v16179_v42 = vld [vmem:[%s19958_s30 + $0x1ce] sm:$0xff]  ;;  %v16180_v59 = vld [vmem:[%s19958_s30 + $0x1d6] sm:$0xff] }
 0x34b   : >> { %v5911_v40 = vpop.f32.mrf.mxu1  ;;  %v6207_v55 = vpop.f32.mrf.mxu0  ;;  %v16230_v56 = vld [vmem:[%s19958_s30 + $0x1d7] sm:$0xff] }
 0x34c   : >> { %v22447_v4 = vadd.f32 %v18887_v16, %v6016_v62  ;;  %v6014_v30 = vadd.f32 %v5911_v40, %v22242_v8  ;;  %v16229_v16 = vld [vmem:[%s19958_s30 + $0x1cf] sm:$0xff] }
 0x34d   : >> { %v18854_v61 = vpop.f32.mrf.mxu1  ;;  %v18888_v12 = vpop.f32.mrf.mxu0 }
 0x34e   : >> { %v22450_v39 = vadd.f32 %v6207_v55, %v6014_v30  ;;  %v6017_v18 = vadd.f32 %v18854_v61, %v22245_v26  ;;  %v16178_v26 = vld [vmem:[%s19958_s30 + $0x1c6] sm:$0xff] }
 0x34f   : >> { %v5914_v14 = vpop.f32.mrf.mxu1  ;;  %v6210_v20 = vpop.f32.mrf.mxu0 }
 0x350   : >> { %v22453_v0 = vadd.f32 %v18888_v12, %v6017_v18  ;;  %v6015_v8 = vadd.f32 %v5914_v14, %v22252_v60  ;;  %v16228_v60 = vld [vmem:[%s19958_s30 + $0x1c7] sm:$0xff]  ;;  %v7562_v12 = vpack.c.bf16 %v16181_v35, %v16180_v59  ;;  %v16235_v59 = vld [vmem:[%s19958_s30 + $0x1ff] sm:$0xff] }
 0x351   : >> { %v18857_v28 = vpop.f32.mrf.mxu1  ;;  %v18891_v57 = vpop.f32.mrf.mxu0  ;;  %19060 = vmatmul.mubr.msk.bf16.gmra.mxu1 %vm281_vm2, %v7559_v49  ;;  %19094 = vmatmul.mubr.msk.bf16.gmra.mxu0 %vm281_vm2, %v7855_v7  ;;  %v7857_v17 = vpack.c.bf16 %v16229_v16, %v16228_v60  ;;  %v7858_v49 = vpack.c.bf16 %v16231_v27, %v16230_v56  ;;  %v16185_v60 = vld [vmem:[%s19958_s30 + $0x1fe] sm:$0xff] }
 0x352   : >> { %v22460_v31 = vadd.f32 %v6210_v20, %v6015_v8  ;;  %v6020_v21 = vadd.f32 %v18857_v28, %v22263_v54  ;;  %19063 = vmatprep.mubr.msk.bf16.mxu1 %vm281_vm2, %v7560_v44  ;;  %19097 = vmatprep.mubr.msk.bf16.mxu0 %vm281_vm2, %v7856_v1  ;;  %v7561_v54 = vpack.c.bf16 %v16179_v42, %v16178_v26  ;;  %v16183_v20 = vld [vmem:[%s19958_s30 + $0x1ee] sm:$0xff]  ;;  %v16184_v26 = vld [vmem:[%s19958_s30 + $0x1f6] sm:$0xff] }
 0x353   : >> { %v5927_v53 = vpop.f32.mrf.mxu1  ;;  %v6223_v62 = vpop.f32.mrf.mxu0  ;;  %v16234_v16 = vld [vmem:[%s19958_s30 + $0x1f7] sm:$0xff] }
 0x354   : >> { %v22471_v40 = vadd.f32 %v18891_v57, %v6020_v21  ;;  %v6018_v55 = vadd.f32 %v5927_v53, %v22266_v52  ;;  %v16233_v57 = vld [vmem:[%s19958_s30 + $0x1ef] sm:$0xff] }
 0x355   : >> { %v18858_v11 = vpop.f32.mrf.mxu1  ;;  %v18892_v45 = vpop.f32.mrf.mxu0 }
 0x356   : >> { %v22474_v30 = vadd.f32 %v6223_v62, %v6018_v55  ;;  %v6021_v61 = vadd.f32 %v18858_v11, %v22269_v19  ;;  %v16182_v19 = vld [vmem:[%s19958_s30 + $0x1e6] sm:$0xff] }
 0x357   : >> { %v5930_v7 = vpop.f32.mrf.mxu1  ;;  %v6226_v18 = vpop.f32.mrf.mxu0 }
 0x358   : >> { %v22477_v44 = vadd.f32 %v18892_v45, %v6021_v61  ;;  %v6019_v52 = vadd.f32 %v5930_v7, %v22276_v58  ;;  %v16232_v58 = vld [vmem:[%s19958_s30 + $0x1e7] sm:$0xff]  ;;  %v7564_v45 = vpack.c.bf16 %v16185_v60, %v16184_v26  ;;  %v16239_v26 = vld [vmem:[%s19958_s30 + $0x21f] sm:$0xff] }
 0x359   : >> { %v18861_v1 = vpop.f32.mrf.mxu1  ;;  %v18895_v14 = vpop.f32.mrf.mxu0  ;;  %19064 = vmatmul.mubr.msk.bf16.gmra.mxu1 %vm281_vm2, %v7561_v54  ;;  %19098 = vmatmul.mubr.msk.bf16.gmra.mxu0 %vm281_vm2, %v7857_v17  ;;  %v7859_v27 = vpack.c.bf16 %v16233_v57, %v16232_v58  ;;  %v7860_v54 = vpack.c.bf16 %v16235_v59, %v16234_v16  ;;  %v16189_v58 = vld [vmem:[%s19958_s30 + $0x21e] sm:$0xff] }
 0x35a   : >> { %v22484_v8 = vadd.f32 %v6226_v18, %v6019_v52  ;;  %v6024_v28 = vadd.f32 %v18861_v1, %v22287_v6  ;;  %19067 = vmatprep.mubr.msk.bf16.mxu1 %vm281_vm2, %v7562_v12  ;;  %19101 = vmatprep.mubr.msk.bf16.mxu0 %vm281_vm2, %v7858_v49  ;;  %v7563_v6 = vpack.c.bf16 %v16183_v20, %v16182_v19  ;;  %v16187_v18 = vld [vmem:[%s19958_s30 + $0x20e] sm:$0xff]  ;;  %v16188_v19 = vld [vmem:[%s19958_s30 + $0x216] sm:$0xff] }
 0x35b   : >> { %v5943_v42 = vpop.f32.mrf.mxu1  ;;  %v6239_v21 = vpop.f32.mrf.mxu0  ;;  %v16238_v57 = vld [vmem:[%s19958_s30 + $0x217] sm:$0xff] }
 0x35c   : >> { %v22495_v53 = vadd.f32 %v18895_v14, %v6024_v28  ;;  %v6022_v62 = vadd.f32 %v5943_v42, %v22290_v24  ;;  %v16237_v14 = vld [vmem:[%s19958_s30 + $0x20f] sm:$0xff] }
 0x35d   : >> { %v18862_v35 = vpop.f32.mrf.mxu1  ;;  %v18896_v56 = vpop.f32.mrf.mxu0 }
 0x35e   : >> { %v22498_v55 = vadd.f32 %v6239_v21, %v6022_v62  ;;  %v6025_v11 = vadd.f32 %v18862_v35, %v22293_v51  ;;  %v16186_v51 = vld [vmem:[%s19958_s30 + $0x206] sm:$0xff] }
 0x35f   : >> { %v5946_v17 = vpop.f32.mrf.mxu1  ;;  %v6242_v61 = vpop.f32.mrf.mxu0 }
 0x360   : >> { %v22501_v12 = vadd.f32 %v18896_v56, %v6025_v11  ;;  %v6023_v24 = vadd.f32 %v5946_v17, %v22300_v46  ;;  %v16236_v46 = vld [vmem:[%s19958_s30 + $0x207] sm:$0xff]  ;;  %v7566_v56 = vpack.c.bf16 %v16189_v58, %v16188_v19 }
 0x361   : >> { %v18865_v49 = vpop.f32.mrf.mxu1  ;;  %v18899_v7 = vpop.f32.mrf.mxu0  ;;  %19068 = vmatmul.mubr.msk.bf16.gmra.mxu1 %vm281_vm2, %v7563_v6  ;;  %19102 = vmatmul.mubr.msk.bf16.gmra.mxu0 %vm281_vm2, %v7859_v27  ;;  %v7861_v59 = vpack.c.bf16 %v16237_v14, %v16236_v46  ;;  %v7862_v6 = vpack.c.bf16 %v16239_v26, %v16238_v57  ;;  %v16261_v46 = vld [vmem:[%s19958_s30 + $0x140] sm:$0xff]  ;;  %v16310_v14 = vld [vmem:[%s19958_s30 + $0x198] sm:$0xff] }
 0x362   : >> { %v22508_v52 = vadd.f32 %v6242_v61, %v6023_v24  ;;  %v6028_v1 = vadd.f32 %v18865_v49, %v22311_v9  ;;  %19071 = vmatprep.mubr.msk.bf16.mxu1 %vm281_vm2, %v7564_v45  ;;  %19105 = vmatprep.mubr.msk.bf16.mxu0 %vm281_vm2, %v7860_v54  ;;  %v7565_v9 = vpack.c.bf16 %v16187_v18, %v16186_v51  ;;  %v16191_v61 = vld [vmem:[%s19958_s30 + $0x22e] sm:$0xff]  ;;  %v16260_v51 = vld [vmem:[%s19958_s30 + $0x138] sm:$0xff]  ;;  %v16311_v19 = vld [vmem:[%s19958_s30 + $0x1a0] sm:$0xff] }
 0x363   : >> { %v5959_v20 = vpop.f32.mrf.mxu1  ;;  %v6255_v28 = vpop.f32.mrf.mxu0 }
 0x364   : >> { %v22519_v42 = vadd.f32 %v18899_v7, %v6028_v1  ;;  %v6026_v21 = vadd.f32 %v5959_v20, %v22314_v37  ;;  %v16241_v7 = vld [vmem:[%s19958_s30 + $0x22f] sm:$0xff] }
 0x365   : >> { %v18866_v60 = vpop.f32.mrf.mxu1  ;;  %v18900_v16 = vpop.f32.mrf.mxu0 }
 0x366   : >> { %v22522_v62 = vadd.f32 %v6255_v28, %v6026_v21  ;;  %v6029_v35 = vadd.f32 %v18866_v60, %v22317_v34  ;;  %v16190_v34 = vld [vmem:[%s19958_s30 + $0x226] sm:$0xff] }
 0x367   : >> { %v5962_v27 = vpop.f32.mrf.mxu1  ;;  %v6258_v11 = vpop.f32.mrf.mxu0 }
 0x368   : >> { %v22525_v45 = vadd.f32 %v18900_v16, %v6029_v35  ;;  %v6027_v37 = vadd.f32 %v5962_v27, %v22324_v50  ;;  %v16240_v50 = vld [vmem:[%s19958_s30 + $0x227] sm:$0xff]  ;;  %v8144_v16 = vpack.c.bf16 %v16261_v46, %v16260_v51 }
 0x369   : >> { %v18869_v54 = vpop.f32.mrf.mxu1  ;;  %v18903_v17 = vpop.f32.mrf.mxu0  ;;  %19072 = vmatmul.mubr.msk.bf16.gmra.mxu1 %vm281_vm2, %v7565_v9  ;;  %19106 = vmatmul.mubr.msk.bf16.gmra.mxu0 %vm281_vm2, %v7861_v59  ;;  %v7863_v26 = vpack.c.bf16 %v16241_v7, %v16240_v50  ;;  %v22549_v9 = vpack.c.bf16 %v16311_v19, %v16310_v14  ;;  %v16265_v51 = vld [vmem:[%s19958_s30 + $0x160] sm:$0xff] }
 0x36a   : >> { %v22532_v24 = vadd.f32 %v6258_v11, %v6027_v37  ;;  %v6032_v49 = vadd.f32 %v18869_v54, %v22335_v2  ;;  %19075 = vmatprep.mubr.msk.bf16.mxu1 %vm281_vm2, %v7566_v56  ;;  %19109 = vmatprep.mubr.msk.bf16.mxu0 %vm281_vm2, %v7862_v6  ;;  %v7567_v2 = vpack.c.bf16 %v16191_v61, %v16190_v34  ;;  %v16312_v54 = vld [vmem:[%s19958_s30 + $0x1a8] sm:$0xff] }
 0x36b   : >> { %v5975_v18 = vpop.f32.mrf.mxu1  ;;  %v6271_v1 = vpop.f32.mrf.mxu0 }
 0x36c   : >> { %v22543_v20 = vadd.f32 %v18903_v17, %v6032_v49  ;;  %v6030_v28 = vadd.f32 %v5975_v18, %v22338_v3  ;;  %v16313_v17 = vld [vmem:[%s19958_s30 + $0x1b0] sm:$0xff]  ;;  %v16264_v49 = vld [vmem:[%s19958_s30 + $0x158] sm:$0xff] }
 0x36d   : >> { %v18870_v58 = vpop.f32.mrf.mxu1  ;;  %v18904_v57 = vpop.f32.mrf.mxu0  ;;  %v16314_v18 = vld [vmem:[%s19958_s30 + $0x1b8] sm:$0xff]  ;;  %v22573_v19 = vpack.c.bf16 %v16313_v17, %v16312_v54  ;;  %v16316_v54 = vld [vmem:[%s19958_s30 + $0x1c8] sm:$0xff]  ;;  %v16317_v17 = vld [vmem:[%s19958_s30 + $0x1d0] sm:$0xff] }
 0x36e   : >> { %v22546_v21 = vadd.f32 %v6271_v1, %v6030_v28  ;;  %v6033_v60 = vadd.f32 %v18870_v58, %v22341_v13  ;;  %v16262_v13 = vld [vmem:[%s19958_s30 + $0x148] sm:$0xff]  ;;  %v16315_v1 = vld [vmem:[%s19958_s30 + $0x1c0] sm:$0xff]  ;;  %v16492_v28 = vld [vmem:[%s25309_s1 + $0x3e] sm:$0x3] }
 0x36f   : >> { %v5978_v59 = vpop.f32.mrf.mxu1  ;;  %v6274_v35 = vpop.f32.mrf.mxu0  ;;  %v16542_v58 = vld [vmem:[%s25309_s1 + $0x40] sm:$0x3] }
 0x370   : >> { %v22551_v56 = vadd.f32 %v18904_v57, %v6033_v60  ;;  %v6031_v3 = vadd.f32 %v5978_v59, %v22347_v32  ;;  %v16263_v32 = vld [vmem:[%s19958_s30 + $0x150] sm:$0xff]  ;;  %v8146_v60 = vpack.c.bf16 %v16265_v51, %v16264_v49  ;;  %v16318_v51 = vld [vmem:[%s19958_s30 + $0x1d8] sm:$0xff] }
 0x371   : >> { %v18873_v6 = vpop.f32.mrf.mxu1  ;;  %v18907_v27 = vpop.f32.mrf.mxu0  ;;  %19076 = vmatmul.mubr.msk.bf16.gmra.mxu1 %vm281_vm2, %v7567_v2  ;;  %19110 = vmatmul.mubr.msk.bf16.gmra.mxu0 %vm281_vm2, %v7863_v26  ;;  %v8145_v14 = vpack.c.bf16 %v16263_v32, %v16262_v13  ;;  %v16266_v13 = vld [vmem:[%s19958_s30 + $0x168] sm:$0xff] }
 0x372   : >> { %v22557_v11 = vadd.f32 %v6274_v35, %v6031_v3  ;;  %v6036_v37 = vadd.f32 %v18873_v6, %v22356_v23  ;;  %19115 = vmatprep.mubr.msk.bf16.mxu1 %vm281_vm2, %v8144_v16  ;;  %19149 = vmatprep.mubr.msk.bf16.mxu0 %vm281_vm2, %v22549_v9  ;;  %v22584_v16 = vpack.c.bf16 %v16315_v1, %v16314_v18  ;;  %v16319_v18 = vld [vmem:[%s19958_s30 + $0x1e0] sm:$0xff] }
 0x373   : >> { %v5991_v34 = vpop.f32.mrf.mxu1  ;;  %v6287_v61 = vpop.f32.mrf.mxu0  ;;  %v22590_v3 = vand.u32 %v16492_v28, %v19951_v5  ;;  %v22593_v6 = vand.u32 %v16542_v58, %v19951_v5 }
 0x374   : >> { %v22567_v50 = vadd.f32 %v18907_v27, %v6036_v37  ;;  %v6034_v7 = vadd.f32 %v5991_v34, %v22368_v63  ;;  %v16267_v37 = vld [vmem:[%s19958_s30 + $0x170] sm:$0xff]  ;;  %v16268_v34 = vld [vmem:[%s19958_s30 + $0x178] sm:$0xff] }
 0x375   : >> { %v18874_v46 = vpop.f32.mrf.mxu1  ;;  %v18908_v23 = vpop.f32.mrf.mxu0 }
 0x376   : >> { %v22581_v57 = vadd.f32 %v6287_v61, %v6034_v7  ;;  %v6037_v63 = vadd.f32 %v18874_v46, %v22371_v47  ;;  %v16269_v7 = vld [vmem:[%s19958_s30 + $0x180] sm:$0xff]  ;;  %v8147_v46 = vpack.c.bf16 %v16267_v37, %v16266_v13  ;;  %v16271_v37 = vld [vmem:[%s19958_s30 + $0x190] sm:$0xff] }
 0x377   : >> { %v5994_v2 = vpop.f32.mrf.mxu1  ;;  %v6290_v26 = vpop.f32.mrf.mxu0  ;;  %v8148_v58 = vpack.c.bf16 %v16269_v7, %v16268_v34  ;;  %v16322_v34 = vld [vmem:[%s19958_s30 + $0x1f8] sm:$0xff] }
 0x378   : >> { %v22586_v59 = vadd.f32 %v18908_v23, %v6037_v63  ;;  %v6035_v35 = vadd.f32 %v5994_v2, %v22384_v10  ;;  %v22619_v23 = vpack.c.bf16 %v16317_v17, %v16316_v54  ;;  %v22624_v63 = vpack.c.bf16 %v16319_v18, %v16318_v51 }
 0x379   : >> { %v18913_v27 = vpop.f32.mrf.mxu1  ;;  %v18947_v47 = vpop.f32.mrf.mxu0  ;;  %19116 = vmatmul.mubr.msk.bf16.vlgmr.msra.gmra.mxu1 %vm281_vm2, %v8145_v14  ;;  %19150 = vmatmul.mubr.msk.bf16.vlgmr.msra.gmra.mxu0 %vm281_vm2, %v22573_v19 }
 0x37a   : >> { %v22600_v32 = vadd.f32 %v6290_v26, %v6035_v35  ;;  %v6600_v10 = vadd.f32 %v18913_v27, %v22397_v15  ;;  %19182 = vmatpush3.bf16.msra.mxu1 %v22375_v29  ;;  %19216 = vmatpush3.bf16.msra.mxu0 %v22378_v25 }
 0x37b   : >> { %v6471_v61 = vpop.f32.mrf.mxu1  ;;  %v6767_v49 = vpop.f32.mrf.mxu0  ;;  %19119 = vmatprep.mubr.msk.bf16.mxu1 %vm281_vm2, %v8146_v60  ;;  %19153 = vmatprep.mubr.msk.bf16.mxu0 %vm281_vm2, %v22584_v16 }
 0x37c   : >> { %v22614_v1 = vadd.f32 %v18947_v47, %v6600_v10  ;;  %v6598_v15 = vadd.f32 %v6471_v61, %v22402_v33  ;;  %19249 = vmatprep.subr.bf16.mxu1 %v22590_v3  ;;  %19283 = vmatprep.subr.bf16.mxu0 %v22593_v6  ;;  %v16321_v10 = vld [vmem:[%s19958_s30 + $0x1f0] sm:$0xff]  ;;  %v16323_v61 = vld [vmem:[%s19958_s30 + $0x200] sm:$0xff] }
 0x37d   : >> { %v18914_v29 = vpop.f32.mrf.mxu1  ;;  %v18948_v25 = vpop.f32.mrf.mxu0 }
 0x37e   : >> { %v22621_v14 = vadd.f32 %v6767_v49, %v6598_v15  ;;  %v6601_v28 = vadd.f32 %v18914_v29, %v22405_v48  ;;  %v16270_v48 = vld [vmem:[%s19958_s30 + $0x188] sm:$0xff] }
 0x37f   : >> { %v6474_v33 = vpop.f32.mrf.mxu1  ;;  %v6770_v2 = vpop.f32.mrf.mxu0  ;;  %v8149_v15 = vpack.c.bf16 %v16271_v37, %v16270_v48  ;;  %v16325_v48 = vld [vmem:[%s19958_s30 + $0x210] sm:$0xff]  ;;  %v16326_v37 = vld [vmem:[%s19958_s30 + $0x218] sm:$0xff] }
 0x380   : >> { %v22626_v26 = vadd.f32 %v18948_v25, %v6601_v28  ;;  %v6599_v60 = vadd.f32 %v6474_v33, %v22412_v36  ;;  %v16320_v36 = vld [vmem:[%s19958_s30 + $0x1e8] sm:$0xff] }
 0x381   : >> { %v18917_v35 = vpop.f32.mrf.mxu1  ;;  %v18951_v27 = vpop.f32.mrf.mxu0  ;;  %19120 = vmatmul.mubr.msk.bf16.gmra.mxu1 %vm281_vm2, %v8147_v46  ;;  %19154 = vmatmul.mubr.msk.bf16.gmra.mxu0 %vm281_vm2, %v22619_v23  ;;  %v22652_v46 = vpack.c.bf16 %v16323_v61, %v16322_v34 }
 0x382   : >> { %v22633_v47 = vadd.f32 %v6770_v2, %v6599_v60  ;;  %v6604_v13 = vadd.f32 %v18917_v35, %v22423_v43  ;;  %19123 = vmatprep.mubr.msk.bf16.mxu1 %vm281_vm2, %v8148_v58  ;;  %19157 = vmatprep.mubr.msk.bf16.mxu0 %vm281_vm2, %v22624_v63  ;;  %v22647_v43 = vpack.c.bf16 %v16321_v10, %v16320_v36  ;;  %v16327_v36 = vld [vmem:[%s19958_s30 + $0x220] sm:$0xff] }
 0x383   : >> { %v6487_v54 = vpop.f32.mrf.mxu1  ;;  %v6783_v17 = vpop.f32.mrf.mxu0 }
 0x384   : >> { %v22644_v49 = vadd.f32 %v18951_v27, %v6604_v13  ;;  %v6602_v7 = vadd.f32 %v6487_v54, %v22426_v22  ;;  %v16324_v27 = vld [vmem:[%s19958_s30 + $0x208] sm:$0xff] }
 0x385   : >> { %v18918_v51 = vpop.f32.mrf.mxu1  ;;  %v18952_v18 = vpop.f32.mrf.mxu0  ;;  %v22674_v61 = vpack.c.bf16 %v16325_v48, %v16324_v27  ;;  %v16331_v27 = vld [vmem:[%s19958_s30 + $0x240] sm:$0xff] }
 0x386   : >> { %v22649_v29 = vadd.f32 %v6783_v17, %v6602_v7  ;;  %v6605_v25 = vadd.f32 %v18918_v51, %v22429_v41  ;;  %v22679_v7 = vpack.c.bf16 %v16327_v36, %v16326_v37 }
 0x387   : >> { %v6490_v28 = vpop.f32.mrf.mxu1  ;;  %v6786_v58 = vpop.f32.mrf.mxu0 }
 0x388   : >> { %v22654_v33 = vadd.f32 %v18952_v18, %v6605_v25  ;;  %v6603_v22 = vadd.f32 %v6490_v28, %v22436_v38 }
 0x389   : >> { %v18921_v2 = vpop.f32.mrf.mxu1  ;;  %v18955_v60 = vpop.f32.mrf.mxu0  ;;  %19124 = vmatmul.mubr.msk.bf16.gmra.mxu1 %vm281_vm2, %v8149_v15  ;;  %19158 = vmatmul.mubr.msk.bf16.gmra.mxu0 %vm281_vm2, %v22647_v43 }
 0x38a   : >> { %v22660_v35 = vadd.f32 %v6786_v58, %v6603_v22  ;;  %v6608_v41 = vadd.f32 %v18921_v2, %v22447_v4  ;;  %19127 = vmatprep.mubr.msk.bf16.mxu1 %vm281_vm2, %v22549_v9  ;;  %19161 = vmatprep.mubr.msk.bf16.mxu0 %vm281_vm2, %v22652_v46  ;;  %v16328_v22 = vld [vmem:[%s19958_s30 + $0x228] sm:$0xff] }
 0x38b   : >> { %v6503_v38 = vpop.f32.mrf.mxu1  ;;  %v6799_v13 = vpop.f32.mrf.mxu0 }
 0x38c   : >> { %v22671_v10 = vadd.f32 %v18955_v60, %v6608_v41  ;;  %v6606_v54 = vadd.f32 %v6503_v38, %v22450_v39  ;;  %v16330_v41 = vld [vmem:[%s19958_s30 + $0x238] sm:$0xff] }
 0x38d   : >> { %v18922_v17 = vpop.f32.mrf.mxu1  ;;  %v18956_v34 = vpop.f32.mrf.mxu0  ;;  %v8450_v36 = vpack.c.bf16 %v16331_v27, %v16330_v41 }
 0x38e   : >> { %v22676_v4 = vadd.f32 %v6799_v13, %v6606_v54  ;;  %v6609_v9 = vadd.f32 %v18922_v17, %v22453_v0 }
 0x38f   : >> { %v6506_v51 = vpop.f32.mrf.mxu1  ;;  %v6802_v18 = vpop.f32.mrf.mxu0 }
 0x390   : >> { %v22681_v15 = vadd.f32 %v18956_v34, %v6609_v9  ;;  %v6607_v39 = vadd.f32 %v6506_v51, %v22460_v31  ;;  %v16329_v31 = vld [vmem:[%s19958_s30 + $0x230] sm:$0xff] }
 0x391   : >> { %v18925_v25 = vpop.f32.mrf.mxu1  ;;  %v18959_v28 = vpop.f32.mrf.mxu0  ;;  %19128 = vmatmul.mubr.msk.bf16.gmra.mxu1 %vm281_vm2, %v22573_v19  ;;  %19162 = vmatmul.mubr.msk.bf16.gmra.mxu0 %vm281_vm2, %v22674_v61  ;;  %v22702_v37 = vpack.c.bf16 %v16329_v31, %v16328_v22  ;;  %v16335_v22 = vld [vmem:[%s19958_s30 + $0x260] sm:$0xff] }
 0x392   : >> { %v22688_v58 = vadd.f32 %v6802_v18, %v6607_v39  ;;  %v6612_v0 = vadd.f32 %v18925_v25, %v22471_v40  ;;  %19131 = vmatprep.mubr.msk.bf16.mxu1 %vm281_vm2, %v22584_v16  ;;  %19165 = vmatprep.mubr.msk.bf16.mxu0 %vm281_vm2, %v22679_v7  ;;  %v16332_v39 = vld [vmem:[%s19958_s30 + $0x248] sm:$0xff]  ;;  %v16333_v25 = vld [vmem:[%s19958_s30 + $0x250] sm:$0xff] }
 0x393   : >> { %v6519_v2 = vpop.f32.mrf.mxu1  ;;  %v6815_v60 = vpop.f32.mrf.mxu0  ;;  %v8451_v41 = vpack.c.bf16 %v16333_v25, %v16332_v39 }
 0x394   : >> { %v22699_v19 = vadd.f32 %v18959_v28, %v6612_v0  ;;  %v6610_v48 = vadd.f32 %v6519_v2, %v22474_v30  ;;  %v16334_v0 = vld [vmem:[%s19958_s30 + $0x258] sm:$0xff] }
 0x395   : >> { %v18926_v38 = vpop.f32.mrf.mxu1  ;;  %v18960_v13 = vpop.f32.mrf.mxu0  ;;  %v8452_v27 = vpack.c.bf16 %v16335_v22, %v16334_v0 }
 0x396   : >> { %v22704_v40 = vadd.f32 %v6815_v60, %v6610_v48  ;;  %v6613_v16 = vadd.f32 %v18926_v38, %v22477_v44 }
 0x397   : >> { %v6522_v54 = vpop.f32.mrf.mxu1  ;;  %v6818_v17 = vpop.f32.mrf.mxu0 }
 0x398   : >> { %v22707_v34 = vadd.f32 %v18960_v13, %v6613_v16  ;;  %v6611_v9 = vadd.f32 %v6522_v54, %v22484_v8 }
 0x399   : >> { %v18929_v30 = vpop.f32.mrf.mxu1  ;;  %v18963_v51 = vpop.f32.mrf.mxu0  ;;  %19132 = vmatmul.mubr.msk.bf16.gmra.mxu1 %vm281_vm2, %v22619_v23  ;;  %19166 = vmatmul.mubr.msk.bf16.gmra.mxu0 %vm281_vm2, %v22702_v37 }
 0x39a   : >> { %v22714_v18 = vadd.f32 %v6818_v17, %v6611_v9  ;;  %v6616_v44 = vadd.f32 %v18929_v30, %v22495_v53  ;;  %19135 = vmatprep.mubr.msk.bf16.mxu1 %vm281_vm2, %v22624_v63  ;;  %19169 = vmatprep.mubr.msk.bf16.mxu0 %vm281_vm2, %v8450_v36  ;;  %v16336_v17 = vld [vmem:[%s19958_s30 + $0x268] sm:$0xff]  ;;  %v16337_v9 = vld [vmem:[%s19958_s30 + $0x270] sm:$0xff] }
 0x39b   : >> { %v6535_v8 = vpop.f32.mrf.mxu1  ;;  %v6831_v28 = vpop.f32.mrf.mxu0 }
 0x39c   : >> { %v22724_v31 = vadd.f32 %v18963_v51, %v6616_v44  ;;  %v6614_v23 = vadd.f32 %v6535_v8, %v22498_v55  ;;  %v16338_v51 = vld [vmem:[%s19958_s30 + $0x278] sm:$0xff]  ;;  %v16339_v44 = vld [vmem:[%s19958_s30 + $0x280] sm:$0xff] }
 0x39d   : >> { %v18930_v2 = vpop.f32.mrf.mxu1  ;;  %v18964_v60 = vpop.f32.mrf.mxu0  ;;  %v8454_v0 = vpack.c.bf16 %v16339_v44, %v16338_v51 }
 0x39e   : >> { %v22727_v53 = vadd.f32 %v6831_v28, %v6614_v23  ;;  %v6617_v63 = vadd.f32 %v18930_v2, %v22501_v12  ;;  %v8453_v28 = vpack.c.bf16 %v16337_v9, %v16336_v17 }
 0x39f   : >> { %v6538_v48 = vpop.f32.mrf.mxu1  ;;  %v6834_v38 = vpop.f32.mrf.mxu0 }
 0x3a0   : >> { %v22730_v13 = vadd.f32 %v18964_v60, %v6617_v63  ;;  %v6615_v16 = vadd.f32 %v6538_v48, %v22508_v52  ;;  %v16341_v48 = vld [vmem:[%s19958_s30 + $0x290] sm:$0xff] }
 0x3a1   : >> { %v18933_v36 = vpop.f32.mrf.mxu1  ;;  %v18967_v55 = vpop.f32.mrf.mxu0  ;;  %19136 = vmatmul.mubr.msk.bf16.gmra.mxu1 %vm281_vm2, %v22647_v43  ;;  %19170 = vmatmul.mubr.msk.bf16.gmra.mxu0 %vm281_vm2, %v8451_v41 }
 0x3a2   : >> { %v22736_v54 = vadd.f32 %v6834_v38, %v6615_v16  ;;  %v6620_v12 = vadd.f32 %v18933_v36, %v22519_v42  ;;  %19139 = vmatprep.mubr.msk.bf16.mxu1 %vm281_vm2, %v22652_v46  ;;  %19173 = vmatprep.mubr.msk.bf16.mxu0 %vm281_vm2, %v8452_v27  ;;  %v16340_v27 = vld [vmem:[%s19958_s30 + $0x288] sm:$0xff] }
 0x3a3   : >> { %v6551_v30 = vpop.f32.mrf.mxu1  ;;  %v6847_v52 = vpop.f32.mrf.mxu0  ;;  %v16361_v36 = vld [vmem:[%s19958_s30 + $0x1a1] sm:$0xff] }
 0x3a4   : >> { %v22746_v39 = vadd.f32 %v18967_v55, %v6620_v12  ;;  %v6618_v43 = vadd.f32 %v6551_v30, %v22522_v62  ;;  %v16410_v55 = vld [vmem:[%s19958_s30 + $0x19a] sm:$0xff]  ;;  %v16411_v12 = vld [vmem:[%s19958_s30 + $0x1a2] sm:$0xff]  ;;  %v8455_v30 = vpack.c.bf16 %v16341_v48, %v16340_v27 }
 0x3a5   : >> { %v18934_v25 = vpop.f32.mrf.mxu1  ;;  %v18968_v8 = vpop.f32.mrf.mxu0  ;;  %v9032_v44 = vpack.c.bf16 %v16411_v12, %v16410_v55  ;;  %v16365_v48 = vld [vmem:[%s19958_s30 + $0x1c1] sm:$0xff] }
 0x3a6   : >> { %v22749_v42 = vadd.f32 %v6847_v52, %v6618_v43  ;;  %v6621_v46 = vadd.f32 %v18934_v25, %v22525_v45  ;;  %v16592_v12 = vld [vmem:[%s25309_s1 + $0x42] sm:$0x3] }
 0x3a7   : >> { %v6554_v22 = vpop.f32.mrf.mxu1  ;;  %v6850_v23 = vpop.f32.mrf.mxu0 }
 0x3a8   : >> { %v22752_v2 = vadd.f32 %v18968_v8, %v6621_v46  ;;  %v6619_v60 = vadd.f32 %v6554_v22, %v22532_v24  ;;  %v16360_v24 = vld [vmem:[%s19958_s30 + $0x199] sm:$0xff] }
 0x3a9   : >> { %v18937_v62 = vpop.f32.mrf.mxu1  ;;  %v18971_v41 = vpop.f32.mrf.mxu0  ;;  %19140 = vmatmul.mubr.msk.bf16.gmra.mxu1 %vm281_vm2, %v22674_v61  ;;  %19174 = vmatmul.mubr.msk.bf16.gmra.mxu0 %vm281_vm2, %v8453_v28  ;;  %v8736_v51 = vpack.c.bf16 %v16361_v36, %v16360_v24  ;;  %v16414_v24 = vld [vmem:[%s19958_s30 + $0x1ba] sm:$0xff] }
 0x3aa   : >> { %v22758_v63 = vadd.f32 %v6850_v23, %v6619_v60  ;;  %v6624_v45 = vadd.f32 %v18937_v62, %v22543_v20  ;;  %19143 = vmatprep.mubr.msk.bf16.mxu1 %vm281_vm2, %v22679_v7  ;;  %19177 = vmatprep.mubr.msk.bf16.mxu0 %vm281_vm2, %v8454_v0  ;;  %v16412_v23 = vld [vmem:[%s19958_s30 + $0x1aa] sm:$0xff]  ;;  %v16413_v60 = vld [vmem:[%s19958_s30 + $0x1b2] sm:$0xff] }
 0x3ab   : >> { %v6567_v38 = vpop.f32.mrf.mxu1  ;;  %v6863_v16 = vpop.f32.mrf.mxu0  ;;  %v9033_v55 = vpack.c.bf16 %v16413_v60, %v16412_v23  ;;  %v16417_v23 = vld [vmem:[%s19958_s30 + $0x1d2] sm:$0xff] }
 0x3ac   : >> { %v22770_v61 = vadd.f32 %v18971_v41, %v6624_v45  ;;  %v6622_v17 = vadd.f32 %v6567_v38, %v22546_v21  ;;  %v16364_v45 = vld [vmem:[%s19958_s30 + $0x1b9] sm:$0xff]  ;;  %v16415_v38 = vld [vmem:[%s19958_s30 + $0x1c2] sm:$0xff] }
 0x3ad   : >> { %v18938_v9 = vpop.f32.mrf.mxu1  ;;  %v18972_v20 = vpop.f32.mrf.mxu0  ;;  %v16368_v60 = vld [vmem:[%s19958_s30 + $0x1d9] sm:$0xff] }
 0x3ae   : >> { %v22773_v52 = vadd.f32 %v6863_v16, %v6622_v17  ;;  %v6625_v7 = vadd.f32 %v18938_v9, %v22551_v56  ;;  %v16362_v56 = vld [vmem:[%s19958_s30 + $0x1a9] sm:$0xff]  ;;  %v16642_v17 = vld [vmem:[%s25309_s1 + $0x44] sm:$0x3] }
 0x3af   : >> { %v6570_v43 = vpop.f32.mrf.mxu1  ;;  %v6866_v25 = vpop.f32.mrf.mxu0 }
 0x3b0   : >> { %v22776_v8 = vadd.f32 %v18972_v20, %v6625_v7  ;;  %v6623_v21 = vadd.f32 %v6570_v43, %v22557_v11  ;;  %v16363_v11 = vld [vmem:[%s19958_s30 + $0x1b1] sm:$0xff]  ;;  %v8738_v7 = vpack.c.bf16 %v16365_v48, %v16364_v45  ;;  %v16369_v45 = vld [vmem:[%s19958_s30 + $0x1e1] sm:$0xff] }
 0x3b1   : >> { %v18941_v28 = vpop.f32.mrf.mxu1  ;;  %v18975_v46 = vpop.f32.mrf.mxu0  ;;  %19144 = vmatmul.mubr.msk.bf16.gmra.mxu1 %vm281_vm2, %v22702_v37  ;;  %19178 = vmatmul.mubr.msk.bf16.gmra.mxu0 %vm281_vm2, %v8455_v30  ;;  %v16419_v48 = vld [vmem:[%s19958_s30 + $0x1e2] sm:$0xff] }
 0x3b2   : >> { %v22783_v0 = vadd.f32 %v6866_v25, %v6623_v21  ;;  %v6628_v22 = vadd.f32 %v18941_v28, %v22567_v50  ;;  %19183 = vmatprep.mubr.msk.bf16.mxu1 %vm281_vm2, %v8736_v51  ;;  %19217 = vmatprep.mubr.msk.bf16.mxu0 %vm281_vm2, %v9032_v44  ;;  %v8737_v50 = vpack.c.bf16 %v16363_v11, %v16362_v56  ;;  %v16367_v56 = vld [vmem:[%s19958_s30 + $0x1d1] sm:$0xff] }
 0x3b3   : >> { %v6583_v62 = vpop.f32.mrf.mxu1  ;;  %v6879_v41 = vpop.f32.mrf.mxu0  ;;  %v9034_v51 = vpack.c.bf16 %v16415_v38, %v16414_v24  ;;  %v22811_v25 = vand.u32 %v16592_v12, %v19951_v5  ;;  %v22814_v21 = vand.u32 %v16642_v17, %v19951_v5  ;;  %v16416_v11 = vld [vmem:[%s19958_s30 + $0x1ca] sm:$0xff] }
 0x3b4   : >> { %v22792_v37 = vadd.f32 %v18975_v46, %v6628_v22  ;;  %v6626_v27 = vadd.f32 %v6583_v62, %v22581_v57 }
 0x3b5   : >> { %v18942_v16 = vpop.f32.mrf.mxu1  ;;  %v18976_v36 = vpop.f32.mrf.mxu0 }
 0x3b6   : >> { %v22804_v9 = vadd.f32 %v6879_v41, %v6626_v27  ;;  %v6629_v57 = vadd.f32 %v18942_v16, %v22586_v59  ;;  %v16366_v59 = vld [vmem:[%s19958_s30 + $0x1c9] sm:$0xff]  ;;  %v16418_v27 = vld [vmem:[%s19958_s30 + $0x1da] sm:$0xff]  ;;  %v9035_v16 = vpack.c.bf16 %v16417_v23, %v16416_v11 }
 0x3b7   : >> { %v6586_v20 = vpop.f32.mrf.mxu1  ;;  %v6882_v30 = vpop.f32.mrf.mxu0  ;;  %v8739_v38 = vpack.c.bf16 %v16367_v56, %v16366_v59  ;;  %v9036_v12 = vpack.c.bf16 %v16419_v48, %v16418_v27  ;;  %v16372_v59 = vld [vmem:[%s19958_s30 + $0x1f9] sm:$0xff]  ;;  %v16373_v11 = vld [vmem:[%s19958_s30 + $0x201] sm:$0xff] }
 0x3b8   : >> { %v22807_v44 = vadd.f32 %v18976_v36, %v6629_v57  ;;  %v6627_v43 = vadd.f32 %v6586_v20, %v22600_v32  ;;  %v16422_v23 = vld [vmem:[%s19958_s30 + $0x1fa] sm:$0xff] }
 0x3b9   : >> { %v18981_v28 = vpop.f32.mrf.mxu1  ;;  %v19015_v46 = vpop.f32.mrf.mxu0  ;;  %19184 = vmatmul.mubr.msk.bf16.vlgmr.msra.gmra.mxu1 %vm281_vm2, %v8737_v50  ;;  %19218 = vmatmul.mubr.msk.bf16.vlgmr.msra.gmra.mxu0 %vm281_vm2, %v9033_v55  ;;  %v8740_v55 = vpack.c.bf16 %v16369_v45, %v16368_v60  ;;  %v16423_v60 = vld [vmem:[%s19958_s30 + $0x202] sm:$0xff] }
 0x3ba   : >> { %v22820_v22 = vadd.f32 %v6882_v30, %v6627_v43  ;;  %v7192_v32 = vadd.f32 %v18981_v28, %v22614_v1  ;;  %19250 = vmatpush3.bf16.msra.mxu1 %v22590_v3  ;;  %19284 = vmatpush3.bf16.msra.mxu0 %v22593_v6 }
 0x3bb   : >> { %v7063_v62 = vpop.f32.mrf.mxu1  ;;  %v7359_v41 = vpop.f32.mrf.mxu0  ;;  %19187 = vmatprep.mubr.msk.bf16.mxu1 %vm281_vm2, %v8738_v7  ;;  %19221 = vmatprep.mubr.msk.bf16.mxu0 %vm281_vm2, %v9034_v51  ;;  %v16371_v51 = vld [vmem:[%s19958_s30 + $0x1f1] sm:$0xff] }
 0x3bc   : >> { %v22833_v24 = vadd.f32 %v19015_v46, %v7192_v32  ;;  %v7190_v1 = vadd.f32 %v7063_v62, %v22621_v14  ;;  %19317 = vmatprep.subr.bf16.mxu1 %v22811_v25  ;;  %19351 = vmatprep.subr.bf16.mxu0 %v22814_v21  ;;  %v16421_v46 = vld [vmem:[%s19958_s30 + $0x1f2] sm:$0xff] }
 0x3bd   : >> { %v18982_v3 = vpop.f32.mrf.mxu1  ;;  %v19016_v6 = vpop.f32.mrf.mxu0 }
 0x3be   : >> { %v22838_v36 = vadd.f32 %v7359_v41, %v7190_v1  ;;  %v7193_v50 = vadd.f32 %v18982_v3, %v22626_v26  ;;  %v16370_v26 = vld [vmem:[%s19958_s30 + $0x1e9] sm:$0xff] }
 0x3bf   : >> { %v7066_v17 = vpop.f32.mrf.mxu1  ;;  %v7362_v14 = vpop.f32.mrf.mxu0 }
 0x3c0   : >> { %v22841_v57 = vadd.f32 %v19016_v6, %v7193_v50  ;;  %v7191_v20 = vadd.f32 %v7066_v17, %v22633_v47  ;;  %v16420_v47 = vld [vmem:[%s19958_s30 + $0x1ea] sm:$0xff]  ;;  %v8742_v6 = vpack.c.bf16 %v16373_v11, %v16372_v59  ;;  %v16427_v59 = vld [vmem:[%s19958_s30 + $0x222] sm:$0xff] }
 0x3c1   : >> { %v18985_v30 = vpop.f32.mrf.mxu1  ;;  %v19019_v7 = vpop.f32.mrf.mxu0  ;;  %19188 = vmatmul.mubr.msk.bf16.gmra.mxu1 %vm281_vm2, %v8739_v38  ;;  %19222 = vmatmul.mubr.msk.bf16.gmra.mxu0 %vm281_vm2, %v9035_v16  ;;  %v9037_v48 = vpack.c.bf16 %v16421_v46, %v16420_v47  ;;  %v9038_v38 = vpack.c.bf16 %v16423_v60, %v16422_v23  ;;  %v16377_v47 = vld [vmem:[%s19958_s30 + $0x221] sm:$0xff] }
 0x3c2   : >> { %v22848_v43 = vadd.f32 %v7362_v14, %v7191_v20  ;;  %v7196_v28 = vadd.f32 %v18985_v30, %v22644_v49  ;;  %19191 = vmatprep.mubr.msk.bf16.mxu1 %vm281_vm2, %v8740_v55  ;;  %19225 = vmatprep.mubr.msk.bf16.mxu0 %vm281_vm2, %v9036_v12  ;;  %v8741_v49 = vpack.c.bf16 %v16371_v51, %v16370_v26  ;;  %v16375_v14 = vld [vmem:[%s19958_s30 + $0x211] sm:$0xff]  ;;  %v16376_v26 = vld [vmem:[%s19958_s30 + $0x219] sm:$0xff] }
 0x3c3   : >> { %v7079_v56 = vpop.f32.mrf.mxu1  ;;  %v7375_v32 = vpop.f32.mrf.mxu0  ;;  %v16426_v46 = vld [vmem:[%s19958_s30 + $0x21a] sm:$0xff] }
 0x3c4   : >> { %v22859_v62 = vadd.f32 %v19019_v7, %v7196_v28  ;;  %v7194_v41 = vadd.f32 %v7079_v56, %v22649_v29  ;;  %v16425_v7 = vld [vmem:[%s19958_s30 + $0x212] sm:$0xff] }
 0x3c5   : >> { %v18986_v45 = vpop.f32.mrf.mxu1  ;;  %v19020_v27 = vpop.f32.mrf.mxu0 }
 0x3c6   : >> { %v22862_v1 = vadd.f32 %v7375_v32, %v7194_v41  ;;  %v7197_v3 = vadd.f32 %v18986_v45, %v22654_v33  ;;  %v16374_v33 = vld [vmem:[%s19958_s30 + $0x209] sm:$0xff] }
 0x3c7   : >> { %v7082_v16 = vpop.f32.mrf.mxu1  ;;  %v7378_v50 = vpop.f32.mrf.mxu0 }
 0x3c8   : >> { %v22865_v55 = vadd.f32 %v19020_v27, %v7197_v3  ;;  %v7195_v29 = vadd.f32 %v7082_v16, %v22660_v35  ;;  %v16424_v35 = vld [vmem:[%s19958_s30 + $0x20a] sm:$0xff]  ;;  %v8744_v27 = vpack.c.bf16 %v16377_v47, %v16376_v26  ;;  %v16431_v26 = vld [vmem:[%s19958_s30 + $0x242] sm:$0xff] }
 0x3c9   : >> { %v18989_v12 = vpop.f32.mrf.mxu1  ;;  %v19023_v17 = vpop.f32.mrf.mxu0  ;;  %19192 = vmatmul.mubr.msk.bf16.gmra.mxu1 %vm281_vm2, %v8741_v49  ;;  %19226 = vmatmul.mubr.msk.bf16.gmra.mxu0 %vm281_vm2, %v9037_v48  ;;  %v9039_v60 = vpack.c.bf16 %v16425_v7, %v16424_v35  ;;  %v9040_v49 = vpack.c.bf16 %v16427_v59, %v16426_v46  ;;  %v16381_v35 = vld [vmem:[%s19958_s30 + $0x241] sm:$0xff] }
 0x3ca   : >> { %v22872_v20 = vadd.f32 %v7378_v50, %v7195_v29  ;;  %v7200_v30 = vadd.f32 %v18989_v12, %v22671_v10  ;;  %19195 = vmatprep.mubr.msk.bf16.mxu1 %vm281_vm2, %v8742_v6  ;;  %19229 = vmatprep.mubr.msk.bf16.mxu0 %vm281_vm2, %v9038_v38  ;;  %v8743_v10 = vpack.c.bf16 %v16375_v14, %v16374_v33  ;;  %v16379_v50 = vld [vmem:[%s19958_s30 + $0x231] sm:$0xff]  ;;  %v16380_v33 = vld [vmem:[%s19958_s30 + $0x239] sm:$0xff] }
 0x3cb   : >> { %v7095_v51 = vpop.f32.mrf.mxu1  ;;  %v7391_v28 = vpop.f32.mrf.mxu0  ;;  %v16430_v7 = vld [vmem:[%s19958_s30 + $0x23a] sm:$0xff] }
 0x3cc   : >> { %v22883_v56 = vadd.f32 %v19023_v17, %v7200_v30  ;;  %v7198_v32 = vadd.f32 %v7095_v51, %v22676_v4  ;;  %v16429_v17 = vld [vmem:[%s19958_s30 + $0x232] sm:$0xff] }
 0x3cd   : >> { %v18990_v11 = vpop.f32.mrf.mxu1  ;;  %v19024_v23 = vpop.f32.mrf.mxu0 }
 0x3ce   : >> { %v22886_v41 = vadd.f32 %v7391_v28, %v7198_v32  ;;  %v7201_v45 = vadd.f32 %v18990_v11, %v22681_v15  ;;  %v16378_v15 = vld [vmem:[%s19958_s30 + $0x229] sm:$0xff] }
 0x3cf   : >> { %v7098_v48 = vpop.f32.mrf.mxu1  ;;  %v7394_v3 = vpop.f32.mrf.mxu0 }
 0x3d0   : >> { %v22889_v6 = vadd.f32 %v19024_v23, %v7201_v45  ;;  %v7199_v4 = vadd.f32 %v7098_v48, %v22688_v58  ;;  %v16428_v58 = vld [vmem:[%s19958_s30 + $0x22a] sm:$0xff]  ;;  %v8746_v23 = vpack.c.bf16 %v16381_v35, %v16380_v33  ;;  %v16435_v33 = vld [vmem:[%s19958_s30 + $0x262] sm:$0xff] }
 0x3d1   : >> { %v18993_v38 = vpop.f32.mrf.mxu1  ;;  %v19027_v16 = vpop.f32.mrf.mxu0  ;;  %19196 = vmatmul.mubr.msk.bf16.gmra.mxu1 %vm281_vm2, %v8743_v10  ;;  %19230 = vmatmul.mubr.msk.bf16.gmra.mxu0 %vm281_vm2, %v9039_v60  ;;  %v9041_v59 = vpack.c.bf16 %v16429_v17, %v16428_v58  ;;  %v9042_v10 = vpack.c.bf16 %v16431_v26, %v16430_v7  ;;  %v16385_v58 = vld [vmem:[%s19958_s30 + $0x261] sm:$0xff] }
 0x3d2   : >> { %v22896_v29 = vadd.f32 %v7394_v3, %v7199_v4  ;;  %v7204_v12 = vadd.f32 %v18993_v38, %v22699_v19  ;;  %19199 = vmatprep.mubr.msk.bf16.mxu1 %vm281_vm2, %v8744_v27  ;;  %19233 = vmatprep.mubr.msk.bf16.mxu0 %vm281_vm2, %v9040_v49  ;;  %v8745_v19 = vpack.c.bf16 %v16379_v50, %v16378_v15  ;;  %v16383_v3 = vld [vmem:[%s19958_s30 + $0x251] sm:$0xff]  ;;  %v16384_v15 = vld [vmem:[%s19958_s30 + $0x259] sm:$0xff] }
 0x3d3   : >> { %v7111_v14 = vpop.f32.mrf.mxu1  ;;  %v7407_v30 = vpop.f32.mrf.mxu0  ;;  %v16434_v17 = vld [vmem:[%s19958_s30 + $0x25a] sm:$0xff] }
 0x3d4   : >> { %v22907_v51 = vadd.f32 %v19027_v16, %v7204_v12  ;;  %v7202_v28 = vadd.f32 %v7111_v14, %v22704_v40  ;;  %v16433_v16 = vld [vmem:[%s19958_s30 + $0x252] sm:$0xff] }
 0x3d5   : >> { %v18994_v47 = vpop.f32.mrf.mxu1  ;;  %v19028_v46 = vpop.f32.mrf.mxu0 }
 0x3d6   : >> { %v22910_v32 = vadd.f32 %v7407_v30, %v7202_v28  ;;  %v7205_v11 = vadd.f32 %v18994_v47, %v22707_v34  ;;  %v16382_v34 = vld [vmem:[%s19958_s30 + $0x249] sm:$0xff] }
 0x3d7   : >> { %v7114_v60 = vpop.f32.mrf.mxu1  ;;  %v7410_v45 = vpop.f32.mrf.mxu0 }
 0x3d8   : >> { %v22913_v27 = vadd.f32 %v19028_v46, %v7205_v11  ;;  %v7203_v40 = vadd.f32 %v7114_v60, %v22714_v18  ;;  %v16432_v18 = vld [vmem:[%s19958_s30 + $0x24a] sm:$0xff]  ;;  %v8748_v46 = vpack.c.bf16 %v16385_v58, %v16384_v15  ;;  %v16439_v15 = vld [vmem:[%s19958_s30 + $0x282] sm:$0xff] }
 0x3d9   : >> { %v18997_v49 = vpop.f32.mrf.mxu1  ;;  %v19031_v48 = vpop.f32.mrf.mxu0  ;;  %19200 = vmatmul.mubr.msk.bf16.gmra.mxu1 %vm281_vm2, %v8745_v19  ;;  %19234 = vmatmul.mubr.msk.bf16.gmra.mxu0 %vm281_vm2, %v9041_v59  ;;  %v9043_v26 = vpack.c.bf16 %v16433_v16, %v16432_v18  ;;  %v9044_v19 = vpack.c.bf16 %v16435_v33, %v16434_v17  ;;  %v16389_v18 = vld [vmem:[%s19958_s30 + $0x281] sm:$0xff] }
 0x3da   : >> { %v22920_v4 = vadd.f32 %v7410_v45, %v7203_v40  ;;  %v7208_v38 = vadd.f32 %v18997_v49, %v22724_v31  ;;  %19203 = vmatprep.mubr.msk.bf16.mxu1 %vm281_vm2, %v8746_v23  ;;  %19237 = vmatprep.mubr.msk.bf16.mxu0 %vm281_vm2, %v9042_v10  ;;  %v8747_v31 = vpack.c.bf16 %v16383_v3, %v16382_v34  ;;  %v16387_v45 = vld [vmem:[%s19958_s30 + $0x271] sm:$0xff]  ;;  %v16388_v34 = vld [vmem:[%s19958_s30 + $0x279] sm:$0xff] }
 0x3db   : >> { %v7127_v50 = vpop.f32.mrf.mxu1  ;;  %v7423_v12 = vpop.f32.mrf.mxu0  ;;  %v16438_v16 = vld [vmem:[%s19958_s30 + $0x27a] sm:$0xff] }
 0x3dc   : >> { %v22931_v14 = vadd.f32 %v19031_v48, %v7208_v38  ;;  %v7206_v30 = vadd.f32 %v7127_v50, %v22727_v53  ;;  %v16437_v48 = vld [vmem:[%s19958_s30 + $0x272] sm:$0xff] }
 0x3dd   : >> { %v18998_v35 = vpop.f32.mrf.mxu1  ;;  %v19032_v7 = vpop.f32.mrf.mxu0 }
 0x3de   : >> { %v22934_v28 = vadd.f32 %v7423_v12, %v7206_v30  ;;  %v7209_v47 = vadd.f32 %v18998_v35, %v22730_v13  ;;  %v16386_v13 = vld [vmem:[%s19958_s30 + $0x269] sm:$0xff] }
 0x3df   : >> { %v7130_v59 = vpop.f32.mrf.mxu1  ;;  %v7426_v11 = vpop.f32.mrf.mxu0 }
 0x3e0   : >> { %v22937_v23 = vadd.f32 %v19032_v7, %v7209_v47  ;;  %v7207_v53 = vadd.f32 %v7130_v59, %v22736_v54  ;;  %v16436_v54 = vld [vmem:[%s19958_s30 + $0x26a] sm:$0xff]  ;;  %v8750_v7 = vpack.c.bf16 %v16389_v18, %v16388_v34 }
 0x3e1   : >> { %v19001_v10 = vpop.f32.mrf.mxu1  ;;  %v19035_v60 = vpop.f32.mrf.mxu0  ;;  %19204 = vmatmul.mubr.msk.bf16.gmra.mxu1 %vm281_vm2, %v8747_v31  ;;  %19238 = vmatmul.mubr.msk.bf16.gmra.mxu0 %vm281_vm2, %v9043_v26  ;;  %v9045_v33 = vpack.c.bf16 %v16437_v48, %v16436_v54  ;;  %v9046_v31 = vpack.c.bf16 %v16439_v15, %v16438_v16  ;;  %v16461_v54 = vld [vmem:[%s19958_s30 + $0x1a3] sm:$0xff] }
 0x3e2   : >> { %v22944_v40 = vadd.f32 %v7426_v11, %v7207_v53  ;;  %v7212_v49 = vadd.f32 %v19001_v10, %v22746_v39  ;;  %19207 = vmatprep.mubr.msk.bf16.mxu1 %vm281_vm2, %v8748_v46  ;;  %19241 = vmatprep.mubr.msk.bf16.mxu0 %vm281_vm2, %v9044_v19  ;;  %v8749_v39 = vpack.c.bf16 %v16387_v45, %v16386_v13  ;;  %v16391_v11 = vld [vmem:[%s19958_s30 + $0x291] sm:$0xff]  ;;  %v16460_v13 = vld [vmem:[%s19958_s30 + $0x19b] sm:$0xff]  ;;  %v16511_v34 = vld [vmem:[%s19958_s30 + $0x1a4] sm:$0xff] }
 0x3e3   : >> { %v7143_v3 = vpop.f32.mrf.mxu1  ;;  %v7439_v38 = vpop.f32.mrf.mxu0  ;;  %v16510_v48 = vld [vmem:[%s19958_s30 + $0x19c] sm:$0xff] }
 0x3e4   : >> { %v22955_v50 = vadd.f32 %v19035_v60, %v7212_v49  ;;  %v7210_v12 = vadd.f32 %v7143_v3, %v22749_v42  ;;  %v16441_v60 = vld [vmem:[%s19958_s30 + $0x292] sm:$0xff] }
 0x3e5   : >> { %v19002_v58 = vpop.f32.mrf.mxu1  ;;  %v19036_v17 = vpop.f32.mrf.mxu0 }
 0x3e6   : >> { %v22958_v30 = vadd.f32 %v7439_v38, %v7210_v12  ;;  %v7213_v35 = vadd.f32 %v19002_v58, %v22752_v2  ;;  %v16390_v2 = vld [vmem:[%s19958_s30 + $0x289] sm:$0xff] }
 0x3e7   : >> { %v7146_v26 = vpop.f32.mrf.mxu1  ;;  %v7442_v47 = vpop.f32.mrf.mxu0 }
 0x3e8   : >> { %v22961_v46 = vadd.f32 %v19036_v17, %v7213_v35  ;;  %v7211_v42 = vadd.f32 %v7146_v26, %v22758_v63  ;;  %v16440_v63 = vld [vmem:[%s19958_s30 + $0x28a] sm:$0xff]  ;;  %v9328_v17 = vpack.c.bf16 %v16461_v54, %v16460_v13 }
 0x3e9   : >> { %v19005_v19 = vpop.f32.mrf.mxu1  ;;  %v19039_v59 = vpop.f32.mrf.mxu0  ;;  %19208 = vmatmul.mubr.msk.bf16.gmra.mxu1 %vm281_vm2, %v8749_v39  ;;  %19242 = vmatmul.mubr.msk.bf16.gmra.mxu0 %vm281_vm2, %v9045_v33  ;;  %v9047_v15 = vpack.c.bf16 %v16441_v60, %v16440_v63  ;;  %v9624_v39 = vpack.c.bf16 %v16511_v34, %v16510_v48  ;;  %v16465_v13 = vld [vmem:[%s19958_s30 + $0x1c3] sm:$0xff] }
 0x3ea   : >> { %v22968_v53 = vadd.f32 %v7442_v47, %v7211_v42  ;;  %v7216_v10 = vadd.f32 %v19005_v19, %v22770_v61  ;;  %19211 = vmatprep.mubr.msk.bf16.mxu1 %vm281_vm2, %v8750_v7  ;;  %19245 = vmatprep.mubr.msk.bf16.mxu0 %vm281_vm2, %v9046_v31  ;;  %v8751_v61 = vpack.c.bf16 %v16391_v11, %v16390_v2  ;;  %v16463_v19 = vld [vmem:[%s19958_s30 + $0x1b3] sm:$0xff] }
 0x3eb   : >> { %v7159_v45 = vpop.f32.mrf.mxu1  ;;  %v7455_v49 = vpop.f32.mrf.mxu0 }
 0x3ec   : >> { %v22979_v3 = vadd.f32 %v19039_v59, %v7216_v10  ;;  %v7214_v38 = vadd.f32 %v7159_v45, %v22773_v52  ;;  %v16513_v59 = vld [vmem:[%s19958_s30 + $0x1b4] sm:$0xff]  ;;  %v16514_v45 = vld [vmem:[%s19958_s30 + $0x1bc] sm:$0xff] }
 0x3ed   : >> { %v19006_v18 = vpop.f32.mrf.mxu1  ;;  %v19040_v16 = vpop.f32.mrf.mxu0  ;;  %v16464_v10 = vld [vmem:[%s19958_s30 + $0x1bb] sm:$0xff] }
 0x3ee   : >> { %v22982_v12 = vadd.f32 %v7455_v49, %v7214_v38  ;;  %v7217_v58 = vadd.f32 %v19006_v18, %v22776_v8  ;;  %v16462_v8 = vld [vmem:[%s19958_s30 + $0x1ab] sm:$0xff]  ;;  %v16692_v38 = vld [vmem:[%s25309_s1 + $0x46] sm:$0x3]  ;;  %v16742_v18 = vld [vmem:[%s25309_s1 + $0x48] sm:$0x3] }
 0x3ef   : >> { %v7162_v33 = vpop.f32.mrf.mxu1  ;;  %v7458_v35 = vpop.f32.mrf.mxu0  ;;  %v16515_v49 = vld [vmem:[%s19958_s30 + $0x1c4] sm:$0xff] }
 0x3f0   : >> { %v22985_v7 = vadd.f32 %v19040_v16, %v7217_v58  ;;  %v7215_v52 = vadd.f32 %v7162_v33, %v22783_v0  ;;  %v16512_v0 = vld [vmem:[%s19958_s30 + $0x1ac] sm:$0xff]  ;;  %v9330_v58 = vpack.c.bf16 %v16465_v13, %v16464_v10  ;;  %v16469_v10 = vld [vmem:[%s19958_s30 + $0x1e3] sm:$0xff] }
 0x3f1   : >> { %v19009_v31 = vpop.f32.mrf.mxu1  ;;  %v19043_v26 = vpop.f32.mrf.mxu0  ;;  %19212 = vmatmul.mubr.msk.bf16.gmra.mxu1 %vm281_vm2, %v8751_v61  ;;  %19246 = vmatmul.mubr.msk.bf16.gmra.mxu0 %vm281_vm2, %v9047_v15  ;;  %v9625_v34 = vpack.c.bf16 %v16513_v59, %v16512_v0  ;;  %v16517_v0 = vld [vmem:[%s19958_s30 + $0x1d4] sm:$0xff]  ;;  %v16519_v13 = vld [vmem:[%s19958_s30 + $0x1e4] sm:$0xff] }
 0x3f2   : >> { %v22991_v47 = vadd.f32 %v7458_v35, %v7215_v52  ;;  %v7220_v42 = vadd.f32 %v19009_v31, %v22792_v37  ;;  %19251 = vmatprep.mubr.msk.bf16.mxu1 %vm281_vm2, %v9328_v17  ;;  %19285 = vmatprep.mubr.msk.bf16.mxu0 %vm281_vm2, %v9624_v39  ;;  %v9329_v37 = vpack.c.bf16 %v16463_v19, %v16462_v8  ;;  %v16467_v8 = vld [vmem:[%s19958_s30 + $0x1d3] sm:$0xff]  ;;  %v16468_v59 = vld [vmem:[%s19958_s30 + $0x1db] sm:$0xff] }
 0x3f3   : >> { %v7175_v2 = vpop.f32.mrf.mxu1  ;;  %v7471_v11 = vpop.f32.mrf.mxu0  ;;  %v9626_v17 = vpack.c.bf16 %v16515_v49, %v16514_v45  ;;  %v23019_v35 = vand.u32 %v16692_v38, %v19951_v5  ;;  %v23022_v52 = vand.u32 %v16742_v18, %v19951_v5  ;;  %v16516_v19 = vld [vmem:[%s19958_s30 + $0x1cc] sm:$0xff] }
 0x3f4   : >> { %v23000_v63 = vadd.f32 %v19043_v26, %v7220_v42  ;;  %v7218_v60 = vadd.f32 %v7175_v2, %v22804_v9 }
 0x3f5   : >> { %v19010_v54 = vpop.f32.mrf.mxu1  ;;  %v19044_v48 = vpop.f32.mrf.mxu0 }
 0x3f6   : >> { %v23012_v16 = vadd.f32 %v7471_v11, %v7218_v60  ;;  %v7221_v9 = vadd.f32 %v19010_v54, %v22807_v44  ;;  %v16466_v44 = vld [vmem:[%s19958_s30 + $0x1cb] sm:$0xff]  ;;  %v16518_v60 = vld [vmem:[%s19958_s30 + $0x1dc] sm:$0xff]  ;;  %v9627_v54 = vpack.c.bf16 %v16517_v0, %v16516_v19 }
 0x3f7   : >> { %v7178_v61 = vpop.f32.mrf.mxu1  ;;  %v7474_v15 = vpop.f32.mrf.mxu0  ;;  %v9331_v49 = vpack.c.bf16 %v16467_v8, %v16466_v44  ;;  %v9628_v38 = vpack.c.bf16 %v16519_v13, %v16518_v60  ;;  %v16472_v44 = vld [vmem:[%s19958_s30 + $0x1fb] sm:$0xff]  ;;  %v16473_v19 = vld [vmem:[%s19958_s30 + $0x203] sm:$0xff] }
 0x3f8   : >> { %v23015_v39 = vadd.f32 %v19044_v48, %v7221_v9  ;;  %v7219_v33 = vadd.f32 %v7178_v61, %v22820_v22  ;;  %v16522_v0 = vld [vmem:[%s19958_s30 + $0x1fc] sm:$0xff] }
 0x3f9   : >> { %v19049_v31 = vpop.f32.mrf.mxu1  ;;  %v19083_v26 = vpop.f32.mrf.mxu0  ;;  %19252 = vmatmul.mubr.msk.bf16.vlgmr.msra.gmra.mxu1 %vm281_vm2, %v9329_v37  ;;  %19286 = vmatmul.mubr.msk.bf16.vlgmr.msra.gmra.mxu0 %vm281_vm2, %v9625_v34  ;;  %v9332_v34 = vpack.c.bf16 %v16469_v10, %v16468_v59  ;;  %v16523_v59 = vld [vmem:[%s19958_s30 + $0x204] sm:$0xff] }
 0x3fa   : >> { %v23028_v42 = vadd.f32 %v7474_v15, %v7219_v33  ;;  %v7784_v22 = vadd.f32 %v19049_v31, %v22833_v24  ;;  %19318 = vmatpush3.bf16.msra.mxu1 %v22811_v25  ;;  %19352 = vmatpush3.bf16.msra.mxu0 %v22814_v21 }
 0x3fb   : >> { %v7655_v2 = vpop.f32.mrf.mxu1  ;;  %v7951_v11 = vpop.f32.mrf.mxu0  ;;  %19255 = vmatprep.mubr.msk.bf16.mxu1 %vm281_vm2, %v9330_v58  ;;  %19289 = vmatprep.mubr.msk.bf16.mxu0 %vm281_vm2, %v9626_v17  ;;  %v16471_v17 = vld [vmem:[%s19958_s30 + $0x1f3] sm:$0xff] }
 0x3fc   : >> { %v23041_v45 = vadd.f32 %v19083_v26, %v7784_v22  ;;  %v7782_v24 = vadd.f32 %v7655_v2, %v22838_v36  ;;  %19385 = vmatprep.subr.bf16.mxu1 %v23019_v35  ;;  %19419 = vmatprep.subr.bf16.mxu0 %v23022_v52  ;;  %v16521_v26 = vld [vmem:[%s19958_s30 + $0x1f4] sm:$0xff] }
 0x3fd   : >> { %v19050_v25 = vpop.f32.mrf.mxu1  ;;  %v19084_v21 = vpop.f32.mrf.mxu0 }
 0x3fe   : >> { %v23046_v48 = vadd.f32 %v7951_v11, %v7782_v24  ;;  %v7785_v37 = vadd.f32 %v19050_v25, %v22841_v57  ;;  %v16470_v57 = vld [vmem:[%s19958_s30 + $0x1eb] sm:$0xff] }
 0x3ff   : >> { %v7658_v18 = vpop.f32.mrf.mxu1  ;;  %v7954_v36 = vpop.f32.mrf.mxu0 }
 0x400   : >> { %v23049_v9 = vadd.f32 %v19084_v21, %v7785_v37  ;;  %v7783_v61 = vadd.f32 %v7658_v18, %v22848_v43  ;;  %v16520_v43 = vld [vmem:[%s19958_s30 + $0x1ec] sm:$0xff]  ;;  %v9334_v21 = vpack.c.bf16 %v16473_v19, %v16472_v44  ;;  %v16527_v44 = vld [vmem:[%s19958_s30 + $0x224] sm:$0xff] }
 0x401   : >> { %v19053_v15 = vpop.f32.mrf.mxu1  ;;  %v19087_v58 = vpop.f32.mrf.mxu0  ;;  %19256 = vmatmul.mubr.msk.bf16.gmra.mxu1 %vm281_vm2, %v9331_v49  ;;  %19290 = vmatmul.mubr.msk.bf16.gmra.mxu0 %vm281_vm2, %v9627_v54  ;;  %v9629_v13 = vpack.c.bf16 %v16521_v26, %v16520_v43  ;;  %v9630_v49 = vpack.c.bf16 %v16523_v59, %v16522_v0  ;;  %v16477_v43 = vld [vmem:[%s19958_s30 + $0x223] sm:$0xff] }
 0x402   : >> { %v23056_v33 = vadd.f32 %v7954_v36, %v7783_v61  ;;  %v7788_v31 = vadd.f32 %v19053_v15, %v22859_v62  ;;  %19259 = vmatprep.mubr.msk.bf16.mxu1 %vm281_vm2, %v9332_v34  ;;  %19293 = vmatprep.mubr.msk.bf16.mxu0 %vm281_vm2, %v9628_v38  ;;  %v9333_v62 = vpack.c.bf16 %v16471_v17, %v16470_v57  ;;  %v16475_v36 = vld [vmem:[%s19958_s30 + $0x213] sm:$0xff]  ;;  %v16476_v57 = vld [vmem:[%s19958_s30 + $0x21b] sm:$0xff] }
 0x403   : >> { %v7671_v8 = vpop.f32.mrf.mxu1  ;;  %v7967_v22 = vpop.f32.mrf.mxu0  ;;  %v16526_v26 = vld [vmem:[%s19958_s30 + $0x21c] sm:$0xff] }
 0x404   : >> { %v23067_v2 = vadd.f32 %v19087_v58, %v7788_v31  ;;  %v7786_v11 = vadd.f32 %v7671_v8, %v22862_v1  ;;  %v16525_v58 = vld [vmem:[%s19958_s30 + $0x214] sm:$0xff] }
 0x405   : >> { %v19054_v10 = vpop.f32.mrf.mxu1  ;;  %v19088_v60 = vpop.f32.mrf.mxu0 }
 0x406   : >> { %v23070_v24 = vadd.f32 %v7967_v22, %v7786_v11  ;;  %v7789_v25 = vadd.f32 %v19054_v10, %v22865_v55  ;;  %v16474_v55 = vld [vmem:[%s19958_s30 + $0x20b] sm:$0xff] }
 0x407   : >> { %v7674_v54 = vpop.f32.mrf.mxu1  ;;  %v7970_v37 = vpop.f32.mrf.mxu0 }
 0x408   : >> { %v23073_v34 = vadd.f32 %v19088_v60, %v7789_v25  ;;  %v7787_v1 = vadd.f32 %v7674_v54, %v22872_v20  ;;  %v16524_v20 = vld [vmem:[%s19958_s30 + $0x20c] sm:$0xff]  ;;  %v9336_v60 = vpack.c.bf16 %v16477_v43, %v16476_v57  ;;  %v16531_v57 = vld [vmem:[%s19958_s30 + $0x244] sm:$0xff] }
 0x409   : >> { %v19057_v38 = vpop.f32.mrf.mxu1  ;;  %v19091_v18 = vpop.f32.mrf.mxu0  ;;  %19260 = vmatmul.mubr.msk.bf16.gmra.mxu1 %vm281_vm2, %v9333_v62  ;;  %19294 = vmatmul.mubr.msk.bf16.gmra.mxu0 %vm281_vm2, %v9629_v13  ;;  %v9631_v59 = vpack.c.bf16 %v16525_v58, %v16524_v20  ;;  %v9632_v62 = vpack.c.bf16 %v16527_v44, %v16526_v26  ;;  %v16481_v20 = vld [vmem:[%s19958_s30 + $0x243] sm:$0xff] }
 0x40a   : >> { %v23080_v61 = vadd.f32 %v7970_v37, %v7787_v1  ;;  %v7792_v15 = vadd.f32 %v19057_v38, %v22883_v56  ;;  %19263 = vmatprep.mubr.msk.bf16.mxu1 %vm281_vm2, %v9334_v21  ;;  %19297 = vmatprep.mubr.msk.bf16.mxu0 %vm281_vm2, %v9630_v49  ;;  %v9335_v56 = vpack.c.bf16 %v16475_v36, %v16474_v55  ;;  %v16479_v37 = vld [vmem:[%s19958_s30 + $0x233] sm:$0xff]  ;;  %v16480_v55 = vld [vmem:[%s19958_s30 + $0x23b] sm:$0xff] }
 0x40b   : >> { %v7687_v17 = vpop.f32.mrf.mxu1  ;;  %v7983_v31 = vpop.f32.mrf.mxu0  ;;  %v16530_v58 = vld [vmem:[%s19958_s30 + $0x23c] sm:$0xff] }
 0x40c   : >> { %v23091_v8 = vadd.f32 %v19091_v18, %v7792_v15  ;;  %v7790_v22 = vadd.f32 %v7687_v17, %v22886_v41  ;;  %v16529_v18 = vld [vmem:[%s19958_s30 + $0x234] sm:$0xff] }
 0x40d   : >> { %v19058_v19 = vpop.f32.mrf.mxu1  ;;  %v19092_v0 = vpop.f32.mrf.mxu0 }
 0x40e   : >> { %v23094_v11 = vadd.f32 %v7983_v31, %v7790_v22  ;;  %v7793_v10 = vadd.f32 %v19058_v19, %v22889_v6  ;;  %v16478_v6 = vld [vmem:[%s19958_s30 + $0x22b] sm:$0xff] }
 0x40f   : >> { %v7690_v13 = vpop.f32.mrf.mxu1  ;;  %v7986_v25 = vpop.f32.mrf.mxu0 }
 0x410   : >> { %v23097_v21 = vadd.f32 %v19092_v0, %v7793_v10  ;;  %v7791_v41 = vadd.f32 %v7690_v13, %v22896_v29  ;;  %v16528_v29 = vld [vmem:[%s19958_s30 + $0x22c] sm:$0xff]  ;;  %v9338_v0 = vpack.c.bf16 %v16481_v20, %v16480_v55  ;;  %v16535_v55 = vld [vmem:[%s19958_s30 + $0x264] sm:$0xff] }
 0x411   : >> { %v19061_v49 = vpop.f32.mrf.mxu1  ;;  %v19095_v54 = vpop.f32.mrf.mxu0  ;;  %19264 = vmatmul.mubr.msk.bf16.gmra.mxu1 %vm281_vm2, %v9335_v56  ;;  %19298 = vmatmul.mubr.msk.bf16.gmra.mxu0 %vm281_vm2, %v9631_v59  ;;  %v9633_v44 = vpack.c.bf16 %v16529_v18, %v16528_v29  ;;  %v9634_v56 = vpack.c.bf16 %v16531_v57, %v16530_v58  ;;  %v16485_v29 = vld [vmem:[%s19958_s30 + $0x263] sm:$0xff] }
 0x412   : >> { %v23104_v1 = vadd.f32 %v7986_v25, %v7791_v41  ;;  %v7796_v38 = vadd.f32 %v19061_v49, %v22907_v51  ;;  %19267 = vmatprep.mubr.msk.bf16.mxu1 %vm281_vm2, %v9336_v60  ;;  %19301 = vmatprep.mubr.msk.bf16.mxu0 %vm281_vm2, %v9632_v62  ;;  %v9337_v51 = vpack.c.bf16 %v16479_v37, %v16478_v6  ;;  %v16483_v25 = vld [vmem:[%s19958_s30 + $0x253] sm:$0xff]  ;;  %v16484_v6 = vld [vmem:[%s19958_s30 + $0x25b] sm:$0xff] }
 0x413   : >> { %v7703_v36 = vpop.f32.mrf.mxu1  ;;  %v7999_v15 = vpop.f32.mrf.mxu0  ;;  %v16534_v18 = vld [vmem:[%s19958_s30 + $0x25c] sm:$0xff] }
 0x414   : >> { %v23115_v17 = vadd.f32 %v19095_v54, %v7796_v38  ;;  %v7794_v31 = vadd.f32 %v7703_v36, %v22910_v32  ;;  %v16533_v54 = vld [vmem:[%s19958_s30 + $0x254] sm:$0xff] }
 0x415   : >> { %v19062_v43 = vpop.f32.mrf.mxu1  ;;  %v19096_v26 = vpop.f32.mrf.mxu0 }
 0x416   : >> { %v23118_v22 = vadd.f32 %v7999_v15, %v7794_v31  ;;  %v7797_v19 = vadd.f32 %v19062_v43, %v22913_v27  ;;  %v16482_v27 = vld [vmem:[%s19958_s30 + $0x24b] sm:$0xff] }
 0x417   : >> { %v7706_v59 = vpop.f32.mrf.mxu1  ;;  %v8002_v10 = vpop.f32.mrf.mxu0 }
 0x418   : >> { %v23121_v60 = vadd.f32 %v19096_v26, %v7797_v19  ;;  %v7795_v32 = vadd.f32 %v7706_v59, %v22920_v4  ;;  %v16532_v4 = vld [vmem:[%s19958_s30 + $0x24c] sm:$0xff]  ;;  %v9340_v26 = vpack.c.bf16 %v16485_v29, %v16484_v6  ;;  %v16539_v6 = vld [vmem:[%s19958_s30 + $0x284] sm:$0xff] }
 0x419   : >> { %v19065_v62 = vpop.f32.mrf.mxu1  ;;  %v19099_v13 = vpop.f32.mrf.mxu0  ;;  %19268 = vmatmul.mubr.msk.bf16.gmra.mxu1 %vm281_vm2, %v9337_v51  ;;  %19302 = vmatmul.mubr.msk.bf16.gmra.mxu0 %vm281_vm2, %v9633_v44  ;;  %v9635_v57 = vpack.c.bf16 %v16533_v54, %v16532_v4  ;;  %v9636_v51 = vpack.c.bf16 %v16535_v55, %v16534_v18  ;;  %v16489_v4 = vld [vmem:[%s19958_s30 + $0x283] sm:$0xff] }
 0x41a   : >> { %v23128_v41 = vadd.f32 %v8002_v10, %v7795_v32  ;;  %v7800_v49 = vadd.f32 %v19065_v62, %v22931_v14  ;;  %19271 = vmatprep.mubr.msk.bf16.mxu1 %vm281_vm2, %v9338_v0  ;;  %19305 = vmatprep.mubr.msk.bf16.mxu0 %vm281_vm2, %v9634_v56  ;;  %v9339_v14 = vpack.c.bf16 %v16483_v25, %v16482_v27  ;;  %v16487_v10 = vld [vmem:[%s19958_s30 + $0x273] sm:$0xff]  ;;  %v16488_v27 = vld [vmem:[%s19958_s30 + $0x27b] sm:$0xff] }
 0x41b   : >> { %v7719_v37 = vpop.f32.mrf.mxu1  ;;  %v8015_v38 = vpop.f32.mrf.mxu0  ;;  %v16538_v54 = vld [vmem:[%s19958_s30 + $0x27c] sm:$0xff] }
 0x41c   : >> { %v23139_v36 = vadd.f32 %v19099_v13, %v7800_v49  ;;  %v7798_v15 = vadd.f32 %v7719_v37, %v22934_v28  ;;  %v16537_v13 = vld [vmem:[%s19958_s30 + $0x274] sm:$0xff] }
 0x41d   : >> { %v19066_v20 = vpop.f32.mrf.mxu1  ;;  %v19100_v58 = vpop.f32.mrf.mxu0 }
 0x41e   : >> { %v23142_v31 = vadd.f32 %v8015_v38, %v7798_v15  ;;  %v7801_v43 = vadd.f32 %v19066_v20, %v22937_v23  ;;  %v16486_v23 = vld [vmem:[%s19958_s30 + $0x26b] sm:$0xff] }
 0x41f   : >> { %v7722_v44 = vpop.f32.mrf.mxu1  ;;  %v8018_v19 = vpop.f32.mrf.mxu0 }
 0x420   : >> { %v23145_v0 = vadd.f32 %v19100_v58, %v7801_v43  ;;  %v7799_v28 = vadd.f32 %v7722_v44, %v22944_v40  ;;  %v16536_v40 = vld [vmem:[%s19958_s30 + $0x26c] sm:$0xff]  ;;  %v9342_v58 = vpack.c.bf16 %v16489_v4, %v16488_v27 }
 0x421   : >> { %v19069_v56 = vpop.f32.mrf.mxu1  ;;  %v19103_v59 = vpop.f32.mrf.mxu0  ;;  %19272 = vmatmul.mubr.msk.bf16.gmra.mxu1 %vm281_vm2, %v9339_v14  ;;  %19306 = vmatmul.mubr.msk.bf16.gmra.mxu0 %vm281_vm2, %v9635_v57  ;;  %v9637_v55 = vpack.c.bf16 %v16537_v13, %v16536_v40  ;;  %v9638_v14 = vpack.c.bf16 %v16539_v6, %v16538_v54  ;;  %v16561_v40 = vld [vmem:[%s19958_s30 + $0x1a5] sm:$0xff] }
 0x422   : >> { %v23152_v32 = vadd.f32 %v8018_v19, %v7799_v28  ;;  %v7804_v62 = vadd.f32 %v19069_v56, %v22955_v50  ;;  %19275 = vmatprep.mubr.msk.bf16.mxu1 %vm281_vm2, %v9340_v26  ;;  %19309 = vmatprep.mubr.msk.bf16.mxu0 %vm281_vm2, %v9636_v51  ;;  %v9341_v50 = vpack.c.bf16 %v16487_v10, %v16486_v23  ;;  %v16491_v19 = vld [vmem:[%s19958_s30 + $0x293] sm:$0xff]  ;;  %v16560_v23 = vld [vmem:[%s19958_s30 + $0x19d] sm:$0xff]  ;;  %v16611_v27 = vld [vmem:[%s19958_s30 + $0x1a6] sm:$0xff] }
 0x423   : >> { %v7735_v25 = vpop.f32.mrf.mxu1  ;;  %v8031_v49 = vpop.f32.mrf.mxu0  ;;  %v16610_v13 = vld [vmem:[%s19958_s30 + $0x19e] sm:$0xff] }
 0x424   : >> { %v23163_v37 = vadd.f32 %v19103_v59, %v7804_v62  ;;  %v7802_v38 = vadd.f32 %v7735_v25, %v22958_v30  ;;  %v16541_v59 = vld [vmem:[%s19958_s30 + $0x294] sm:$0xff] }
 0x425   : >> { %v19070_v29 = vpop.f32.mrf.mxu1  ;;  %v19104_v18 = vpop.f32.mrf.mxu0 }
 0x426   : >> { %v23166_v15 = vadd.f32 %v8031_v49, %v7802_v38  ;;  %v7805_v20 = vadd.f32 %v19070_v29, %v22961_v46  ;;  %v16490_v46 = vld [vmem:[%s19958_s30 + $0x28b] sm:$0xff] }
 0x427   : >> { %v7738_v57 = vpop.f32.mrf.mxu1  ;;  %v8034_v43 = vpop.f32.mrf.mxu0 }
 0x428   : >> { %v23169_v26 = vadd.f32 %v19104_v18, %v7805_v20  ;;  %v7803_v30 = vadd.f32 %v7738_v57, %v22968_v53  ;;  %v16540_v53 = vld [vmem:[%s19958_s30 + $0x28c] sm:$0xff]  ;;  %v9920_v18 = vpack.c.bf16 %v16561_v40, %v16560_v23 }
 0x429   : >> { %v19073_v51 = vpop.f32.mrf.mxu1  ;;  %v19107_v44 = vpop.f32.mrf.mxu0  ;;  %19276 = vmatmul.mubr.msk.bf16.gmra.mxu1 %vm281_vm2, %v9341_v50  ;;  %19310 = vmatmul.mubr.msk.bf16.gmra.mxu0 %vm281_vm2, %v9637_v55  ;;  %v9639_v6 = vpack.c.bf16 %v16541_v59, %v16540_v53  ;;  %v10216_v50 = vpack.c.bf16 %v16611_v27, %v16610_v13  ;;  %v16565_v23 = vld [vmem:[%s19958_s30 + $0x1c5] sm:$0xff] }
 0x42a   : >> { %v23176_v28 = vadd.f32 %v8034_v43, %v7803_v30  ;;  %v7808_v56 = vadd.f32 %v19073_v51, %v22979_v3  ;;  %19279 = vmatprep.mubr.msk.bf16.mxu1 %vm281_vm2, %v9342_v58  ;;  %19313 = vmatprep.mubr.msk.bf16.mxu0 %vm281_vm2, %v9638_v14  ;;  %v9343_v3 = vpack.c.bf16 %v16491_v19, %v16490_v46  ;;  %v16563_v51 = vld [vmem:[%s19958_s30 + $0x1b5] sm:$0xff] }
 0x42b   : >> { %v7751_v10 = vpop.f32.mrf.mxu1  ;;  %v8047_v62 = vpop.f32.mrf.mxu0 }
 0x42c   : >> { %v23187_v25 = vadd.f32 %v19107_v44, %v7808_v56  ;;  %v7806_v49 = vadd.f32 %v7751_v10, %v22982_v12  ;;  %v16613_v44 = vld [vmem:[%s19958_s30 + $0x1b6] sm:$0xff]  ;;  %v16614_v10 = vld [vmem:[%s19958_s30 + $0x1be] sm:$0xff] }
 0x42d   : >> { %v19074_v4 = vpop.f32.mrf.mxu1  ;;  %v19108_v54 = vpop.f32.mrf.mxu0  ;;  %v16564_v56 = vld [vmem:[%s19958_s30 + $0x1bd] sm:$0xff] }
 0x42e   : >> { %v23190_v38 = vadd.f32 %v8047_v62, %v7806_v49  ;;  %v7809_v29 = vadd.f32 %v19074_v4, %v22985_v7  ;;  %v16562_v7 = vld [vmem:[%s19958_s30 + $0x1ad] sm:$0xff]  ;;  %v16792_v49 = vld [vmem:[%s25309_s1 + $0x4a] sm:$0x3] }
 0x42f   : >> { %v7754_v55 = vpop.f32.mrf.mxu1  ;;  %v8050_v20 = vpop.f32.mrf.mxu0  ;;  %v16615_v62 = vld [vmem:[%s19958_s30 + $0x1c6] sm:$0xff] }
 0x430   : >> { %v23193_v58 = vadd.f32 %v19108_v54, %v7809_v29  ;;  %v7807_v12 = vadd.f32 %v7754_v55, %v22991_v47  ;;  %v16612_v47 = vld [vmem:[%s19958_s30 + $0x1ae] sm:$0xff]  ;;  %v16842_v4 = vld [vmem:[%s25309_s1 + $0x4c] sm:$0x3]  ;;  %v9922_v29 = vpack.c.bf16 %v16565_v23, %v16564_v56 }
 0x431   : >> { %v19077_v14 = vpop.f32.mrf.mxu1  ;;  %v19111_v57 = vpop.f32.mrf.mxu0  ;;  %19280 = vmatmul.mubr.msk.bf16.gmra.mxu1 %vm281_vm2, %v9343_v3  ;;  %19314 = vmatmul.mubr.msk.bf16.gmra.mxu0 %vm281_vm2, %v9639_v6  ;;  %v10217_v27 = vpack.c.bf16 %v16613_v44, %v16612_v47  ;;  %v16617_v47 = vld [vmem:[%s19958_s30 + $0x1d6] sm:$0xff]  ;;  %v16569_v56 = vld [vmem:[%s19958_s30 + $0x1e5] sm:$0xff] }
 0x432   : >> { %v23199_v43 = vadd.f32 %v8050_v20, %v7807_v12  ;;  %v7812_v30 = vadd.f32 %v19077_v14, %v23000_v63  ;;  %19319 = vmatprep.mubr.msk.bf16.mxu1 %vm281_vm2, %v9920_v18  ;;  %19353 = vmatprep.mubr.msk.bf16.mxu0 %vm281_vm2, %v10216_v50  ;;  %v9921_v63 = vpack.c.bf16 %v16563_v51, %v16562_v7  ;;  %v16567_v7 = vld [vmem:[%s19958_s30 + $0x1d5] sm:$0xff]  ;;  %v16568_v44 = vld [vmem:[%s19958_s30 + $0x1dd] sm:$0xff]  ;;  %v16619_v23 = vld [vmem:[%s19958_s30 + $0x1e6] sm:$0xff] }
 0x433   : >> { %v7767_v46 = vpop.f32.mrf.mxu1  ;;  %v8063_v19 = vpop.f32.mrf.mxu0  ;;  %v10218_v18 = vpack.c.bf16 %v16615_v62, %v16614_v10  ;;  %v23227_v20 = vand.u32 %v16792_v49, %v19951_v5  ;;  %v23230_v12 = vand.u32 %v16842_v4, %v19951_v5  ;;  %v16616_v51 = vld [vmem:[%s19958_s30 + $0x1ce] sm:$0xff] }
 0x434   : >> { %v23208_v53 = vadd.f32 %v19111_v57, %v7812_v30  ;;  %v7810_v59 = vadd.f32 %v7767_v46, %v23012_v16 }
 0x435   : >> { %v19078_v40 = vpop.f32.mrf.mxu1  ;;  %v19112_v13 = vpop.f32.mrf.mxu0 }
 0x436   : >> { %v23220_v54 = vadd.f32 %v8063_v19, %v7810_v59  ;;  %v7813_v16 = vadd.f32 %v19078_v40, %v23015_v39  ;;  %v16566_v39 = vld [vmem:[%s19958_s30 + $0x1cd] sm:$0xff]  ;;  %v16618_v59 = vld [vmem:[%s19958_s30 + $0x1de] sm:$0xff]  ;;  %v10219_v40 = vpack.c.bf16 %v16617_v47, %v16616_v51 }
 0x437   : >> { %v7770_v3 = vpop.f32.mrf.mxu1  ;;  %v8066_v6 = vpop.f32.mrf.mxu0  ;;  %v9923_v62 = vpack.c.bf16 %v16567_v7, %v16566_v39  ;;  %v10220_v49 = vpack.c.bf16 %v16619_v23, %v16618_v59  ;;  %v16572_v39 = vld [vmem:[%s19958_s30 + $0x1fd] sm:$0xff]  ;;  %v16573_v51 = vld [vmem:[%s19958_s30 + $0x205] sm:$0xff] }
 0x438   : >> { %v23223_v50 = vadd.f32 %v19112_v13, %v7813_v16  ;;  %v7811_v55 = vadd.f32 %v7770_v3, %v23028_v42  ;;  %v16622_v47 = vld [vmem:[%s19958_s30 + $0x1fe] sm:$0xff] }
 0x439   : >> { %v19117_v14 = vpop.f32.mrf.mxu1  ;;  %v19151_v57 = vpop.f32.mrf.mxu0  ;;  %19320 = vmatmul.mubr.msk.bf16.vlgmr.msra.gmra.mxu1 %vm281_vm2, %v9921_v63  ;;  %19354 = vmatmul.mubr.msk.bf16.vlgmr.msra.gmra.mxu0 %vm281_vm2, %v10217_v27  ;;  %v9924_v27 = vpack.c.bf16 %v16569_v56, %v16568_v44  ;;  %v16623_v44 = vld [vmem:[%s19958_s30 + $0x206] sm:$0xff] }
 0x43a   : >> { %v23236_v30 = vadd.f32 %v8066_v6, %v7811_v55  ;;  %v8376_v42 = vadd.f32 %v19117_v14, %v23041_v45  ;;  %19386 = vmatpush3.bf16.msra.mxu1 %v23019_v35  ;;  %19420 = vmatpush3.bf16.msra.mxu0 %v23022_v52 }
 0x43b   : >> { %v8247_v46 = vpop.f32.mrf.mxu1  ;;  %v8543_v19 = vpop.f32.mrf.mxu0  ;;  %19323 = vmatprep.mubr.msk.bf16.mxu1 %vm281_vm2, %v9922_v29  ;;  %19357 = vmatprep.mubr.msk.bf16.mxu0 %vm281_vm2, %v10218_v18  ;;  %v16571_v18 = vld [vmem:[%s19958_s30 + $0x1f5] sm:$0xff] }
 0x43c   : >> { %v23249_v10 = vadd.f32 %v19151_v57, %v8376_v42  ;;  %v8374_v45 = vadd.f32 %v8247_v46, %v23046_v48  ;;  %19453 = vmatprep.subr.bf16.mxu1 %v23227_v20  ;;  %19487 = vmatprep.subr.bf16.mxu0 %v23230_v12  ;;  %v16621_v57 = vld [vmem:[%s19958_s30 + $0x1f6] sm:$0xff] }
 0x43d   : >> { %v19118_v35 = vpop.f32.mrf.mxu1  ;;  %v19152_v52 = vpop.f32.mrf.mxu0 }
 0x43e   : >> { %v23254_v13 = vadd.f32 %v8543_v19, %v8374_v45  ;;  %v8377_v63 = vadd.f32 %v19118_v35, %v23049_v9  ;;  %v16570_v9 = vld [vmem:[%s19958_s30 + $0x1ed] sm:$0xff] }
 0x43f   : >> { %v8250_v4 = vpop.f32.mrf.mxu1  ;;  %v8546_v48 = vpop.f32.mrf.mxu0 }
 0x440   : >> { %v23257_v16 = vadd.f32 %v19152_v52, %v8377_v63  ;;  %v8375_v3 = vadd.f32 %v8250_v4, %v23056_v33  ;;  %v16620_v33 = vld [vmem:[%s19958_s30 + $0x1ee] sm:$0xff]  ;;  %v9926_v52 = vpack.c.bf16 %v16573_v51, %v16572_v39  ;;  %v16627_v39 = vld [vmem:[%s19958_s30 + $0x226] sm:$0xff] }
 0x441   : >> { %v19121_v6 = vpop.f32.mrf.mxu1  ;;  %v19155_v29 = vpop.f32.mrf.mxu0  ;;  %19324 = vmatmul.mubr.msk.bf16.gmra.mxu1 %vm281_vm2, %v9923_v62  ;;  %19358 = vmatmul.mubr.msk.bf16.gmra.mxu0 %vm281_vm2, %v10219_v40  ;;  %v10221_v23 = vpack.c.bf16 %v16621_v57, %v16620_v33  ;;  %v23281_v62 = vpack.c.bf16 %v16623_v44, %v16622_v47  ;;  %v16577_v33 = vld [vmem:[%s19958_s30 + $0x225] sm:$0xff] }
 0x442   : >> { %v23264_v55 = vadd.f32 %v8546_v48, %v8375_v3  ;;  %v8380_v14 = vadd.f32 %v19121_v6, %v23067_v2  ;;  %19327 = vmatprep.mubr.msk.bf16.mxu1 %vm281_vm2, %v9924_v27  ;;  %19361 = vmatprep.mubr.msk.bf16.mxu0 %vm281_vm2, %v10220_v49  ;;  %v9925_v2 = vpack.c.bf16 %v16571_v18, %v16570_v9  ;;  %v16575_v48 = vld [vmem:[%s19958_s30 + $0x215] sm:$0xff]  ;;  %v16576_v9 = vld [vmem:[%s19958_s30 + $0x21d] sm:$0xff] }
 0x443   : >> { %v8263_v7 = vpop.f32.mrf.mxu1  ;;  %v8559_v42 = vpop.f32.mrf.mxu0  ;;  %v16626_v57 = vld [vmem:[%s19958_s30 + $0x21e] sm:$0xff] }
 0x444   : >> { %v23275_v46 = vadd.f32 %v19155_v29, %v8380_v14  ;;  %v8378_v19 = vadd.f32 %v8263_v7, %v23070_v24  ;;  %v16625_v29 = vld [vmem:[%s19958_s30 + $0x216] sm:$0xff] }
 0x445   : >> { %v19122_v56 = vpop.f32.mrf.mxu1  ;;  %v19156_v59 = vpop.f32.mrf.mxu0 }
 0x446   : >> { %v23278_v45 = vadd.f32 %v8559_v42, %v8378_v19  ;;  %v8381_v35 = vadd.f32 %v19122_v56, %v23073_v34  ;;  %v16574_v34 = vld [vmem:[%s19958_s30 + $0x20d] sm:$0xff] }
 0x447   : >> { %v8266_v40 = vpop.f32.mrf.mxu1  ;;  %v8562_v63 = vpop.f32.mrf.mxu0  ;;  %v9927_v47 = vpack.c.bf16 %v16575_v48, %v16574_v34  ;;  %v16629_v34 = vld [vmem:[%s19958_s30 + $0x236] sm:$0xff] }
 0x448   : >> { %v23283_v27 = vadd.f32 %v19156_v59, %v8381_v35  ;;  %v8379_v24 = vadd.f32 %v8266_v40, %v23080_v61  ;;  %v16624_v61 = vld [vmem:[%s19958_s30 + $0x20e] sm:$0xff]  ;;  %v9928_v59 = vpack.c.bf16 %v16577_v33, %v16576_v9  ;;  %v16580_v48 = vld [vmem:[%s19958_s30 + $0x23d] sm:$0xff] }
 0x449   : >> { %v19125_v49 = vpop.f32.mrf.mxu1  ;;  %v19159_v4 = vpop.f32.mrf.mxu0  ;;  %19328 = vmatmul.mubr.msk.bf16.gmra.mxu1 %vm281_vm2, %v9925_v2  ;;  %19362 = vmatmul.mubr.msk.bf16.gmra.mxu0 %vm281_vm2, %v10221_v23  ;;  %v23305_v44 = vpack.c.bf16 %v16625_v29, %v16624_v61  ;;  %v23310_v2 = vpack.c.bf16 %v16627_v39, %v16626_v57  ;;  %v16581_v29 = vld [vmem:[%s19958_s30 + $0x245] sm:$0xff] }
 0x44a   : >> { %v23290_v3 = vadd.f32 %v8562_v63, %v8379_v24  ;;  %v8384_v6 = vadd.f32 %v19125_v49, %v23091_v8  ;;  %19331 = vmatprep.mubr.msk.bf16.mxu1 %vm281_vm2, %v9926_v52  ;;  %19365 = vmatprep.mubr.msk.bf16.mxu0 %vm281_vm2, %v23281_v62  ;;  %v16579_v24 = vld [vmem:[%s19958_s30 + $0x235] sm:$0xff]  ;;  %v16630_v9 = vld [vmem:[%s19958_s30 + $0x23e] sm:$0xff] }
 0x44b   : >> { %v8279_v18 = vpop.f32.mrf.mxu1  ;;  %v8575_v14 = vpop.f32.mrf.mxu0 }
 0x44c   : >> { %v23302_v7 = vadd.f32 %v19159_v4, %v8384_v6  ;;  %v8382_v42 = vadd.f32 %v8279_v18, %v23094_v11  ;;  %v16631_v18 = vld [vmem:[%s19958_s30 + $0x246] sm:$0xff] }
 0x44d   : >> { %v19126_v51 = vpop.f32.mrf.mxu1  ;;  %v19160_v8 = vpop.f32.mrf.mxu0 }
 0x44e   : >> { %v23307_v19 = vadd.f32 %v8575_v14, %v8382_v42  ;;  %v8385_v56 = vadd.f32 %v19126_v51, %v23097_v21  ;;  %v16578_v21 = vld [vmem:[%s19958_s30 + $0x22d] sm:$0xff] }
 0x44f   : >> { %v8282_v23 = vpop.f32.mrf.mxu1  ;;  %v8578_v35 = vpop.f32.mrf.mxu0  ;;  %v9929_v39 = vpack.c.bf16 %v16579_v24, %v16578_v21 }
 0x450   : >> { %v23312_v11 = vadd.f32 %v19160_v8, %v8385_v56  ;;  %v8383_v52 = vadd.f32 %v8282_v23, %v23104_v1  ;;  %v16628_v1 = vld [vmem:[%s19958_s30 + $0x22e] sm:$0xff]  ;;  %v23340_v56 = vpack.c.bf16 %v16631_v18, %v16630_v9 }
 0x451   : >> { %v19129_v40 = vpop.f32.mrf.mxu1  ;;  %v19163_v63 = vpop.f32.mrf.mxu0  ;;  %19332 = vmatmul.mubr.msk.bf16.gmra.mxu1 %vm281_vm2, %v9927_v47  ;;  %19366 = vmatmul.mubr.msk.bf16.gmra.mxu0 %vm281_vm2, %v23305_v44  ;;  %v23335_v42 = vpack.c.bf16 %v16629_v34, %v16628_v1  ;;  %v9930_v47 = vpack.c.bf16 %v16581_v29, %v16580_v48  ;;  %v16584_v1 = vld [vmem:[%s19958_s30 + $0x25d] sm:$0xff]  ;;  %v16635_v29 = vld [vmem:[%s19958_s30 + $0x266] sm:$0xff] }
 0x452   : >> { %v23320_v49 = vadd.f32 %v8578_v35, %v8383_v52  ;;  %v8388_v4 = vadd.f32 %v19129_v40, %v23115_v17  ;;  %19335 = vmatprep.mubr.msk.bf16.mxu1 %vm281_vm2, %v9928_v59  ;;  %19369 = vmatprep.mubr.msk.bf16.mxu0 %vm281_vm2, %v23310_v2 }
 0x453   : >> { %v8295_v6 = vpop.f32.mrf.mxu1  ;;  %v8591_v61 = vpop.f32.mrf.mxu0 }
 0x454   : >> { %v23332_v14 = vadd.f32 %v19163_v63, %v8388_v4  ;;  %v8386_v33 = vadd.f32 %v8295_v6, %v23118_v22  ;;  %v16583_v63 = vld [vmem:[%s19958_s30 + $0x255] sm:$0xff]  ;;  %v16585_v6 = vld [vmem:[%s19958_s30 + $0x265] sm:$0xff] }
 0x455   : >> { %v19130_v57 = vpop.f32.mrf.mxu1  ;;  %v19164_v17 = vpop.f32.mrf.mxu0  ;;  %v16633_v4 = vld [vmem:[%s19958_s30 + $0x256] sm:$0xff] }
 0x456   : >> { %v23337_v51 = vadd.f32 %v8591_v61, %v8386_v33  ;;  %v8389_v8 = vadd.f32 %v19130_v57, %v23121_v60  ;;  %v16582_v60 = vld [vmem:[%s19958_s30 + $0x24d] sm:$0xff]  ;;  %v16634_v61 = vld [vmem:[%s19958_s30 + $0x25e] sm:$0xff] }
 0x457   : >> { %v8298_v59 = vpop.f32.mrf.mxu1  ;;  %v8594_v23 = vpop.f32.mrf.mxu0  ;;  %v9931_v57 = vpack.c.bf16 %v16583_v63, %v16582_v60  ;;  %v16587_v63 = vld [vmem:[%s19958_s30 + $0x275] sm:$0xff] }
 0x458   : >> { %v23342_v22 = vadd.f32 %v19164_v17, %v8389_v8  ;;  %v8387_v35 = vadd.f32 %v8298_v59, %v23128_v41  ;;  %v16632_v41 = vld [vmem:[%s19958_s30 + $0x24e] sm:$0xff]  ;;  %v23370_v59 = vpack.c.bf16 %v16635_v29, %v16634_v61  ;;  %v16638_v61 = vld [vmem:[%s19958_s30 + $0x27e] sm:$0xff]  ;;  %v16639_v29 = vld [vmem:[%s19958_s30 + $0x286] sm:$0xff] }
 0x459   : >> { %v19133_v52 = vpop.f32.mrf.mxu1  ;;  %v19167_v40 = vpop.f32.mrf.mxu0  ;;  %19336 = vmatmul.mubr.msk.bf16.gmra.mxu1 %vm281_vm2, %v9929_v39  ;;  %19370 = vmatmul.mubr.msk.bf16.gmra.mxu0 %vm281_vm2, %v23335_v42  ;;  %v23365_v17 = vpack.c.bf16 %v16633_v4, %v16632_v41  ;;  %v16637_v4 = vld [vmem:[%s19958_s30 + $0x276] sm:$0xff] }
 0x45a   : >> { %v23350_v21 = vadd.f32 %v8594_v23, %v8387_v35  ;;  %v8392_v24 = vadd.f32 %v19133_v52, %v23139_v36  ;;  %19339 = vmatprep.mubr.msk.bf16.mxu1 %vm281_vm2, %v9930_v47  ;;  %19373 = vmatprep.mubr.msk.bf16.mxu0 %vm281_vm2, %v23340_v56  ;;  %v9932_v47 = vpack.c.bf16 %v16585_v6, %v16584_v1  ;;  %v16588_v1 = vld [vmem:[%s19958_s30 + $0x27d] sm:$0xff]  ;;  %v16589_v6 = vld [vmem:[%s19958_s30 + $0x285] sm:$0xff] }
 0x45b   : >> { %v8311_v34 = vpop.f32.mrf.mxu1  ;;  %v8607_v48 = vpop.f32.mrf.mxu0 }
 0x45c   : >> { %v23362_v9 = vadd.f32 %v19167_v40, %v8392_v24  ;;  %v8390_v18 = vadd.f32 %v8311_v34, %v23142_v31 }
 0x45d   : >> { %v19134_v33 = vpop.f32.mrf.mxu1  ;;  %v19168_v36 = vpop.f32.mrf.mxu0 }
 0x45e   : >> { %v23367_v39 = vadd.f32 %v8607_v48, %v8390_v18  ;;  %v8393_v8 = vadd.f32 %v19134_v33, %v23145_v0  ;;  %v16586_v0 = vld [vmem:[%s19958_s30 + $0x26d] sm:$0xff] }
 0x45f   : >> { %v8314_v23 = vpop.f32.mrf.mxu1  ;;  %v8610_v35 = vpop.f32.mrf.mxu0 }
 0x460   : >> { %v23372_v31 = vadd.f32 %v19168_v36, %v8393_v8  ;;  %v8391_v52 = vadd.f32 %v8314_v23, %v23152_v32  ;;  %v16636_v32 = vld [vmem:[%s19958_s30 + $0x26e] sm:$0xff] }
 0x461   : >> { %v19137_v40 = vpop.f32.mrf.mxu1  ;;  %v19171_v60 = vpop.f32.mrf.mxu0  ;;  %19340 = vmatmul.mubr.msk.bf16.gmra.mxu1 %vm281_vm2, %v9931_v57  ;;  %19374 = vmatmul.mubr.msk.bf16.gmra.mxu0 %vm281_vm2, %v23365_v17  ;;  %v9933_v57 = vpack.c.bf16 %v16587_v63, %v16586_v0  ;;  %v23395_v8 = vpack.c.bf16 %v16637_v4, %v16636_v32 }
 0x462   : >> { %v23380_v24 = vadd.f32 %v8610_v35, %v8391_v52  ;;  %v8396_v41 = vadd.f32 %v19137_v40, %v23163_v37  ;;  %19343 = vmatprep.mubr.msk.bf16.mxu1 %vm281_vm2, %v9932_v47  ;;  %19377 = vmatprep.mubr.msk.bf16.mxu0 %vm281_vm2, %v23370_v59  ;;  %v9934_v35 = vpack.c.bf16 %v16589_v6, %v16588_v1  ;;  %v16591_v1 = vld [vmem:[%s19958_s30 + $0x295] sm:$0xff] }
 0x463   : >> { %v8327_v34 = vpop.f32.mrf.mxu1  ;;  %v8623_v48 = vpop.f32.mrf.mxu0  ;;  %v23400_v52 = vpack.c.bf16 %v16639_v29, %v16638_v61  ;;  %v16710_v61 = vld [vmem:[%s19958_s30 + $0x1ff] sm:$0xff]  ;;  %v16711_v29 = vld [vmem:[%s19958_s30 + $0x207] sm:$0xff] }
 0x464   : >> { %v23392_v18 = vadd.f32 %v19171_v60, %v8396_v41  ;;  %v8394_v33 = vadd.f32 %v8327_v34, %v23166_v15  ;;  %v16641_v34 = vld [vmem:[%s19958_s30 + $0x296] sm:$0xff] }
 0x465   : >> { %v19138_v36 = vpop.f32.mrf.mxu1  ;;  %v19172_v37 = vpop.f32.mrf.mxu0 }
 0x466   : >> { %v23397_v47 = vadd.f32 %v8623_v48, %v8394_v33  ;;  %v8397_v23 = vadd.f32 %v19138_v36, %v23169_v26  ;;  %v16590_v26 = vld [vmem:[%s19958_s30 + $0x28d] sm:$0xff] }
 0x467   : >> { %v8330_v40 = vpop.f32.mrf.mxu1  ;;  %v8626_v60 = vpop.f32.mrf.mxu0 }
 0x468   : >> { %v23402_v41 = vadd.f32 %v19172_v37, %v8397_v23  ;;  %v8395_v15 = vadd.f32 %v8330_v40, %v23176_v28  ;;  %v16640_v28 = vld [vmem:[%s19958_s30 + $0x28e] sm:$0xff]  ;;  %v9935_v23 = vpack.c.bf16 %v16591_v1, %v16590_v26 }
 0x469   : >> { %v19141_v0 = vpop.f32.mrf.mxu1  ;;  %v19175_v63 = vpop.f32.mrf.mxu0  ;;  %19344 = vmatmul.mubr.msk.bf16.gmra.mxu1 %vm281_vm2, %v9933_v57  ;;  %19378 = vmatmul.mubr.msk.bf16.gmra.mxu0 %vm281_vm2, %v23395_v8  ;;  %v16712_v1 = vld [vmem:[%s19958_s30 + $0x20f] sm:$0xff] }
 0x46a   : >> { %v23409_v32 = vadd.f32 %v8626_v60, %v8395_v15  ;;  %v8400_v4 = vadd.f32 %v19141_v0, %v23187_v25  ;;  %19347 = vmatprep.mubr.msk.bf16.mxu1 %vm281_vm2, %v9934_v35  ;;  %19381 = vmatprep.mubr.msk.bf16.mxu0 %vm281_vm2, %v23400_v52  ;;  %v23423_v25 = vpack.c.bf16 %v16641_v34, %v16640_v28  ;;  %v16713_v28 = vld [vmem:[%s19958_s30 + $0x217] sm:$0xff] }
 0x46b   : >> { %v8343_v48 = vpop.f32.mrf.mxu1  ;;  %v8639_v6 = vpop.f32.mrf.mxu0  ;;  %v10808_v60 = vpack.c.bf16 %v16711_v29, %v16710_v61  ;;  %v16714_v61 = vld [vmem:[%s19958_s30 + $0x21f] sm:$0xff]  ;;  %v16715_v29 = vld [vmem:[%s19958_s30 + $0x227] sm:$0xff] }
 0x46c   : >> { %25314 = vst [vmem:[#allocation2_spill] sm:$0xff] %v23409_v32  ;;  %v23420_v33 = vadd.f32 %v19175_v63, %v8400_v4  ;;  %v8398_v36 = vadd.f32 %v8343_v48, %v23190_v38 }
 0x46d   : >> { %v19142_v37 = vpop.f32.mrf.mxu1  ;;  %v19176_v57 = vpop.f32.mrf.mxu0 }
 0x46e   : >> { %v23425_v35 = vadd.f32 %v8639_v6, %v8398_v36  ;;  %v8401_v40 = vadd.f32 %v19142_v37, %v23193_v58 }
 0x46f   : >> { %v8346_v15 = vpop.f32.mrf.mxu1  ;;  %v8642_v0 = vpop.f32.mrf.mxu0 }
 0x470   : >> { %v23428_v32 = vadd.f32 %v19176_v57, %v8401_v40  ;;  %v8399_v63 = vadd.f32 %v8346_v15, %v23199_v43  ;;  %v10809_v57 = vpack.c.bf16 %v16713_v28, %v16712_v1  ;;  %v10810_v15 = vpack.c.bf16 %v16715_v29, %v16714_v61  ;;  %v16719_v61 = vld [vmem:[%s19958_s30 + $0x247] sm:$0xff] }
 0x471   : >> { %v19145_v38 = vpop.f32.mrf.mxu1  ;;  %v19179_v4 = vpop.f32.mrf.mxu0  ;;  %19348 = vmatmul.mubr.msk.bf16.gmra.mxu1 %vm281_vm2, %v9935_v23  ;;  %19382 = vmatmul.mubr.msk.bf16.gmra.mxu0 %vm281_vm2, %v23423_v25 }
 0x472   : >> { %v23434_v26 = vadd.f32 %v8642_v0, %v8399_v63  ;;  %v8404_v58 = vadd.f32 %v19145_v38, %v23208_v53  ;;  %19387 = vmatprep.mubr.msk.bf16.mxu1 %vm281_vm2, %v23281_v62  ;;  %19421 = vmatprep.mubr.msk.bf16.mxu0 %vm281_vm2, %v10808_v60  ;;  %v16892_v53 = vld [vmem:[%s25309_s1 + $0x4e] sm:$0x3]  ;;  %v16942_v62 = vld [vmem:[%s25309_s1 + $0x50] sm:$0x3] }
 0x473   : >> { %v8359_v43 = vpop.f32.mrf.mxu1  ;;  %v8655_v34 = vpop.f32.mrf.mxu0  ;;  %v23460_v38 = vand.u32 %v16892_v53, %v19951_v5 }
 0x474   : >> { %v23442_v48 = vadd.f32 %v19179_v4, %v8404_v58  ;;  %v8402_v6 = vadd.f32 %v8359_v43, %v23220_v54  ;;  %v23463_v4 = vand.u32 %v16942_v62, %v19951_v5  ;;  %v16717_v43 = vld [vmem:[%s19958_s30 + $0x237] sm:$0xff] }
 0x475   : >> { %v19146_v36 = vpop.f32.mrf.mxu1  ;;  %v19180_v37 = vpop.f32.mrf.mxu0 }
 0x476   : >> { %v23453_v23 = vadd.f32 %v8655_v34, %v8402_v6  ;;  %v8405_v40 = vadd.f32 %v19146_v36, %v23223_v50 }
 0x477   : >> { %v8362_v60 = vpop.f32.mrf.mxu1  ;;  %v8658_v54 = vpop.f32.mrf.mxu0 }
 0x478   : >> { %v23456_v0 = vadd.f32 %v19180_v37, %v8405_v40  ;;  %v8403_v63 = vadd.f32 %v8362_v60, %v23236_v30  ;;  %v16716_v30 = vld [vmem:[%s19958_s30 + $0x22f] sm:$0xff] }
 0x479   : >> { %v19185_v58 = vpop.f32.mrf.mxu1  ;;  %v19219_v1 = vpop.f32.mrf.mxu0  ;;  %19388 = vmatmul.mubr.msk.bf16.vlgmr.msra.gmra.mxu1 %vm281_vm2, %v23305_v44  ;;  %19422 = vmatmul.mubr.msk.bf16.vlgmr.msra.gmra.mxu0 %vm281_vm2, %v10809_v57  ;;  %v16718_v44 = vld [vmem:[%s19958_s30 + $0x23f] sm:$0xff] }
 0x47a   : >> { %v23468_v50 = vadd.f32 %v8658_v54, %v8403_v63  ;;  %v8968_v28 = vadd.f32 %v19185_v58, %v23249_v10  ;;  %19454 = vmatpush3.bf16.msra.mxu1 %v23227_v20  ;;  %19488 = vmatpush3.bf16.msra.mxu0 %v23230_v12  ;;  %v10811_v10 = vpack.c.bf16 %v16717_v43, %v16716_v30  ;;  %v16720_v63 = vld [vmem:[%s19958_s30 + $0x24f] sm:$0xff]  ;;  %v16721_v58 = vld [vmem:[%s19958_s30 + $0x257] sm:$0xff]  ;;  %v16723_v30 = vld [vmem:[%s19958_s30 + $0x267] sm:$0xff] }
 0x47b   : >> { %v8839_v34 = vpop.f32.mrf.mxu1  ;;  %v9135_v6 = vpop.f32.mrf.mxu0  ;;  %19391 = vmatprep.mubr.msk.bf16.mxu1 %vm281_vm2, %v23310_v2  ;;  %19425 = vmatprep.mubr.msk.bf16.mxu0 %vm281_vm2, %v10810_v15  ;;  %v10812_v57 = vpack.c.bf16 %v16719_v61, %v16718_v44  ;;  %v10813_v44 = vpack.c.bf16 %v16721_v58, %v16720_v63 }
 0x47c   : >> { %v23480_v29 = vadd.f32 %v19219_v1, %v8968_v28  ;;  %v8966_v36 = vadd.f32 %v8839_v34, %v23254_v13  ;;  %19521 = vmatprep.subr.bf16.mxu1 %v23460_v38  ;;  %19555 = vmatprep.subr.bf16.mxu0 %v23463_v4  ;;  %v16722_v28 = vld [vmem:[%s19958_s30 + $0x25f] sm:$0xff] }
 0x47d   : >> { %v19186_v20 = vpop.f32.mrf.mxu1  ;;  %v19220_v12 = vpop.f32.mrf.mxu0  ;;  %v10814_v61 = vpack.c.bf16 %v16723_v30, %v16722_v28 }
 0x47e   : >> { %v23485_v37 = vadd.f32 %v9135_v6, %v8966_v36  ;;  %v8969_v2 = vadd.f32 %v19186_v20, %v23257_v16 }
 0x47f   : >> { %v8842_v53 = vpop.f32.mrf.mxu1  ;;  %v9138_v62 = vpop.f32.mrf.mxu0 }
 0x480   : >> { %v23488_v40 = vadd.f32 %v19220_v12, %v8969_v2  ;;  %v8967_v13 = vadd.f32 %v8842_v53, %v23264_v55  ;;  %v16724_v53 = vld [vmem:[%s19958_s30 + $0x26f] sm:$0xff] }
 0x481   : >> { %v19189_v60 = vpop.f32.mrf.mxu1  ;;  %v19223_v54 = vpop.f32.mrf.mxu0  ;;  %19392 = vmatmul.mubr.msk.bf16.gmra.mxu1 %vm281_vm2, %v23335_v42  ;;  %19426 = vmatmul.mubr.msk.bf16.gmra.mxu0 %vm281_vm2, %v10811_v10 }
 0x482   : >> { %v23494_v15 = vadd.f32 %v9138_v62, %v8967_v13  ;;  %v8972_v16 = vadd.f32 %v19189_v60, %v23275_v46  ;;  %19395 = vmatprep.mubr.msk.bf16.mxu1 %vm281_vm2, %v23340_v56  ;;  %19429 = vmatprep.mubr.msk.bf16.mxu0 %vm281_vm2, %v10812_v57  ;;  %v16725_v62 = vld [vmem:[%s19958_s30 + $0x277] sm:$0xff]  ;;  %v16726_v60 = vld [vmem:[%s19958_s30 + $0x27f] sm:$0xff] }
 0x483   : >> { %v8855_v1 = vpop.f32.mrf.mxu1  ;;  %v9151_v55 = vpop.f32.mrf.mxu0 }
 0x484   : >> { %v23504_v43 = vadd.f32 %v19223_v54, %v8972_v16  ;;  %v8970_v42 = vadd.f32 %v8855_v1, %v23278_v45  ;;  %v16727_v54 = vld [vmem:[%s19958_s30 + $0x287] sm:$0xff]  ;;  %v10815_v1 = vpack.c.bf16 %v16725_v62, %v16724_v53 }
 0x485   : >> { %v19190_v34 = vpop.f32.mrf.mxu1  ;;  %v19224_v6 = vpop.f32.mrf.mxu0 }
 0x486   : >> { %v23507_v46 = vadd.f32 %v9151_v55, %v8970_v42  ;;  %v8973_v56 = vadd.f32 %v19190_v34, %v23283_v27  ;;  %v10816_v55 = vpack.c.bf16 %v16727_v54, %v16726_v60 }
 0x487   : >> { %v8858_v36 = vpop.f32.mrf.mxu1  ;;  %v9154_v20 = vpop.f32.mrf.mxu0 }
 0x488   : >> { %v23510_v12 = vadd.f32 %v19224_v6, %v8973_v56  ;;  %v8971_v10 = vadd.f32 %v8858_v36, %v23290_v3  ;;  %v16728_v56 = vld [vmem:[%s19958_s30 + $0x28f] sm:$0xff] }
 0x489   : >> { %v19193_v2 = vpop.f32.mrf.mxu1  ;;  %v19227_v45 = vpop.f32.mrf.mxu0  ;;  %19396 = vmatmul.mubr.msk.bf16.gmra.mxu1 %vm281_vm2, %v23365_v17  ;;  %19430 = vmatmul.mubr.msk.bf16.gmra.mxu0 %vm281_vm2, %v10813_v44 }
 0x48a   : >> { %v23516_v57 = vadd.f32 %v9154_v20, %v8971_v10  ;;  %v8976_v27 = vadd.f32 %v19193_v2, %v23302_v7  ;;  %19399 = vmatprep.mubr.msk.bf16.mxu1 %vm281_vm2, %v23370_v59  ;;  %19433 = vmatprep.mubr.msk.bf16.mxu0 %vm281_vm2, %v10814_v61  ;;  %v16729_v61 = vld [vmem:[%s19958_s30 + $0x297] sm:$0xff]  ;;  %v16681_v10 = vld [vmem:[%s19958_s30 + $0x2a6] sm:$0xff] }
 0x48b   : >> { %v8871_v13 = vpop.f32.mrf.mxu1  ;;  %v9167_v3 = vpop.f32.mrf.mxu0  ;;  %v16730_v2 = vld [vmem:[%s19958_s30 + $0x29f] sm:$0xff]  ;;  %v10817_v62 = vpack.c.bf16 %v16729_v61, %v16728_v56 }
 0x48c   : >> { %v23526_v16 = vadd.f32 %v19227_v45, %v8976_v27  ;;  %v8974_v17 = vadd.f32 %v8871_v13, %v23307_v19  ;;  %v16731_v45 = vld [vmem:[%s19958_s30 + $0x2a7] sm:$0xff]  ;;  %v16734_v56 = vld [vmem:[%s19958_s30 + $0x2bf] sm:$0xff] }
 0x48d   : >> { %v19194_v63 = vpop.f32.mrf.mxu1  ;;  %v19228_v58 = vpop.f32.mrf.mxu0  ;;  %v10818_v60 = vpack.c.bf16 %v16731_v45, %v16730_v2 }
 0x48e   : >> { %v23529_v7 = vadd.f32 %v9167_v3, %v8974_v17  ;;  %v8977_v59 = vadd.f32 %v19194_v63, %v23312_v11 }
 0x48f   : >> { %v8874_v28 = vpop.f32.mrf.mxu1  ;;  %v9170_v30 = vpop.f32.mrf.mxu0 }
 0x490   : >> { %v23532_v42 = vadd.f32 %v19228_v58, %v8977_v59  ;;  %v8975_v34 = vadd.f32 %v8874_v28, %v23320_v49  ;;  %v16680_v49 = vld [vmem:[%s19958_s30 + $0x29e] sm:$0xff]  ;;  %v16683_v59 = vld [vmem:[%s19958_s30 + $0x2b6] sm:$0xff] }
 0x491   : >> { %v19197_v19 = vpop.f32.mrf.mxu1  ;;  %v19231_v6 = vpop.f32.mrf.mxu0  ;;  %19400 = vmatmul.mubr.msk.bf16.gmra.mxu1 %vm281_vm2, %v23395_v8  ;;  %19434 = vmatmul.mubr.msk.bf16.gmra.mxu0 %vm281_vm2, %v10815_v1  ;;  %v10522_v3 = vpack.c.bf16 %v16681_v10, %v16680_v49 }
 0x492   : >> { %v23538_v44 = vadd.f32 %v9170_v30, %v8975_v34  ;;  %v8980_v11 = vadd.f32 %v19197_v19, %v23332_v14  ;;  %19403 = vmatprep.mubr.msk.bf16.mxu1 %vm281_vm2, %v23400_v52  ;;  %19437 = vmatprep.mubr.msk.bf16.mxu0 %vm281_vm2, %v10816_v55  ;;  %v16733_v30 = vld [vmem:[%s19958_s30 + $0x2b7] sm:$0xff] }
 0x493   : >> { %v8887_v36 = vpop.f32.mrf.mxu1  ;;  %v9183_v20 = vpop.f32.mrf.mxu0  ;;  %v16684_v34 = vld [vmem:[%s19958_s30 + $0x2be] sm:$0xff] }
 0x494   : >> { %v23550_v8 = vadd.f32 %v19231_v6, %v8980_v11  ;;  %v8978_v27 = vadd.f32 %v8887_v36, %v23337_v51  ;;  %v16685_v11 = vld [vmem:[%s19958_s30 + $0x2c6] sm:$0xff] }
 0x495   : >> { %v19198_v53 = vpop.f32.mrf.mxu1  ;;  %v19232_v14 = vpop.f32.mrf.mxu0 }
 0x496   : >> { %v23553_v52 = vadd.f32 %v9183_v20, %v8978_v27  ;;  %v8981_v13 = vadd.f32 %v19198_v53, %v23342_v22  ;;  %v16682_v22 = vld [vmem:[%s19958_s30 + $0x2ae] sm:$0xff]  ;;  %v10524_v27 = vpack.c.bf16 %v16685_v11, %v16684_v34 }
 0x497   : >> { %v8890_v54 = vpop.f32.mrf.mxu1  ;;  %v9186_v17 = vpop.f32.mrf.mxu0 }
 0x498   : >> { %v23556_v63 = vadd.f32 %v19232_v14, %v8981_v13  ;;  %v8979_v51 = vadd.f32 %v8890_v54, %v23350_v21  ;;  %v16732_v21 = vld [vmem:[%s19958_s30 + $0x2af] sm:$0xff] }
 0x499   : >> { %v19201_v58 = vpop.f32.mrf.mxu1  ;;  %v19235_v1 = vpop.f32.mrf.mxu0  ;;  %19404 = vmatmul.mubr.msk.bf16.gmra.mxu1 %vm281_vm2, %v23423_v25  ;;  %19438 = vmatmul.mubr.msk.bf16.gmra.mxu0 %vm281_vm2, %v10817_v62  ;;  %v16735_v25 = vld [vmem:[%s19958_s30 + $0x2c7] sm:$0xff]  ;;  %v10819_v10 = vpack.c.bf16 %v16733_v30, %v16732_v21  ;;  %v16687_v54 = vld [vmem:[%s19958_s30 + $0x2d6] sm:$0xff]  ;;  %v16738_v21 = vld [vmem:[%s19958_s30 + $0x2df] sm:$0xff] }
 0x49a   : >> { %v23564_v55 = vadd.f32 %v9186_v17, %v8979_v51  ;;  %v8984_v28 = vadd.f32 %v19201_v58, %v23362_v9  ;;  %19407 = vmatprep.mubr.msk.bf16.mxu1 %vm281_vm2, %v10522_v3  ;;  %19441 = vmatprep.mubr.msk.bf16.mxu0 %vm281_vm2, %v10818_v60  ;;  %v10523_v9 = vpack.c.bf16 %v16683_v59, %v16682_v22  ;;  %v16737_v58 = vld [vmem:[%s19958_s30 + $0x2d7] sm:$0xff]  ;;  %v16739_v30 = vld [vmem:[%s19958_s30 + $0x2e7] sm:$0xff] }
 0x49b   : >> { %v8903_v19 = vpop.f32.mrf.mxu1  ;;  %v9199_v6 = vpop.f32.mrf.mxu0  ;;  %v10820_v53 = vpack.c.bf16 %v16735_v25, %v16734_v56 }
 0x49c   : >> { %v23575_v61 = vadd.f32 %v19235_v1, %v8984_v28  ;;  %v8982_v49 = vadd.f32 %v8903_v19, %v23367_v39  ;;  %v16688_v1 = vld [vmem:[%s19958_s30 + $0x2de] sm:$0xff]  ;;  %v16689_v28 = vld [vmem:[%s19958_s30 + $0x2e6] sm:$0xff] }
 0x49d   : >> { %v19202_v36 = vpop.f32.mrf.mxu1  ;;  %v19236_v20 = vpop.f32.mrf.mxu0 }
 0x49e   : >> { %v23578_v2 = vadd.f32 %v9199_v6, %v8982_v49  ;;  %v8985_v45 = vadd.f32 %v19202_v36, %v23372_v31  ;;  %v16686_v31 = vld [vmem:[%s19958_s30 + $0x2ce] sm:$0xff]  ;;  %v10526_v36 = vpack.c.bf16 %v16689_v28, %v16688_v1  ;;  %v16810_v1 = vld [vmem:[%s19958_s30 + $0x201] sm:$0xff] }
 0x49f   : >> { %v8906_v14 = vpop.f32.mrf.mxu1  ;;  %v9202_v62 = vpop.f32.mrf.mxu0 }
 0x4a0   : >> { %v23581_v13 = vadd.f32 %v19236_v20, %v8985_v45  ;;  %v8983_v39 = vadd.f32 %v8906_v14, %v23380_v24  ;;  %v16736_v24 = vld [vmem:[%s19958_s30 + $0x2cf] sm:$0xff]  ;;  %v10822_v20 = vpack.c.bf16 %v16739_v30, %v16738_v21 }
 0x4a1   : >> { %v19205_v3 = vpop.f32.mrf.mxu1  ;;  %v19239_v60 = vpop.f32.mrf.mxu0  ;;  %19408 = vmatmul.mubr.msk.bf16.gmra.mxu1 %vm281_vm2, %v10523_v9  ;;  %19442 = vmatmul.mubr.msk.bf16.gmra.mxu0 %vm281_vm2, %v10819_v10  ;;  %v10821_v56 = vpack.c.bf16 %v16737_v58, %v16736_v24  ;;  %v16761_v58 = vld [vmem:[%s19958_s30 + $0x208] sm:$0xff] }
 0x4a2   : >> { %v23588_v17 = vadd.f32 %v9202_v62, %v8983_v39  ;;  %v8988_v51 = vadd.f32 %v19205_v3, %v23392_v18  ;;  %19411 = vmatprep.mubr.msk.bf16.mxu1 %vm281_vm2, %v10524_v27  ;;  %19445 = vmatprep.mubr.msk.bf16.mxu0 %vm281_vm2, %v10820_v53  ;;  %v10525_v18 = vpack.c.bf16 %v16687_v54, %v16686_v31  ;;  %v16691_v62 = vld [vmem:[%s19958_s30 + $0x2f6] sm:$0xff]  ;;  %v16760_v54 = vld [vmem:[%s19958_s30 + $0x200] sm:$0xff] }
 0x4a3   : >> { %v8919_v22 = vpop.f32.mrf.mxu1  ;;  %v9215_v59 = vpop.f32.mrf.mxu0  ;;  %v16741_v31 = vld [vmem:[%s19958_s30 + $0x2f7] sm:$0xff] }
 0x4a4   : >> { %v23599_v34 = vadd.f32 %v19239_v60, %v8988_v51  ;;  %v8986_v19 = vadd.f32 %v8919_v22, %v23397_v47  ;;  %v25315_v47 = vld [vmem:[#allocation2_spill] sm:$0xff]  ;;  %v16740_v60 = vld [vmem:[%s19958_s30 + $0x2ef] sm:$0xff] }
 0x4a5   : >> { %v19206_v6 = vpop.f32.mrf.mxu1  ;;  %v19240_v11 = vpop.f32.mrf.mxu0  ;;  %v16811_v22 = vld [vmem:[%s19958_s30 + $0x209] sm:$0xff] }
 0x4a6   : >> { %v23602_v25 = vadd.f32 %v9215_v59, %v8986_v19  ;;  %v8989_v49 = vadd.f32 %v19206_v6, %v23402_v41  ;;  %v16690_v41 = vld [vmem:[%s19958_s30 + $0x2ee] sm:$0xff]  ;;  %v10823_v19 = vpack.c.bf16 %v16741_v31, %v16740_v60 }
 0x4a7   : >> { %v8922_v9 = vpop.f32.mrf.mxu1  ;;  %v9218_v10 = vpop.f32.mrf.mxu0 }
 0x4a8   : >> { %v23605_v45 = vadd.f32 %v19240_v11, %v8989_v49  ;;  %v8987_v27 = vadd.f32 %v8922_v9, %v25315_v47 }
 0x4a9   : >> { %v19209_v53 = vpop.f32.mrf.mxu1  ;;  %v19243_v14 = vpop.f32.mrf.mxu0  ;;  %19412 = vmatmul.mubr.msk.bf16.gmra.mxu1 %vm281_vm2, %v10525_v18  ;;  %19446 = vmatmul.mubr.msk.bf16.gmra.mxu0 %vm281_vm2, %v10821_v56  ;;  %v11104_v18 = vpack.c.bf16 %v16761_v58, %v16760_v54  ;;  %v11400_v56 = vpack.c.bf16 %v16811_v22, %v16810_v1  ;;  %v16765_v54 = vld [vmem:[%s19958_s30 + $0x228] sm:$0xff] }
 0x4aa   : >> { %v23612_v39 = vadd.f32 %v9218_v10, %v8987_v27  ;;  %v8992_v3 = vadd.f32 %v19209_v53, %v23420_v33  ;;  %19415 = vmatprep.mubr.msk.bf16.mxu1 %vm281_vm2, %v10526_v36  ;;  %19449 = vmatprep.mubr.msk.bf16.mxu0 %vm281_vm2, %v10822_v20  ;;  %v10527_v33 = vpack.c.bf16 %v16691_v62, %v16690_v41  ;;  %v16763_v53 = vld [vmem:[%s19958_s30 + $0x218] sm:$0xff] }
 0x4ab   : >> { %v8935_v51 = vpop.f32.mrf.mxu1  ;;  %v9231_v24 = vpop.f32.mrf.mxu0 }
 0x4ac   : >> { %v23623_v59 = vadd.f32 %v19243_v14, %v8992_v3  ;;  %v8990_v28 = vadd.f32 %v8935_v51, %v23425_v35  ;;  %v16813_v14 = vld [vmem:[%s19958_s30 + $0x219] sm:$0xff]  ;;  %v16814_v51 = vld [vmem:[%s19958_s30 + $0x221] sm:$0xff] }
 0x4ad   : >> { %v19210_v21 = vpop.f32.mrf.mxu1  ;;  %v19244_v30 = vpop.f32.mrf.mxu0  ;;  %v16764_v3 = vld [vmem:[%s19958_s30 + $0x220] sm:$0xff] }
 0x4ae   : >> { %v23626_v6 = vadd.f32 %v9231_v24, %v8990_v28  ;;  %v8993_v11 = vadd.f32 %v19210_v21, %v23428_v32  ;;  %v16762_v32 = vld [vmem:[%s19958_s30 + $0x210] sm:$0xff] }
 0x4af   : >> { %v8938_v49 = vpop.f32.mrf.mxu1  ;;  %v9234_v36 = vpop.f32.mrf.mxu0  ;;  %v16815_v24 = vld [vmem:[%s19958_s30 + $0x229] sm:$0xff]  ;;  %v16992_v28 = vld [vmem:[%s25309_s1 + $0x52] sm:$0x3]  ;;  %v17042_v21 = vld [vmem:[%s25309_s1 + $0x54] sm:$0x3] }
 0x4b0   : >> { %v23629_v20 = vadd.f32 %v19244_v30, %v8993_v11  ;;  %v8991_v35 = vadd.f32 %v8938_v49, %v23434_v26  ;;  %v16812_v26 = vld [vmem:[%s19958_s30 + $0x211] sm:$0xff]  ;;  %v11106_v11 = vpack.c.bf16 %v16765_v54, %v16764_v3  ;;  %v16769_v3 = vld [vmem:[%s19958_s30 + $0x248] sm:$0xff] }
 0x4b1   : >> { %v19213_v9 = vpop.f32.mrf.mxu1  ;;  %v19247_v10 = vpop.f32.mrf.mxu0  ;;  %19416 = vmatmul.mubr.msk.bf16.gmra.mxu1 %vm281_vm2, %v10527_v33  ;;  %19450 = vmatmul.mubr.msk.bf16.gmra.mxu0 %vm281_vm2, %v10823_v19  ;;  %v11401_v22 = vpack.c.bf16 %v16813_v14, %v16812_v26  ;;  %v16817_v26 = vld [vmem:[%s19958_s30 + $0x239] sm:$0xff]  ;;  %v16819_v54 = vld [vmem:[%s19958_s30 + $0x249] sm:$0xff] }
 0x4b2   : >> { %v23635_v47 = vadd.f32 %v9234_v36, %v8991_v35  ;;  %v8996_v27 = vadd.f32 %v19213_v9, %v23442_v48  ;;  %19455 = vmatprep.mubr.msk.bf16.mxu1 %vm281_vm2, %v11104_v18  ;;  %19489 = vmatprep.mubr.msk.bf16.mxu0 %vm281_vm2, %v11400_v56  ;;  %v11105_v48 = vpack.c.bf16 %v16763_v53, %v16762_v32  ;;  %v16767_v32 = vld [vmem:[%s19958_s30 + $0x238] sm:$0xff]  ;;  %v16768_v14 = vld [vmem:[%s19958_s30 + $0x240] sm:$0xff] }
 0x4b3   : >> { %v8951_v41 = vpop.f32.mrf.mxu1  ;;  %v9247_v62 = vpop.f32.mrf.mxu0  ;;  %v11402_v18 = vpack.c.bf16 %v16815_v24, %v16814_v51  ;;  %v23663_v36 = vand.u32 %v16992_v28, %v19951_v5  ;;  %v23666_v35 = vand.u32 %v17042_v21, %v19951_v5  ;;  %v16816_v53 = vld [vmem:[%s19958_s30 + $0x231] sm:$0xff] }
 0x4b4   : >> { %v23644_v60 = vadd.f32 %v19247_v10, %v8996_v27  ;;  %v8994_v31 = vadd.f32 %v8951_v41, %v23453_v23 }
 0x4b5   : >> { %v19214_v58 = vpop.f32.mrf.mxu1  ;;  %v19248_v1 = vpop.f32.mrf.mxu0 }
 0x4b6   : >> { %v23656_v30 = vadd.f32 %v9247_v62, %v8994_v31  ;;  %v8997_v23 = vadd.f32 %v19214_v58, %v23456_v0  ;;  %v16766_v0 = vld [vmem:[%s19958_s30 + $0x230] sm:$0xff]  ;;  %v16818_v31 = vld [vmem:[%s19958_s30 + $0x241] sm:$0xff]  ;;  %v11403_v58 = vpack.c.bf16 %v16817_v26, %v16816_v53 }
 0x4b7   : >> { %v8954_v33 = vpop.f32.mrf.mxu1  ;;  %v9250_v19 = vpop.f32.mrf.mxu0  ;;  %v11107_v24 = vpack.c.bf16 %v16767_v32, %v16766_v0  ;;  %v11404_v28 = vpack.c.bf16 %v16819_v54, %v16818_v31  ;;  %v16772_v0 = vld [vmem:[%s19958_s30 + $0x260] sm:$0xff]  ;;  %v16773_v53 = vld [vmem:[%s19958_s30 + $0x268] sm:$0xff] }
 0x4b8   : >> { %v23659_v56 = vadd.f32 %v19248_v1, %v8997_v23  ;;  %v8995_v49 = vadd.f32 %v8954_v33, %v23468_v50  ;;  %v16822_v26 = vld [vmem:[%s19958_s30 + $0x261] sm:$0xff] }
 0x4b9   : >> { %v19253_v9 = vpop.f32.mrf.mxu1  ;;  %v19287_v10 = vpop.f32.mrf.mxu0  ;;  %19456 = vmatmul.mubr.msk.bf16.vlgmr.msra.gmra.mxu1 %vm281_vm2, %v11105_v48  ;;  %19490 = vmatmul.mubr.msk.bf16.vlgmr.msra.gmra.mxu0 %vm281_vm2, %v11401_v22  ;;  %v11108_v22 = vpack.c.bf16 %v16769_v3, %v16768_v14  ;;  %v16823_v14 = vld [vmem:[%s19958_s30 + $0x269] sm:$0xff] }
 0x4ba   : >> { %v23672_v27 = vadd.f32 %v9250_v19, %v8995_v49  ;;  %v9560_v50 = vadd.f32 %v19253_v9, %v23480_v29  ;;  %19522 = vmatpush3.bf16.msra.mxu1 %v23460_v38  ;;  %19556 = vmatpush3.bf16.msra.mxu0 %v23463_v4 }
 0x4bb   : >> { %v9431_v41 = vpop.f32.mrf.mxu1  ;;  %v9727_v62 = vpop.f32.mrf.mxu0  ;;  %19459 = vmatprep.mubr.msk.bf16.mxu1 %vm281_vm2, %v11106_v11  ;;  %19493 = vmatprep.mubr.msk.bf16.mxu0 %vm281_vm2, %v11402_v18  ;;  %v16771_v18 = vld [vmem:[%s19958_s30 + $0x258] sm:$0xff] }
 0x4bc   : >> { %v23685_v51 = vadd.f32 %v19287_v10, %v9560_v50  ;;  %v9558_v29 = vadd.f32 %v9431_v41, %v23485_v37  ;;  %19589 = vmatprep.subr.bf16.mxu1 %v23663_v36  ;;  %19623 = vmatprep.subr.bf16.mxu0 %v23666_v35  ;;  %v16821_v10 = vld [vmem:[%s19958_s30 + $0x259] sm:$0xff] }
 0x4bd   : >> { %v19254_v38 = vpop.f32.mrf.mxu1  ;;  %v19288_v4 = vpop.f32.mrf.mxu0 }
 0x4be   : >> { %v23690_v1 = vadd.f32 %v9727_v62, %v9558_v29  ;;  %v9561_v48 = vadd.f32 %v19254_v38, %v23488_v40  ;;  %v16770_v40 = vld [vmem:[%s19958_s30 + $0x250] sm:$0xff] }
 0x4bf   : >> { %v9434_v21 = vpop.f32.mrf.mxu1  ;;  %v9730_v37 = vpop.f32.mrf.mxu0 }
 0x4c0   : >> { %v23693_v23 = vadd.f32 %v19288_v4, %v9561_v48  ;;  %v9559_v33 = vadd.f32 %v9434_v21, %v23494_v15  ;;  %v16820_v15 = vld [vmem:[%s19958_s30 + $0x251] sm:$0xff]  ;;  %v11110_v4 = vpack.c.bf16 %v16773_v53, %v16772_v0  ;;  %v16827_v0 = vld [vmem:[%s19958_s30 + $0x289] sm:$0xff] }
 0x4c1   : >> { %v19257_v19 = vpop.f32.mrf.mxu1  ;;  %v19291_v11 = vpop.f32.mrf.mxu0  ;;  %19460 = vmatmul.mubr.msk.bf16.gmra.mxu1 %vm281_vm2, %v11107_v24  ;;  %19494 = vmatmul.mubr.msk.bf16.gmra.mxu0 %vm281_vm2, %v11403_v58  ;;  %v11405_v54 = vpack.c.bf16 %v16821_v10, %v16820_v15  ;;  %v11406_v24 = vpack.c.bf16 %v16823_v14, %v16822_v26  ;;  %v16777_v15 = vld [vmem:[%s19958_s30 + $0x288] sm:$0xff] }
 0x4c2   : >> { %v23700_v49 = vadd.f32 %v9730_v37, %v9559_v33  ;;  %v9564_v9 = vadd.f32 %v19257_v19, %v23504_v43  ;;  %19463 = vmatprep.mubr.msk.bf16.mxu1 %vm281_vm2, %v11108_v22  ;;  %19497 = vmatprep.mubr.msk.bf16.mxu0 %vm281_vm2, %v11404_v28  ;;  %v11109_v43 = vpack.c.bf16 %v16771_v18, %v16770_v40  ;;  %v16775_v37 = vld [vmem:[%s19958_s30 + $0x278] sm:$0xff]  ;;  %v16776_v40 = vld [vmem:[%s19958_s30 + $0x280] sm:$0xff] }
 0x4c3   : >> { %v9447_v32 = vpop.f32.mrf.mxu1  ;;  %v9743_v50 = vpop.f32.mrf.mxu0  ;;  %v16826_v10 = vld [vmem:[%s19958_s30 + $0x281] sm:$0xff] }
 0x4c4   : >> { %v23711_v41 = vadd.f32 %v19291_v11, %v9564_v9  ;;  %v9562_v62 = vadd.f32 %v9447_v32, %v23507_v46  ;;  %v16825_v11 = vld [vmem:[%s19958_s30 + $0x279] sm:$0xff] }
 0x4c5   : >> { %v19258_v3 = vpop.f32.mrf.mxu1  ;;  %v19292_v31 = vpop.f32.mrf.mxu0 }
 0x4c6   : >> { %v23714_v29 = vadd.f32 %v9743_v50, %v9562_v62  ;;  %v9565_v38 = vadd.f32 %v19258_v3, %v23510_v12  ;;  %v16774_v12 = vld [vmem:[%s19958_s30 + $0x270] sm:$0xff] }
 0x4c7   : >> { %v9450_v58 = vpop.f32.mrf.mxu1  ;;  %v9746_v48 = vpop.f32.mrf.mxu0 }
 0x4c8   : >> { %v23717_v22 = vadd.f32 %v19292_v31, %v9565_v38  ;;  %v9563_v46 = vadd.f32 %v9450_v58, %v23516_v57  ;;  %v16824_v57 = vld [vmem:[%s19958_s30 + $0x271] sm:$0xff]  ;;  %v11112_v31 = vpack.c.bf16 %v16777_v15, %v16776_v40  ;;  %v16831_v40 = vld [vmem:[%s19958_s30 + $0x2a9] sm:$0xff] }
 0x4c9   : >> { %v19261_v28 = vpop.f32.mrf.mxu1  ;;  %v19295_v21 = vpop.f32.mrf.mxu0  ;;  %19464 = vmatmul.mubr.msk.bf16.gmra.mxu1 %vm281_vm2, %v11109_v43  ;;  %19498 = vmatmul.mubr.msk.bf16.gmra.mxu0 %vm281_vm2, %v11405_v54  ;;  %v11407_v14 = vpack.c.bf16 %v16825_v11, %v16824_v57  ;;  %v11408_v43 = vpack.c.bf16 %v16827_v0, %v16826_v10  ;;  %v16781_v57 = vld [vmem:[%s19958_s30 + $0x2a8] sm:$0xff] }
 0x4ca   : >> { %v23724_v33 = vadd.f32 %v9746_v48, %v9563_v46  ;;  %v9568_v19 = vadd.f32 %v19261_v28, %v23526_v16  ;;  %19467 = vmatprep.mubr.msk.bf16.mxu1 %vm281_vm2, %v11110_v4  ;;  %19501 = vmatprep.mubr.msk.bf16.mxu0 %vm281_vm2, %v11406_v24  ;;  %v11111_v16 = vpack.c.bf16 %v16775_v37, %v16774_v12  ;;  %v16779_v48 = vld [vmem:[%s19958_s30 + $0x298] sm:$0xff]  ;;  %v16780_v12 = vld [vmem:[%s19958_s30 + $0x2a0] sm:$0xff] }
 0x4cb   : >> { %v9463_v18 = vpop.f32.mrf.mxu1  ;;  %v9759_v9 = vpop.f32.mrf.mxu0  ;;  %v16830_v11 = vld [vmem:[%s19958_s30 + $0x2a1] sm:$0xff] }
 0x4cc   : >> { %v23735_v32 = vadd.f32 %v19295_v21, %v9568_v19  ;;  %v9566_v50 = vadd.f32 %v9463_v18, %v23529_v7  ;;  %v16829_v21 = vld [vmem:[%s19958_s30 + $0x299] sm:$0xff] }
 0x4cd   : >> { %v19262_v53 = vpop.f32.mrf.mxu1  ;;  %v19296_v26 = vpop.f32.mrf.mxu0 }
 0x4ce   : >> { %v23738_v62 = vadd.f32 %v9759_v9, %v9566_v50  ;;  %v9569_v3 = vadd.f32 %v19262_v53, %v23532_v42  ;;  %v16778_v42 = vld [vmem:[%s19958_s30 + $0x290] sm:$0xff] }
 0x4cf   : >> { %v9466_v54 = vpop.f32.mrf.mxu1  ;;  %v9762_v38 = vpop.f32.mrf.mxu0 }
 0x4d0   : >> { %v23741_v4 = vadd.f32 %v19296_v26, %v9569_v3  ;;  %v9567_v7 = vadd.f32 %v9466_v54, %v23538_v44  ;;  %v16828_v44 = vld [vmem:[%s19958_s30 + $0x291] sm:$0xff]  ;;  %v11114_v26 = vpack.c.bf16 %v16781_v57, %v16780_v12  ;;  %v16835_v12 = vld [vmem:[%s19958_s30 + $0x2c9] sm:$0xff] }
 0x4d1   : >> { %v19265_v24 = vpop.f32.mrf.mxu1  ;;  %v19299_v58 = vpop.f32.mrf.mxu0  ;;  %19468 = vmatmul.mubr.msk.bf16.gmra.mxu1 %vm281_vm2, %v11111_v16  ;;  %19502 = vmatmul.mubr.msk.bf16.gmra.mxu0 %vm281_vm2, %v11407_v14  ;;  %v11409_v0 = vpack.c.bf16 %v16829_v21, %v16828_v44  ;;  %v11410_v16 = vpack.c.bf16 %v16831_v40, %v16830_v11  ;;  %v16785_v44 = vld [vmem:[%s19958_s30 + $0x2c8] sm:$0xff] }
 0x4d2   : >> { %v23748_v46 = vadd.f32 %v9762_v38, %v9567_v7  ;;  %v9572_v28 = vadd.f32 %v19265_v24, %v23550_v8  ;;  %19471 = vmatprep.mubr.msk.bf16.mxu1 %vm281_vm2, %v11112_v31  ;;  %19505 = vmatprep.mubr.msk.bf16.mxu0 %vm281_vm2, %v11408_v43  ;;  %v11113_v8 = vpack.c.bf16 %v16779_v48, %v16778_v42  ;;  %v16783_v38 = vld [vmem:[%s19958_s30 + $0x2b8] sm:$0xff]  ;;  %v16784_v42 = vld [vmem:[%s19958_s30 + $0x2c0] sm:$0xff] }
 0x4d3   : >> { %v9479_v37 = vpop.f32.mrf.mxu1  ;;  %v9775_v19 = vpop.f32.mrf.mxu0  ;;  %v16834_v21 = vld [vmem:[%s19958_s30 + $0x2c1] sm:$0xff] }
 0x4d4   : >> { %v23759_v18 = vadd.f32 %v19299_v58, %v9572_v28  ;;  %v9570_v9 = vadd.f32 %v9479_v37, %v23553_v52  ;;  %v16833_v58 = vld [vmem:[%s19958_s30 + $0x2b9] sm:$0xff] }
 0x4d5   : >> { %v19266_v15 = vpop.f32.mrf.mxu1  ;;  %v19300_v10 = vpop.f32.mrf.mxu0 }
 0x4d6   : >> { %v23762_v50 = vadd.f32 %v9775_v19, %v9570_v9  ;;  %v9573_v53 = vadd.f32 %v19266_v15, %v23556_v63  ;;  %v16782_v63 = vld [vmem:[%s19958_s30 + $0x2b0] sm:$0xff] }
 0x4d7   : >> { %v9482_v14 = vpop.f32.mrf.mxu1  ;;  %v9778_v3 = vpop.f32.mrf.mxu0 }
 0x4d8   : >> { %v23765_v31 = vadd.f32 %v19300_v10, %v9573_v53  ;;  %v9571_v52 = vadd.f32 %v9482_v14, %v23564_v55  ;;  %v16832_v55 = vld [vmem:[%s19958_s30 + $0x2b1] sm:$0xff]  ;;  %v11116_v10 = vpack.c.bf16 %v16785_v44, %v16784_v42  ;;  %v16839_v42 = vld [vmem:[%s19958_s30 + $0x2e9] sm:$0xff] }
 0x4d9   : >> { %v19269_v43 = vpop.f32.mrf.mxu1  ;;  %v19303_v54 = vpop.f32.mrf.mxu0  ;;  %19472 = vmatmul.mubr.msk.bf16.gmra.mxu1 %vm281_vm2, %v11113_v8  ;;  %19506 = vmatmul.mubr.msk.bf16.gmra.mxu0 %vm281_vm2, %v11409_v0  ;;  %v11411_v40 = vpack.c.bf16 %v16833_v58, %v16832_v55  ;;  %v11412_v8 = vpack.c.bf16 %v16835_v12, %v16834_v21  ;;  %v16789_v55 = vld [vmem:[%s19958_s30 + $0x2e8] sm:$0xff] }
 0x4da   : >> { %v23772_v7 = vadd.f32 %v9778_v3, %v9571_v52  ;;  %v9576_v24 = vadd.f32 %v19269_v43, %v23575_v61  ;;  %19475 = vmatprep.mubr.msk.bf16.mxu1 %vm281_vm2, %v11114_v26  ;;  %19509 = vmatprep.mubr.msk.bf16.mxu0 %vm281_vm2, %v11410_v16  ;;  %v11115_v61 = vpack.c.bf16 %v16783_v38, %v16782_v63  ;;  %v16787_v3 = vld [vmem:[%s19958_s30 + $0x2d8] sm:$0xff]  ;;  %v16788_v63 = vld [vmem:[%s19958_s30 + $0x2e0] sm:$0xff] }
 0x4db   : >> { %v9495_v48 = vpop.f32.mrf.mxu1  ;;  %v9791_v28 = vpop.f32.mrf.mxu0  ;;  %v16838_v58 = vld [vmem:[%s19958_s30 + $0x2e1] sm:$0xff] }
 0x4dc   : >> { %v23783_v37 = vadd.f32 %v19303_v54, %v9576_v24  ;;  %v9574_v19 = vadd.f32 %v9495_v48, %v23578_v2  ;;  %v16837_v54 = vld [vmem:[%s19958_s30 + $0x2d9] sm:$0xff] }
 0x4dd   : >> { %v19270_v57 = vpop.f32.mrf.mxu1  ;;  %v19304_v11 = vpop.f32.mrf.mxu0 }
 0x4de   : >> { %v23786_v9 = vadd.f32 %v9791_v28, %v9574_v19  ;;  %v9577_v15 = vadd.f32 %v19270_v57, %v23581_v13  ;;  %v16786_v13 = vld [vmem:[%s19958_s30 + $0x2d0] sm:$0xff] }
 0x4df   : >> { %v9498_v0 = vpop.f32.mrf.mxu1  ;;  %v9794_v53 = vpop.f32.mrf.mxu0 }
 0x4e0   : >> { %v23789_v26 = vadd.f32 %v19304_v11, %v9577_v15  ;;  %v9575_v2 = vadd.f32 %v9498_v0, %v23588_v17  ;;  %v16836_v17 = vld [vmem:[%s19958_s30 + $0x2d1] sm:$0xff]  ;;  %v11118_v11 = vpack.c.bf16 %v16789_v55, %v16788_v63 }
 0x4e1   : >> { %v19273_v16 = vpop.f32.mrf.mxu1  ;;  %v19307_v14 = vpop.f32.mrf.mxu0  ;;  %19476 = vmatmul.mubr.msk.bf16.gmra.mxu1 %vm281_vm2, %v11115_v61  ;;  %19510 = vmatmul.mubr.msk.bf16.gmra.mxu0 %vm281_vm2, %v11411_v40  ;;  %v11413_v12 = vpack.c.bf16 %v16837_v54, %v16836_v17  ;;  %v11414_v61 = vpack.c.bf16 %v16839_v42, %v16838_v58  ;;  %v16861_v17 = vld [vmem:[%s19958_s30 + $0x20a] sm:$0xff] }
 0x4e2   : >> { %v23796_v52 = vadd.f32 %v9794_v53, %v9575_v2  ;;  %v9580_v43 = vadd.f32 %v19273_v16, %v23599_v34  ;;  %19479 = vmatprep.mubr.msk.bf16.mxu1 %vm281_vm2, %v11116_v10  ;;  %19513 = vmatprep.mubr.msk.bf16.mxu0 %vm281_vm2, %v11412_v8  ;;  %v11117_v34 = vpack.c.bf16 %v16787_v3, %v16786_v13  ;;  %v16791_v53 = vld [vmem:[%s19958_s30 + $0x2f8] sm:$0xff]  ;;  %v16860_v13 = vld [vmem:[%s19958_s30 + $0x202] sm:$0xff]  ;;  %v16911_v63 = vld [vmem:[%s19958_s30 + $0x20b] sm:$0xff] }
 0x4e3   : >> { %v9511_v38 = vpop.f32.mrf.mxu1  ;;  %v9807_v24 = vpop.f32.mrf.mxu0  ;;  %v16910_v54 = vld [vmem:[%s19958_s30 + $0x203] sm:$0xff] }
 0x4e4   : >> { %v23807_v48 = vadd.f32 %v19307_v14, %v9580_v43  ;;  %v9578_v28 = vadd.f32 %v9511_v38, %v23602_v25  ;;  %v16841_v14 = vld [vmem:[%s19958_s30 + $0x2f9] sm:$0xff] }
 0x4e5   : >> { %v19274_v44 = vpop.f32.mrf.mxu1  ;;  %v19308_v21 = vpop.f32.mrf.mxu0 }
 0x4e6   : >> { %v23810_v19 = vadd.f32 %v9807_v24, %v9578_v28  ;;  %v9581_v57 = vadd.f32 %v19274_v44, %v23605_v45  ;;  %v16790_v45 = vld [vmem:[%s19958_s30 + $0x2f0] sm:$0xff] }
 0x4e7   : >> { %v9514_v40 = vpop.f32.mrf.mxu1  ;;  %v9810_v15 = vpop.f32.mrf.mxu0 }
 0x4e8   : >> { %v23813_v10 = vadd.f32 %v19308_v21, %v9581_v57  ;;  %v9579_v25 = vadd.f32 %v9514_v40, %v23612_v39  ;;  %v16840_v39 = vld [vmem:[%s19958_s30 + $0x2f1] sm:$0xff]  ;;  %v11696_v21 = vpack.c.bf16 %v16861_v17, %v16860_v13 }
 0x4e9   : >> { %v19277_v8 = vpop.f32.mrf.mxu1  ;;  %v19311_v0 = vpop.f32.mrf.mxu0  ;;  %19480 = vmatmul.mubr.msk.bf16.gmra.mxu1 %vm281_vm2, %v11117_v34  ;;  %19514 = vmatmul.mubr.msk.bf16.gmra.mxu0 %vm281_vm2, %v11413_v12  ;;  %v11415_v42 = vpack.c.bf16 %v16841_v14, %v16840_v39  ;;  %v11992_v34 = vpack.c.bf16 %v16911_v63, %v16910_v54  ;;  %v16865_v13 = vld [vmem:[%s19958_s30 + $0x22a] sm:$0xff] }
 0x4ea   : >> { %v23820_v2 = vadd.f32 %v9810_v15, %v9579_v25  ;;  %v9584_v16 = vadd.f32 %v19277_v8, %v23623_v59  ;;  %19483 = vmatprep.mubr.msk.bf16.mxu1 %vm281_vm2, %v11118_v11  ;;  %19517 = vmatprep.mubr.msk.bf16.mxu0 %vm281_vm2, %v11414_v61  ;;  %v11119_v59 = vpack.c.bf16 %v16791_v53, %v16790_v45  ;;  %v16863_v8 = vld [vmem:[%s19958_s30 + $0x21a] sm:$0xff] }
 0x4eb   : >> { %v9527_v3 = vpop.f32.mrf.mxu1  ;;  %v9823_v43 = vpop.f32.mrf.mxu0 }
 0x4ec   : >> { %v23831_v38 = vadd.f32 %v19311_v0, %v9584_v16  ;;  %v9582_v24 = vadd.f32 %v9527_v3, %v23626_v6  ;;  %v16913_v0 = vld [vmem:[%s19958_s30 + $0x21b] sm:$0xff]  ;;  %v16914_v3 = vld [vmem:[%s19958_s30 + $0x223] sm:$0xff] }
 0x4ed   : >> { %v19278_v55 = vpop.f32.mrf.mxu1  ;;  %v19312_v58 = vpop.f32.mrf.mxu0  ;;  %v16864_v16 = vld [vmem:[%s19958_s30 + $0x222] sm:$0xff] }
 0x4ee   : >> { %v23834_v28 = vadd.f32 %v9823_v43, %v9582_v24  ;;  %v9585_v44 = vadd.f32 %v19278_v55, %v23629_v20  ;;  %v16862_v20 = vld [vmem:[%s19958_s30 + $0x212] sm:$0xff] }
 0x4ef   : >> { %v9530_v12 = vpop.f32.mrf.mxu1  ;;  %v9826_v57 = vpop.f32.mrf.mxu0  ;;  %v16915_v43 = vld [vmem:[%s19958_s30 + $0x22b] sm:$0xff]  ;;  %v17092_v24 = vld [vmem:[%s25309_s1 + $0x56] sm:$0x3]  ;;  %v17142_v55 = vld [vmem:[%s25309_s1 + $0x58] sm:$0x3] }
 0x4f0   : >> { %v23837_v11 = vadd.f32 %v19312_v58, %v9585_v44  ;;  %v9583_v6 = vadd.f32 %v9530_v12, %v23635_v47  ;;  %v16912_v47 = vld [vmem:[%s19958_s30 + $0x213] sm:$0xff]  ;;  %v11698_v44 = vpack.c.bf16 %v16865_v13, %v16864_v16  ;;  %v16869_v16 = vld [vmem:[%s19958_s30 + $0x24a] sm:$0xff] }
 0x4f1   : >> { %v19281_v61 = vpop.f32.mrf.mxu1  ;;  %v19315_v40 = vpop.f32.mrf.mxu0  ;;  %19484 = vmatmul.mubr.msk.bf16.gmra.mxu1 %vm281_vm2, %v11119_v59  ;;  %19518 = vmatmul.mubr.msk.bf16.gmra.mxu0 %vm281_vm2, %v11415_v42  ;;  %v11993_v63 = vpack.c.bf16 %v16913_v0, %v16912_v47  ;;  %v16917_v47 = vld [vmem:[%s19958_s30 + $0x23b] sm:$0xff]  ;;  %v16919_v13 = vld [vmem:[%s19958_s30 + $0x24b] sm:$0xff] }
 0x4f2   : >> { %v23843_v15 = vadd.f32 %v9826_v57, %v9583_v6  ;;  %v9588_v25 = vadd.f32 %v19281_v61, %v23644_v60  ;;  %19523 = vmatprep.mubr.msk.bf16.mxu1 %vm281_vm2, %v11696_v21  ;;  %19557 = vmatprep.mubr.msk.bf16.mxu0 %vm281_vm2, %v11992_v34  ;;  %v11697_v60 = vpack.c.bf16 %v16863_v8, %v16862_v20  ;;  %v16867_v20 = vld [vmem:[%s19958_s30 + $0x23a] sm:$0xff]  ;;  %v16868_v0 = vld [vmem:[%s19958_s30 + $0x242] sm:$0xff] }
 0x4f3   : >> { %v9543_v45 = vpop.f32.mrf.mxu1  ;;  %v9839_v53 = vpop.f32.mrf.mxu0  ;;  %v11994_v21 = vpack.c.bf16 %v16915_v43, %v16914_v3  ;;  %v23871_v57 = vand.u32 %v17092_v24, %v19951_v5  ;;  %v23874_v6 = vand.u32 %v17142_v55, %v19951_v5  ;;  %v16916_v8 = vld [vmem:[%s19958_s30 + $0x233] sm:$0xff] }
 0x4f4   : >> { %v23852_v39 = vadd.f32 %v19315_v40, %v9588_v25  ;;  %v9586_v14 = vadd.f32 %v9543_v45, %v23656_v30 }
 0x4f5   : >> { %v19282_v17 = vpop.f32.mrf.mxu1  ;;  %v19316_v54 = vpop.f32.mrf.mxu0 }
 0x4f6   : >> { %v23864_v58 = vadd.f32 %v9839_v53, %v9586_v14  ;;  %v9589_v30 = vadd.f32 %v19282_v17, %v23659_v56  ;;  %v16866_v56 = vld [vmem:[%s19958_s30 + $0x232] sm:$0xff]  ;;  %v16918_v14 = vld [vmem:[%s19958_s30 + $0x243] sm:$0xff]  ;;  %v11995_v17 = vpack.c.bf16 %v16917_v47, %v16916_v8 }
 0x4f7   : >> { %v9546_v59 = vpop.f32.mrf.mxu1  ;;  %v9842_v42 = vpop.f32.mrf.mxu0  ;;  %v11699_v43 = vpack.c.bf16 %v16867_v20, %v16866_v56  ;;  %v11996_v24 = vpack.c.bf16 %v16919_v13, %v16918_v14  ;;  %v16872_v56 = vld [vmem:[%s19958_s30 + $0x262] sm:$0xff]  ;;  %v16873_v8 = vld [vmem:[%s19958_s30 + $0x26a] sm:$0xff] }
 0x4f8   : >> { %v23867_v34 = vadd.f32 %v19316_v54, %v9589_v30  ;;  %v9587_v12 = vadd.f32 %v9546_v59, %v23672_v27  ;;  %v16922_v47 = vld [vmem:[%s19958_s30 + $0x263] sm:$0xff] }
 0x4f9   : >> { %v19321_v61 = vpop.f32.mrf.mxu1  ;;  %v19355_v40 = vpop.f32.mrf.mxu0  ;;  %19524 = vmatmul.mubr.msk.bf16.vlgmr.msra.gmra.mxu1 %vm281_vm2, %v11697_v60  ;;  %19558 = vmatmul.mubr.msk.bf16.vlgmr.msra.gmra.mxu0 %vm281_vm2, %v11993_v63  ;;  %v11700_v63 = vpack.c.bf16 %v16869_v16, %v16868_v0  ;;  %v16923_v0 = vld [vmem:[%s19958_s30 + $0x26b] sm:$0xff] }
 0x4fa   : >> { %v23880_v25 = vadd.f32 %v9842_v42, %v9587_v12  ;;  %v10152_v27 = vadd.f32 %v19321_v61, %v23685_v51  ;;  %19590 = vmatpush3.bf16.msra.mxu1 %v23663_v36  ;;  %19624 = vmatpush3.bf16.msra.mxu0 %v23666_v35 }
 0x4fb   : >> { %v10023_v45 = vpop.f32.mrf.mxu1  ;;  %v10319_v53 = vpop.f32.mrf.mxu0  ;;  %19527 = vmatprep.mubr.msk.bf16.mxu1 %vm281_vm2, %v11698_v44  ;;  %19561 = vmatprep.mubr.msk.bf16.mxu0 %vm281_vm2, %v11994_v21  ;;  %v16871_v21 = vld [vmem:[%s19958_s30 + $0x25a] sm:$0xff] }
 0x4fc   : >> { %v23893_v3 = vadd.f32 %v19355_v40, %v10152_v27  ;;  %v10150_v51 = vadd.f32 %v10023_v45, %v23690_v1  ;;  %19657 = vmatprep.subr.bf16.mxu1 %v23871_v57  ;;  %19691 = vmatprep.subr.bf16.mxu0 %v23874_v6  ;;  %v16921_v40 = vld [vmem:[%s19958_s30 + $0x25b] sm:$0xff] }
 0x4fd   : >> { %v19322_v36 = vpop.f32.mrf.mxu1  ;;  %v19356_v35 = vpop.f32.mrf.mxu0 }
 0x4fe   : >> { %v23898_v54 = vadd.f32 %v10319_v53, %v10150_v51  ;;  %v10153_v60 = vadd.f32 %v19322_v36, %v23693_v23  ;;  %v16870_v23 = vld [vmem:[%s19958_s30 + $0x252] sm:$0xff] }
 0x4ff   : >> { %v10026_v55 = vpop.f32.mrf.mxu1  ;;  %v10322_v1 = vpop.f32.mrf.mxu0 }
 0x500   : >> { %v23901_v30 = vadd.f32 %v19356_v35, %v10153_v60  ;;  %v10151_v59 = vadd.f32 %v10026_v55, %v23700_v49  ;;  %v16920_v49 = vld [vmem:[%s19958_s30 + $0x253] sm:$0xff]  ;;  %v11702_v35 = vpack.c.bf16 %v16873_v8, %v16872_v56  ;;  %v16927_v56 = vld [vmem:[%s19958_s30 + $0x28b] sm:$0xff] }
 0x501   : >> { %v19325_v42 = vpop.f32.mrf.mxu1  ;;  %v19359_v44 = vpop.f32.mrf.mxu0  ;;  %19528 = vmatmul.mubr.msk.bf16.gmra.mxu1 %vm281_vm2, %v11699_v43  ;;  %19562 = vmatmul.mubr.msk.bf16.gmra.mxu0 %vm281_vm2, %v11995_v17  ;;  %v11997_v13 = vpack.c.bf16 %v16921_v40, %v16920_v49  ;;  %v11998_v43 = vpack.c.bf16 %v16923_v0, %v16922_v47  ;;  %v16877_v49 = vld [vmem:[%s19958_s30 + $0x28a] sm:$0xff] }
 0x502   : >> { %v23908_v12 = vadd.f32 %v10322_v1, %v10151_v59  ;;  %v10156_v61 = vadd.f32 %v19325_v42, %v23711_v41  ;;  %19531 = vmatprep.mubr.msk.bf16.mxu1 %vm281_vm2, %v11700_v63  ;;  %19565 = vmatprep.mubr.msk.bf16.mxu0 %vm281_vm2, %v11996_v24  ;;  %v11701_v41 = vpack.c.bf16 %v16871_v21, %v16870_v23  ;;  %v16875_v1 = vld [vmem:[%s19958_s30 + $0x27a] sm:$0xff]  ;;  %v16876_v23 = vld [vmem:[%s19958_s30 + $0x282] sm:$0xff] }
 0x503   : >> { %v10039_v20 = vpop.f32.mrf.mxu1  ;;  %v10335_v27 = vpop.f32.mrf.mxu0  ;;  %v16926_v40 = vld [vmem:[%s19958_s30 + $0x283] sm:$0xff] }
 0x504   : >> { %v23919_v45 = vadd.f32 %v19359_v44, %v10156_v61  ;;  %v10154_v53 = vadd.f32 %v10039_v20, %v23714_v29  ;;  %v16925_v44 = vld [vmem:[%s19958_s30 + $0x27b] sm:$0xff] }
 0x505   : >> { %v19326_v16 = vpop.f32.mrf.mxu1  ;;  %v19360_v14 = vpop.f32.mrf.mxu0 }
 0x506   : >> { %v23922_v51 = vadd.f32 %v10335_v27, %v10154_v53  ;;  %v10157_v36 = vadd.f32 %v19326_v16, %v23717_v22  ;;  %v16874_v22 = vld [vmem:[%s19958_s30 + $0x272] sm:$0xff] }
 0x507   : >> { %v10042_v17 = vpop.f32.mrf.mxu1  ;;  %v10338_v60 = vpop.f32.mrf.mxu0 }
 0x508   : >> { %v23925_v63 = vadd.f32 %v19360_v14, %v10157_v36  ;;  %v10155_v29 = vadd.f32 %v10042_v17, %v23724_v33  ;;  %v16924_v33 = vld [vmem:[%s19958_s30 + $0x273] sm:$0xff]  ;;  %v11704_v14 = vpack.c.bf16 %v16877_v49, %v16876_v23  ;;  %v16931_v23 = vld [vmem:[%s19958_s30 + $0x2ab] sm:$0xff] }
 0x509   : >> { %v19329_v24 = vpop.f32.mrf.mxu1  ;;  %v19363_v55 = vpop.f32.mrf.mxu0  ;;  %19532 = vmatmul.mubr.msk.bf16.gmra.mxu1 %vm281_vm2, %v11701_v41  ;;  %19566 = vmatmul.mubr.msk.bf16.gmra.mxu0 %vm281_vm2, %v11997_v13  ;;  %v11999_v0 = vpack.c.bf16 %v16925_v44, %v16924_v33  ;;  %v12000_v41 = vpack.c.bf16 %v16927_v56, %v16926_v40  ;;  %v16881_v33 = vld [vmem:[%s19958_s30 + $0x2aa] sm:$0xff] }
 0x50a   : >> { %v23932_v59 = vadd.f32 %v10338_v60, %v10155_v29  ;;  %v10160_v42 = vadd.f32 %v19329_v24, %v23735_v32  ;;  %19535 = vmatprep.mubr.msk.bf16.mxu1 %vm281_vm2, %v11702_v35  ;;  %19569 = vmatprep.mubr.msk.bf16.mxu0 %vm281_vm2, %v11998_v43  ;;  %v11703_v32 = vpack.c.bf16 %v16875_v1, %v16874_v22  ;;  %v16879_v60 = vld [vmem:[%s19958_s30 + $0x29a] sm:$0xff]  ;;  %v16880_v22 = vld [vmem:[%s19958_s30 + $0x2a2] sm:$0xff] }
 0x50b   : >> { %v10055_v21 = vpop.f32.mrf.mxu1  ;;  %v10351_v61 = vpop.f32.mrf.mxu0  ;;  %v16930_v44 = vld [vmem:[%s19958_s30 + $0x2a3] sm:$0xff] }
 0x50c   : >> { %v23943_v20 = vadd.f32 %v19363_v55, %v10160_v42  ;;  %v10158_v27 = vadd.f32 %v10055_v21, %v23738_v62  ;;  %v16929_v55 = vld [vmem:[%s19958_s30 + $0x29b] sm:$0xff] }
 0x50d   : >> { %v19330_v8 = vpop.f32.mrf.mxu1  ;;  %v19364_v47 = vpop.f32.mrf.mxu0 }
 0x50e   : >> { %v23946_v53 = vadd.f32 %v10351_v61, %v10158_v27  ;;  %v10161_v16 = vadd.f32 %v19330_v8, %v23741_v4  ;;  %v16878_v4 = vld [vmem:[%s19958_s30 + $0x292] sm:$0xff] }
 0x50f   : >> { %v10058_v13 = vpop.f32.mrf.mxu1  ;;  %v10354_v36 = vpop.f32.mrf.mxu0 }
 0x510   : >> { %v23949_v35 = vadd.f32 %v19364_v47, %v10161_v16  ;;  %v10159_v62 = vadd.f32 %v10058_v13, %v23748_v46  ;;  %v16928_v46 = vld [vmem:[%s19958_s30 + $0x293] sm:$0xff]  ;;  %v11706_v47 = vpack.c.bf16 %v16881_v33, %v16880_v22  ;;  %v16935_v22 = vld [vmem:[%s19958_s30 + $0x2cb] sm:$0xff] }
 0x511   : >> { %v19333_v43 = vpop.f32.mrf.mxu1  ;;  %v19367_v17 = vpop.f32.mrf.mxu0  ;;  %19536 = vmatmul.mubr.msk.bf16.gmra.mxu1 %vm281_vm2, %v11703_v32  ;;  %19570 = vmatmul.mubr.msk.bf16.gmra.mxu0 %vm281_vm2, %v11999_v0  ;;  %v12001_v56 = vpack.c.bf16 %v16929_v55, %v16928_v46  ;;  %v12002_v32 = vpack.c.bf16 %v16931_v23, %v16930_v44  ;;  %v16885_v46 = vld [vmem:[%s19958_s30 + $0x2ca] sm:$0xff] }
 0x512   : >> { %v23956_v29 = vadd.f32 %v10354_v36, %v10159_v62  ;;  %v10164_v24 = vadd.f32 %v19333_v43, %v23759_v18  ;;  %19539 = vmatprep.mubr.msk.bf16.mxu1 %vm281_vm2, %v11704_v14  ;;  %19573 = vmatprep.mubr.msk.bf16.mxu0 %vm281_vm2, %v12000_v41  ;;  %v11705_v18 = vpack.c.bf16 %v16879_v60, %v16878_v4  ;;  %v16883_v36 = vld [vmem:[%s19958_s30 + $0x2ba] sm:$0xff]  ;;  %v16884_v4 = vld [vmem:[%s19958_s30 + $0x2c2] sm:$0xff] }
 0x513   : >> { %v10071_v1 = vpop.f32.mrf.mxu1  ;;  %v10367_v42 = vpop.f32.mrf.mxu0  ;;  %v16934_v55 = vld [vmem:[%s19958_s30 + $0x2c3] sm:$0xff] }
 0x514   : >> { %v23967_v21 = vadd.f32 %v19367_v17, %v10164_v24  ;;  %v10162_v61 = vadd.f32 %v10071_v1, %v23762_v50  ;;  %v16933_v17 = vld [vmem:[%s19958_s30 + $0x2bb] sm:$0xff] }
 0x515   : >> { %v19334_v49 = vpop.f32.mrf.mxu1  ;;  %v19368_v40 = vpop.f32.mrf.mxu0 }
 0x516   : >> { %v23970_v27 = vadd.f32 %v10367_v42, %v10162_v61  ;;  %v10165_v8 = vadd.f32 %v19334_v49, %v23765_v31  ;;  %v16882_v31 = vld [vmem:[%s19958_s30 + $0x2b2] sm:$0xff] }
 0x517   : >> { %v10074_v0 = vpop.f32.mrf.mxu1  ;;  %v10370_v16 = vpop.f32.mrf.mxu0 }
 0x518   : >> { %v23973_v14 = vadd.f32 %v19368_v40, %v10165_v8  ;;  %v10163_v50 = vadd.f32 %v10074_v0, %v23772_v7  ;;  %v16932_v7 = vld [vmem:[%s19958_s30 + $0x2b3] sm:$0xff]  ;;  %v11708_v40 = vpack.c.bf16 %v16885_v46, %v16884_v4  ;;  %v16939_v4 = vld [vmem:[%s19958_s30 + $0x2eb] sm:$0xff] }
 0x519   : >> { %v19337_v41 = vpop.f32.mrf.mxu1  ;;  %v19371_v13 = vpop.f32.mrf.mxu0  ;;  %19540 = vmatmul.mubr.msk.bf16.gmra.mxu1 %vm281_vm2, %v11705_v18  ;;  %19574 = vmatmul.mubr.msk.bf16.gmra.mxu0 %vm281_vm2, %v12001_v56  ;;  %v12003_v23 = vpack.c.bf16 %v16933_v17, %v16932_v7  ;;  %v12004_v18 = vpack.c.bf16 %v16935_v22, %v16934_v55  ;;  %v16889_v7 = vld [vmem:[%s19958_s30 + $0x2ea] sm:$0xff] }
 0x51a   : >> { %v23980_v62 = vadd.f32 %v10370_v16, %v10163_v50  ;;  %v10168_v43 = vadd.f32 %v19337_v41, %v23783_v37  ;;  %19543 = vmatprep.mubr.msk.bf16.mxu1 %vm281_vm2, %v11706_v47  ;;  %19577 = vmatprep.mubr.msk.bf16.mxu0 %vm281_vm2, %v12002_v32  ;;  %v11707_v37 = vpack.c.bf16 %v16883_v36, %v16882_v31  ;;  %v16887_v16 = vld [vmem:[%s19958_s30 + $0x2da] sm:$0xff]  ;;  %v16888_v31 = vld [vmem:[%s19958_s30 + $0x2e2] sm:$0xff] }
 0x51b   : >> { %v10087_v60 = vpop.f32.mrf.mxu1  ;;  %v10383_v24 = vpop.f32.mrf.mxu0  ;;  %v16938_v17 = vld [vmem:[%s19958_s30 + $0x2e3] sm:$0xff] }
 0x51c   : >> { %v23991_v1 = vadd.f32 %v19371_v13, %v10168_v43  ;;  %v10166_v42 = vadd.f32 %v10087_v60, %v23786_v9  ;;  %v16937_v13 = vld [vmem:[%s19958_s30 + $0x2db] sm:$0xff] }
 0x51d   : >> { %v19338_v33 = vpop.f32.mrf.mxu1  ;;  %v19372_v44 = vpop.f32.mrf.mxu0 }
 0x51e   : >> { %v23994_v61 = vadd.f32 %v10383_v24, %v10166_v42  ;;  %v10169_v49 = vadd.f32 %v19338_v33, %v23789_v26  ;;  %v16886_v26 = vld [vmem:[%s19958_s30 + $0x2d2] sm:$0xff] }
 0x51f   : >> { %v10090_v56 = vpop.f32.mrf.mxu1  ;;  %v10386_v8 = vpop.f32.mrf.mxu0 }
 0x520   : >> { %v23997_v47 = vadd.f32 %v19372_v44, %v10169_v49  ;;  %v10167_v9 = vadd.f32 %v10090_v56, %v23796_v52  ;;  %v16936_v52 = vld [vmem:[%s19958_s30 + $0x2d3] sm:$0xff]  ;;  %v11710_v44 = vpack.c.bf16 %v16889_v7, %v16888_v31 }
 0x521   : >> { %v19341_v32 = vpop.f32.mrf.mxu1  ;;  %v19375_v0 = vpop.f32.mrf.mxu0  ;;  %19544 = vmatmul.mubr.msk.bf16.gmra.mxu1 %vm281_vm2, %v11707_v37  ;;  %19578 = vmatmul.mubr.msk.bf16.gmra.mxu0 %vm281_vm2, %v12003_v23  ;;  %v12005_v22 = vpack.c.bf16 %v16937_v13, %v16936_v52  ;;  %v12006_v37 = vpack.c.bf16 %v16939_v4, %v16938_v17  ;;  %v16961_v52 = vld [vmem:[%s19958_s30 + $0x20c] sm:$0xff]  ;;  %v17010_v13 = vld [vmem:[%s19958_s30 + $0x264] sm:$0xff] }
 0x522   : >> { %v24004_v50 = vadd.f32 %v10386_v8, %v10167_v9  ;;  %v10172_v41 = vadd.f32 %v19341_v32, %v23807_v48  ;;  %19547 = vmatprep.mubr.msk.bf16.mxu1 %vm281_vm2, %v11708_v40  ;;  %19581 = vmatprep.mubr.msk.bf16.mxu0 %vm281_vm2, %v12004_v18  ;;  %v11709_v48 = vpack.c.bf16 %v16887_v16, %v16886_v26  ;;  %v16891_v8 = vld [vmem:[%s19958_s30 + $0x2fa] sm:$0xff]  ;;  %v16960_v26 = vld [vmem:[%s19958_s30 + $0x204] sm:$0xff]  ;;  %v17011_v31 = vld [vmem:[%s19958_s30 + $0x26c] sm:$0xff] }
 0x523   : >> { %v10103_v36 = vpop.f32.mrf.mxu1  ;;  %v10399_v43 = vpop.f32.mrf.mxu0 }
 0x524   : >> { %v24015_v60 = vadd.f32 %v19375_v0, %v10172_v41  ;;  %v10170_v24 = vadd.f32 %v10103_v36, %v23810_v19  ;;  %v16941_v0 = vld [vmem:[%s19958_s30 + $0x2fb] sm:$0xff] }
 0x525   : >> { %v19342_v46 = vpop.f32.mrf.mxu1  ;;  %v19376_v55 = vpop.f32.mrf.mxu0 }
 0x526   : >> { %v24018_v42 = vadd.f32 %v10399_v43, %v10170_v24  ;;  %v10173_v33 = vadd.f32 %v19342_v46, %v23813_v10  ;;  %v16890_v10 = vld [vmem:[%s19958_s30 + $0x2f2] sm:$0xff] }
 0x527   : >> { %v10106_v23 = vpop.f32.mrf.mxu1  ;;  %v10402_v49 = vpop.f32.mrf.mxu0 }
 0x528   : >> { %v24021_v40 = vadd.f32 %v19376_v55, %v10173_v33  ;;  %v10171_v19 = vadd.f32 %v10106_v23, %v23820_v2  ;;  %v16940_v2 = vld [vmem:[%s19958_s30 + $0x2f3] sm:$0xff]  ;;  %v12288_v55 = vpack.c.bf16 %v16961_v52, %v16960_v26 }
 0x529   : >> { %v19345_v18 = vpop.f32.mrf.mxu1  ;;  %v19379_v56 = vpop.f32.mrf.mxu0  ;;  %19548 = vmatmul.mubr.msk.bf16.gmra.mxu1 %vm281_vm2, %v11709_v48  ;;  %19582 = vmatmul.mubr.msk.bf16.gmra.mxu0 %vm281_vm2, %v12005_v22  ;;  %v12007_v4 = vpack.c.bf16 %v16941_v0, %v16940_v2  ;;  %v24045_v48 = vpack.c.bf16 %v17011_v31, %v17010_v13  ;;  %v16965_v26 = vld [vmem:[%s19958_s30 + $0x22c] sm:$0xff] }
 0x52a   : >> { %v24028_v9 = vadd.f32 %v10402_v49, %v10171_v19  ;;  %v10176_v32 = vadd.f32 %v19345_v18, %v23831_v38  ;;  %19551 = vmatprep.mubr.msk.bf16.mxu1 %vm281_vm2, %v11710_v44  ;;  %19585 = vmatprep.mubr.msk.bf16.mxu0 %vm281_vm2, %v12006_v37  ;;  %v11711_v38 = vpack.c.bf16 %v16891_v8, %v16890_v10  ;;  %v17012_v18 = vld [vmem:[%s19958_s30 + $0x274] sm:$0xff] }
 0x52b   : >> { %v10119_v16 = vpop.f32.mrf.mxu1  ;;  %v10415_v41 = vpop.f32.mrf.mxu0 }
 0x52c   : >> { %v24039_v36 = vadd.f32 %v19379_v56, %v10176_v32  ;;  %v10174_v43 = vadd.f32 %v10119_v16, %v23834_v28  ;;  %v17013_v56 = vld [vmem:[%s19958_s30 + $0x27c] sm:$0xff]  ;;  %v16964_v32 = vld [vmem:[%s19958_s30 + $0x224] sm:$0xff] }
 0x52d   : >> { %v19346_v7 = vpop.f32.mrf.mxu1  ;;  %v19380_v17 = vpop.f32.mrf.mxu0  ;;  %v17014_v16 = vld [vmem:[%s19958_s30 + $0x284] sm:$0xff]  ;;  %v24069_v31 = vpack.c.bf16 %v17013_v56, %v17012_v18  ;;  %v17016_v18 = vld [vmem:[%s19958_s30 + $0x294] sm:$0xff]  ;;  %v17017_v56 = vld [vmem:[%s19958_s30 + $0x29c] sm:$0xff] }
 0x52e   : >> { %v24042_v24 = vadd.f32 %v10415_v41, %v10174_v43  ;;  %v10177_v46 = vadd.f32 %v19346_v7, %v23837_v11  ;;  %v16962_v11 = vld [vmem:[%s19958_s30 + $0x214] sm:$0xff]  ;;  %v17015_v41 = vld [vmem:[%s19958_s30 + $0x28c] sm:$0xff]  ;;  %v17242_v7 = vld [vmem:[%s25309_s1 + $0x5c] sm:$0x3] }
 0x52f   : >> { %v10122_v22 = vpop.f32.mrf.mxu1  ;;  %v10418_v33 = vpop.f32.mrf.mxu0  ;;  %v17192_v43 = vld [vmem:[%s25309_s1 + $0x5a] sm:$0x3] }
 0x530   : >> { %v24047_v44 = vadd.f32 %v19380_v17, %v10177_v46  ;;  %v10175_v28 = vadd.f32 %v10122_v22, %v23843_v15  ;;  %v16963_v15 = vld [vmem:[%s19958_s30 + $0x21c] sm:$0xff]  ;;  %v12290_v46 = vpack.c.bf16 %v16965_v26, %v16964_v32  ;;  %v17018_v26 = vld [vmem:[%s19958_s30 + $0x2a4] sm:$0xff] }
 0x531   : >> { %v19349_v37 = vpop.f32.mrf.mxu1  ;;  %v19383_v23 = vpop.f32.mrf.mxu0  ;;  %19552 = vmatmul.mubr.msk.bf16.gmra.mxu1 %vm281_vm2, %v11711_v38  ;;  %19586 = vmatmul.mubr.msk.bf16.gmra.mxu0 %vm281_vm2, %v12007_v4  ;;  %v12289_v13 = vpack.c.bf16 %v16963_v15, %v16962_v11  ;;  %v16966_v11 = vld [vmem:[%s19958_s30 + $0x234] sm:$0xff] }
 0x532   : >> { %v24053_v49 = vadd.f32 %v10418_v33, %v10175_v28  ;;  %v10180_v19 = vadd.f32 %v19349_v37, %v23852_v39  ;;  %19591 = vmatprep.mubr.msk.bf16.mxu1 %vm281_vm2, %v12288_v55  ;;  %19625 = vmatprep.mubr.msk.bf16.mxu0 %vm281_vm2, %v24045_v48  ;;  %v24080_v55 = vpack.c.bf16 %v17015_v41, %v17014_v16  ;;  %v17019_v16 = vld [vmem:[%s19958_s30 + $0x2ac] sm:$0xff] }
 0x533   : >> { %v10135_v10 = vpop.f32.mrf.mxu1  ;;  %v10431_v8 = vpop.f32.mrf.mxu0  ;;  %v24086_v28 = vand.u32 %v17192_v43, %v19951_v5  ;;  %v24089_v37 = vand.u32 %v17242_v7, %v19951_v5 }
 0x534   : >> { %v24063_v2 = vadd.f32 %v19383_v23, %v10180_v19  ;;  %v10178_v0 = vadd.f32 %v10135_v10, %v23864_v58  ;;  %v16967_v19 = vld [vmem:[%s19958_s30 + $0x23c] sm:$0xff]  ;;  %v16968_v10 = vld [vmem:[%s19958_s30 + $0x244] sm:$0xff] }
 0x535   : >> { %v19350_v52 = vpop.f32.mrf.mxu1  ;;  %v19384_v39 = vpop.f32.mrf.mxu0 }
 0x536   : >> { %v24077_v17 = vadd.f32 %v10431_v8, %v10178_v0  ;;  %v10181_v58 = vadd.f32 %v19350_v52, %v23867_v34  ;;  %v16969_v0 = vld [vmem:[%s19958_s30 + $0x24c] sm:$0xff]  ;;  %v12291_v52 = vpack.c.bf16 %v16967_v19, %v16966_v11  ;;  %v16971_v19 = vld [vmem:[%s19958_s30 + $0x25c] sm:$0xff] }
 0x537   : >> { %v10138_v38 = vpop.f32.mrf.mxu1  ;;  %v10434_v4 = vpop.f32.mrf.mxu0  ;;  %v12292_v7 = vpack.c.bf16 %v16969_v0, %v16968_v10  ;;  %v17022_v10 = vld [vmem:[%s19958_s30 + $0x2c4] sm:$0xff] }
 0x538   : >> { %v24082_v22 = vadd.f32 %v19384_v39, %v10181_v58  ;;  %v10179_v33 = vadd.f32 %v10138_v38, %v23880_v25  ;;  %v24115_v39 = vpack.c.bf16 %v17017_v56, %v17016_v18  ;;  %v24120_v58 = vpack.c.bf16 %v17019_v16, %v17018_v26 }
 0x539   : >> { %v19389_v23 = vpop.f32.mrf.mxu1  ;;  %v19423_v34 = vpop.f32.mrf.mxu0  ;;  %19592 = vmatmul.mubr.msk.bf16.vlgmr.msra.gmra.mxu1 %vm281_vm2, %v12289_v13  ;;  %19626 = vmatmul.mubr.msk.bf16.vlgmr.msra.gmra.mxu0 %vm281_vm2, %v24069_v31 }
 0x53a   : >> { %v24096_v15 = vadd.f32 %v10434_v4, %v10179_v33  ;;  %v10744_v25 = vadd.f32 %v19389_v23, %v23893_v3  ;;  %19658 = vmatpush3.bf16.msra.mxu1 %v23871_v57  ;;  %19692 = vmatpush3.bf16.msra.mxu0 %v23874_v6 }
 0x53b   : >> { %v10615_v8 = vpop.f32.mrf.mxu1  ;;  %v10911_v32 = vpop.f32.mrf.mxu0  ;;  %19595 = vmatprep.mubr.msk.bf16.mxu1 %vm281_vm2, %v12290_v46  ;;  %19629 = vmatprep.mubr.msk.bf16.mxu0 %vm281_vm2, %v24080_v55 }
 0x53c   : >> { %v24110_v41 = vadd.f32 %v19423_v34, %v10744_v25  ;;  %v10742_v3 = vadd.f32 %v10615_v8, %v23898_v54  ;;  %19725 = vmatprep.subr.bf16.mxu1 %v24086_v28  ;;  %19759 = vmatprep.subr.bf16.mxu0 %v24089_v37  ;;  %v17021_v25 = vld [vmem:[%s19958_s30 + $0x2bc] sm:$0xff]  ;;  %v17023_v8 = vld [vmem:[%s19958_s30 + $0x2cc] sm:$0xff] }
 0x53d   : >> { %v19390_v57 = vpop.f32.mrf.mxu1  ;;  %v19424_v6 = vpop.f32.mrf.mxu0 }
 0x53e   : >> { %v24117_v13 = vadd.f32 %v10911_v32, %v10742_v3  ;;  %v10745_v43 = vadd.f32 %v19390_v57, %v23901_v30  ;;  %v16970_v30 = vld [vmem:[%s19958_s30 + $0x254] sm:$0xff] }
 0x53f   : >> { %v10618_v54 = vpop.f32.mrf.mxu1  ;;  %v10914_v38 = vpop.f32.mrf.mxu0  ;;  %v12293_v3 = vpack.c.bf16 %v16971_v19, %v16970_v30  ;;  %v17025_v30 = vld [vmem:[%s19958_s30 + $0x2dc] sm:$0xff]  ;;  %v17026_v19 = vld [vmem:[%s19958_s30 + $0x2e4] sm:$0xff] }
 0x540   : >> { %v24122_v4 = vadd.f32 %v19424_v6, %v10745_v43  ;;  %v10743_v46 = vadd.f32 %v10618_v54, %v23908_v12  ;;  %v17020_v12 = vld [vmem:[%s19958_s30 + $0x2b4] sm:$0xff] }
 0x541   : >> { %v19393_v33 = vpop.f32.mrf.mxu1  ;;  %v19427_v23 = vpop.f32.mrf.mxu0  ;;  %19596 = vmatmul.mubr.msk.bf16.gmra.mxu1 %vm281_vm2, %v12291_v52  ;;  %19630 = vmatmul.mubr.msk.bf16.gmra.mxu0 %vm281_vm2, %v24115_v39  ;;  %v24148_v52 = vpack.c.bf16 %v17023_v8, %v17022_v10 }
 0x542   : >> { %v24129_v34 = vadd.f32 %v10914_v38, %v10743_v46  ;;  %v10748_v11 = vadd.f32 %v19393_v33, %v23919_v45  ;;  %19599 = vmatprep.mubr.msk.bf16.mxu1 %vm281_vm2, %v12292_v7  ;;  %19633 = vmatprep.mubr.msk.bf16.mxu0 %vm281_vm2, %v24120_v58  ;;  %v24143_v45 = vpack.c.bf16 %v17021_v25, %v17020_v12  ;;  %v17027_v12 = vld [vmem:[%s19958_s30 + $0x2ec] sm:$0xff] }
 0x543   : >> { %v10631_v18 = vpop.f32.mrf.mxu1  ;;  %v10927_v56 = vpop.f32.mrf.mxu0 }
 0x544   : >> { %v24140_v32 = vadd.f32 %v19427_v23, %v10748_v11  ;;  %v10746_v0 = vadd.f32 %v10631_v18, %v23922_v51  ;;  %v17024_v23 = vld [vmem:[%s19958_s30 + $0x2d4] sm:$0xff] }
 0x545   : >> { %v19394_v26 = vpop.f32.mrf.mxu1  ;;  %v19428_v16 = vpop.f32.mrf.mxu0  ;;  %v24170_v8 = vpack.c.bf16 %v17025_v30, %v17024_v23  ;;  %v17031_v23 = vld [vmem:[%s19958_s30 + $0x30c] sm:$0xff] }
 0x546   : >> { %v24145_v57 = vadd.f32 %v10927_v56, %v10746_v0  ;;  %v10749_v6 = vadd.f32 %v19394_v26, %v23925_v63  ;;  %v24175_v0 = vpack.c.bf16 %v17027_v12, %v17026_v19 }
 0x547   : >> { %v10634_v43 = vpop.f32.mrf.mxu1  ;;  %v10930_v7 = vpop.f32.mrf.mxu0 }
 0x548   : >> { %v24150_v54 = vadd.f32 %v19428_v16, %v10749_v6  ;;  %v10747_v51 = vadd.f32 %v10634_v43, %v23932_v59 }
 0x549   : >> { %v19397_v38 = vpop.f32.mrf.mxu1  ;;  %v19431_v46 = vpop.f32.mrf.mxu0  ;;  %19600 = vmatmul.mubr.msk.bf16.gmra.mxu1 %vm281_vm2, %v12293_v3  ;;  %19634 = vmatmul.mubr.msk.bf16.gmra.mxu0 %vm281_vm2, %v24143_v45 }
 0x54a   : >> { %v24156_v33 = vadd.f32 %v10930_v7, %v10747_v51  ;;  %v10752_v63 = vadd.f32 %v19397_v38, %v23943_v20  ;;  %19603 = vmatprep.mubr.msk.bf16.mxu1 %vm281_vm2, %v24045_v48  ;;  %19637 = vmatprep.mubr.msk.bf16.mxu0 %vm281_vm2, %v24148_v52  ;;  %v17028_v51 = vld [vmem:[%s19958_s30 + $0x2f4] sm:$0xff] }
 0x54b   : >> { %v10647_v59 = vpop.f32.mrf.mxu1  ;;  %v10943_v11 = vpop.f32.mrf.mxu0 }
 0x54c   : >> { %v24167_v25 = vadd.f32 %v19431_v46, %v10752_v63  ;;  %v10750_v18 = vadd.f32 %v10647_v59, %v23946_v53  ;;  %v17030_v63 = vld [vmem:[%s19958_s30 + $0x304] sm:$0xff] }
 0x54d   : >> { %v19398_v56 = vpop.f32.mrf.mxu1  ;;  %v19432_v10 = vpop.f32.mrf.mxu0  ;;  %v12594_v12 = vpack.c.bf16 %v17031_v23, %v17030_v63 }
 0x54e   : >> { %v24172_v20 = vadd.f32 %v10943_v11, %v10750_v18  ;;  %v10753_v48 = vadd.f32 %v19398_v56, %v23949_v35 }
 0x54f   : >> { %v10650_v26 = vpop.f32.mrf.mxu1  ;;  %v10946_v16 = vpop.f32.mrf.mxu0 }
 0x550   : >> { %v24177_v3 = vadd.f32 %v19432_v10, %v10753_v48  ;;  %v10751_v53 = vadd.f32 %v10650_v26, %v23956_v29  ;;  %v17029_v29 = vld [vmem:[%s19958_s30 + $0x2fc] sm:$0xff] }
 0x551   : >> { %v19401_v6 = vpop.f32.mrf.mxu1  ;;  %v19435_v43 = vpop.f32.mrf.mxu0  ;;  %19604 = vmatmul.mubr.msk.bf16.gmra.mxu1 %vm281_vm2, %v24069_v31  ;;  %19638 = vmatmul.mubr.msk.bf16.gmra.mxu0 %vm281_vm2, %v24170_v8  ;;  %v24198_v19 = vpack.c.bf16 %v17029_v29, %v17028_v51  ;;  %v17035_v51 = vld [vmem:[%s19958_s30 + $0x32c] sm:$0xff] }
 0x552   : >> { %v24184_v7 = vadd.f32 %v10946_v16, %v10751_v53  ;;  %v10756_v35 = vadd.f32 %v19401_v6, %v23967_v21  ;;  %19607 = vmatprep.mubr.msk.bf16.mxu1 %vm281_vm2, %v24080_v55  ;;  %19641 = vmatprep.mubr.msk.bf16.mxu0 %vm281_vm2, %v24175_v0  ;;  %v17032_v53 = vld [vmem:[%s19958_s30 + $0x314] sm:$0xff]  ;;  %v17033_v6 = vld [vmem:[%s19958_s30 + $0x31c] sm:$0xff] }
 0x553   : >> { %v10663_v38 = vpop.f32.mrf.mxu1  ;;  %v10959_v46 = vpop.f32.mrf.mxu0  ;;  %v12595_v63 = vpack.c.bf16 %v17033_v6, %v17032_v53 }
 0x554   : >> { %v24195_v31 = vadd.f32 %v19435_v43, %v10756_v35  ;;  %v10754_v30 = vadd.f32 %v10663_v38, %v23970_v27  ;;  %v17034_v35 = vld [vmem:[%s19958_s30 + $0x324] sm:$0xff] }
 0x555   : >> { %v19402_v59 = vpop.f32.mrf.mxu1  ;;  %v19436_v11 = vpop.f32.mrf.mxu0  ;;  %v12596_v23 = vpack.c.bf16 %v17035_v51, %v17034_v35 }
 0x556   : >> { %v24200_v21 = vadd.f32 %v10959_v46, %v10754_v30  ;;  %v10757_v55 = vadd.f32 %v19402_v59, %v23973_v14 }
 0x557   : >> { %v10666_v18 = vpop.f32.mrf.mxu1  ;;  %v10962_v56 = vpop.f32.mrf.mxu0 }
 0x558   : >> { %v24203_v10 = vadd.f32 %v19436_v11, %v10757_v55  ;;  %v10755_v48 = vadd.f32 %v10666_v18, %v23980_v62 }
 0x559   : >> { %v19405_v27 = vpop.f32.mrf.mxu1  ;;  %v19439_v26 = vpop.f32.mrf.mxu0  ;;  %19608 = vmatmul.mubr.msk.bf16.gmra.mxu1 %vm281_vm2, %v24115_v39  ;;  %19642 = vmatmul.mubr.msk.bf16.gmra.mxu0 %vm281_vm2, %v24198_v19 }
 0x55a   : >> { %v24210_v16 = vadd.f32 %v10962_v56, %v10755_v48  ;;  %v10760_v14 = vadd.f32 %v19405_v27, %v23991_v1  ;;  %19611 = vmatprep.mubr.msk.bf16.mxu1 %vm281_vm2, %v24120_v58  ;;  %19645 = vmatprep.mubr.msk.bf16.mxu0 %vm281_vm2, %v12594_v12  ;;  %v17036_v56 = vld [vmem:[%s19958_s30 + $0x334] sm:$0xff]  ;;  %v17037_v48 = vld [vmem:[%s19958_s30 + $0x33c] sm:$0xff] }
 0x55b   : >> { %v10679_v62 = vpop.f32.mrf.mxu1  ;;  %v10975_v43 = vpop.f32.mrf.mxu0 }
 0x55c   : >> { %v24220_v29 = vadd.f32 %v19439_v26, %v10760_v14  ;;  %v10758_v39 = vadd.f32 %v10679_v62, %v23994_v61  ;;  %v17038_v26 = vld [vmem:[%s19958_s30 + $0x344] sm:$0xff]  ;;  %v17039_v14 = vld [vmem:[%s19958_s30 + $0x34c] sm:$0xff] }
 0x55d   : >> { %v19406_v38 = vpop.f32.mrf.mxu1  ;;  %v19440_v46 = vpop.f32.mrf.mxu0  ;;  %v12598_v35 = vpack.c.bf16 %v17039_v14, %v17038_v26 }
 0x55e   : >> { %v24223_v1 = vadd.f32 %v10975_v43, %v10758_v39  ;;  %v10761_v58 = vadd.f32 %v19406_v38, %v23997_v47  ;;  %v12597_v43 = vpack.c.bf16 %v17037_v48, %v17036_v56 }
 0x55f   : >> { %v10682_v30 = vpop.f32.mrf.mxu1  ;;  %v10978_v59 = vpop.f32.mrf.mxu0 }
 0x560   : >> { %v24226_v11 = vadd.f32 %v19440_v46, %v10761_v58  ;;  %v10759_v55 = vadd.f32 %v10682_v30, %v24004_v50  ;;  %v17041_v30 = vld [vmem:[%s19958_s30 + $0x35c] sm:$0xff] }
 0x561   : >> { %v19409_v12 = vpop.f32.mrf.mxu1  ;;  %v19443_v61 = vpop.f32.mrf.mxu0  ;;  %19612 = vmatmul.mubr.msk.bf16.gmra.mxu1 %vm281_vm2, %v24143_v45  ;;  %19646 = vmatmul.mubr.msk.bf16.gmra.mxu0 %vm281_vm2, %v12595_v63 }
 0x562   : >> { %v24232_v18 = vadd.f32 %v10978_v59, %v10759_v55  ;;  %v10764_v47 = vadd.f32 %v19409_v12, %v24015_v60  ;;  %19615 = vmatprep.mubr.msk.bf16.mxu1 %vm281_vm2, %v24148_v52  ;;  %19649 = vmatprep.mubr.msk.bf16.mxu0 %vm281_vm2, %v12596_v23  ;;  %v17040_v23 = vld [vmem:[%s19958_s30 + $0x354] sm:$0xff] }
 0x563   : >> { %v10695_v27 = vpop.f32.mrf.mxu1  ;;  %v10991_v50 = vpop.f32.mrf.mxu0  ;;  %v17061_v12 = vld [vmem:[%s19958_s30 + $0x26d] sm:$0xff] }
 0x564   : >> { %v24242_v53 = vadd.f32 %v19443_v61, %v10764_v47  ;;  %v10762_v45 = vadd.f32 %v10695_v27, %v24018_v42  ;;  %v17110_v61 = vld [vmem:[%s19958_s30 + $0x266] sm:$0xff]  ;;  %v17111_v47 = vld [vmem:[%s19958_s30 + $0x26e] sm:$0xff]  ;;  %v12599_v27 = vpack.c.bf16 %v17041_v30, %v17040_v23 }
 0x565   : >> { %v19410_v6 = vpop.f32.mrf.mxu1  ;;  %v19444_v62 = vpop.f32.mrf.mxu0  ;;  %v13176_v14 = vpack.c.bf16 %v17111_v47, %v17110_v61  ;;  %v17065_v30 = vld [vmem:[%s19958_s30 + $0x28d] sm:$0xff]  ;;  %v17292_v47 = vld [vmem:[%s25309_s1 + $0x5e] sm:$0x3] }
 0x566   : >> { %v24245_v60 = vadd.f32 %v10991_v50, %v10762_v45  ;;  %v10765_v52 = vadd.f32 %v19410_v6, %v24021_v40 }
 0x567   : >> { %v10698_v51 = vpop.f32.mrf.mxu1  ;;  %v10994_v39 = vpop.f32.mrf.mxu0 }
 0x568   : >> { %v24248_v38 = vadd.f32 %v19444_v62, %v10765_v52  ;;  %v10763_v46 = vadd.f32 %v10698_v51, %v24028_v9  ;;  %v17060_v9 = vld [vmem:[%s19958_s30 + $0x265] sm:$0xff] }
 0x569   : >> { %v19413_v42 = vpop.f32.mrf.mxu1  ;;  %v19447_v63 = vpop.f32.mrf.mxu0  ;;  %19616 = vmatmul.mubr.msk.bf16.gmra.mxu1 %vm281_vm2, %v24170_v8  ;;  %19650 = vmatmul.mubr.msk.bf16.gmra.mxu0 %vm281_vm2, %v12597_v43  ;;  %v12880_v26 = vpack.c.bf16 %v17061_v12, %v17060_v9  ;;  %v17114_v9 = vld [vmem:[%s19958_s30 + $0x286] sm:$0xff] }
 0x56a   : >> { %v24254_v58 = vadd.f32 %v10994_v39, %v10763_v46  ;;  %v10768_v40 = vadd.f32 %v19413_v42, %v24039_v36  ;;  %19619 = vmatprep.mubr.msk.bf16.mxu1 %vm281_vm2, %v24175_v0  ;;  %19653 = vmatprep.mubr.msk.bf16.mxu0 %vm281_vm2, %v12598_v35  ;;  %v17112_v39 = vld [vmem:[%s19958_s30 + $0x276] sm:$0xff]  ;;  %v17113_v46 = vld [vmem:[%s19958_s30 + $0x27e] sm:$0xff] }
 0x56b   : >> { %v10711_v59 = vpop.f32.mrf.mxu1  ;;  %v11007_v55 = vpop.f32.mrf.mxu0  ;;  %v13177_v61 = vpack.c.bf16 %v17113_v46, %v17112_v39  ;;  %v17068_v39 = vld [vmem:[%s19958_s30 + $0x2a5] sm:$0xff] }
 0x56c   : >> { %v24266_v8 = vadd.f32 %v19447_v63, %v10768_v40  ;;  %v10766_v56 = vadd.f32 %v10711_v59, %v24042_v24  ;;  %v17064_v40 = vld [vmem:[%s19958_s30 + $0x285] sm:$0xff]  ;;  %v17115_v59 = vld [vmem:[%s19958_s30 + $0x28e] sm:$0xff] }
 0x56d   : >> { %v19414_v48 = vpop.f32.mrf.mxu1  ;;  %v19448_v36 = vpop.f32.mrf.mxu0 }
 0x56e   : >> { %v24269_v50 = vadd.f32 %v11007_v55, %v10766_v56  ;;  %v10769_v0 = vadd.f32 %v19414_v48, %v24047_v44  ;;  %v17062_v44 = vld [vmem:[%s19958_s30 + $0x275] sm:$0xff]  ;;  %v17342_v56 = vld [vmem:[%s25309_s1 + $0x60] sm:$0x3] }
 0x56f   : >> { %v10714_v45 = vpop.f32.mrf.mxu1  ;;  %v11010_v6 = vpop.f32.mrf.mxu0 }
 0x570   : >> { %v24272_v62 = vadd.f32 %v19448_v36, %v10769_v0  ;;  %v10767_v24 = vadd.f32 %v10714_v45, %v24053_v49  ;;  %v17063_v49 = vld [vmem:[%s19958_s30 + $0x27d] sm:$0xff]  ;;  %v12882_v0 = vpack.c.bf16 %v17065_v30, %v17064_v40  ;;  %v17118_v40 = vld [vmem:[%s19958_s30 + $0x2a6] sm:$0xff] }
 0x571   : >> { %v19417_v43 = vpop.f32.mrf.mxu1  ;;  %v19451_v52 = vpop.f32.mrf.mxu0  ;;  %19620 = vmatmul.mubr.msk.bf16.gmra.mxu1 %vm281_vm2, %v24198_v19  ;;  %19654 = vmatmul.mubr.msk.bf16.gmra.mxu0 %vm281_vm2, %v12599_v27 }
 0x572   : >> { %v24279_v35 = vadd.f32 %v11010_v6, %v10767_v24  ;;  %v10772_v51 = vadd.f32 %v19417_v43, %v24063_v2  ;;  %19659 = vmatprep.mubr.msk.bf16.mxu1 %vm281_vm2, %v12880_v26  ;;  %19693 = vmatprep.mubr.msk.bf16.mxu0 %vm281_vm2, %v13176_v14  ;;  %v12881_v2 = vpack.c.bf16 %v17063_v49, %v17062_v44  ;;  %v17067_v44 = vld [vmem:[%s19958_s30 + $0x29d] sm:$0xff] }
 0x573   : >> { %v10727_v42 = vpop.f32.mrf.mxu1  ;;  %v11023_v63 = vpop.f32.mrf.mxu0  ;;  %v13178_v26 = vpack.c.bf16 %v17115_v59, %v17114_v9  ;;  %v24307_v6 = vand.u32 %v17292_v47, %v19951_v5  ;;  %v24310_v24 = vand.u32 %v17342_v56, %v19951_v5  ;;  %v17116_v5 = vld [vmem:[%s19958_s30 + $0x296] sm:$0xff]  ;;  %v17117_v49 = vld [vmem:[%s19958_s30 + $0x29e] sm:$0xff] }
 0x574   : >> { %v24288_v19 = vadd.f32 %v19451_v52, %v10772_v51  ;;  %v10770_v23 = vadd.f32 %v10727_v42, %v24077_v17  ;;  %v13179_v59 = vpack.c.bf16 %v17117_v49, %v17116_v5  ;;  %v17122_v5 = vld [vmem:[%s19958_s30 + $0x2c6] sm:$0xff]  ;;  %v17123_v49 = vld [vmem:[%s19958_s30 + $0x2ce] sm:$0xff] }
 0x575   : >> { %v19418_v55 = vpop.f32.mrf.mxu1  ;;  %v19452_v12 = vpop.f32.mrf.mxu0 }
 0x576   : >> { %v24300_v48 = vadd.f32 %v11023_v63, %v10770_v23  ;;  %v10773_v17 = vadd.f32 %v19418_v55, %v24082_v22  ;;  %v17066_v22 = vld [vmem:[%s19958_s30 + $0x295] sm:$0xff]  ;;  %v17069_v63 = vld [vmem:[%s19958_s30 + $0x2ad] sm:$0xff] }
 0x577   : >> { %v10730_v36 = vpop.f32.mrf.mxu1  ;;  %v11026_v27 = vpop.f32.mrf.mxu0  ;;  %v17119_v23 = vld [vmem:[%s19958_s30 + $0x2ae] sm:$0xff]  ;;  %v12883_v9 = vpack.c.bf16 %v17067_v44, %v17066_v22 }
 0x578   : >> { %v24303_v14 = vadd.f32 %v19452_v12, %v10773_v17  ;;  %v10771_v45 = vadd.f32 %v10730_v36, %v24096_v15 }
 0x579   : >> { %v19457_v43 = vpop.f32.mrf.mxu1  ;;  %v19491_v52 = vpop.f32.mrf.mxu0  ;;  %19660 = vmatmul.mubr.msk.bf16.vlgmr.msra.gmra.mxu1 %vm281_vm2, %v12881_v2  ;;  %19694 = vmatmul.mubr.msk.bf16.vlgmr.msra.gmra.mxu0 %vm281_vm2, %v13177_v61  ;;  %v12884_v2 = vpack.c.bf16 %v17069_v63, %v17068_v39  ;;  %v13180_v61 = vpack.c.bf16 %v17119_v23, %v17118_v40 }
 0x57a   : >> { %v24316_v51 = vadd.f32 %v11026_v27, %v10771_v45  ;;  %v11336_v15 = vadd.f32 %v19457_v43, %v24110_v41  ;;  %19726 = vmatpush3.bf16.msra.mxu1 %v24086_v28  ;;  %19760 = vmatpush3.bf16.msra.mxu0 %v24089_v37  ;;  %v17121_v43 = vld [vmem:[%s19958_s30 + $0x2be] sm:$0xff] }
 0x57b   : >> { %v11207_v46 = vpop.f32.mrf.mxu1  ;;  %v11503_v42 = vpop.f32.mrf.mxu0  ;;  %19663 = vmatprep.mubr.msk.bf16.mxu1 %vm281_vm2, %v12882_v0  ;;  %19697 = vmatprep.mubr.msk.bf16.mxu0 %vm281_vm2, %v13178_v26  ;;  %v17071_v0 = vld [vmem:[%s19958_s30 + $0x2bd] sm:$0xff] }
 0x57c   : >> { %v24329_v30 = vadd.f32 %v19491_v52, %v11336_v15  ;;  %v11334_v41 = vadd.f32 %v11207_v46, %v24117_v13  ;;  %19793 = vmatprep.subr.bf16.mxu1 %v24307_v6  ;;  %19827 = vmatprep.subr.bf16.mxu0 %v24310_v24  ;;  %v17072_v52 = vld [vmem:[%s19958_s30 + $0x2c5] sm:$0xff]  ;;  %v17073_v15 = vld [vmem:[%s19958_s30 + $0x2cd] sm:$0xff] }
 0x57d   : >> { %v19458_v28 = vpop.f32.mrf.mxu1  ;;  %v19492_v37 = vpop.f32.mrf.mxu0 }
 0x57e   : >> { %v24334_v55 = vadd.f32 %v11503_v42, %v11334_v41  ;;  %v11337_v12 = vadd.f32 %v19458_v28, %v24122_v4  ;;  %v17070_v4 = vld [vmem:[%s19958_s30 + $0x2b5] sm:$0xff]  ;;  %v12886_v28 = vpack.c.bf16 %v17073_v15, %v17072_v52 }
 0x57f   : >> { %v11210_v47 = vpop.f32.mrf.mxu1  ;;  %v11506_v13 = vpop.f32.mrf.mxu0 }
 0x580   : >> { %v24337_v56 = vadd.f32 %v19492_v37, %v11337_v12  ;;  %v11335_v17 = vadd.f32 %v11210_v47, %v24129_v34  ;;  %v17120_v34 = vld [vmem:[%s19958_s30 + $0x2b6] sm:$0xff]  ;;  %v13182_v37 = vpack.c.bf16 %v17123_v49, %v17122_v5 }
 0x581   : >> { %v19461_v36 = vpop.f32.mrf.mxu1  ;;  %v19495_v27 = vpop.f32.mrf.mxu0  ;;  %19664 = vmatmul.mubr.msk.bf16.gmra.mxu1 %vm281_vm2, %v12883_v9  ;;  %19698 = vmatmul.mubr.msk.bf16.gmra.mxu0 %vm281_vm2, %v13179_v59  ;;  %v13181_v40 = vpack.c.bf16 %v17121_v43, %v17120_v34  ;;  %v17075_v47 = vld [vmem:[%s19958_s30 + $0x2dd] sm:$0xff]  ;;  %v17126_v34 = vld [vmem:[%s19958_s30 + $0x2e6] sm:$0xff]  ;;  %v17127_v43 = vld [vmem:[%s19958_s30 + $0x2ee] sm:$0xff] }
 0x582   : >> { %v24344_v26 = vadd.f32 %v11506_v13, %v11335_v17  ;;  %v11340_v45 = vadd.f32 %v19461_v36, %v24140_v32  ;;  %19667 = vmatprep.mubr.msk.bf16.mxu1 %vm281_vm2, %v12884_v2  ;;  %19701 = vmatprep.mubr.msk.bf16.mxu0 %vm281_vm2, %v13180_v61  ;;  %v12885_v32 = vpack.c.bf16 %v17071_v0, %v17070_v4  ;;  %v17125_v36 = vld [vmem:[%s19958_s30 + $0x2de] sm:$0xff] }
 0x583   : >> { %v11223_v22 = vpop.f32.mrf.mxu1  ;;  %v11519_v44 = vpop.f32.mrf.mxu0 }
 0x584   : >> { %v24355_v39 = vadd.f32 %v19495_v27, %v11340_v45  ;;  %v11338_v46 = vadd.f32 %v11223_v22, %v24145_v57  ;;  %v17076_v27 = vld [vmem:[%s19958_s30 + $0x2e5] sm:$0xff]  ;;  %v17077_v45 = vld [vmem:[%s19958_s30 + $0x2ed] sm:$0xff] }
 0x585   : >> { %v19462_v42 = vpop.f32.mrf.mxu1  ;;  %v19496_v63 = vpop.f32.mrf.mxu0 }
 0x586   : >> { %v24358_v23 = vadd.f32 %v11519_v44, %v11338_v46  ;;  %v11341_v41 = vadd.f32 %v19462_v42, %v24150_v54  ;;  %v17074_v54 = vld [vmem:[%s19958_s30 + $0x2d5] sm:$0xff]  ;;  %v12888_v42 = vpack.c.bf16 %v17077_v45, %v17076_v27 }
 0x587   : >> { %v11226_v9 = vpop.f32.mrf.mxu1  ;;  %v11522_v59 = vpop.f32.mrf.mxu0 }
 0x588   : >> { %v24361_v12 = vadd.f32 %v19496_v63, %v11341_v41  ;;  %v11339_v57 = vadd.f32 %v11226_v9, %v24156_v33  ;;  %v17124_v33 = vld [vmem:[%s19958_s30 + $0x2d6] sm:$0xff]  ;;  %v13184_v63 = vpack.c.bf16 %v17127_v43, %v17126_v34 }
 0x589   : >> { %v19465_v2 = vpop.f32.mrf.mxu1  ;;  %v19499_v61 = vpop.f32.mrf.mxu0  ;;  %19668 = vmatmul.mubr.msk.bf16.gmra.mxu1 %vm281_vm2, %v12885_v32  ;;  %19702 = vmatmul.mubr.msk.bf16.gmra.mxu0 %vm281_vm2, %v13181_v40  ;;  %v13183_v5 = vpack.c.bf16 %v17125_v36, %v17124_v33  ;;  %v17079_v9 = vld [vmem:[%s19958_s30 + $0x2fd] sm:$0xff]  ;;  %v17130_v33 = vld [vmem:[%s19958_s30 + $0x306] sm:$0xff]  ;;  %v17131_v36 = vld [vmem:[%s19958_s30 + $0x30e] sm:$0xff] }
 0x58a   : >> { %v24368_v13 = vadd.f32 %v11522_v59, %v11339_v57  ;;  %v11344_v17 = vadd.f32 %v19465_v2, %v24167_v25  ;;  %19671 = vmatprep.mubr.msk.bf16.mxu1 %vm281_vm2, %v12886_v28  ;;  %19705 = vmatprep.mubr.msk.bf16.mxu0 %vm281_vm2, %v13182_v37  ;;  %v12887_v25 = vpack.c.bf16 %v17075_v47, %v17074_v54  ;;  %v17129_v2 = vld [vmem:[%s19958_s30 + $0x2fe] sm:$0xff] }
 0x58b   : >> { %v11239_v4 = vpop.f32.mrf.mxu1  ;;  %v11535_v0 = vpop.f32.mrf.mxu0 }
 0x58c   : >> { %v24379_v52 = vadd.f32 %v19499_v61, %v11344_v17  ;;  %v11342_v22 = vadd.f32 %v11239_v4, %v24172_v20  ;;  %v17080_v61 = vld [vmem:[%s19958_s30 + $0x305] sm:$0xff]  ;;  %v17081_v17 = vld [vmem:[%s19958_s30 + $0x30d] sm:$0xff] }
 0x58d   : >> { %v19466_v44 = vpop.f32.mrf.mxu1  ;;  %v19500_v15 = vpop.f32.mrf.mxu0 }
 0x58e   : >> { %v24382_v49 = vadd.f32 %v11535_v0, %v11342_v22  ;;  %v11345_v46 = vadd.f32 %v19466_v44, %v24177_v3  ;;  %v17078_v3 = vld [vmem:[%s19958_s30 + $0x2f5] sm:$0xff]  ;;  %v12890_v44 = vpack.c.bf16 %v17081_v17, %v17080_v61 }
 0x58f   : >> { %v11242_v32 = vpop.f32.mrf.mxu1  ;;  %v11538_v40 = vpop.f32.mrf.mxu0 }
 0x590   : >> { %v24385_v41 = vadd.f32 %v19500_v15, %v11345_v46  ;;  %v11343_v20 = vadd.f32 %v11242_v32, %v24184_v7  ;;  %v17128_v7 = vld [vmem:[%s19958_s30 + $0x2f6] sm:$0xff]  ;;  %v13186_v15 = vpack.c.bf16 %v17131_v36, %v17130_v33 }
 0x591   : >> { %v19469_v28 = vpop.f32.mrf.mxu1  ;;  %v19503_v37 = vpop.f32.mrf.mxu0  ;;  %19672 = vmatmul.mubr.msk.bf16.gmra.mxu1 %vm281_vm2, %v12887_v25  ;;  %19706 = vmatmul.mubr.msk.bf16.gmra.mxu0 %vm281_vm2, %v13183_v5  ;;  %v13185_v34 = vpack.c.bf16 %v17129_v2, %v17128_v7  ;;  %v17083_v32 = vld [vmem:[%s19958_s30 + $0x31d] sm:$0xff]  ;;  %v17134_v7 = vld [vmem:[%s19958_s30 + $0x326] sm:$0xff]  ;;  %v17135_v2 = vld [vmem:[%s19958_s30 + $0x32e] sm:$0xff] }
 0x592   : >> { %v24392_v59 = vadd.f32 %v11538_v40, %v11343_v20  ;;  %v11348_v57 = vadd.f32 %v19469_v28, %v24195_v31  ;;  %19675 = vmatprep.mubr.msk.bf16.mxu1 %vm281_vm2, %v12888_v42  ;;  %19709 = vmatprep.mubr.msk.bf16.mxu0 %vm281_vm2, %v13184_v63  ;;  %v12889_v31 = vpack.c.bf16 %v17079_v9, %v17078_v3  ;;  %v17133_v28 = vld [vmem:[%s19958_s30 + $0x31e] sm:$0xff] }
 0x593   : >> { %v11255_v54 = vpop.f32.mrf.mxu1  ;;  %v11551_v47 = vpop.f32.mrf.mxu0 }
 0x594   : >> { %v24403_v27 = vadd.f32 %v19503_v37, %v11348_v57  ;;  %v11346_v4 = vadd.f32 %v11255_v54, %v24200_v21  ;;  %v17084_v37 = vld [vmem:[%s19958_s30 + $0x325] sm:$0xff]  ;;  %v17085_v57 = vld [vmem:[%s19958_s30 + $0x32d] sm:$0xff] }
 0x595   : >> { %v19470_v0 = vpop.f32.mrf.mxu1  ;;  %v19504_v45 = vpop.f32.mrf.mxu0 }
 0x596   : >> { %v24406_v43 = vadd.f32 %v11551_v47, %v11346_v4  ;;  %v11349_v22 = vadd.f32 %v19470_v0, %v24203_v10  ;;  %v17082_v10 = vld [vmem:[%s19958_s30 + $0x315] sm:$0xff]  ;;  %v12892_v0 = vpack.c.bf16 %v17085_v57, %v17084_v37 }
 0x597   : >> { %v11258_v25 = vpop.f32.mrf.mxu1  ;;  %v11554_v5 = vpop.f32.mrf.mxu0 }
 0x598   : >> { %v24409_v46 = vadd.f32 %v19504_v45, %v11349_v22  ;;  %v11347_v21 = vadd.f32 %v11258_v25, %v24210_v16  ;;  %v17132_v16 = vld [vmem:[%s19958_s30 + $0x316] sm:$0xff]  ;;  %v13188_v45 = vpack.c.bf16 %v17135_v2, %v17134_v7 }
 0x599   : >> { %v19473_v42 = vpop.f32.mrf.mxu1  ;;  %v19507_v63 = vpop.f32.mrf.mxu0  ;;  %19676 = vmatmul.mubr.msk.bf16.gmra.mxu1 %vm281_vm2, %v12889_v31  ;;  %19710 = vmatmul.mubr.msk.bf16.gmra.mxu0 %vm281_vm2, %v13185_v34  ;;  %v13187_v33 = vpack.c.bf16 %v17133_v28, %v17132_v16  ;;  %v17087_v25 = vld [vmem:[%s19958_s30 + $0x33d] sm:$0xff]  ;;  %v17138_v16 = vld [vmem:[%s19958_s30 + $0x346] sm:$0xff]  ;;  %v17139_v28 = vld [vmem:[%s19958_s30 + $0x34e] sm:$0xff] }
 0x59a   : >> { %v24416_v40 = vadd.f32 %v11554_v5, %v11347_v21  ;;  %v11352_v20 = vadd.f32 %v19473_v42, %v24220_v29  ;;  %19679 = vmatprep.mubr.msk.bf16.mxu1 %vm281_vm2, %v12890_v44  ;;  %19713 = vmatprep.mubr.msk.bf16.mxu0 %vm281_vm2, %v13186_v15  ;;  %v12891_v29 = vpack.c.bf16 %v17083_v32, %v17082_v10  ;;  %v17137_v42 = vld [vmem:[%s19958_s30 + $0x33e] sm:$0xff] }
 0x59b   : >> { %v11271_v3 = vpop.f32.mrf.mxu1  ;;  %v11567_v9 = vpop.f32.mrf.mxu0 }
 0x59c   : >> { %v24427_v61 = vadd.f32 %v19507_v63, %v11352_v20  ;;  %v11350_v54 = vadd.f32 %v11271_v3, %v24223_v1  ;;  %v17088_v63 = vld [vmem:[%s19958_s30 + $0x345] sm:$0xff]  ;;  %v17089_v20 = vld [vmem:[%s19958_s30 + $0x34d] sm:$0xff] }
 0x59d   : >> { %v19474_v47 = vpop.f32.mrf.mxu1  ;;  %v19508_v17 = vpop.f32.mrf.mxu0 }
 0x59e   : >> { %v24430_v36 = vadd.f32 %v11567_v9, %v11350_v54  ;;  %v11353_v4 = vadd.f32 %v19474_v47, %v24226_v11  ;;  %v17086_v11 = vld [vmem:[%s19958_s30 + $0x335] sm:$0xff]  ;;  %v12894_v47 = vpack.c.bf16 %v17089_v20, %v17088_v63 }
 0x59f   : >> { %v11274_v31 = vpop.f32.mrf.mxu1  ;;  %v11570_v34 = vpop.f32.mrf.mxu0 }
 0x5a0   : >> { %v24433_v22 = vadd.f32 %v19508_v17, %v11353_v4  ;;  %v11351_v1 = vadd.f32 %v11274_v31, %v24232_v18  ;;  %v17136_v18 = vld [vmem:[%s19958_s30 + $0x336] sm:$0xff]  ;;  %v13190_v17 = vpack.c.bf16 %v17139_v28, %v17138_v16 }
 0x5a1   : >> { %v19477_v44 = vpop.f32.mrf.mxu1  ;;  %v19511_v15 = vpop.f32.mrf.mxu0  ;;  %19680 = vmatmul.mubr.msk.bf16.gmra.mxu1 %vm281_vm2, %v12891_v29  ;;  %19714 = vmatmul.mubr.msk.bf16.gmra.mxu0 %vm281_vm2, %v13187_v33  ;;  %v13189_v7 = vpack.c.bf16 %v17137_v42, %v17136_v18  ;;  %v17091_v31 = vld [vmem:[%s19958_s30 + $0x35d] sm:$0xff]  ;;  %v17210_v18 = vld [vmem:[%s19958_s30 + $0x268] sm:$0xff]  ;;  %v17211_v42 = vld [vmem:[%s19958_s30 + $0x270] sm:$0xff] }
 0x5a2   : >> { %v24440_v5 = vadd.f32 %v11570_v34, %v11351_v1  ;;  %v11356_v21 = vadd.f32 %v19477_v44, %v24242_v53  ;;  %19683 = vmatprep.mubr.msk.bf16.mxu1 %vm281_vm2, %v12892_v0  ;;  %19717 = vmatprep.mubr.msk.bf16.mxu0 %vm281_vm2, %v13188_v45  ;;  %v12893_v53 = vpack.c.bf16 %v17087_v25, %v17086_v11  ;;  %v17141_v44 = vld [vmem:[%s19958_s30 + $0x35e] sm:$0xff] }
 0x5a3   : >> { %v11287_v10 = vpop.f32.mrf.mxu1  ;;  %v11583_v32 = vpop.f32.mrf.mxu0 }
 0x5a4   : >> { %v24451_v37 = vadd.f32 %v19511_v15, %v11356_v21  ;;  %v11354_v3 = vadd.f32 %v11287_v10, %v24245_v60  ;;  %v17160_v15 = vld [vmem:[%s19958_s30 + $0x267] sm:$0xff]  ;;  %v17161_v21 = vld [vmem:[%s19958_s30 + $0x26f] sm:$0xff] }
 0x5a5   : >> { %v19478_v9 = vpop.f32.mrf.mxu1  ;;  %v19512_v57 = vpop.f32.mrf.mxu0 }
 0x5a6   : >> { %v24454_v2 = vadd.f32 %v11583_v32, %v11354_v3  ;;  %v11357_v54 = vadd.f32 %v19478_v9, %v24248_v38  ;;  %v17090_v38 = vld [vmem:[%s19958_s30 + $0x355] sm:$0xff]  ;;  %v13472_v9 = vpack.c.bf16 %v17161_v21, %v17160_v15  ;;  %v17214_v15 = vld [vmem:[%s19958_s30 + $0x288] sm:$0xff] }
 0x5a7   : >> { %v11290_v29 = vpop.f32.mrf.mxu1  ;;  %v11586_v33 = vpop.f32.mrf.mxu0 }
 0x5a8   : >> { %v24457_v4 = vadd.f32 %v19512_v57, %v11357_v54  ;;  %v11355_v60 = vadd.f32 %v11290_v29, %v24254_v58  ;;  %v17140_v58 = vld [vmem:[%s19958_s30 + $0x356] sm:$0xff]  ;;  %v13768_v57 = vpack.c.bf16 %v17211_v42, %v17210_v18 }
 0x5a9   : >> { %v19481_v0 = vpop.f32.mrf.mxu1  ;;  %v19515_v45 = vpop.f32.mrf.mxu0  ;;  %19684 = vmatmul.mubr.msk.bf16.gmra.mxu1 %vm281_vm2, %v12893_v53  ;;  %19718 = vmatmul.mubr.msk.bf16.gmra.mxu0 %vm281_vm2, %v13189_v7  ;;  %v13191_v16 = vpack.c.bf16 %v17141_v44, %v17140_v58  ;;  %v17165_v44 = vld [vmem:[%s19958_s30 + $0x28f] sm:$0xff] }
 0x5aa   : >> { %v24464_v34 = vadd.f32 %v11586_v33, %v11355_v60  ;;  %v11360_v1 = vadd.f32 %v19481_v0, %v24266_v8  ;;  %19687 = vmatprep.mubr.msk.bf16.mxu1 %vm281_vm2, %v12894_v47  ;;  %19721 = vmatprep.mubr.msk.bf16.mxu0 %vm281_vm2, %v13190_v17  ;;  %v12895_v8 = vpack.c.bf16 %v17091_v31, %v17090_v38  ;;  %v17163_v60 = vld [vmem:[%s19958_s30 + $0x27f] sm:$0xff]  ;;  %v17164_v31 = vld [vmem:[%s19958_s30 + $0x287] sm:$0xff] }
 0x5ab   : >> { %v11303_v11 = vpop.f32.mrf.mxu1  ;;  %v11599_v25 = vpop.f32.mrf.mxu0  ;;  %v17213_v0 = vld [vmem:[%s19958_s30 + $0x280] sm:$0xff] }
 0x5ac   : >> { %v24475_v63 = vadd.f32 %v19515_v45, %v11360_v1  ;;  %v11358_v10 = vadd.f32 %v11303_v11, %v24269_v50  ;;  %v17215_v11 = vld [vmem:[%s19958_s30 + $0x290] sm:$0xff] }
 0x5ad   : >> { %v19482_v32 = vpop.f32.mrf.mxu1  ;;  %v19516_v20 = vpop.f32.mrf.mxu0 }
 0x5ae   : >> { %v24478_v28 = vadd.f32 %v11599_v25, %v11358_v10  ;;  %v11361_v3 = vadd.f32 %v19482_v32, %v24272_v62  ;;  %v17162_v62 = vld [vmem:[%s19958_s30 + $0x277] sm:$0xff] }
 0x5af   : >> { %v11306_v53 = vpop.f32.mrf.mxu1  ;;  %v11602_v7 = vpop.f32.mrf.mxu0  ;;  %v13473_v21 = vpack.c.bf16 %v17163_v60, %v17162_v62  ;;  %v17169_v60 = vld [vmem:[%s19958_s30 + $0x2af] sm:$0xff] }
 0x5b0   : >> { %v24481_v54 = vadd.f32 %v19516_v20, %v11361_v3  ;;  %v11359_v50 = vadd.f32 %v11306_v53, %v24279_v35  ;;  %v17212_v35 = vld [vmem:[%s19958_s30 + $0x278] sm:$0xff] }
 0x5b1   : >> { %v19485_v47 = vpop.f32.mrf.mxu1  ;;  %v19519_v17 = vpop.f32.mrf.mxu0  ;;  %19688 = vmatmul.mubr.msk.bf16.gmra.mxu1 %vm281_vm2, %v12895_v8  ;;  %19722 = vmatmul.mubr.msk.bf16.gmra.mxu0 %vm281_vm2, %v13191_v16  ;;  %v13769_v18 = vpack.c.bf16 %v17213_v0, %v17212_v35  ;;  %v13474_v8 = vpack.c.bf16 %v17165_v44, %v17164_v31  ;;  %v17167_v53 = vld [vmem:[%s19958_s30 + $0x29f] sm:$0xff]  ;;  %v17218_v35 = vld [vmem:[%s19958_s30 + $0x2a8] sm:$0xff]  ;;  %v17219_v0 = vld [vmem:[%s19958_s30 + $0x2b0] sm:$0xff] }
 0x5b2   : >> { %v24487_v29 = vadd.f32 %v11602_v7, %v11359_v50  ;;  %v11364_v33 = vadd.f32 %v19485_v47, %v24288_v19  ;;  %19727 = vmatprep.mubr.msk.bf16.mxu1 %vm281_vm2, %v13472_v9  ;;  %19761 = vmatprep.mubr.msk.bf16.mxu0 %vm281_vm2, %v13768_v57  ;;  %v17217_v47 = vld [vmem:[%s19958_s30 + $0x2a0] sm:$0xff] }
 0x5b3   : >> { %v11319_v45 = vpop.f32.mrf.mxu1  ;;  %v11615_v38 = vpop.f32.mrf.mxu0 }
 0x5b4   : >> { %v24496_v1 = vadd.f32 %v19519_v17, %v11364_v33  ;;  %v11362_v58 = vadd.f32 %v11319_v45, %v24300_v48  ;;  %v13770_v48 = vpack.c.bf16 %v17215_v11, %v17214_v15  ;;  %v17168_v17 = vld [vmem:[%s19958_s30 + $0x2a7] sm:$0xff]  ;;  %v13772_v11 = vpack.c.bf16 %v17219_v0, %v17218_v35 }
 0x5b5   : >> { %v19486_v25 = vpop.f32.mrf.mxu1  ;;  %v19520_v19 = vpop.f32.mrf.mxu0  ;;  %v13476_v15 = vpack.c.bf16 %v17169_v60, %v17168_v17 }
 0x5b6   : >> { %v24502_v42 = vadd.f32 %v11615_v38, %v11362_v58  ;;  %v11365_v10 = vadd.f32 %v19486_v25, %v24303_v14  ;;  %v17166_v14 = vld [vmem:[%s19958_s30 + $0x297] sm:$0xff] }
 0x5b7   : >> { %v11322_v32 = vpop.f32.mrf.mxu1  ;;  %v11618_v20 = vpop.f32.mrf.mxu0 }
 0x5b8   : >> { %v24505_v16 = vadd.f32 %v19520_v19, %v11365_v10  ;;  %v11363_v3 = vadd.f32 %v11322_v32, %v24316_v51  ;;  %v17216_v51 = vld [vmem:[%s19958_s30 + $0x298] sm:$0xff] }
 0x5b9   : >> { %v19525_v9 = vpop.f32.mrf.mxu1  ;;  %v19559_v57 = vpop.f32.mrf.mxu0  ;;  %19728 = vmatmul.mubr.msk.bf16.vlgmr.msra.gmra.mxu1 %vm281_vm2, %v13473_v21  ;;  %19762 = vmatmul.mubr.msk.bf16.vlgmr.msra.gmra.mxu0 %vm281_vm2, %v13769_v18  ;;  %v13771_v31 = vpack.c.bf16 %v17217_v47, %v17216_v51  ;;  %v17171_v32 = vld [vmem:[%s19958_s30 + $0x2bf] sm:$0xff] }
 0x5ba   : >> { %v24512_v7 = vadd.f32 %v11618_v20, %v11363_v3  ;;  %v11928_v50 = vadd.f32 %v19525_v9, %v24329_v30  ;;  %19794 = vmatpush3.bf16.msra.mxu1 %v24307_v6  ;;  %19828 = vmatpush3.bf16.msra.mxu0 %v24310_v24  ;;  %v13475_v24 = vpack.c.bf16 %v17167_v53, %v17166_v14  ;;  %v17172_v3 = vld [vmem:[%s19958_s30 + $0x2c7] sm:$0xff]  ;;  %v17173_v14 = vld [vmem:[%s19958_s30 + $0x2cf] sm:$0xff] }
 0x5bb   : >> { %v11799_v62 = vpop.f32.mrf.mxu1  ;;  %v12095_v33 = vpop.f32.mrf.mxu0  ;;  %19731 = vmatprep.mubr.msk.bf16.mxu1 %vm281_vm2, %v13474_v8  ;;  %19765 = vmatprep.mubr.msk.bf16.mxu0 %vm281_vm2, %v13770_v48  ;;  %v17221_v48 = vld [vmem:[%s19958_s30 + $0x2c0] sm:$0xff]  ;;  %v17222_v53 = vld [vmem:[%s19958_s30 + $0x2c8] sm:$0xff]  ;;  %v13478_v0 = vpack.c.bf16 %v17173_v14, %v17172_v3 }
 0x5bc   : >> { %v24525_v45 = vadd.f32 %v19559_v57, %v11928_v50  ;;  %v11926_v30 = vadd.f32 %v11799_v62, %v24334_v55  ;;  %v17223_v50 = vld [vmem:[%s19958_s30 + $0x2d0] sm:$0xff] }
 0x5bd   : >> { %v19526_v38 = vpop.f32.mrf.mxu1  ;;  %v19560_v6 = vpop.f32.mrf.mxu0 }
 0x5be   : >> { %v24528_v58 = vadd.f32 %v12095_v33, %v11926_v30  ;;  %v11929_v44 = vadd.f32 %v19526_v38, %v24337_v56  ;;  %v17170_v56 = vld [vmem:[%s19958_s30 + $0x2b7] sm:$0xff]  ;;  %v13774_v30 = vpack.c.bf16 %v17223_v50, %v17222_v53 }
 0x5bf   : >> { %v11802_v25 = vpop.f32.mrf.mxu1  ;;  %v12098_v19 = vpop.f32.mrf.mxu0 }
 0x5c0   : >> { %v24531_v21 = vadd.f32 %v19560_v6, %v11929_v44  ;;  %v11927_v55 = vadd.f32 %v11802_v25, %v24344_v26  ;;  %v17220_v26 = vld [vmem:[%s19958_s30 + $0x2b8] sm:$0xff] }
 0x5c1   : >> { %v19529_v18 = vpop.f32.mrf.mxu1  ;;  %v19563_v10 = vpop.f32.mrf.mxu0  ;;  %19732 = vmatmul.mubr.msk.bf16.gmra.mxu1 %vm281_vm2, %v13475_v24  ;;  %19766 = vmatmul.mubr.msk.bf16.gmra.mxu0 %vm281_vm2, %v13771_v31  ;;  %v13773_v33 = vpack.c.bf16 %v17221_v48, %v17220_v26 }
 0x5c2   : >> { %v24538_v20 = vadd.f32 %v12098_v19, %v11927_v55  ;;  %v11932_v8 = vadd.f32 %v19529_v18, %v24355_v39  ;;  %19735 = vmatprep.mubr.msk.bf16.mxu1 %vm281_vm2, %v13476_v15  ;;  %19769 = vmatprep.mubr.msk.bf16.mxu0 %vm281_vm2, %v13772_v11  ;;  %v13477_v39 = vpack.c.bf16 %v17171_v32, %v17170_v56  ;;  %v17175_v15 = vld [vmem:[%s19958_s30 + $0x2df] sm:$0xff]  ;;  %v17176_v55 = vld [vmem:[%s19958_s30 + $0x2e7] sm:$0xff]  ;;  %v17177_v56 = vld [vmem:[%s19958_s30 + $0x2ef] sm:$0xff] }
 0x5c3   : >> { %v11815_v9 = vpop.f32.mrf.mxu1  ;;  %v12111_v57 = vpop.f32.mrf.mxu0  ;;  %v17225_v19 = vld [vmem:[%s19958_s30 + $0x2e0] sm:$0xff]  ;;  %v17226_v32 = vld [vmem:[%s19958_s30 + $0x2e8] sm:$0xff]  ;;  %v13480_v50 = vpack.c.bf16 %v17177_v56, %v17176_v55 }
 0x5c4   : >> { %v24549_v51 = vadd.f32 %v19563_v10, %v11932_v8  ;;  %v11930_v47 = vadd.f32 %v11815_v9, %v24358_v23  ;;  %v17227_v8 = vld [vmem:[%s19958_s30 + $0x2f0] sm:$0xff] }
 0x5c5   : >> { %v19530_v17 = vpop.f32.mrf.mxu1  ;;  %v19564_v62 = vpop.f32.mrf.mxu0 }
 0x5c6   : >> { %v24552_v60 = vadd.f32 %v12111_v57, %v11930_v47  ;;  %v11933_v35 = vadd.f32 %v19530_v17, %v24361_v12  ;;  %v17174_v12 = vld [vmem:[%s19958_s30 + $0x2d7] sm:$0xff]  ;;  %v13776_v47 = vpack.c.bf16 %v17227_v8, %v17226_v32 }
 0x5c7   : >> { %v11818_v38 = vpop.f32.mrf.mxu1  ;;  %v12114_v6 = vpop.f32.mrf.mxu0 }
 0x5c8   : >> { %v24555_v24 = vadd.f32 %v19564_v62, %v11933_v35  ;;  %v11931_v23 = vadd.f32 %v11818_v38, %v24368_v13  ;;  %v17224_v13 = vld [vmem:[%s19958_s30 + $0x2d8] sm:$0xff] }
 0x5c9   : >> { %v19533_v31 = vpop.f32.mrf.mxu1  ;;  %v19567_v44 = vpop.f32.mrf.mxu0  ;;  %19736 = vmatmul.mubr.msk.bf16.gmra.mxu1 %vm281_vm2, %v13477_v39  ;;  %19770 = vmatmul.mubr.msk.bf16.gmra.mxu0 %vm281_vm2, %v13773_v33  ;;  %v13775_v57 = vpack.c.bf16 %v17225_v19, %v17224_v13 }
 0x5ca   : >> { %v24562_v11 = vadd.f32 %v12114_v6, %v11931_v23  ;;  %v11936_v25 = vadd.f32 %v19533_v31, %v24379_v52  ;;  %19739 = vmatprep.mubr.msk.bf16.mxu1 %vm281_vm2, %v13478_v0  ;;  %19773 = vmatprep.mubr.msk.bf16.mxu0 %vm281_vm2, %v13774_v30  ;;  %v13479_v52 = vpack.c.bf16 %v17175_v15, %v17174_v12  ;;  %v17179_v0 = vld [vmem:[%s19958_s30 + $0x2ff] sm:$0xff]  ;;  %v17180_v23 = vld [vmem:[%s19958_s30 + $0x307] sm:$0xff]  ;;  %v17181_v12 = vld [vmem:[%s19958_s30 + $0x30f] sm:$0xff] }
 0x5cb   : >> { %v11831_v18 = vpop.f32.mrf.mxu1  ;;  %v12127_v10 = vpop.f32.mrf.mxu0  ;;  %v17229_v6 = vld [vmem:[%s19958_s30 + $0x300] sm:$0xff]  ;;  %v17230_v15 = vld [vmem:[%s19958_s30 + $0x308] sm:$0xff]  ;;  %v13482_v8 = vpack.c.bf16 %v17181_v12, %v17180_v23 }
 0x5cc   : >> { %v24573_v26 = vadd.f32 %v19567_v44, %v11936_v25  ;;  %v11934_v48 = vadd.f32 %v11831_v18, %v24382_v49  ;;  %v17231_v25 = vld [vmem:[%s19958_s30 + $0x310] sm:$0xff] }
 0x5cd   : >> { %v19534_v3 = vpop.f32.mrf.mxu1  ;;  %v19568_v9 = vpop.f32.mrf.mxu0 }
 0x5ce   : >> { %v24576_v14 = vadd.f32 %v12127_v10, %v11934_v48  ;;  %v11937_v53 = vadd.f32 %v19534_v3, %v24385_v41  ;;  %v17178_v41 = vld [vmem:[%s19958_s30 + $0x2f7] sm:$0xff]  ;;  %v13778_v48 = vpack.c.bf16 %v17231_v25, %v17230_v15 }
 0x5cf   : >> { %v11834_v17 = vpop.f32.mrf.mxu1  ;;  %v12130_v62 = vpop.f32.mrf.mxu0 }
 0x5d0   : >> { %v24579_v39 = vadd.f32 %v19568_v9, %v11937_v53  ;;  %v11935_v49 = vadd.f32 %v11834_v17, %v24392_v59  ;;  %v17228_v59 = vld [vmem:[%s19958_s30 + $0x2f8] sm:$0xff] }
 0x5d1   : >> { %v19537_v33 = vpop.f32.mrf.mxu1  ;;  %v19571_v35 = vpop.f32.mrf.mxu0  ;;  %19740 = vmatmul.mubr.msk.bf16.gmra.mxu1 %vm281_vm2, %v13479_v52  ;;  %19774 = vmatmul.mubr.msk.bf16.gmra.mxu0 %vm281_vm2, %v13775_v57  ;;  %v13777_v10 = vpack.c.bf16 %v17229_v6, %v17228_v59 }
 0x5d2   : >> { %v24586_v30 = vadd.f32 %v12130_v62, %v11935_v49  ;;  %v11940_v38 = vadd.f32 %v19537_v33, %v24403_v27  ;;  %19743 = vmatprep.mubr.msk.bf16.mxu1 %vm281_vm2, %v13480_v50  ;;  %19777 = vmatprep.mubr.msk.bf16.mxu0 %vm281_vm2, %v13776_v47  ;;  %v13481_v27 = vpack.c.bf16 %v17179_v0, %v17178_v41  ;;  %v17183_v50 = vld [vmem:[%s19958_s30 + $0x31f] sm:$0xff]  ;;  %v17184_v49 = vld [vmem:[%s19958_s30 + $0x327] sm:$0xff]  ;;  %v17185_v41 = vld [vmem:[%s19958_s30 + $0x32f] sm:$0xff] }
 0x5d3   : >> { %v11847_v31 = vpop.f32.mrf.mxu1  ;;  %v12143_v44 = vpop.f32.mrf.mxu0  ;;  %v17233_v62 = vld [vmem:[%s19958_s30 + $0x320] sm:$0xff]  ;;  %v17234_v0 = vld [vmem:[%s19958_s30 + $0x328] sm:$0xff]  ;;  %v13484_v25 = vpack.c.bf16 %v17185_v41, %v17184_v49 }
 0x5d4   : >> { %v24597_v13 = vadd.f32 %v19571_v35, %v11940_v38  ;;  %v11938_v19 = vadd.f32 %v11847_v31, %v24406_v43  ;;  %v17235_v38 = vld [vmem:[%s19958_s30 + $0x330] sm:$0xff] }
 0x5d5   : >> { %v19538_v55 = vpop.f32.mrf.mxu1  ;;  %v19572_v18 = vpop.f32.mrf.mxu0 }
 0x5d6   : >> { %v24600_v56 = vadd.f32 %v12143_v44, %v11938_v19  ;;  %v11941_v32 = vadd.f32 %v19538_v55, %v24409_v46  ;;  %v17182_v46 = vld [vmem:[%s19958_s30 + $0x317] sm:$0xff]  ;;  %v13780_v19 = vpack.c.bf16 %v17235_v38, %v17234_v0 }
 0x5d7   : >> { %v11850_v3 = vpop.f32.mrf.mxu1  ;;  %v12146_v9 = vpop.f32.mrf.mxu0 }
 0x5d8   : >> { %v24603_v52 = vadd.f32 %v19572_v18, %v11941_v32  ;;  %v11939_v43 = vadd.f32 %v11850_v3, %v24416_v40  ;;  %v17232_v40 = vld [vmem:[%s19958_s30 + $0x318] sm:$0xff] }
 0x5d9   : >> { %v19541_v57 = vpop.f32.mrf.mxu1  ;;  %v19575_v53 = vpop.f32.mrf.mxu0  ;;  %19744 = vmatmul.mubr.msk.bf16.gmra.mxu1 %vm281_vm2, %v13481_v27  ;;  %19778 = vmatmul.mubr.msk.bf16.gmra.mxu0 %vm281_vm2, %v13777_v10  ;;  %v13779_v44 = vpack.c.bf16 %v17233_v62, %v17232_v40 }
 0x5da   : >> { %v24610_v47 = vadd.f32 %v12146_v9, %v11939_v43  ;;  %v11944_v17 = vadd.f32 %v19541_v57, %v24427_v61  ;;  %19747 = vmatprep.mubr.msk.bf16.mxu1 %vm281_vm2, %v13482_v8  ;;  %19781 = vmatprep.mubr.msk.bf16.mxu0 %vm281_vm2, %v13778_v48  ;;  %v13483_v61 = vpack.c.bf16 %v17183_v50, %v17182_v46  ;;  %v17187_v8 = vld [vmem:[%s19958_s30 + $0x33f] sm:$0xff]  ;;  %v17188_v43 = vld [vmem:[%s19958_s30 + $0x347] sm:$0xff]  ;;  %v17189_v46 = vld [vmem:[%s19958_s30 + $0x34f] sm:$0xff] }
 0x5db   : >> { %v11863_v33 = vpop.f32.mrf.mxu1  ;;  %v12159_v35 = vpop.f32.mrf.mxu0  ;;  %v17237_v9 = vld [vmem:[%s19958_s30 + $0x340] sm:$0xff]  ;;  %v17238_v50 = vld [vmem:[%s19958_s30 + $0x348] sm:$0xff]  ;;  %v13486_v38 = vpack.c.bf16 %v17189_v46, %v17188_v43 }
 0x5dc   : >> { %v24621_v59 = vadd.f32 %v19575_v53, %v11944_v17  ;;  %v11942_v6 = vadd.f32 %v11863_v33, %v24430_v36  ;;  %v17239_v17 = vld [vmem:[%s19958_s30 + $0x350] sm:$0xff] }
 0x5dd   : >> { %v19542_v23 = vpop.f32.mrf.mxu1  ;;  %v19576_v31 = vpop.f32.mrf.mxu0 }
 0x5de   : >> { %v24624_v12 = vadd.f32 %v12159_v35, %v11942_v6  ;;  %v11945_v15 = vadd.f32 %v19542_v23, %v24433_v22  ;;  %v17186_v22 = vld [vmem:[%s19958_s30 + $0x337] sm:$0xff]  ;;  %v13782_v6 = vpack.c.bf16 %v17239_v17, %v17238_v50 }
 0x5df   : >> { %v11866_v55 = vpop.f32.mrf.mxu1  ;;  %v12162_v18 = vpop.f32.mrf.mxu0 }
 0x5e0   : >> { %v24627_v27 = vadd.f32 %v19576_v31, %v11945_v15  ;;  %v11943_v36 = vadd.f32 %v11866_v55, %v24440_v5  ;;  %v17236_v5 = vld [vmem:[%s19958_s30 + $0x338] sm:$0xff] }
 0x5e1   : >> { %v19545_v10 = vpop.f32.mrf.mxu1  ;;  %v19579_v32 = vpop.f32.mrf.mxu0  ;;  %19748 = vmatmul.mubr.msk.bf16.gmra.mxu1 %vm281_vm2, %v13483_v61  ;;  %19782 = vmatmul.mubr.msk.bf16.gmra.mxu0 %vm281_vm2, %v13779_v44  ;;  %v13781_v35 = vpack.c.bf16 %v17237_v9, %v17236_v5 }
 0x5e2   : >> { %v24634_v48 = vadd.f32 %v12162_v18, %v11943_v36  ;;  %v11948_v3 = vadd.f32 %v19545_v10, %v24451_v37  ;;  %19751 = vmatprep.mubr.msk.bf16.mxu1 %vm281_vm2, %v13484_v25  ;;  %19785 = vmatprep.mubr.msk.bf16.mxu0 %vm281_vm2, %v13780_v19  ;;  %v13485_v37 = vpack.c.bf16 %v17187_v8, %v17186_v22  ;;  %v17191_v25 = vld [vmem:[%s19958_s30 + $0x35f] sm:$0xff]  ;;  %v17260_v36 = vld [vmem:[%s19958_s30 + $0x269] sm:$0xff]  ;;  %v17261_v22 = vld [vmem:[%s19958_s30 + $0x271] sm:$0xff] }
 0x5e3   : >> { %v11879_v57 = vpop.f32.mrf.mxu1  ;;  %v12175_v53 = vpop.f32.mrf.mxu0  ;;  %v17241_v18 = vld [vmem:[%s19958_s30 + $0x360] sm:$0xff]  ;;  %v17310_v8 = vld [vmem:[%s19958_s30 + $0x26a] sm:$0xff]  ;;  %v14064_v17 = vpack.c.bf16 %v17261_v22, %v17260_v36 }
 0x5e4   : >> { %v24645_v40 = vadd.f32 %v19579_v32, %v11948_v3  ;;  %v11946_v62 = vadd.f32 %v11879_v57, %v24454_v2  ;;  %v17311_v3 = vld [vmem:[%s19958_s30 + $0x272] sm:$0xff] }
 0x5e5   : >> { %v19546_v49 = vpop.f32.mrf.mxu1  ;;  %v19580_v33 = vpop.f32.mrf.mxu0 }
 0x5e6   : >> { %v24648_v41 = vadd.f32 %v12175_v53, %v11946_v62  ;;  %v11949_v0 = vadd.f32 %v19546_v49, %v24457_v4  ;;  %v17190_v4 = vld [vmem:[%s19958_s30 + $0x357] sm:$0xff]  ;;  %v14360_v62 = vpack.c.bf16 %v17311_v3, %v17310_v8 }
 0x5e7   : >> { %v11882_v23 = vpop.f32.mrf.mxu1  ;;  %v12178_v31 = vpop.f32.mrf.mxu0 }
 0x5e8   : >> { %v24651_v61 = vadd.f32 %v19580_v33, %v11949_v0  ;;  %v11947_v2 = vadd.f32 %v11882_v23, %v24464_v34  ;;  %v17240_v34 = vld [vmem:[%s19958_s30 + $0x358] sm:$0xff] }
 0x5e9   : >> { %v19549_v44 = vpop.f32.mrf.mxu1  ;;  %v19583_v15 = vpop.f32.mrf.mxu0  ;;  %19752 = vmatmul.mubr.msk.bf16.gmra.mxu1 %vm281_vm2, %v13485_v37  ;;  %19786 = vmatmul.mubr.msk.bf16.gmra.mxu0 %vm281_vm2, %v13781_v35  ;;  %v13783_v53 = vpack.c.bf16 %v17241_v18, %v17240_v34 }
 0x5ea   : >> { %v24658_v19 = vadd.f32 %v12178_v31, %v11947_v2  ;;  %v11952_v55 = vadd.f32 %v19549_v44, %v24475_v63  ;;  %19755 = vmatprep.mubr.msk.bf16.mxu1 %vm281_vm2, %v13486_v38  ;;  %19789 = vmatprep.mubr.msk.bf16.mxu0 %vm281_vm2, %v13782_v6  ;;  %v13487_v63 = vpack.c.bf16 %v17191_v25, %v17190_v4  ;;  %v17263_v38 = vld [vmem:[%s19958_s30 + $0x281] sm:$0xff]  ;;  %v17264_v2 = vld [vmem:[%s19958_s30 + $0x289] sm:$0xff]  ;;  %v17265_v4 = vld [vmem:[%s19958_s30 + $0x291] sm:$0xff] }
 0x5eb   : >> { %v11895_v10 = vpop.f32.mrf.mxu1  ;;  %v12191_v32 = vpop.f32.mrf.mxu0  ;;  %v17313_v31 = vld [vmem:[%s19958_s30 + $0x282] sm:$0xff]  ;;  %v17314_v25 = vld [vmem:[%s19958_s30 + $0x28a] sm:$0xff]  ;;  %v14066_v3 = vpack.c.bf16 %v17265_v4, %v17264_v2 }
 0x5ec   : >> { %v24669_v5 = vadd.f32 %v19583_v15, %v11952_v55  ;;  %v11950_v9 = vadd.f32 %v11895_v10, %v24478_v28  ;;  %v17315_v55 = vld [vmem:[%s19958_s30 + $0x292] sm:$0xff] }
 0x5ed   : >> { %v19550_v43 = vpop.f32.mrf.mxu1  ;;  %v19584_v57 = vpop.f32.mrf.mxu0 }
 0x5ee   : >> { %v24672_v46 = vadd.f32 %v12191_v32, %v11950_v9  ;;  %v11953_v50 = vadd.f32 %v19550_v43, %v24481_v54  ;;  %v17262_v54 = vld [vmem:[%s19958_s30 + $0x279] sm:$0xff]  ;;  %v14362_v9 = vpack.c.bf16 %v17315_v55, %v17314_v25 }
 0x5ef   : >> { %v11898_v49 = vpop.f32.mrf.mxu1  ;;  %v12194_v33 = vpop.f32.mrf.mxu0 }
 0x5f0   : >> { %v24675_v37 = vadd.f32 %v19584_v57, %v11953_v50  ;;  %v11951_v28 = vadd.f32 %v11898_v49, %v24487_v29  ;;  %v17312_v29 = vld [vmem:[%s19958_s30 + $0x27a] sm:$0xff] }
 0x5f1   : >> { %v19553_v35 = vpop.f32.mrf.mxu1  ;;  %v19587_v0 = vpop.f32.mrf.mxu0  ;;  %19756 = vmatmul.mubr.msk.bf16.gmra.mxu1 %vm281_vm2, %v13487_v63  ;;  %19790 = vmatmul.mubr.msk.bf16.gmra.mxu0 %vm281_vm2, %v13783_v53  ;;  %v14361_v32 = vpack.c.bf16 %v17313_v31, %v17312_v29 }
 0x5f2   : >> { %v24682_v6 = vadd.f32 %v12194_v33, %v11951_v28  ;;  %v11956_v23 = vadd.f32 %v19553_v35, %v24496_v1  ;;  %19795 = vmatprep.mubr.msk.bf16.mxu1 %vm281_vm2, %v14064_v17  ;;  %19829 = vmatprep.mubr.msk.bf16.mxu0 %vm281_vm2, %v14360_v62  ;;  %v14065_v1 = vpack.c.bf16 %v17263_v38, %v17262_v54  ;;  %v17267_v17 = vld [vmem:[%s19958_s30 + $0x2a1] sm:$0xff]  ;;  %v17268_v28 = vld [vmem:[%s19958_s30 + $0x2a9] sm:$0xff]  ;;  %v17269_v54 = vld [vmem:[%s19958_s30 + $0x2b1] sm:$0xff] }
 0x5f3   : >> { %v11911_v44 = vpop.f32.mrf.mxu1  ;;  %v12207_v15 = vpop.f32.mrf.mxu0  ;;  %v17317_v33 = vld [vmem:[%s19958_s30 + $0x2a2] sm:$0xff]  ;;  %v17318_v38 = vld [vmem:[%s19958_s30 + $0x2aa] sm:$0xff]  ;;  %v14068_v55 = vpack.c.bf16 %v17269_v54, %v17268_v28 }
 0x5f4   : >> { %v24693_v34 = vadd.f32 %v19587_v0, %v11956_v23  ;;  %v11954_v18 = vadd.f32 %v11911_v44, %v24502_v42  ;;  %v17319_v23 = vld [vmem:[%s19958_s30 + $0x2b2] sm:$0xff] }
 0x5f5   : >> { %v19554_v36 = vpop.f32.mrf.mxu1  ;;  %v19588_v10 = vpop.f32.mrf.mxu0 }
 0x5f6   : >> { %v24696_v22 = vadd.f32 %v12207_v15, %v11954_v18  ;;  %v11957_v8 = vadd.f32 %v19554_v36, %v24505_v16  ;;  %v17266_v16 = vld [vmem:[%s19958_s30 + $0x299] sm:$0xff]  ;;  %v14364_v18 = vpack.c.bf16 %v17319_v23, %v17318_v38 }
 0x5f7   : >> { %v11914_v43 = vpop.f32.mrf.mxu1  ;;  %v12210_v57 = vpop.f32.mrf.mxu0 }
 0x5f8   : >> { %v24699_v63 = vadd.f32 %v19588_v10, %v11957_v8  ;;  %v11955_v42 = vadd.f32 %v11914_v43, %v24512_v7  ;;  %v17316_v7 = vld [vmem:[%s19958_s30 + $0x29a] sm:$0xff] }
 0x5f9   : >> { %v19593_v53 = vpop.f32.mrf.mxu1  ;;  %v19627_v50 = vpop.f32.mrf.mxu0  ;;  %19796 = vmatmul.mubr.msk.bf16.vlgmr.msra.gmra.mxu1 %vm281_vm2, %v14065_v1  ;;  %19830 = vmatmul.mubr.msk.bf16.vlgmr.msra.gmra.mxu0 %vm281_vm2, %v14361_v32  ;;  %v14363_v15 = vpack.c.bf16 %v17317_v33, %v17316_v7 }
 0x5fa   : >> { %v24706_v62 = vadd.f32 %v12210_v57, %v11955_v42  ;;  %v12520_v49 = vadd.f32 %v19593_v53, %v24525_v45  ;;  %19799 = vmatprep.mubr.msk.bf16.mxu1 %vm281_vm2, %v14066_v3  ;;  %19833 = vmatprep.mubr.msk.bf16.mxu0 %vm281_vm2, %v14362_v9  ;;  %v14067_v45 = vpack.c.bf16 %v17267_v17, %v17266_v16  ;;  %v17271_v3 = vld [vmem:[%s19958_s30 + $0x2c1] sm:$0xff]  ;;  %v17272_v42 = vld [vmem:[%s19958_s30 + $0x2c9] sm:$0xff]  ;;  %v17273_v16 = vld [vmem:[%s19958_s30 + $0x2d1] sm:$0xff] }
 0x5fb   : >> { %v12391_v35 = vpop.f32.mrf.mxu1  ;;  %v12687_v0 = vpop.f32.mrf.mxu0  ;;  %v17321_v57 = vld [vmem:[%s19958_s30 + $0x2c2] sm:$0xff]  ;;  %v17322_v17 = vld [vmem:[%s19958_s30 + $0x2ca] sm:$0xff]  ;;  %v14070_v23 = vpack.c.bf16 %v17273_v16, %v17272_v42 }
 0x5fc   : >> { %v24717_v29 = vadd.f32 %v19627_v50, %v12520_v49  ;;  %v12518_v31 = vadd.f32 %v12391_v35, %v24528_v58  ;;  %v17323_v49 = vld [vmem:[%s19958_s30 + $0x2d2] sm:$0xff] }
 0x5fd   : >> { %v19594_v2 = vpop.f32.mrf.mxu1  ;;  %v19628_v44 = vpop.f32.mrf.mxu0 }
 0x5fe   : >> { %v24720_v4 = vadd.f32 %v12687_v0, %v12518_v31  ;;  %v12521_v25 = vadd.f32 %v19594_v2, %v24531_v21  ;;  %v17270_v21 = vld [vmem:[%s19958_s30 + $0x2b9] sm:$0xff]  ;;  %v14366_v31 = vpack.c.bf16 %v17323_v49, %v17322_v17 }
 0x5ff   : >> { %v12394_v36 = vpop.f32.mrf.mxu1  ;;  %v12690_v10 = vpop.f32.mrf.mxu0 }
 0x600   : >> { %v24723_v1 = vadd.f32 %v19628_v44, %v12521_v25  ;;  %v12519_v58 = vadd.f32 %v12394_v36, %v24538_v20  ;;  %v17320_v20 = vld [vmem:[%s19958_s30 + $0x2ba] sm:$0xff] }
 0x601   : >> { %v19597_v32 = vpop.f32.mrf.mxu1  ;;  %v19631_v8 = vpop.f32.mrf.mxu0  ;;  %19800 = vmatmul.mubr.msk.bf16.gmra.mxu1 %vm281_vm2, %v14067_v45  ;;  %19834 = vmatmul.mubr.msk.bf16.gmra.mxu0 %vm281_vm2, %v14363_v15  ;;  %v14365_v0 = vpack.c.bf16 %v17321_v57, %v17320_v20 }
 0x602   : >> { %v24730_v9 = vadd.f32 %v12690_v10, %v12519_v58  ;;  %v12524_v43 = vadd.f32 %v19597_v32, %v24549_v51  ;;  %19803 = vmatprep.mubr.msk.bf16.mxu1 %vm281_vm2, %v14068_v55  ;;  %19837 = vmatprep.mubr.msk.bf16.mxu0 %vm281_vm2, %v14364_v18  ;;  %v14069_v51 = vpack.c.bf16 %v17271_v3, %v17270_v21  ;;  %v17275_v55 = vld [vmem:[%s19958_s30 + $0x2e1] sm:$0xff]  ;;  %v17276_v58 = vld [vmem:[%s19958_s30 + $0x2e9] sm:$0xff]  ;;  %v17277_v21 = vld [vmem:[%s19958_s30 + $0x2f1] sm:$0xff] }
 0x603   : >> { %v12407_v53 = vpop.f32.mrf.mxu1  ;;  %v12703_v50 = vpop.f32.mrf.mxu0  ;;  %v17325_v10 = vld [vmem:[%s19958_s30 + $0x2e2] sm:$0xff]  ;;  %v17326_v3 = vld [vmem:[%s19958_s30 + $0x2ea] sm:$0xff]  ;;  %v14072_v49 = vpack.c.bf16 %v17277_v21, %v17276_v58 }
 0x604   : >> { %v24741_v7 = vadd.f32 %v19631_v8, %v12524_v43  ;;  %v12522_v33 = vadd.f32 %v12407_v53, %v24552_v60  ;;  %v17327_v43 = vld [vmem:[%s19958_s30 + $0x2f2] sm:$0xff] }
 0x605   : >> { %v19598_v28 = vpop.f32.mrf.mxu1  ;;  %v19632_v35 = vpop.f32.mrf.mxu0 }
 0x606   : >> { %v24744_v54 = vadd.f32 %v12703_v50, %v12522_v33  ;;  %v12525_v38 = vadd.f32 %v19598_v28, %v24555_v24  ;;  %v17274_v24 = vld [vmem:[%s19958_s30 + $0x2d9] sm:$0xff]  ;;  %v14368_v33 = vpack.c.bf16 %v17327_v43, %v17326_v3 }
 0x607   : >> { %v12410_v2 = vpop.f32.mrf.mxu1  ;;  %v12706_v44 = vpop.f32.mrf.mxu0 }
 0x608   : >> { %v24747_v45 = vadd.f32 %v19632_v35, %v12525_v38  ;;  %v12523_v60 = vadd.f32 %v12410_v2, %v24562_v11  ;;  %v17324_v11 = vld [vmem:[%s19958_s30 + $0x2da] sm:$0xff] }
 0x609   : >> { %v19601_v15 = vpop.f32.mrf.mxu1  ;;  %v19635_v25 = vpop.f32.mrf.mxu0  ;;  %19804 = vmatmul.mubr.msk.bf16.gmra.mxu1 %vm281_vm2, %v14069_v51  ;;  %19838 = vmatmul.mubr.msk.bf16.gmra.mxu0 %vm281_vm2, %v14365_v0  ;;  %v14367_v50 = vpack.c.bf16 %v17325_v10, %v17324_v11 }
 0x60a   : >> { %v24754_v18 = vadd.f32 %v12706_v44, %v12523_v60  ;;  %v12528_v36 = vadd.f32 %v19601_v15, %v24573_v26  ;;  %19807 = vmatprep.mubr.msk.bf16.mxu1 %vm281_vm2, %v14070_v23  ;;  %19841 = vmatprep.mubr.msk.bf16.mxu0 %vm281_vm2, %v14366_v31  ;;  %v14071_v26 = vpack.c.bf16 %v17275_v55, %v17274_v24  ;;  %v17279_v23 = vld [vmem:[%s19958_s30 + $0x301] sm:$0xff]  ;;  %v17280_v60 = vld [vmem:[%s19958_s30 + $0x309] sm:$0xff]  ;;  %v17281_v24 = vld [vmem:[%s19958_s30 + $0x311] sm:$0xff] }
 0x60b   : >> { %v12423_v32 = vpop.f32.mrf.mxu1  ;;  %v12719_v8 = vpop.f32.mrf.mxu0  ;;  %v17329_v44 = vld [vmem:[%s19958_s30 + $0x302] sm:$0xff]  ;;  %v17330_v55 = vld [vmem:[%s19958_s30 + $0x30a] sm:$0xff]  ;;  %v14074_v43 = vpack.c.bf16 %v17281_v24, %v17280_v60 }
 0x60c   : >> { %v24765_v20 = vadd.f32 %v19635_v25, %v12528_v36  ;;  %v12526_v57 = vadd.f32 %v12423_v32, %v24576_v14  ;;  %v17331_v36 = vld [vmem:[%s19958_s30 + $0x312] sm:$0xff] }
 0x60d   : >> { %v19602_v42 = vpop.f32.mrf.mxu1  ;;  %v19636_v53 = vpop.f32.mrf.mxu0 }
 0x60e   : >> { %v24768_v16 = vadd.f32 %v12719_v8, %v12526_v57  ;;  %v12529_v17 = vadd.f32 %v19602_v42, %v24579_v39  ;;  %v17278_v39 = vld [vmem:[%s19958_s30 + $0x2f9] sm:$0xff]  ;;  %v14370_v57 = vpack.c.bf16 %v17331_v36, %v17330_v55 }
 0x60f   : >> { %v12426_v28 = vpop.f32.mrf.mxu1  ;;  %v12722_v35 = vpop.f32.mrf.mxu0 }
 0x610   : >> { %v24771_v51 = vadd.f32 %v19636_v53, %v12529_v17  ;;  %v12527_v14 = vadd.f32 %v12426_v28, %v24586_v30  ;;  %v17328_v30 = vld [vmem:[%s19958_s30 + $0x2fa] sm:$0xff] }
 0x611   : >> { %v19605_v0 = vpop.f32.mrf.mxu1  ;;  %v19639_v38 = vpop.f32.mrf.mxu0  ;;  %19808 = vmatmul.mubr.msk.bf16.gmra.mxu1 %vm281_vm2, %v14071_v26  ;;  %19842 = vmatmul.mubr.msk.bf16.gmra.mxu0 %vm281_vm2, %v14367_v50  ;;  %v14369_v8 = vpack.c.bf16 %v17329_v44, %v17328_v30 }
 0x612   : >> { %v24778_v31 = vadd.f32 %v12722_v35, %v12527_v14  ;;  %v12532_v2 = vadd.f32 %v19605_v0, %v24597_v13  ;;  %19811 = vmatprep.mubr.msk.bf16.mxu1 %vm281_vm2, %v14072_v49  ;;  %19845 = vmatprep.mubr.msk.bf16.mxu0 %vm281_vm2, %v14368_v33  ;;  %v14073_v13 = vpack.c.bf16 %v17279_v23, %v17278_v39  ;;  %v17283_v49 = vld [vmem:[%s19958_s30 + $0x321] sm:$0xff]  ;;  %v17284_v14 = vld [vmem:[%s19958_s30 + $0x329] sm:$0xff]  ;;  %v17285_v39 = vld [vmem:[%s19958_s30 + $0x331] sm:$0xff] }
 0x613   : >> { %v12439_v15 = vpop.f32.mrf.mxu1  ;;  %v12735_v25 = vpop.f32.mrf.mxu0  ;;  %v17333_v35 = vld [vmem:[%s19958_s30 + $0x322] sm:$0xff]  ;;  %v17334_v23 = vld [vmem:[%s19958_s30 + $0x32a] sm:$0xff]  ;;  %v14076_v36 = vpack.c.bf16 %v17285_v39, %v17284_v14 }
 0x614   : >> { %v24789_v11 = vadd.f32 %v19639_v38, %v12532_v2  ;;  %v12530_v10 = vadd.f32 %v12439_v15, %v24600_v56  ;;  %v17335_v2 = vld [vmem:[%s19958_s30 + $0x332] sm:$0xff] }
 0x615   : >> { %v19606_v58 = vpop.f32.mrf.mxu1  ;;  %v19640_v32 = vpop.f32.mrf.mxu0 }
 0x616   : >> { %v24792_v21 = vadd.f32 %v12735_v25, %v12530_v10  ;;  %v12533_v3 = vadd.f32 %v19606_v58, %v24603_v52  ;;  %v17282_v52 = vld [vmem:[%s19958_s30 + $0x319] sm:$0xff]  ;;  %v14372_v10 = vpack.c.bf16 %v17335_v2, %v17334_v23 }
 0x617   : >> { %v12442_v42 = vpop.f32.mrf.mxu1  ;;  %v12738_v53 = vpop.f32.mrf.mxu0 }
 0x618   : >> { %v24795_v26 = vadd.f32 %v19640_v32, %v12533_v3  ;;  %v12531_v56 = vadd.f32 %v12442_v42, %v24610_v47  ;;  %v17332_v47 = vld [vmem:[%s19958_s30 + $0x31a] sm:$0xff] }
 0x619   : >> { %v19609_v50 = vpop.f32.mrf.mxu1  ;;  %v19643_v17 = vpop.f32.mrf.mxu0  ;;  %19812 = vmatmul.mubr.msk.bf16.gmra.mxu1 %vm281_vm2, %v14073_v13  ;;  %19846 = vmatmul.mubr.msk.bf16.gmra.mxu0 %vm281_vm2, %v14369_v8  ;;  %v14371_v25 = vpack.c.bf16 %v17333_v35, %v17332_v47 }
 0x61a   : >> { %v24802_v33 = vadd.f32 %v12738_v53, %v12531_v56  ;;  %v12536_v28 = vadd.f32 %v19609_v50, %v24621_v59  ;;  %19815 = vmatprep.mubr.msk.bf16.mxu1 %vm281_vm2, %v14074_v43  ;;  %19849 = vmatprep.mubr.msk.bf16.mxu0 %vm281_vm2, %v14370_v57  ;;  %v14075_v59 = vpack.c.bf16 %v17283_v49, %v17282_v52  ;;  %v17287_v43 = vld [vmem:[%s19958_s30 + $0x341] sm:$0xff]  ;;  %v17288_v56 = vld [vmem:[%s19958_s30 + $0x349] sm:$0xff]  ;;  %v17289_v52 = vld [vmem:[%s19958_s30 + $0x351] sm:$0xff] }
 0x61b   : >> { %v12455_v0 = vpop.f32.mrf.mxu1  ;;  %v12751_v38 = vpop.f32.mrf.mxu0  ;;  %v17337_v53 = vld [vmem:[%s19958_s30 + $0x342] sm:$0xff]  ;;  %v17338_v49 = vld [vmem:[%s19958_s30 + $0x34a] sm:$0xff]  ;;  %v14078_v2 = vpack.c.bf16 %v17289_v52, %v17288_v56 }
 0x61c   : >> { %v24813_v30 = vadd.f32 %v19643_v17, %v12536_v28  ;;  %v12534_v44 = vadd.f32 %v12455_v0, %v24624_v12  ;;  %v17339_v28 = vld [vmem:[%s19958_s30 + $0x352] sm:$0xff] }
 0x61d   : >> { %v19610_v60 = vpop.f32.mrf.mxu1  ;;  %v19644_v15 = vpop.f32.mrf.mxu0 }
 0x61e   : >> { %v24816_v24 = vadd.f32 %v12751_v38, %v12534_v44  ;;  %v12537_v55 = vadd.f32 %v19610_v60, %v24627_v27  ;;  %v17286_v27 = vld [vmem:[%s19958_s30 + $0x339] sm:$0xff]  ;;  %v14374_v44 = vpack.c.bf16 %v17339_v28, %v17338_v49 }
 0x61f   : >> { %v12458_v58 = vpop.f32.mrf.mxu1  ;;  %v12754_v32 = vpop.f32.mrf.mxu0 }
 0x620   : >> { %v24819_v13 = vadd.f32 %v19644_v15, %v12537_v55  ;;  %v12535_v12 = vadd.f32 %v12458_v58, %v24634_v48  ;;  %v17336_v48 = vld [vmem:[%s19958_s30 + $0x33a] sm:$0xff] }
 0x621   : >> { %v19613_v8 = vpop.f32.mrf.mxu1  ;;  %v19647_v3 = vpop.f32.mrf.mxu0  ;;  %19816 = vmatmul.mubr.msk.bf16.gmra.mxu1 %vm281_vm2, %v14075_v59  ;;  %19850 = vmatmul.mubr.msk.bf16.gmra.mxu0 %vm281_vm2, %v14371_v25  ;;  %v14373_v38 = vpack.c.bf16 %v17337_v53, %v17336_v48  ;;  %v17291_v58 = vld [vmem:[%s19958_s30 + $0x361] sm:$0xff] }
 0x622   : >> { %v24826_v57 = vadd.f32 %v12754_v32, %v12535_v12  ;;  %v12540_v42 = vadd.f32 %v19613_v8, %v24645_v40  ;;  %19819 = vmatprep.mubr.msk.bf16.mxu1 %vm281_vm2, %v14076_v36  ;;  %19853 = vmatprep.mubr.msk.bf16.mxu0 %vm281_vm2, %v14372_v10  ;;  %v14077_v40 = vpack.c.bf16 %v17287_v43, %v17286_v27  ;;  %v17290_v36 = vld [vmem:[%s19958_s30 + $0x359] sm:$0xff]  ;;  %v17341_v12 = vld [vmem:[%s19958_s30 + $0x362] sm:$0xff] }
 0x623   : >> { %v12471_v50 = vpop.f32.mrf.mxu1  ;;  %v12767_v17 = vpop.f32.mrf.mxu0  ;;  %v17340_v32 = vld [vmem:[%s19958_s30 + $0x35a] sm:$0xff]  ;;  %v14079_v48 = vpack.c.bf16 %v17291_v58, %v17290_v36 }
 0x624   : >> { %v24837_v47 = vadd.f32 %v19647_v3, %v12540_v42  ;;  %v12538_v35 = vadd.f32 %v12471_v50, %v24648_v41  ;;  %v14375_v53 = vpack.c.bf16 %v17341_v12, %v17340_v32 }
 0x625   : >> { %v19614_v14 = vpop.f32.mrf.mxu1  ;;  %v19648_v0 = vpop.f32.mrf.mxu0 }
 0x626   : >> { %v24840_v39 = vadd.f32 %v12767_v17, %v12538_v35  ;;  %v12541_v23 = vadd.f32 %v19614_v14, %v24651_v61 }
 0x627   : >> { %v12474_v60 = vpop.f32.mrf.mxu1  ;;  %v12770_v15 = vpop.f32.mrf.mxu0 }
 0x628   : >> { %v24843_v59 = vadd.f32 %v19648_v0, %v12541_v23  ;;  %v12539_v41 = vadd.f32 %v12474_v60, %v24658_v19 }
 0x629   : >> { %v19617_v25 = vpop.f32.mrf.mxu1  ;;  %v19651_v55 = vpop.f32.mrf.mxu0  ;;  %19820 = vmatmul.mubr.msk.bf16.gmra.mxu1 %vm281_vm2, %v14077_v40  ;;  %19854 = vmatmul.mubr.msk.bf16.gmra.mxu0 %vm281_vm2, %v14373_v38 }
 0x62a   : >> { %v24849_v10 = vadd.f32 %v12770_v15, %v12539_v41  ;;  %v12544_v61 = vadd.f32 %v19617_v25, %v24669_v5  ;;  %19823 = vmatprep.mubr.msk.bf16.mxu1 %vm281_vm2, %v14078_v2  ;;  %19857 = vmatprep.mubr.msk.bf16.mxu0 %vm281_vm2, %v14374_v44 }
 0x62b   : >> { %v12487_v8 = vpop.f32.mrf.mxu1  ;;  %v12783_v19 = vpop.f32.mrf.mxu0 }
 0x62c   : >> { %v24857_v3 = vadd.f32 %v19651_v55, %v12544_v61  ;;  %v12542_v27 = vadd.f32 %v12487_v8, %v24672_v46 }
 0x62d   : >> { %v19618_v43 = vpop.f32.mrf.mxu1  ;;  %v19652_v42 = vpop.f32.mrf.mxu0 }
 0x62e   : >> { %v24860_v56 = vadd.f32 %v12783_v19, %v12542_v27  ;;  %v12545_v5 = vadd.f32 %v19618_v43, %v24675_v37 }
 0x62f   : >> { %v12490_v50 = vpop.f32.mrf.mxu1  ;;  %v12786_v17 = vpop.f32.mrf.mxu0 }
 0x630   : >> { %v24863_v52 = vadd.f32 %v19652_v42, %v12545_v5  ;;  %v12543_v49 = vadd.f32 %v12490_v50, %v24682_v6 }
 0x631   : >> { %v19621_v28 = vpop.f32.mrf.mxu1  ;;  %v19655_v35 = vpop.f32.mrf.mxu0  ;;  %19824 = vmatmul.mubr.msk.bf16.gmra.mxu1 %vm281_vm2, %v14079_v48  ;;  %19858 = vmatmul.mubr.msk.bf16.gmra.mxu0 %vm281_vm2, %v14375_v53 }
 0x632   : >> { %v24868_v46 = vadd.f32 %v12786_v17, %v12543_v49  ;;  %v12548_v14 = vadd.f32 %v19621_v28, %v24693_v34 }
 0x633   : >> { %v12503_v0 = vpop.f32.mrf.mxu1  ;;  %v12799_v40 = vpop.f32.mrf.mxu0 }
 0x634   : >> { %v24871_v38 = vadd.f32 %v19655_v35, %v12548_v14  ;;  %v12546_v37 = vadd.f32 %v12503_v0, %v24696_v22 }
 0x635   : >> { %v19622_v23 = vpop.f32.mrf.mxu1  ;;  %v19656_v2 = vpop.f32.mrf.mxu0 }
 0x636   : >> { %v24874_v44 = vadd.f32 %v12799_v40, %v12546_v37  ;;  %v12549_v6 = vadd.f32 %v19622_v23, %v24699_v63 }
 0x637   : >> { %v12506_v60 = vpop.f32.mrf.mxu1  ;;  %v12802_v15 = vpop.f32.mrf.mxu0 }
 0x638   : >> { %v24877_v41 = vadd.f32 %v19656_v2, %v12549_v6  ;;  %v12547_v25 = vadd.f32 %v12506_v60, %v24706_v62 }
 0x639   : >> { %v19661_v55 = vpop.f32.mrf.mxu1  ;;  %v19695_v34 = vpop.f32.mrf.mxu0 }
 0x63a   : >> { %v24880_v36 = vadd.f32 %v12802_v15, %v12547_v25  ;;  %v13112_v61 = vadd.f32 %v19661_v55, %v24717_v29 }
 0x63b   : >> { %v12983_v58 = vpop.f32.mrf.mxu1  ;;  %v13279_v22 = vpop.f32.mrf.mxu0 }
 0x63c   : >> { %v24883_v32 = vadd.f32 %v19695_v34, %v13112_v61  ;;  %v13110_v12 = vadd.f32 %v12983_v58, %v24720_v4 }
 0x63d   : >> { %v19662_v8 = vpop.f32.mrf.mxu1  ;;  %v19696_v63 = vpop.f32.mrf.mxu0 }
 0x63e   : >> { %v24886_v19 = vadd.f32 %v13279_v22, %v13110_v12  ;;  %v13113_v27 = vadd.f32 %v19662_v8, %v24723_v1 }
 0x63f   : >> { %v12986_v43 = vpop.f32.mrf.mxu1  ;;  %v13282_v62 = vpop.f32.mrf.mxu0 }
 0x640   : >> { %v24889_v42 = vadd.f32 %v19696_v63, %v13113_v27  ;;  %v13111_v48 = vadd.f32 %v12986_v43, %v24730_v9 }
 0x641   : >> { %v19665_v53 = vpop.f32.mrf.mxu1  ;;  %v19699_v29 = vpop.f32.mrf.mxu0 }
 0x642   : >> { %v24892_v5 = vadd.f32 %v13282_v62, %v13111_v48  ;;  %v13116_v50 = vadd.f32 %v19665_v53, %v24741_v7 }
 0x643   : >> { %v12999_v17 = vpop.f32.mrf.mxu1  ;;  %v13295_v4 = vpop.f32.mrf.mxu0 }
 0x644   : >> { %v24895_v49 = vadd.f32 %v19699_v29, %v13116_v50  ;;  %v13114_v28 = vadd.f32 %v12999_v17, %v24744_v54 }
 0x645   : >> { %v19666_v35 = vpop.f32.mrf.mxu1  ;;  %v19700_v1 = vpop.f32.mrf.mxu0 }
 0x646   : >> { %v24898_v14 = vadd.f32 %v13295_v4, %v13114_v28  ;;  %v13117_v0 = vadd.f32 %v19666_v35, %v24747_v45 }
 0x647   : >> { %v13002_v40 = vpop.f32.mrf.mxu1  ;;  %v13298_v9 = vpop.f32.mrf.mxu0 }
 0x648   : >> { %v24901_v37 = vadd.f32 %v19700_v1, %v13117_v0  ;;  %v13115_v23 = vadd.f32 %v13002_v40, %v24754_v18 }
 0x649   : >> { %v19669_v2 = vpop.f32.mrf.mxu1  ;;  %v19703_v7 = vpop.f32.mrf.mxu0 }
 0x64a   : >> { %v24904_v6 = vadd.f32 %v13298_v9, %v13115_v23  ;;  %v13120_v60 = vadd.f32 %v19669_v2, %v24765_v20 }
 0x64b   : >> { %v13015_v15 = vpop.f32.mrf.mxu1  ;;  %v13311_v54 = vpop.f32.mrf.mxu0 }
 0x64c   : >> { %v24907_v25 = vadd.f32 %v19703_v7, %v13120_v60  ;;  %v13118_v55 = vadd.f32 %v13015_v15, %v24768_v16 }
 0x64d   : >> { %v19670_v34 = vpop.f32.mrf.mxu1  ;;  %v19704_v45 = vpop.f32.mrf.mxu0 }
 0x64e   : >> { %v24910_v61 = vadd.f32 %v13311_v54, %v13118_v55  ;;  %v13121_v58 = vadd.f32 %v19670_v34, %v24771_v51 }
 0x64f   : >> { %v13018_v22 = vpop.f32.mrf.mxu1  ;;  %v13314_v18 = vpop.f32.mrf.mxu0 }
 0x650   : >> { %v24913_v12 = vadd.f32 %v19704_v45, %v13121_v58  ;;  %v13119_v8 = vadd.f32 %v13018_v22, %v24778_v31 }
 0x651   : >> { %v19673_v63 = vpop.f32.mrf.mxu1  ;;  %v19707_v20 = vpop.f32.mrf.mxu0 }
 0x652   : >> { %v24916_v27 = vadd.f32 %v13314_v18, %v13119_v8  ;;  %v13124_v43 = vadd.f32 %v19673_v63, %v24789_v11 }
 0x653   : >> { %v13031_v62 = vpop.f32.mrf.mxu1  ;;  %v13327_v16 = vpop.f32.mrf.mxu0 }
 0x654   : >> { %v24919_v48 = vadd.f32 %v19707_v20, %v13124_v43  ;;  %v13122_v53 = vadd.f32 %v13031_v62, %v24792_v21 }
 0x655   : >> { %v19674_v29 = vpop.f32.mrf.mxu1  ;;  %v19708_v51 = vpop.f32.mrf.mxu0 }
 0x656   : >> { %v24922_v50 = vadd.f32 %v13327_v16, %v13122_v53  ;;  %v13125_v17 = vadd.f32 %v19674_v29, %v24795_v26 }
 0x657   : >> { %v13034_v4 = vpop.f32.mrf.mxu1  ;;  %v13330_v31 = vpop.f32.mrf.mxu0 }
 0x658   : >> { %v24925_v28 = vadd.f32 %v19708_v51, %v13125_v17  ;;  %v13123_v35 = vadd.f32 %v13034_v4, %v24802_v33 }
 0x659   : >> { %v19677_v1 = vpop.f32.mrf.mxu1  ;;  %v19711_v11 = vpop.f32.mrf.mxu0 }
 0x65a   : >> { %v24928_v0 = vadd.f32 %v13330_v31, %v13123_v35  ;;  %v13128_v40 = vadd.f32 %v19677_v1, %v24813_v30 }
 0x65b   : >> { %v13047_v9 = vpop.f32.mrf.mxu1  ;;  %v13343_v21 = vpop.f32.mrf.mxu0 }
 0x65c   : >> { %v24931_v23 = vadd.f32 %v19711_v11, %v13128_v40  ;;  %v13126_v2 = vadd.f32 %v13047_v9, %v24816_v24 }
 0x65d   : >> { %v19678_v7 = vpop.f32.mrf.mxu1  ;;  %v19712_v26 = vpop.f32.mrf.mxu0 }
 0x65e   : >> { %v24934_v60 = vadd.f32 %v13343_v21, %v13126_v2  ;;  %v13129_v15 = vadd.f32 %v19678_v7, %v24819_v13 }
 0x65f   : >> { %v13050_v54 = vpop.f32.mrf.mxu1  ;;  %v13346_v33 = vpop.f32.mrf.mxu0 }
 0x660   : >> { %v24937_v55 = vadd.f32 %v19712_v26, %v13129_v15  ;;  %v13127_v34 = vadd.f32 %v13050_v54, %v24826_v57 }
 0x661   : >> { %v19681_v45 = vpop.f32.mrf.mxu1  ;;  %v19715_v30 = vpop.f32.mrf.mxu0 }
 0x662   : >> { %25316 = vst [vmem:[#allocation2_spill] sm:$0xff] %v24937_v55  ;;  %v24940_v58 = vadd.f32 %v13346_v33, %v13127_v34  ;;  %v13132_v22 = vadd.f32 %v19681_v45, %v24837_v47 }
 0x663   : >> { %v13063_v18 = vpop.f32.mrf.mxu1  ;;  %v13359_v24 = vpop.f32.mrf.mxu0 }
 0x664   : >> { %25317 = vst [vmem:[#allocation3_spill] sm:$0xff] %v24940_v58  ;;  %v24943_v8 = vadd.f32 %v19715_v30, %v13132_v22  ;;  %v13130_v63 = vadd.f32 %v13063_v18, %v24840_v39 }
 0x665   : >> { %v19682_v20 = vpop.f32.mrf.mxu1  ;;  %v19716_v13 = vpop.f32.mrf.mxu0 }
 0x666   : >> { %25318 = vst [vmem:[#allocation4_spill] sm:$0xff] %v24943_v8  ;;  %v24946_v43 = vadd.f32 %v13359_v24, %v13130_v63  ;;  %v13133_v62 = vadd.f32 %v19682_v20, %v24843_v59 }
 0x667   : >> { %v13066_v16 = vpop.f32.mrf.mxu1  ;;  %v13362_v57 = vpop.f32.mrf.mxu0 }
 0x668   : >> { %25319 = vst [vmem:[#allocation5_spill] sm:$0xff] %v24946_v43  ;;  %v24949_v53 = vadd.f32 %v19716_v13, %v13133_v62  ;;  %v13131_v29 = vadd.f32 %v13066_v16, %v24849_v10 }
 0x669   : >> { %v19685_v51 = vpop.f32.mrf.mxu1  ;;  %v19719_v47 = vpop.f32.mrf.mxu0 }
 0x66a   : >> { %25320 = vst [vmem:[#allocation6_spill] sm:$0xff] %v24949_v53  ;;  %v24952_v17 = vadd.f32 %v13362_v57, %v13131_v29  ;;  %v13136_v4 = vadd.f32 %v19685_v51, %v24857_v3 }
 0x66b   : >> { %v13079_v31 = vpop.f32.mrf.mxu1  ;;  %v13375_v39 = vpop.f32.mrf.mxu0 }
 0x66c   : >> { %25321 = vst [vmem:[#allocation7_spill] sm:$0xff] %v24952_v17  ;;  %v24955_v35 = vadd.f32 %v19719_v47, %v13136_v4  ;;  %v13134_v1 = vadd.f32 %v13079_v31, %v24860_v56 }
 0x66d   : >> { %v19686_v11 = vpop.f32.mrf.mxu1  ;;  %v19720_v59 = vpop.f32.mrf.mxu0 }
 0x66e   : >> { %25322 = vst [vmem:[#allocation8_spill] sm:$0xff] %v24955_v35  ;;  %v24958_v40 = vadd.f32 %v13375_v39, %v13134_v1  ;;  %v13137_v9 = vadd.f32 %v19686_v11, %v24863_v52 }
 0x66f   : >> { %v13082_v21 = vpop.f32.mrf.mxu1  ;;  %v13378_v10 = vpop.f32.mrf.mxu0 }
 0x670   : >> { %25323 = vst [vmem:[#allocation9_spill] sm:$0xff] %v24958_v40  ;;  %v24961_v2 = vadd.f32 %v19720_v59, %v13137_v9  ;;  %v13135_v7 = vadd.f32 %v13082_v21, %v24868_v46 }
 0x671   : >> { %v19689_v26 = vpop.f32.mrf.mxu1  ;;  %v19723_v3 = vpop.f32.mrf.mxu0 }
 0x672   : >> { %25324 = vst [vmem:[#allocation10_spill] sm:$0xff] %v24961_v2  ;;  %v24964_v15 = vadd.f32 %v13378_v10, %v13135_v7  ;;  %v13140_v54 = vadd.f32 %v19689_v26, %v24871_v38 }
 0x673   : >> { %v13095_v33 = vpop.f32.mrf.mxu1  ;;  %v13391_v56 = vpop.f32.mrf.mxu0 }
 0x674   : >> { %25325 = vst [vmem:[#allocation11_spill] sm:$0xff] %v24964_v15  ;;  %v24967_v34 = vadd.f32 %v19723_v3, %v13140_v54  ;;  %v13138_v45 = vadd.f32 %v13095_v33, %v24874_v44 }
 0x675   : >> { %v19690_v30 = vpop.f32.mrf.mxu1  ;;  %v19724_v52 = vpop.f32.mrf.mxu0 }
 0x676   : >> { %25326 = vst [vmem:[#allocation12_spill] sm:$0xff] %v24967_v34  ;;  %v24970_v22 = vadd.f32 %v13391_v56, %v13138_v45  ;;  %v13141_v18 = vadd.f32 %v19690_v30, %v24877_v41 }
 0x677   : >> { %v13098_v24 = vpop.f32.mrf.mxu1  ;;  %v13394_v46 = vpop.f32.mrf.mxu0 }
 0x678   : >> { %25327 = vst [vmem:[#allocation13_spill] sm:$0xff] %v24970_v22  ;;  %v24973_v63 = vadd.f32 %v19724_v52, %v13141_v18  ;;  %v13139_v20 = vadd.f32 %v13098_v24, %v24880_v36 }
 0x679   : >> { %v19729_v13 = vpop.f32.mrf.mxu1  ;;  %v24976_v38 = vpop.f32.mrf.mxu0 }
 0x67a   : >> { %25328 = vst [vmem:[#allocation14_spill] sm:$0xff] %v24973_v63  ;;  %v24978_v62 = vadd.f32 %v13394_v46, %v13139_v20 }
 0x67b   : >> { %v13575_v16 = vpop.f32.mrf.mxu1  ;;  %v24980_v57 = vpop.f32.mrf.mxu0 }
 0x67c   : >> { %25329 = vst [vmem:[#allocation15_spill] sm:$0xff] %v24978_v62 }
 0x67d   : >> { %v24982_v44 = vpop.f32.mrf.mxu1  ;;  %v24984_v29 = vpop.f32.mrf.mxu0 }
 0x67f   : >> { %v24986_v51 = vpop.f32.mrf.mxu1  ;;  %v24988_v41 = vpop.f32.mrf.mxu0 }
 0x681   : >> { %v24990_v47 = vpop.f32.mrf.mxu1  ;;  %v24992_v4 = vpop.f32.mrf.mxu0 }
 0x683   : >> { %v24994_v36 = vpop.f32.mrf.mxu1  ;;  %v24996_v31 = vpop.f32.mrf.mxu0 }
 0x685   : >> { %v24998_v39 = vpop.f32.mrf.mxu1  ;;  %v25000_v1 = vpop.f32.mrf.mxu0 }
 0x687   : >> { %v25002_v11 = vpop.f32.mrf.mxu1  ;;  %v25004_v59 = vpop.f32.mrf.mxu0 }
 0x689   : >> { %v25006_v9 = vpop.f32.mrf.mxu1  ;;  %v25008_v21 = vpop.f32.mrf.mxu0 }
 0x68b   : >> { %v25010_v10 = vpop.f32.mrf.mxu1  ;;  %v25012_v7 = vpop.f32.mrf.mxu0 }
 0x68d   : >> { %v25014_v26 = vpop.f32.mrf.mxu1  ;;  %v25016_v3 = vpop.f32.mrf.mxu0 }
 0x68f   : >> { %v25018_v54 = vpop.f32.mrf.mxu1  ;;  %v25020_v33 = vpop.f32.mrf.mxu0 }
 0x691   : >> { %v25022_v56 = vpop.f32.mrf.mxu1  ;;  %v25024_v45 = vpop.f32.mrf.mxu0 }
 0x693   : >> { %v25026_v30 = vpop.f32.mrf.mxu1  ;;  %v25028_v52 = vpop.f32.mrf.mxu0 }
 0x695   : >> { %v25030_v18 = vpop.f32.mrf.mxu1  ;;  %v25032_v24 = vpop.f32.mrf.mxu0 }
 0x697   : >> { %v25034_v46 = vpop.f32.mrf.mxu1  ;;  %v25036_v20 = vpop.f32.mrf.mxu0 }
 0x699   : >> { %v25038_v62 = vpop.f32.mrf.mxu1  ;;  %v25040_v63 = vpop.f32.mrf.mxu0 }
 0x69b   : >> { %v25042_v22 = vpop.f32.mrf.mxu1  ;;  %v25044_v34 = vpop.f32.mrf.mxu0 }
 0x69c   : >> { %25330 = vst [vmem:[#allocation16_spill] sm:$0xff] %v25044_v34 }
 0x69d   : >> { %v25046_v15 = vpop.f32.mrf.mxu1  ;;  %v25048_v2 = vpop.f32.mrf.mxu0 }
 0x69e   : >> { %25331 = vst [vmem:[#allocation17_spill] sm:$0xff] %v25046_v15  ;;  %25332 = vst [vmem:[#allocation18_spill] sm:$0xff] %v25048_v2 }
 0x69f   : >> { %v25050_v40 = vpop.f32.mrf.mxu1  ;;  %v25052_v35 = vpop.f32.mrf.mxu0 }
 0x6a0   : >> { %25333 = vst [vmem:[#allocation19_spill] sm:$0xff] %v25050_v40  ;;  %25334 = vst [vmem:[#allocation20_spill] sm:$0xff] %v25052_v35 }
 0x6a1   : >> { %v25054_v17 = vpop.f32.mrf.mxu1  ;;  %v25056_v53 = vpop.f32.mrf.mxu0 }
 0x6a2   : >> { %25335 = vst [vmem:[#allocation21_spill] sm:$0xff] %v25054_v17  ;;  %25336 = vst [vmem:[#allocation22_spill] sm:$0xff] %v25056_v53 }
 0x6a3   : >> { %v25058_v43 = vpop.f32.mrf.mxu1  ;;  %v25060_v8 = vpop.f32.mrf.mxu0 }
 0x6a4   : >> { %25337 = vst [vmem:[#allocation23_spill] sm:$0xff] %v25058_v43  ;;  %25338 = vst [vmem:[#allocation24_spill] sm:$0xff] %v25060_v8 }
 0x6a5   : >> { %v25062_v58 = vpop.f32.mrf.mxu1  ;;  %v25064_v55 = vpop.f32.mrf.mxu0 }
 0x6a6   : >> { %25339 = vst [vmem:[#allocation25_spill] sm:$0xff] %v25062_v58  ;;  %25340 = vst [vmem:[#allocation26_spill] sm:$0xff] %v25064_v55 }
 0x6a7   : >> { %v25066_v34 = vpop.f32.mrf.mxu1  ;;  %v25068_v15 = vpop.f32.mrf.mxu0 }
 0x6a8   : >> { %25341 = vst [vmem:[#allocation27_spill] sm:$0xff] %v25066_v34  ;;  %25342 = vst [vmem:[#allocation28_spill] sm:$0xff] %v25068_v15 }
 0x6a9   : >> { %v25070_v2 = vpop.f32.mrf.mxu1  ;;  %v25072_v40 = vpop.f32.mrf.mxu0 }
 0x6aa   : >> { %25343 = vst [vmem:[#allocation29_spill] sm:$0xff] %v25070_v2  ;;  %25344 = vst [vmem:[#allocation30_spill] sm:$0xff] %v25072_v40  ;;  %v13704_v40 = vadd.f32 %v19729_v13, %v24883_v32  ;;  %v13703_v32 = vadd.f32 %v24986_v51, %v24892_v5  ;;  %v13706_v5 = vadd.f32 %v24994_v36, %v24898_v14 }
 0x6ab   : >> { %v25074_v35 = vpop.f32.mrf.mxu1  ;;  %v25076_v17 = vpop.f32.mrf.mxu0 }
 0x6ac   : >> { %25345 = vst [vmem:[#allocation31_spill] sm:$0xff] %v25074_v35  ;;  %25346 = vst [vmem:[#allocation32_spill] sm:$0xff] %v25076_v17  ;;  %v14002_v36 = vadd.f32 %v24996_v31, %v13706_v5 }
 0x6ad   : >> { %v25078_v53 = vpop.f32.mrf.mxu1  ;;  %v25080_v43 = vpop.f32.mrf.mxu0 }
 0x6ae   : >> { %25347 = vst [vmem:[#allocation33_spill] sm:$0xff] %v25078_v53  ;;  %25348 = vst [vmem:[#allocation34_spill] sm:$0xff] %v25080_v43  ;;  %v13702_v43 = vadd.f32 %v13575_v16, %v24886_v19  ;;  %v13708_v19 = vadd.f32 %v24990_v47, %v24895_v49  ;;  %v13999_v49 = vadd.f32 %v24988_v41, %v13703_v32 }
 0x6af   : >> { %v25082_v8 = vpop.f32.mrf.mxu1  ;;  %v25084_v58 = vpop.f32.mrf.mxu0 }
 0x6b0   : >> { %25349 = vst [vmem:[#allocation35_spill] sm:$0xff] %v25082_v8  ;;  %25350 = vst [vmem:[#allocation36_spill] sm:$0xff] %v25084_v58  ;;  %v14000_v58 = vadd.f32 %v24976_v38, %v13704_v40  ;;  %v25115_v40 = vld [vmem:[%s25310_s2] ss:$0 sm:$0xff] }
 0x6b1   : >> { %v25086_v55 = vpop.f32.mrf.mxu1  ;;  %v25088_v34 = vpop.f32.mrf.mxu0 }
 0x6b2   : >> { %25351 = vst [vmem:[#allocation37_spill] sm:$0xff] %v25086_v55  ;;  %25352 = vst [vmem:[#allocation38_spill] sm:$0xff] %v25088_v34  ;;  %v13705_v34 = vadd.f32 %v24982_v44, %v24889_v42 }
 0x6b3   : >> { %v25090_v15 = vpop.f32.mrf.mxu1  ;;  %v25092_v2 = vpop.f32.mrf.mxu0 }
 0x6b4   : >> { %25353 = vst [vmem:[#allocation39_spill] sm:$0xff] %v25090_v15  ;;  %25354 = vst [vmem:[#allocation40_spill] sm:$0xff] %v25092_v2  ;;  %v13998_v2 = vadd.f32 %v24980_v57, %v13702_v43  ;;  %v14001_v16 = vadd.f32 %v24984_v29, %v13705_v34 }
 0x6b5   : >> { %v25095_v35 = vpop.f32.mrf.mxu1  ;;  %v25097_v17 = vpop.f32.mrf.mxu0 }
 0x6b6   : >> { %25355 = vst [vmem:[#allocation41_spill] sm:$0xff] %v25097_v17  ;;  %v13709_v17 = vadd.f32 %v24998_v39, %v24901_v37 }
 0x6b7   : >> { %v25100_v53 = vpop.f32.mrf.mxu1  ;;  %v25102_v8 = vpop.f32.mrf.mxu0 }
 0x6b8   : >> { %25356 = vst [vmem:[#allocation42_spill] sm:$0xff] %v25102_v8  ;;  %v14004_v8 = vadd.f32 %v24992_v4, %v13708_v19  ;;  %v13707_v4 = vadd.f32 %v25002_v11, %v24904_v6 }
 0x6b9   : >> { %v19797_v15 = vpop.f32.mrf.mxu1  ;;  %v19831_v55 = vpop.f32.mrf.mxu0 }
 0x6ba   : >> { %v14296_v13 = vadd.f32 %v19797_v15, %v14000_v58 }
 0x6bb   : >> { %v14167_v38 = vpop.f32.mrf.mxu1  ;;  %v14463_v42 = vpop.f32.mrf.mxu0 }
 0x6bc   : >> { %v14592_v44 = vadd.f32 %v19831_v55, %v14296_v13  ;;  %v14294_v43 = vadd.f32 %v14167_v38, %v13998_v2 }
 0x6bd   : >> { %v19798_v58 = vpop.f32.mrf.mxu1  ;;  %v19832_v15 = vpop.f32.mrf.mxu0 }
 0x6be   : >> { %v14631_v57 = vadd.f32 %v25115_v40, %v14592_v44  ;;  %v14590_v51 = vadd.f32 %v14463_v42, %v14294_v43  ;;  %v14297_v47 = vadd.f32 %v19798_v58, %v14001_v16  ;;  %v14005_v42 = vadd.f32 %v25000_v1, %v13709_v17 }
 0x6bf   : >> { %v14170_v55 = vpop.f32.mrf.mxu1  ;;  %v14466_v14 = vpop.f32.mrf.mxu0  ;;  %v13712_v16 = vadd.f32 %v25006_v9, %v24907_v25  ;;  %v14003_v58 = vadd.f32 %v25004_v59, %v13707_v4 }
 0x6c0   : >> { %v14663_v2 = vmax.f32 %v14631_v57, 0.0  ;;  %v14629_v34 = vadd.f32 %v25115_v40, %v14590_v51  ;;  %v14593_v29 = vadd.f32 %v19832_v15, %v14297_v47  ;;  %v14295_v41 = vadd.f32 %v14170_v55, %v13999_v49 }
 0x6c1   : >> { %v19801_v32 = vpop.f32.mrf.mxu1  ;;  %v19835_v37 = vpop.f32.mrf.mxu0  ;;  %v14008_v57 = vadd.f32 %v25008_v21, %v13712_v16  ;;  %v13713_v51 = vadd.f32 %v25014_v26, %v24913_v12 }
 0x6c2   : >> { %14697 = vst.msk [vmem:[%s25128_s14 + $0x10] sm:$0xff] %vm14694_vm3, %v14663_v2  ;;  %v14661_v39 = vmax.f32 %v14629_v34, 0.0  ;;  %v14632_v13 = vadd.f32 %v25115_v40, %v14593_v29  ;;  %v14591_v19 = vadd.f32 %v14466_v14, %v14295_v41  ;;  %v14300_v38 = vadd.f32 %v19801_v32, %v14004_v8 }
 0x6c3   : >> { %v14183_v44 = vpop.f32.mrf.mxu1  ;;  %v14479_v31 = vpop.f32.mrf.mxu0  ;;  %v13710_v8 = vadd.f32 %v25010_v10, %v24910_v61  ;;  %v13711_v34 = vadd.f32 %v25018_v54, %v24916_v27  ;;  %v14009_v4 = vadd.f32 %v25016_v3, %v13713_v51  ;;  %v13716_v32 = vadd.f32 %v25022_v56, %v24919_v48 }
 0x6c4   : >> { %14695 = vst.msk [vmem:[%s25128_s14] sm:$0xff] %vm14694_vm3, %v14661_v39  ;;  %v14664_v6 = vmax.f32 %v14632_v13, 0.0  ;;  %v14630_v11 = vadd.f32 %v25115_v40, %v14591_v19  ;;  %v14596_v43 = vadd.f32 %v19835_v37, %v14300_v38  ;;  %v14298_v5 = vadd.f32 %v14183_v44, %v14002_v36 }
 0x6c5   : >> { %v19802_v15 = vpop.f32.mrf.mxu1  ;;  %v19836_v17 = vpop.f32.mrf.mxu0  ;;  %v14006_v2 = vadd.f32 %v25012_v7, %v13710_v8  ;;  %v14007_v19 = vadd.f32 %v25020_v33, %v13711_v34  ;;  %v13714_v38 = vadd.f32 %v25026_v30, %v24922_v50  ;;  %v13715_v8 = vadd.f32 %v25034_v46, %v24928_v0  ;;  %v25358_v34 = vld [vmem:[#allocation17_spill] sm:$0xff] }
 0x6c6   : >> { %14698 = vst.msk [vmem:[%s25128_s14 + $0x18] sm:$0xff] %vm14694_vm3, %v14664_v6  ;;  %v14662_v25 = vmax.f32 %v14630_v11, 0.0  ;;  %v14635_v1 = vadd.f32 %v25115_v40, %v14596_v43  ;;  %v14594_v9 = vadd.f32 %v14479_v31, %v14298_v5  ;;  %v14301_v49 = vadd.f32 %v19802_v15, %v14005_v42 }
 0x6c7   : >> { %v14186_v47 = vpop.f32.mrf.mxu1  ;;  %v14482_v59 = vpop.f32.mrf.mxu0  ;;  %v14012_v31 = vadd.f32 %v25024_v45, %v13716_v32  ;;  %v13717_v6 = vadd.f32 %v25030_v18, %v24925_v28  ;;  %v25361_v32 = vld [vmem:[#allocation19_spill] sm:$0xff] }
 0x6c8   : >> { %14696 = vst.msk [vmem:[%s25128_s14 + $0x8] sm:$0xff] %vm14694_vm3, %v14662_v25  ;;  %v14667_v61 = vmax.f32 %v14635_v1, 0.0  ;;  %v14633_v10 = vadd.f32 %v25115_v40, %v14594_v9  ;;  %v14597_v55 = vadd.f32 %v19836_v17, %v14301_v49  ;;  %v14299_v14 = vadd.f32 %v14186_v47, %v14003_v58 }
 0x6c9   : >> { %v19805_v29 = vpop.f32.mrf.mxu1  ;;  %v19839_v21 = vpop.f32.mrf.mxu0  ;;  %v14010_v58 = vadd.f32 %v25028_v52, %v13714_v38  ;;  %v14013_v1 = vadd.f32 %v25032_v24, %v13717_v6  ;;  %v13720_v9 = vadd.f32 %v25038_v62, %v24931_v23  ;;  %v14011_v47 = vadd.f32 %v25036_v20, %v13715_v8 }
 0x6ca   : >> { %14701 = vst.msk [vmem:[%s25128_s14 + $0x30] sm:$0xff] %vm14694_vm3, %v14667_v61  ;;  %v14665_v12 = vmax.f32 %v14633_v10, 0.0  ;;  %v14636_v26 = vadd.f32 %v25115_v40, %v14597_v55  ;;  %v14595_v41 = vadd.f32 %v14482_v59, %v14299_v14  ;;  %v14304_v36 = vadd.f32 %v19805_v29, %v14008_v57 }
 0x6cb   : >> { %v14199_v37 = vpop.f32.mrf.mxu1  ;;  %v14495_v7 = vpop.f32.mrf.mxu0  ;;  %v13718_v59 = vadd.f32 %v25042_v22, %v24934_v60  ;;  %v14016_v14 = vadd.f32 %v25040_v63, %v13720_v9  ;;  %v25370_v9 = vld [vmem:[#allocation25_spill] sm:$0xff] }
 0x6cc   : >> { %14699 = vst.msk [vmem:[%s25128_s14 + $0x20] sm:$0xff] %vm14694_vm3, %v14665_v12  ;;  %v14668_v27 = vmax.f32 %v14636_v26, 0.0  ;;  %v14634_v54 = vadd.f32 %v25115_v40, %v14595_v41  ;;  %v14600_v39 = vadd.f32 %v19839_v21, %v14304_v36  ;;  %v14302_v13 = vadd.f32 %v14199_v37, %v14006_v2  ;;  %v25357_v2 = vld [vmem:[#allocation2_spill] sm:$0xff]  ;;  %v25359_v41 = vld [vmem:[#allocation16_spill] sm:$0xff] }
 0x6cd   : >> { %v19806_v42 = vpop.f32.mrf.mxu1  ;;  %v19840_v3 = vpop.f32.mrf.mxu0  ;;  %v13721_v29 = vadd.f32 %v25358_v34, %v25357_v2  ;;  %v14014_v36 = vadd.f32 %v25359_v41, %v13718_v59  ;;  %v25371_v59 = vld [vmem:[#allocation24_spill] sm:$0xff] }
 0x6ce   : >> { %14702 = vst.msk [vmem:[%s25128_s14 + $0x38] sm:$0xff] %vm14694_vm3, %v14668_v27  ;;  %v14666_v48 = vmax.f32 %v14634_v54, 0.0  ;;  %v14639_v56 = vadd.f32 %v25115_v40, %v14600_v39  ;;  %v14598_v16 = vadd.f32 %v14495_v7, %v14302_v13  ;;  %v14305_v44 = vadd.f32 %v19806_v42, %v14009_v4  ;;  %v25360_v4 = vld [vmem:[#allocation3_spill] sm:$0xff]  ;;  %v25363_v42 = vld [vmem:[#allocation4_spill] sm:$0xff] }
 0x6cf   : >> { %v14202_v11 = vpop.f32.mrf.mxu1  ;;  %v14498_v33 = vpop.f32.mrf.mxu0  ;;  %v13719_v37 = vadd.f32 %v25361_v32, %v25360_v4 }
 0x6d0   : >> { %14700 = vst.msk [vmem:[%s25128_s14 + $0x28] sm:$0xff] %vm14694_vm3, %v14666_v48  ;;  %v14671_v50 = vmax.f32 %v14639_v56, 0.0  ;;  %v14637_v30 = vadd.f32 %v25115_v40, %v14598_v16  ;;  %v14601_v43 = vadd.f32 %v19840_v3, %v14305_v44  ;;  %v14303_v5 = vadd.f32 %v14202_v11, %v14007_v19  ;;  %v25362_v19 = vld [vmem:[#allocation18_spill] sm:$0xff]  ;;  %v25364_v3 = vld [vmem:[#allocation21_spill] sm:$0xff] }
 0x6d1   : >> { %v19809_v15 = vpop.f32.mrf.mxu1  ;;  %v19843_v45 = vpop.f32.mrf.mxu0  ;;  %v14017_v38 = vadd.f32 %v25362_v19, %v13721_v29  ;;  %v13724_v48 = vadd.f32 %v25364_v3, %v25363_v42 }
 0x6d2   : >> { %14705 = vst.msk [vmem:[%s25128_s14 + $0x50] sm:$0xff] %vm14694_vm3, %v14671_v50  ;;  %v14669_v28 = vmax.f32 %v14637_v30, 0.0  ;;  %v14640_v18 = vadd.f32 %v25115_v40, %v14601_v43  ;;  %v14599_v17 = vadd.f32 %v14498_v33, %v14303_v5  ;;  %v14308_v25 = vadd.f32 %v19809_v15, %v14012_v31  ;;  %v25365_v33 = vld [vmem:[#allocation20_spill] sm:$0xff]  ;;  %v25366_v30 = vld [vmem:[#allocation5_spill] sm:$0xff]  ;;  %v25367_v43 = vld [vmem:[#allocation23_spill] sm:$0xff] }
 0x6d3   : >> { %v14215_v49 = vpop.f32.mrf.mxu1  ;;  %v14511_v52 = vpop.f32.mrf.mxu0  ;;  %v14015_v50 = vadd.f32 %v25365_v33, %v13719_v37  ;;  %v13722_v5 = vadd.f32 %v25367_v43, %v25366_v30 }
 0x6d4   : >> { %14703 = vst.msk [vmem:[%s25128_s14 + $0x40] sm:$0xff] %vm14694_vm3, %v14669_v28  ;;  %v14672_v0 = vmax.f32 %v14640_v18, 0.0  ;;  %v14638_v46 = vadd.f32 %v25115_v40, %v14599_v17  ;;  %v14604_v57 = vadd.f32 %v19843_v45, %v14308_v25  ;;  %v14306_v51 = vadd.f32 %v14215_v49, %v14010_v58  ;;  %v25368_v17 = vld [vmem:[#allocation22_spill] sm:$0xff] }
 0x6d5   : >> { %v19810_v61 = vpop.f32.mrf.mxu1  ;;  %v19844_v24 = vpop.f32.mrf.mxu0  ;;  %v14020_v25 = vadd.f32 %v25368_v17, %v13724_v48 }
 0x6d6   : >> { %14706 = vst.msk [vmem:[%s25128_s14 + $0x58] sm:$0xff] %vm14694_vm3, %v14672_v0  ;;  %v14670_v23 = vmax.f32 %v14638_v46, 0.0  ;;  %v14643_v62 = vadd.f32 %v25115_v40, %v14604_v57  ;;  %v14602_v10 = vadd.f32 %v14511_v52, %v14306_v51  ;;  %v14309_v55 = vadd.f32 %v19810_v61, %v14013_v1  ;;  %v25369_v1 = vld [vmem:[#allocation6_spill] sm:$0xff] }
 0x6d7   : >> { %v14218_v21 = vpop.f32.mrf.mxu1  ;;  %v14514_v20 = vpop.f32.mrf.mxu0  ;;  %v13725_v49 = vadd.f32 %v25370_v9, %v25369_v1  ;;  %v14018_v61 = vadd.f32 %v25371_v59, %v13722_v5 }
 0x6d8   : >> { %14704 = vst.msk [vmem:[%s25128_s14 + $0x48] sm:$0xff] %vm14694_vm3, %v14670_v23  ;;  %v14675_v60 = vmax.f32 %v14643_v62, 0.0  ;;  %v14641_v22 = vadd.f32 %v25115_v40, %v14602_v10  ;;  %v14605_v12 = vadd.f32 %v19844_v24, %v14309_v55  ;;  %v14307_v26 = vadd.f32 %v14218_v21, %v14011_v47  ;;  %v25372_v24 = vld [vmem:[#allocation7_spill] sm:$0xff]  ;;  %v25374_v21 = vld [vmem:[#allocation26_spill] sm:$0xff] }
 0x6d9   : >> { %v19813_v7 = vpop.f32.mrf.mxu1  ;;  %v19847_v63 = vpop.f32.mrf.mxu0  ;;  %v25373_v23 = vld [vmem:[#allocation27_spill] sm:$0xff] }
 0x6da   : >> { %14709 = vst.msk [vmem:[%s25128_s14 + $0x70] sm:$0xff] %vm14694_vm3, %v14675_v60  ;;  %v14673_v27 = vmax.f32 %v14641_v22, 0.0  ;;  %v14644_v54 = vadd.f32 %v25115_v40, %v14605_v12  ;;  %v14603_v39 = vadd.f32 %v14514_v20, %v14307_v26  ;;  %v14312_v13 = vadd.f32 %v19813_v7, %v14016_v14  ;;  %v25375_v60 = vld [vmem:[#allocation8_spill] sm:$0xff]  ;;  %v25376_v22 = vld [vmem:[#allocation29_spill] sm:$0xff] }
 0x6db   : >> { %v14231_v56 = vpop.f32.mrf.mxu1  ;;  %v14527_v16 = vpop.f32.mrf.mxu0  ;;  %v13723_v62 = vadd.f32 %v25373_v23, %v25372_v24  ;;  %v14021_v20 = vadd.f32 %v25374_v21, %v13725_v49  ;;  %v13728_v12 = vadd.f32 %v25376_v22, %v25375_v60  ;;  %v25377_v7 = vld [vmem:[#allocation28_spill] sm:$0xff] }
 0x6dc   : >> { %14707 = vst.msk [vmem:[%s25128_s14 + $0x60] sm:$0xff] %vm14694_vm3, %v14673_v27  ;;  %v14676_v44 = vmax.f32 %v14644_v54, 0.0  ;;  %v14642_v31 = vadd.f32 %v25115_v40, %v14603_v39  ;;  %v14608_v6 = vadd.f32 %v19847_v63, %v14312_v13  ;;  %v14310_v11 = vadd.f32 %v14231_v56, %v14014_v36  ;;  %v25378_v27 = vld [vmem:[#allocation9_spill] sm:$0xff]  ;;  %v25379_v54 = vld [vmem:[#allocation31_spill] sm:$0xff]  ;;  %v25380_v56 = vld [vmem:[#allocation30_spill] sm:$0xff] }
 0x6dd   : >> { %v19814_v58 = vpop.f32.mrf.mxu1  ;;  %v19848_v8 = vpop.f32.mrf.mxu0  ;;  %v14019_v63 = vadd.f32 %v25377_v7, %v13723_v62  ;;  %v13726_v39 = vadd.f32 %v25379_v54, %v25378_v27 }
 0x6de   : >> { %14710 = vst.msk [vmem:[%s25128_s14 + $0x78] sm:$0xff] %vm14694_vm3, %v14676_v44  ;;  %v14674_v15 = vmax.f32 %v14642_v31, 0.0  ;;  %v14647_v45 = vadd.f32 %v25115_v40, %v14608_v6  ;;  %v14606_v28 = vadd.f32 %v14527_v16, %v14310_v11  ;;  %v14313_v18 = vadd.f32 %v19814_v58, %v14017_v38  ;;  %v25381_v44 = vld [vmem:[#allocation10_spill] sm:$0xff]  ;;  %v25382_v31 = vld [vmem:[#allocation33_spill] sm:$0xff]  ;;  %v25383_v58 = vld [vmem:[#allocation32_spill] sm:$0xff] }
 0x6df   : >> { %v14234_v52 = vpop.f32.mrf.mxu1  ;;  %v14530_v0 = vpop.f32.mrf.mxu0  ;;  %v14024_v16 = vadd.f32 %v25380_v56, %v13728_v12  ;;  %v13729_v6 = vadd.f32 %v25382_v31, %v25381_v44  ;;  %v25396_v44 = vld [vmem:[#allocation41_spill] sm:$0xff] }
 0x6e0   : >> { %14708 = vst.msk [vmem:[%s25128_s14 + $0x68] sm:$0xff] %vm14694_vm3, %v14674_v15  ;;  %v14679_v46 = vmax.f32 %v14647_v45, 0.0  ;;  %v14645_v57 = vadd.f32 %v25115_v40, %v14606_v28  ;;  %v14609_v51 = vadd.f32 %v19848_v8, %v14313_v18  ;;  %v14311_v47 = vadd.f32 %v14234_v52, %v14015_v50  ;;  %v25384_v15 = vld [vmem:[#allocation11_spill] sm:$0xff]  ;;  %v25386_v52 = vld [vmem:[#allocation34_spill] sm:$0xff] }
 0x6e1   : >> { %v19817_v10 = vpop.f32.mrf.mxu1  ;;  %v19851_v55 = vpop.f32.mrf.mxu0  ;;  %v14022_v8 = vadd.f32 %v25383_v58, %v13726_v39  ;;  %v25385_v45 = vld [vmem:[#allocation35_spill] sm:$0xff]  ;;  %v25394_v39 = vld [vmem:[#allocation40_spill] sm:$0xff] }
 0x6e2   : >> { %14713 = vst.msk [vmem:[%s25128_s14 + $0x90] sm:$0xff] %vm14694_vm3, %v14679_v46  ;;  %v14677_v14 = vmax.f32 %v14645_v57, 0.0  ;;  %v14648_v2 = vadd.f32 %v25115_v40, %v14609_v51  ;;  %v14607_v34 = vadd.f32 %v14530_v0, %v14311_v47  ;;  %v14316_v29 = vadd.f32 %v19817_v10, %v14020_v25  ;;  %v25387_v46 = vld [vmem:[#allocation12_spill] sm:$0xff]  ;;  %v25388_v57 = vld [vmem:[#allocation37_spill] sm:$0xff] }
 0x6e3   : >> { %v14247_v26 = vpop.f32.mrf.mxu1  ;;  %v14543_v41 = vpop.f32.mrf.mxu0  ;;  %v13727_v28 = vadd.f32 %v25385_v45, %v25384_v15  ;;  %v14025_v0 = vadd.f32 %v25386_v52, %v13729_v6  ;;  %v13732_v51 = vadd.f32 %v25388_v57, %v25387_v46  ;;  %v25389_v10 = vld [vmem:[#allocation36_spill] sm:$0xff] }
 0x6e4   : >> { %14711 = vst.msk [vmem:[%s25128_s14 + $0x80] sm:$0xff] %vm14694_vm3, %v14677_v14  ;;  %v14680_v36 = vmax.f32 %v14648_v2, 0.0  ;;  %v14646_v4 = vadd.f32 %v25115_v40, %v14607_v34  ;;  %v14612_v32 = vadd.f32 %v19851_v55, %v14316_v29  ;;  %v14314_v37 = vadd.f32 %v14247_v26, %v14018_v61  ;;  %v25390_v14 = vld [vmem:[#allocation13_spill] sm:$0xff]  ;;  %v25391_v2 = vld [vmem:[#allocation39_spill] sm:$0xff]  ;;  %v25392_v26 = vld [vmem:[#allocation38_spill] sm:$0xff] }
 0x6e5   : >> { %v19818_v13 = vpop.f32.mrf.mxu1  ;;  %v19852_v19 = vpop.f32.mrf.mxu0  ;;  %v14023_v55 = vadd.f32 %v25389_v10, %v13727_v28  ;;  %v13730_v34 = vadd.f32 %v25391_v2, %v25390_v14 }
 0x6e6   : >> { %14714 = vst.msk [vmem:[%s25128_s14 + $0x98] sm:$0xff] %vm14694_vm3, %v14680_v36  ;;  %v14678_v38 = vmax.f32 %v14646_v4, 0.0  ;;  %v14651_v42 = vadd.f32 %v25115_v40, %v14612_v32  ;;  %v14610_v3 = vadd.f32 %v14543_v41, %v14314_v37  ;;  %v14317_v48 = vadd.f32 %v19818_v13, %v14021_v20  ;;  %v25393_v36 = vld [vmem:[#allocation14_spill] sm:$0xff] }
 0x6e7   : >> { %v14250_v11 = vpop.f32.mrf.mxu1  ;;  %v14546_v33 = vpop.f32.mrf.mxu0  ;;  %v14028_v41 = vadd.f32 %v25392_v26, %v13732_v51  ;;  %v13733_v4 = vadd.f32 %v25095_v35, %v25393_v36  ;;  %v14026_v13 = vadd.f32 %v25394_v39, %v13730_v34 }
 0x6e8   : >> { %14712 = vst.msk [vmem:[%s25128_s14 + $0x88] sm:$0xff] %vm14694_vm3, %v14678_v38  ;;  %v14683_v50 = vmax.f32 %v14651_v42, 0.0  ;;  %v14649_v30 = vadd.f32 %v25115_v40, %v14610_v3  ;;  %v14613_v43 = vadd.f32 %v19852_v19, %v14317_v48  ;;  %v14315_v5 = vadd.f32 %v14250_v11, %v14019_v63  ;;  %v25395_v19 = vld [vmem:[#allocation15_spill] sm:$0xff] }
 0x6e9   : >> { %v19821_v18 = vpop.f32.mrf.mxu1  ;;  %v19855_v17 = vpop.f32.mrf.mxu0  ;;  %v13731_v38 = vadd.f32 %v25100_v53, %v25395_v19  ;;  %v14029_v31 = vadd.f32 %v25396_v44, %v13733_v4 }
 0x6ea   : >> { %14717 = vst.msk [vmem:[%s25128_s14 + $0xb0] sm:$0xff] %vm14694_vm3, %v14683_v50  ;;  %v14681_v25 = vmax.f32 %v14649_v30, 0.0  ;;  %v14652_v1 = vadd.f32 %v25115_v40, %v14613_v43  ;;  %v14611_v9 = vadd.f32 %v14546_v33, %v14315_v5  ;;  %v14320_v49 = vadd.f32 %v19821_v18, %v14024_v16  ;;  %v25397_v43 = vld [vmem:[#allocation42_spill] sm:$0xff] }
 0x6eb   : >> { %v14263_v47 = vpop.f32.mrf.mxu1  ;;  %v14559_v59 = vpop.f32.mrf.mxu0  ;;  %v14027_v5 = vadd.f32 %v25397_v43, %v13731_v38 }
 0x6ec   : >> { %14715 = vst.msk [vmem:[%s25128_s14 + $0xa0] sm:$0xff] %vm14694_vm3, %v14681_v25  ;;  %v14684_v61 = vmax.f32 %v14652_v1, 0.0  ;;  %v14650_v24 = vadd.f32 %v25115_v40, %v14611_v9  ;;  %v14616_v23 = vadd.f32 %v19855_v17, %v14320_v49  ;;  %v14318_v62 = vadd.f32 %v14263_v47, %v14022_v8 }
 0x6ed   : >> { %v19822_v29 = vpop.f32.mrf.mxu1  ;;  %v19856_v21 = vpop.f32.mrf.mxu0 }
 0x6ee   : >> { %14718 = vst.msk [vmem:[%s25128_s14 + $0xb8] sm:$0xff] %vm14694_vm3, %v14684_v61  ;;  %v14682_v20 = vmax.f32 %v14650_v24, 0.0  ;;  %v14655_v60 = vadd.f32 %v25115_v40, %v14616_v23  ;;  %v14614_v22 = vadd.f32 %v14559_v59, %v14318_v62  ;;  %v14321_v12 = vadd.f32 %v19822_v29, %v14025_v0 }
 0x6ef   : >> { %v14266_v32 = vpop.f32.mrf.mxu1  ;;  %v14562_v37 = vpop.f32.mrf.mxu0 }
 0x6f0   : >> { %14716 = vst.msk [vmem:[%s25128_s14 + $0xa8] sm:$0xff] %vm14694_vm3, %v14682_v20  ;;  %v14687_v7 = vmax.f32 %v14655_v60, 0.0  ;;  %v14653_v63 = vadd.f32 %v25115_v40, %v14614_v22  ;;  %v14617_v27 = vadd.f32 %v19856_v21, %v14321_v12  ;;  %v14319_v54 = vadd.f32 %v14266_v32, %v14023_v55 }
 0x6f1   : >> { %v19825_v42 = vpop.f32.mrf.mxu1  ;;  %v19859_v3 = vpop.f32.mrf.mxu0 }
 0x6f2   : >> { %14721 = vst.msk [vmem:[%s25128_s14 + $0xd0] sm:$0xff] %vm14694_vm3, %v14687_v7  ;;  %v14685_v35 = vmax.f32 %v14653_v63, 0.0  ;;  %v14656_v48 = vadd.f32 %v25115_v40, %v14617_v27  ;;  %v14615_v56 = vadd.f32 %v14562_v37, %v14319_v54  ;;  %v14324_v16 = vadd.f32 %v19825_v42, %v14028_v41 }
 0x6f3   : >> { %v14279_v6 = vpop.f32.mrf.mxu1  ;;  %v14575_v11 = vpop.f32.mrf.mxu0 }
 0x6f4   : >> { %14719 = vst.msk [vmem:[%s25128_s14 + $0xc0] sm:$0xff] %vm14694_vm3, %v14685_v35  ;;  %v14688_v33 = vmax.f32 %v14656_v48, 0.0  ;;  %v14654_v53 = vadd.f32 %v25115_v40, %v14615_v56  ;;  %v14620_v50 = vadd.f32 %v19859_v3, %v14324_v16  ;;  %v14322_v30 = vadd.f32 %v14279_v6, %v14026_v13 }
 0x6f5   : >> { %v19826_v58 = vpop.f32.mrf.mxu1  ;;  %v19860_v8 = vpop.f32.mrf.mxu0 }
 0x6f6   : >> { %14722 = vst.msk [vmem:[%s25128_s14 + $0xd8] sm:$0xff] %vm14694_vm3, %v14688_v33  ;;  %v14686_v15 = vmax.f32 %v14654_v53, 0.0  ;;  %v14659_v45 = vadd.f32 %v25115_v40, %v14620_v50  ;;  %v14618_v28 = vadd.f32 %v14575_v11, %v14322_v30  ;;  %v14325_v18 = vadd.f32 %v19826_v58, %v14029_v31 }
 0x6f7   : >> { %v14282_v17 = vpop.f32.mrf.mxu1  ;;  %v14578_v52 = vpop.f32.mrf.mxu0 }
 0x6f8   : >> { %14720 = vst.msk [vmem:[%s25128_s14 + $0xc8] sm:$0xff] %vm14694_vm3, %v14686_v15  ;;  %v14691_v25 = vmax.f32 %v14659_v45, 0.0  ;;  %v14657_v1 = vadd.f32 %v25115_v40, %v14618_v28  ;;  %v14621_v9 = vadd.f32 %v19860_v8, %v14325_v18  ;;  %v14323_v49 = vadd.f32 %v14282_v17, %v14027_v5 }
 0x6fa   : >> { %14725 = vst.msk [vmem:[%s25128_s14 + $0xf0] sm:$0xff] %vm14694_vm3, %v14691_v25  ;;  %v14689_v0 = vmax.f32 %v14657_v1, 0.0  ;;  %v14660_v46 = vadd.f32 %v25115_v40, %v14621_v9  ;;  %v14619_v57 = vadd.f32 %v14578_v52, %v14323_v49 }
 0x6fc   : >> { %14723 = vst.msk [vmem:[%s25128_s14 + $0xe0] sm:$0xff] %vm14694_vm3, %v14689_v0  ;;  %v14692_v51 = vmax.f32 %v14660_v46, 0.0  ;;  %v14658_v47 = vadd.f32 %v25115_v40, %v14619_v57  ;;  %176 = sbr.rel (!%p174_p4) target bundleno = 16 (0x10), region = 167 }
 0x6fe   : >> { %14726 = vst.msk [vmem:[%s25128_s14 + $0xf8] sm:$0xff] %vm14694_vm3, %v14692_v51  ;;  %v14690_v59 = vmax.f32 %v14658_v47, 0.0 }
 0x700   : >> { %14724 = vst.msk [vmem:[%s25128_s14 + $0xe8] sm:$0xff] %vm14694_vm3, %v14690_v59 }
 0x701 PF: > { %s13_s12 = sadd.s32 1, %s19892_s12  }
 0x702   : > { %p10_p5 = scmp.ge.s32.totalorder %s13_s12, 4  }
 0x704   :  { %12 = sbr.rel (!%p10_p5) target bundleno = 1 (0x1), region = 178 }

</bundles_post_ra>
